<compile_context>
chip_gen: v6e
topology: v6e:2x2x1
jax: 0.10.0
libtpu: 0.0.40
codegen_flags: <defaults>
</compile_context>

<pallas_src>
import jax
import jax.numpy as jnp
from jax import lax
from jax.experimental import pallas as pl
from jax.experimental.pallas import tpu as pltpu

K = 7      # conv kernel size
PAD = 3    # conv spatial padding


def ca_kernel(w_ref, b_ref, xp_ref, o_ref):
    # w_ref : SMEM (K*K,)  channel-folded Conv2d weight (row-major ky, kx)
    # b_ref : SMEM (1,)    Conv2d bias
    # xp_ref: VMEM (Hp, Wp, Nb)  zero-padded input block, batch on the lane axis
    # o_ref : VMEM (H,  W,  Nb)
    Hp, Wp, Nb = xp_ref.shape
    H, W = Hp - 2 * PAD, Wp - 2 * PAD

    acc = jnp.full((H, W, Nb), b_ref[0], dtype=jnp.float32)
    for kx in range(K):
        # One sublane-offset slice per kx ...
        col = xp_ref[:, kx:kx + W, :].astype(jnp.float32)        # (Hp, W, Nb)
        for ky in range(K):
            # ... the ky shift is a slice along the major dim (free).
            acc = acc + w_ref[ky * K + kx] * col[ky:ky + H]

    a = jax.nn.sigmoid(acc)                                      # (H, W, Nb)
    x_in = xp_ref[PAD:PAD + H, PAD:PAD + W, :].astype(jnp.float32)
    o_ref[...] = (x_in * a).astype(o_ref.dtype)


def ca_module_forward(x, w, b, *, block_n=512):
    """x: (N, 1, H, W); w: (1, 2, K, K); b: (1,).  Returns (N, 1, H, W)."""
    N, C, H, W = x.shape
    assert C == 1, "CAModule.forward is only well-defined for C == 1 (a.reshape_as(x))"
    Hp, Wp = H + 2 * PAD, W + 2 * PAD

    # Fold the two conv input channels (mean == max == x when C == 1).
    w_fold = (w[:, 0] + w[:, 1]).reshape(-1).astype(jnp.float32)    # (49,)
    b_flat = b.reshape(-1).astype(jnp.float32)                      # (1,)

    # Batch-on-lanes layout + spatial zero-pad (fused into one XLA copy pass).
    xt = jnp.transpose(x[:, 0], (1, 2, 0))                          # (H, W, N)
    if N <= block_n:
        nb, npad = N, N
    else:
        assert block_n % 128 == 0, "block_n must be a multiple of 128 when tiling the batch"
        nb = block_n
        npad = -(-N // nb) * nb
        if npad != N:
            xt = jnp.pad(xt, ((0, 0), (0, 0), (0, npad - N)))
    xp = jnp.pad(xt, ((PAD, PAD), (PAD, PAD), (0, 0)))              # (Hp, Wp, npad)

    out_t = pl.pallas_call(
        ca_kernel,
        out_shape=jax.ShapeDtypeStruct((H, W, npad), x.dtype),
        grid_spec=pltpu.PrefetchScalarGridSpec(
            num_scalar_prefetch=0,
            grid=(npad // nb,),
            in_specs=[
                pl.BlockSpec(memory_space=pltpu.MemorySpace.SMEM),       # folded conv weight
                pl.BlockSpec(memory_space=pltpu.MemorySpace.SMEM),       # conv bias
                pl.BlockSpec((Hp, Wp, nb), lambda n: (0, 0, n)),         # padded input block
            ],
            out_specs=pl.BlockSpec((H, W, nb), lambda n: (0, 0, n)),
        ),
        compiler_params=pltpu.CompilerParams(dimension_semantics=("parallel",)),
    )(w_fold, b_flat, xp)

    if npad != N:
        out_t = out_t[:, :, :N]
    return jnp.transpose(out_t, (2, 0, 1))[:, None, :, :]              # (N, 1, H, W)


def ca_module_reference(x, w, b):
    """Pure-JAX reference matching the PyTorch forward."""
    out_avg = jnp.mean(x, axis=1, keepdims=True)
    out_max = jnp.max(x, axis=1, keepdims=True)
    a = jnp.concatenate([out_avg, out_max], axis=1)
    a = lax.conv_general_dilated(
        a, w, window_strides=(1, 1), padding=((PAD, PAD), (PAD, PAD)),
        dimension_numbers=("NCHW", "OIHW", "NCHW"),
        precision=lax.Precision.HIGHEST)
    a = a + b.reshape(1, -1, 1, 1)
    a = jax.nn.sigmoid(a)
    return x * a.reshape(x.shape)


if __name__ == "__main__":
    key = jax.random.PRNGKey(0)
    kx_, kw_, kb_ = jax.random.split(key, 3)

    # Primary small check (C must be 1 — see note in ca_module_forward).
    N, C, H, W = 2, 1, 16, 16
    x = jax.random.normal(kx_, (N, C, H, W), dtype=jnp.float32)
    w = 0.1 * jax.random.normal(kw_, (1, 2, K, K), dtype=jnp.float32)
    b = 0.05 * jax.random.normal(kb_, (1,), dtype=jnp.float32)

    out = jax.block_until_ready(ca_module_forward(x, w, b))
    ref = ca_module_reference(x, w, b)
    assert out.shape == (N, C, H, W)
    assert jnp.allclose(out, ref, atol=1e-5, rtol=1e-5), float(jnp.max(jnp.abs(out - ref)))

    # Secondary check: exercises the batch-tiled, multi-grid-step, lane-dense
    # path with a batch that is not a multiple of the block size.
    N2 = 200
    x2 = jax.random.normal(kx_, (N2, 1, H, W), dtype=jnp.float32)
    out2 = jax.block_until_ready(ca_module_forward(x2, w, b, block_n=128))
    ref2 = ca_module_reference(x2, w, b)
    assert out2.shape == (N2, 1, H, W)
    assert jnp.allclose(out2, ref2, atol=1e-5, rtol=1e-5), float(jnp.max(jnp.abs(out2 - ref2)))

    print("KERNEL_OK")
</pallas_src>

<mosaic_0001>
module attributes {stable_mosaic.version = 11 : i64} {
  func.func @ca_kernel(%arg0: i32, %arg1: memref<49xf32, #tpu.memory_space<smem>>, %arg2: memref<1xf32, #tpu.memory_space<smem>>, %arg3: memref<22x22x2xf32, #tpu.memory_space<vmem>>, %arg4: memref<16x16x2xf32, #tpu.memory_space<vmem>>) attributes {dimension_semantics = [#tpu.dimension_semantics<parallel>], iteration_bounds = array<i64: 1>, scalar_prefetch = 0 : i64, scratch_operands = 0 : i64, tpu.core_type = #tpu.core_type<tc>, window_params = [{transform_indices = @transform_0, window_bounds = array<i64: 49>}, {transform_indices = @transform_1, window_bounds = array<i64: 1>}, {transform_indices = @transform_2, window_bounds = array<i64: 22, 22, 2>}, {transform_indices = @transform_3, window_bounds = array<i64: 16, 16, 2>}]} {
    %c0 = arith.constant 0 : index
    %0 = memref.load %arg2[%c0] : memref<1xf32, #tpu.memory_space<smem>>
    %1 = vector.broadcast %0 : f32 to vector<16x16x2xf32>
    %c0_0 = arith.constant 0 : index
    %c0_1 = arith.constant 0 : index
    %c0_2 = arith.constant 0 : index
    %2 = vector.load %arg3[%c0_0, %c0_1, %c0_2] : memref<22x22x2xf32, #tpu.memory_space<vmem>>, vector<22x16x2xf32>
    %c0_3 = arith.constant 0 : index
    %3 = memref.load %arg1[%c0_3] : memref<49xf32, #tpu.memory_space<smem>>
    %4 = vector.extract_strided_slice %2 {offsets = [0, 0, 0], sizes = [16, 16, 2], strides = [1, 1, 1]} : vector<22x16x2xf32> to vector<16x16x2xf32>
    %5 = vector.broadcast %3 : f32 to vector<16x16x2xf32>
    %6 = arith.mulf %5, %4 : vector<16x16x2xf32>
    %7 = arith.addf %1, %6 : vector<16x16x2xf32>
    %c7 = arith.constant 7 : index
    %8 = memref.load %arg1[%c7] : memref<49xf32, #tpu.memory_space<smem>>
    %9 = vector.extract_strided_slice %2 {offsets = [1, 0, 0], sizes = [16, 16, 2], strides = [1, 1, 1]} : vector<22x16x2xf32> to vector<16x16x2xf32>
    %10 = vector.broadcast %8 : f32 to vector<16x16x2xf32>
    %11 = arith.mulf %10, %9 : vector<16x16x2xf32>
    %12 = arith.addf %7, %11 : vector<16x16x2xf32>
    %c14 = arith.constant 14 : index
    %13 = memref.load %arg1[%c14] : memref<49xf32, #tpu.memory_space<smem>>
    %14 = vector.extract_strided_slice %2 {offsets = [2, 0, 0], sizes = [16, 16, 2], strides = [1, 1, 1]} : vector<22x16x2xf32> to vector<16x16x2xf32>
    %15 = vector.broadcast %13 : f32 to vector<16x16x2xf32>
    %16 = arith.mulf %15, %14 : vector<16x16x2xf32>
    %17 = arith.addf %12, %16 : vector<16x16x2xf32>
    %c21 = arith.constant 21 : index
    %18 = memref.load %arg1[%c21] : memref<49xf32, #tpu.memory_space<smem>>
    %19 = vector.extract_strided_slice %2 {offsets = [3, 0, 0], sizes = [16, 16, 2], strides = [1, 1, 1]} : vector<22x16x2xf32> to vector<16x16x2xf32>
    %20 = vector.broadcast %18 : f32 to vector<16x16x2xf32>
    %21 = arith.mulf %20, %19 : vector<16x16x2xf32>
    %22 = arith.addf %17, %21 : vector<16x16x2xf32>
    %c28 = arith.constant 28 : index
    %23 = memref.load %arg1[%c28] : memref<49xf32, #tpu.memory_space<smem>>
    %24 = vector.extract_strided_slice %2 {offsets = [4, 0, 0], sizes = [16, 16, 2], strides = [1, 1, 1]} : vector<22x16x2xf32> to vector<16x16x2xf32>
    %25 = vector.broadcast %23 : f32 to vector<16x16x2xf32>
    %26 = arith.mulf %25, %24 : vector<16x16x2xf32>
    %27 = arith.addf %22, %26 : vector<16x16x2xf32>
    %c35 = arith.constant 35 : index
    %28 = memref.load %arg1[%c35] : memref<49xf32, #tpu.memory_space<smem>>
    %29 = vector.extract_strided_slice %2 {offsets = [5, 0, 0], sizes = [16, 16, 2], strides = [1, 1, 1]} : vector<22x16x2xf32> to vector<16x16x2xf32>
    %30 = vector.broadcast %28 : f32 to vector<16x16x2xf32>
    %31 = arith.mulf %30, %29 : vector<16x16x2xf32>
    %32 = arith.addf %27, %31 : vector<16x16x2xf32>
    %c42 = arith.constant 42 : index
    %33 = memref.load %arg1[%c42] : memref<49xf32, #tpu.memory_space<smem>>
    %34 = vector.extract_strided_slice %2 {offsets = [6, 0, 0], sizes = [16, 16, 2], strides = [1, 1, 1]} : vector<22x16x2xf32> to vector<16x16x2xf32>
    %35 = vector.broadcast %33 : f32 to vector<16x16x2xf32>
    %36 = arith.mulf %35, %34 : vector<16x16x2xf32>
    %37 = arith.addf %32, %36 : vector<16x16x2xf32>
    %c0_4 = arith.constant 0 : index
    %c1 = arith.constant 1 : index
    %c0_5 = arith.constant 0 : index
    %38 = vector.load %arg3[%c0_4, %c1, %c0_5] : memref<22x22x2xf32, #tpu.memory_space<vmem>>, vector<22x16x2xf32>
    %c1_6 = arith.constant 1 : index
    %39 = memref.load %arg1[%c1_6] : memref<49xf32, #tpu.memory_space<smem>>
    %40 = vector.extract_strided_slice %38 {offsets = [0, 0, 0], sizes = [16, 16, 2], strides = [1, 1, 1]} : vector<22x16x2xf32> to vector<16x16x2xf32>
    %41 = vector.broadcast %39 : f32 to vector<16x16x2xf32>
    %42 = arith.mulf %41, %40 : vector<16x16x2xf32>
    %43 = arith.addf %37, %42 : vector<16x16x2xf32>
    %c8 = arith.constant 8 : index
    %44 = memref.load %arg1[%c8] : memref<49xf32, #tpu.memory_space<smem>>
    %45 = vector.extract_strided_slice %38 {offsets = [1, 0, 0], sizes = [16, 16, 2], strides = [1, 1, 1]} : vector<22x16x2xf32> to vector<16x16x2xf32>
    %46 = vector.broadcast %44 : f32 to vector<16x16x2xf32>
    %47 = arith.mulf %46, %45 : vector<16x16x2xf32>
    %48 = arith.addf %43, %47 : vector<16x16x2xf32>
    %c15 = arith.constant 15 : index
    %49 = memref.load %arg1[%c15] : memref<49xf32, #tpu.memory_space<smem>>
    %50 = vector.extract_strided_slice %38 {offsets = [2, 0, 0], sizes = [16, 16, 2], strides = [1, 1, 1]} : vector<22x16x2xf32> to vector<16x16x2xf32>
    %51 = vector.broadcast %49 : f32 to vector<16x16x2xf32>
    %52 = arith.mulf %51, %50 : vector<16x16x2xf32>
    %53 = arith.addf %48, %52 : vector<16x16x2xf32>
    %c22 = arith.constant 22 : index
    %54 = memref.load %arg1[%c22] : memref<49xf32, #tpu.memory_space<smem>>
    %55 = vector.extract_strided_slice %38 {offsets = [3, 0, 0], sizes = [16, 16, 2], strides = [1, 1, 1]} : vector<22x16x2xf32> to vector<16x16x2xf32>
    %56 = vector.broadcast %54 : f32 to vector<16x16x2xf32>
    %57 = arith.mulf %56, %55 : vector<16x16x2xf32>
    %58 = arith.addf %53, %57 : vector<16x16x2xf32>
    %c29 = arith.constant 29 : index
    %59 = memref.load %arg1[%c29] : memref<49xf32, #tpu.memory_space<smem>>
    %60 = vector.extract_strided_slice %38 {offsets = [4, 0, 0], sizes = [16, 16, 2], strides = [1, 1, 1]} : vector<22x16x2xf32> to vector<16x16x2xf32>
    %61 = vector.broadcast %59 : f32 to vector<16x16x2xf32>
    %62 = arith.mulf %61, %60 : vector<16x16x2xf32>
    %63 = arith.addf %58, %62 : vector<16x16x2xf32>
    %c36 = arith.constant 36 : index
    %64 = memref.load %arg1[%c36] : memref<49xf32, #tpu.memory_space<smem>>
    %65 = vector.extract_strided_slice %38 {offsets = [5, 0, 0], sizes = [16, 16, 2], strides = [1, 1, 1]} : vector<22x16x2xf32> to vector<16x16x2xf32>
    %66 = vector.broadcast %64 : f32 to vector<16x16x2xf32>
    %67 = arith.mulf %66, %65 : vector<16x16x2xf32>
    %68 = arith.addf %63, %67 : vector<16x16x2xf32>
    %c43 = arith.constant 43 : index
    %69 = memref.load %arg1[%c43] : memref<49xf32, #tpu.memory_space<smem>>
    %70 = vector.extract_strided_slice %38 {offsets = [6, 0, 0], sizes = [16, 16, 2], strides = [1, 1, 1]} : vector<22x16x2xf32> to vector<16x16x2xf32>
    %71 = vector.broadcast %69 : f32 to vector<16x16x2xf32>
    %72 = arith.mulf %71, %70 : vector<16x16x2xf32>
    %73 = arith.addf %68, %72 : vector<16x16x2xf32>
    %c0_7 = arith.constant 0 : index
    %c2 = arith.constant 2 : index
    %c0_8 = arith.constant 0 : index
    %74 = vector.load %arg3[%c0_7, %c2, %c0_8] : memref<22x22x2xf32, #tpu.memory_space<vmem>>, vector<22x16x2xf32>
    %c2_9 = arith.constant 2 : index
    %75 = memref.load %arg1[%c2_9] : memref<49xf32, #tpu.memory_space<smem>>
    %76 = vector.extract_strided_slice %74 {offsets = [0, 0, 0], sizes = [16, 16, 2], strides = [1, 1, 1]} : vector<22x16x2xf32> to vector<16x16x2xf32>
    %77 = vector.broadcast %75 : f32 to vector<16x16x2xf32>
    %78 = arith.mulf %77, %76 : vector<16x16x2xf32>
    %79 = arith.addf %73, %78 : vector<16x16x2xf32>
    %c9 = arith.constant 9 : index
    %80 = memref.load %arg1[%c9] : memref<49xf32, #tpu.memory_space<smem>>
    %81 = vector.extract_strided_slice %74 {offsets = [1, 0, 0], sizes = [16, 16, 2], strides = [1, 1, 1]} : vector<22x16x2xf32> to vector<16x16x2xf32>
    %82 = vector.broadcast %80 : f32 to vector<16x16x2xf32>
    %83 = arith.mulf %82, %81 : vector<16x16x2xf32>
    %84 = arith.addf %79, %83 : vector<16x16x2xf32>
    %c16 = arith.constant 16 : index
    %85 = memref.load %arg1[%c16] : memref<49xf32, #tpu.memory_space<smem>>
    %86 = vector.extract_strided_slice %74 {offsets = [2, 0, 0], sizes = [16, 16, 2], strides = [1, 1, 1]} : vector<22x16x2xf32> to vector<16x16x2xf32>
    %87 = vector.broadcast %85 : f32 to vector<16x16x2xf32>
    %88 = arith.mulf %87, %86 : vector<16x16x2xf32>
    %89 = arith.addf %84, %88 : vector<16x16x2xf32>
    %c23 = arith.constant 23 : index
    %90 = memref.load %arg1[%c23] : memref<49xf32, #tpu.memory_space<smem>>
    %91 = vector.extract_strided_slice %74 {offsets = [3, 0, 0], sizes = [16, 16, 2], strides = [1, 1, 1]} : vector<22x16x2xf32> to vector<16x16x2xf32>
    %92 = vector.broadcast %90 : f32 to vector<16x16x2xf32>
    %93 = arith.mulf %92, %91 : vector<16x16x2xf32>
    %94 = arith.addf %89, %93 : vector<16x16x2xf32>
    %c30 = arith.constant 30 : index
    %95 = memref.load %arg1[%c30] : memref<49xf32, #tpu.memory_space<smem>>
    %96 = vector.extract_strided_slice %74 {offsets = [4, 0, 0], sizes = [16, 16, 2], strides = [1, 1, 1]} : vector<22x16x2xf32> to vector<16x16x2xf32>
    %97 = vector.broadcast %95 : f32 to vector<16x16x2xf32>
    %98 = arith.mulf %97, %96 : vector<16x16x2xf32>
    %99 = arith.addf %94, %98 : vector<16x16x2xf32>
    %c37 = arith.constant 37 : index
    %100 = memref.load %arg1[%c37] : memref<49xf32, #tpu.memory_space<smem>>
    %101 = vector.extract_strided_slice %74 {offsets = [5, 0, 0], sizes = [16, 16, 2], strides = [1, 1, 1]} : vector<22x16x2xf32> to vector<16x16x2xf32>
    %102 = vector.broadcast %100 : f32 to vector<16x16x2xf32>
    %103 = arith.mulf %102, %101 : vector<16x16x2xf32>
    %104 = arith.addf %99, %103 : vector<16x16x2xf32>
    %c44 = arith.constant 44 : index
    %105 = memref.load %arg1[%c44] : memref<49xf32, #tpu.memory_space<smem>>
    %106 = vector.extract_strided_slice %74 {offsets = [6, 0, 0], sizes = [16, 16, 2], strides = [1, 1, 1]} : vector<22x16x2xf32> to vector<16x16x2xf32>
    %107 = vector.broadcast %105 : f32 to vector<16x16x2xf32>
    %108 = arith.mulf %107, %106 : vector<16x16x2xf32>
    %109 = arith.addf %104, %108 : vector<16x16x2xf32>
    %c0_10 = arith.constant 0 : index
    %c3 = arith.constant 3 : index
    %c0_11 = arith.constant 0 : index
    %110 = vector.load %arg3[%c0_10, %c3, %c0_11] : memref<22x22x2xf32, #tpu.memory_space<vmem>>, vector<22x16x2xf32>
    %c3_12 = arith.constant 3 : index
    %111 = memref.load %arg1[%c3_12] : memref<49xf32, #tpu.memory_space<smem>>
    %112 = vector.extract_strided_slice %110 {offsets = [0, 0, 0], sizes = [16, 16, 2], strides = [1, 1, 1]} : vector<22x16x2xf32> to vector<16x16x2xf32>
    %113 = vector.broadcast %111 : f32 to vector<16x16x2xf32>
    %114 = arith.mulf %113, %112 : vector<16x16x2xf32>
    %115 = arith.addf %109, %114 : vector<16x16x2xf32>
    %c10 = arith.constant 10 : index
    %116 = memref.load %arg1[%c10] : memref<49xf32, #tpu.memory_space<smem>>
    %117 = vector.extract_strided_slice %110 {offsets = [1, 0, 0], sizes = [16, 16, 2], strides = [1, 1, 1]} : vector<22x16x2xf32> to vector<16x16x2xf32>
    %118 = vector.broadcast %116 : f32 to vector<16x16x2xf32>
    %119 = arith.mulf %118, %117 : vector<16x16x2xf32>
    %120 = arith.addf %115, %119 : vector<16x16x2xf32>
    %c17 = arith.constant 17 : index
    %121 = memref.load %arg1[%c17] : memref<49xf32, #tpu.memory_space<smem>>
    %122 = vector.extract_strided_slice %110 {offsets = [2, 0, 0], sizes = [16, 16, 2], strides = [1, 1, 1]} : vector<22x16x2xf32> to vector<16x16x2xf32>
    %123 = vector.broadcast %121 : f32 to vector<16x16x2xf32>
    %124 = arith.mulf %123, %122 : vector<16x16x2xf32>
    %125 = arith.addf %120, %124 : vector<16x16x2xf32>
    %c24 = arith.constant 24 : index
    %126 = memref.load %arg1[%c24] : memref<49xf32, #tpu.memory_space<smem>>
    %127 = vector.extract_strided_slice %110 {offsets = [3, 0, 0], sizes = [16, 16, 2], strides = [1, 1, 1]} : vector<22x16x2xf32> to vector<16x16x2xf32>
    %128 = vector.broadcast %126 : f32 to vector<16x16x2xf32>
    %129 = arith.mulf %128, %127 : vector<16x16x2xf32>
    %130 = arith.addf %125, %129 : vector<16x16x2xf32>
    %c31 = arith.constant 31 : index
    %131 = memref.load %arg1[%c31] : memref<49xf32, #tpu.memory_space<smem>>
    %132 = vector.extract_strided_slice %110 {offsets = [4, 0, 0], sizes = [16, 16, 2], strides = [1, 1, 1]} : vector<22x16x2xf32> to vector<16x16x2xf32>
    %133 = vector.broadcast %131 : f32 to vector<16x16x2xf32>
    %134 = arith.mulf %133, %132 : vector<16x16x2xf32>
    %135 = arith.addf %130, %134 : vector<16x16x2xf32>
    %c38 = arith.constant 38 : index
    %136 = memref.load %arg1[%c38] : memref<49xf32, #tpu.memory_space<smem>>
    %137 = vector.extract_strided_slice %110 {offsets = [5, 0, 0], sizes = [16, 16, 2], strides = [1, 1, 1]} : vector<22x16x2xf32> to vector<16x16x2xf32>
    %138 = vector.broadcast %136 : f32 to vector<16x16x2xf32>
    %139 = arith.mulf %138, %137 : vector<16x16x2xf32>
    %140 = arith.addf %135, %139 : vector<16x16x2xf32>
    %c45 = arith.constant 45 : index
    %141 = memref.load %arg1[%c45] : memref<49xf32, #tpu.memory_space<smem>>
    %142 = vector.extract_strided_slice %110 {offsets = [6, 0, 0], sizes = [16, 16, 2], strides = [1, 1, 1]} : vector<22x16x2xf32> to vector<16x16x2xf32>
    %143 = vector.broadcast %141 : f32 to vector<16x16x2xf32>
    %144 = arith.mulf %143, %142 : vector<16x16x2xf32>
    %145 = arith.addf %140, %144 : vector<16x16x2xf32>
    %c0_13 = arith.constant 0 : index
    %c4 = arith.constant 4 : index
    %c0_14 = arith.constant 0 : index
    %146 = vector.load %arg3[%c0_13, %c4, %c0_14] : memref<22x22x2xf32, #tpu.memory_space<vmem>>, vector<22x16x2xf32>
    %c4_15 = arith.constant 4 : index
    %147 = memref.load %arg1[%c4_15] : memref<49xf32, #tpu.memory_space<smem>>
    %148 = vector.extract_strided_slice %146 {offsets = [0, 0, 0], sizes = [16, 16, 2], strides = [1, 1, 1]} : vector<22x16x2xf32> to vector<16x16x2xf32>
    %149 = vector.broadcast %147 : f32 to vector<16x16x2xf32>
    %150 = arith.mulf %149, %148 : vector<16x16x2xf32>
    %151 = arith.addf %145, %150 : vector<16x16x2xf32>
    %c11 = arith.constant 11 : index
    %152 = memref.load %arg1[%c11] : memref<49xf32, #tpu.memory_space<smem>>
    %153 = vector.extract_strided_slice %146 {offsets = [1, 0, 0], sizes = [16, 16, 2], strides = [1, 1, 1]} : vector<22x16x2xf32> to vector<16x16x2xf32>
    %154 = vector.broadcast %152 : f32 to vector<16x16x2xf32>
    %155 = arith.mulf %154, %153 : vector<16x16x2xf32>
    %156 = arith.addf %151, %155 : vector<16x16x2xf32>
    %c18 = arith.constant 18 : index
    %157 = memref.load %arg1[%c18] : memref<49xf32, #tpu.memory_space<smem>>
    %158 = vector.extract_strided_slice %146 {offsets = [2, 0, 0], sizes = [16, 16, 2], strides = [1, 1, 1]} : vector<22x16x2xf32> to vector<16x16x2xf32>
    %159 = vector.broadcast %157 : f32 to vector<16x16x2xf32>
    %160 = arith.mulf %159, %158 : vector<16x16x2xf32>
    %161 = arith.addf %156, %160 : vector<16x16x2xf32>
    %c25 = arith.constant 25 : index
    %162 = memref.load %arg1[%c25] : memref<49xf32, #tpu.memory_space<smem>>
    %163 = vector.extract_strided_slice %146 {offsets = [3, 0, 0], sizes = [16, 16, 2], strides = [1, 1, 1]} : vector<22x16x2xf32> to vector<16x16x2xf32>
    %164 = vector.broadcast %162 : f32 to vector<16x16x2xf32>
    %165 = arith.mulf %164, %163 : vector<16x16x2xf32>
    %166 = arith.addf %161, %165 : vector<16x16x2xf32>
    %c32 = arith.constant 32 : index
    %167 = memref.load %arg1[%c32] : memref<49xf32, #tpu.memory_space<smem>>
    %168 = vector.extract_strided_slice %146 {offsets = [4, 0, 0], sizes = [16, 16, 2], strides = [1, 1, 1]} : vector<22x16x2xf32> to vector<16x16x2xf32>
    %169 = vector.broadcast %167 : f32 to vector<16x16x2xf32>
    %170 = arith.mulf %169, %168 : vector<16x16x2xf32>
    %171 = arith.addf %166, %170 : vector<16x16x2xf32>
    %c39 = arith.constant 39 : index
    %172 = memref.load %arg1[%c39] : memref<49xf32, #tpu.memory_space<smem>>
    %173 = vector.extract_strided_slice %146 {offsets = [5, 0, 0], sizes = [16, 16, 2], strides = [1, 1, 1]} : vector<22x16x2xf32> to vector<16x16x2xf32>
    %174 = vector.broadcast %172 : f32 to vector<16x16x2xf32>
    %175 = arith.mulf %174, %173 : vector<16x16x2xf32>
    %176 = arith.addf %171, %175 : vector<16x16x2xf32>
    %c46 = arith.constant 46 : index
    %177 = memref.load %arg1[%c46] : memref<49xf32, #tpu.memory_space<smem>>
    %178 = vector.extract_strided_slice %146 {offsets = [6, 0, 0], sizes = [16, 16, 2], strides = [1, 1, 1]} : vector<22x16x2xf32> to vector<16x16x2xf32>
    %179 = vector.broadcast %177 : f32 to vector<16x16x2xf32>
    %180 = arith.mulf %179, %178 : vector<16x16x2xf32>
    %181 = arith.addf %176, %180 : vector<16x16x2xf32>
    %c0_16 = arith.constant 0 : index
    %c5 = arith.constant 5 : index
    %c0_17 = arith.constant 0 : index
    %182 = vector.load %arg3[%c0_16, %c5, %c0_17] : memref<22x22x2xf32, #tpu.memory_space<vmem>>, vector<22x16x2xf32>
    %c5_18 = arith.constant 5 : index
    %183 = memref.load %arg1[%c5_18] : memref<49xf32, #tpu.memory_space<smem>>
    %184 = vector.extract_strided_slice %182 {offsets = [0, 0, 0], sizes = [16, 16, 2], strides = [1, 1, 1]} : vector<22x16x2xf32> to vector<16x16x2xf32>
    %185 = vector.broadcast %183 : f32 to vector<16x16x2xf32>
    %186 = arith.mulf %185, %184 : vector<16x16x2xf32>
    %187 = arith.addf %181, %186 : vector<16x16x2xf32>
    %c12 = arith.constant 12 : index
    %188 = memref.load %arg1[%c12] : memref<49xf32, #tpu.memory_space<smem>>
    %189 = vector.extract_strided_slice %182 {offsets = [1, 0, 0], sizes = [16, 16, 2], strides = [1, 1, 1]} : vector<22x16x2xf32> to vector<16x16x2xf32>
    %190 = vector.broadcast %188 : f32 to vector<16x16x2xf32>
    %191 = arith.mulf %190, %189 : vector<16x16x2xf32>
    %192 = arith.addf %187, %191 : vector<16x16x2xf32>
    %c19 = arith.constant 19 : index
    %193 = memref.load %arg1[%c19] : memref<49xf32, #tpu.memory_space<smem>>
    %194 = vector.extract_strided_slice %182 {offsets = [2, 0, 0], sizes = [16, 16, 2], strides = [1, 1, 1]} : vector<22x16x2xf32> to vector<16x16x2xf32>
    %195 = vector.broadcast %193 : f32 to vector<16x16x2xf32>
    %196 = arith.mulf %195, %194 : vector<16x16x2xf32>
    %197 = arith.addf %192, %196 : vector<16x16x2xf32>
    %c26 = arith.constant 26 : index
    %198 = memref.load %arg1[%c26] : memref<49xf32, #tpu.memory_space<smem>>
    %199 = vector.extract_strided_slice %182 {offsets = [3, 0, 0], sizes = [16, 16, 2], strides = [1, 1, 1]} : vector<22x16x2xf32> to vector<16x16x2xf32>
    %200 = vector.broadcast %198 : f32 to vector<16x16x2xf32>
    %201 = arith.mulf %200, %199 : vector<16x16x2xf32>
    %202 = arith.addf %197, %201 : vector<16x16x2xf32>
    %c33 = arith.constant 33 : index
    %203 = memref.load %arg1[%c33] : memref<49xf32, #tpu.memory_space<smem>>
    %204 = vector.extract_strided_slice %182 {offsets = [4, 0, 0], sizes = [16, 16, 2], strides = [1, 1, 1]} : vector<22x16x2xf32> to vector<16x16x2xf32>
    %205 = vector.broadcast %203 : f32 to vector<16x16x2xf32>
    %206 = arith.mulf %205, %204 : vector<16x16x2xf32>
    %207 = arith.addf %202, %206 : vector<16x16x2xf32>
    %c40 = arith.constant 40 : index
    %208 = memref.load %arg1[%c40] : memref<49xf32, #tpu.memory_space<smem>>
    %209 = vector.extract_strided_slice %182 {offsets = [5, 0, 0], sizes = [16, 16, 2], strides = [1, 1, 1]} : vector<22x16x2xf32> to vector<16x16x2xf32>
    %210 = vector.broadcast %208 : f32 to vector<16x16x2xf32>
    %211 = arith.mulf %210, %209 : vector<16x16x2xf32>
    %212 = arith.addf %207, %211 : vector<16x16x2xf32>
    %c47 = arith.constant 47 : index
    %213 = memref.load %arg1[%c47] : memref<49xf32, #tpu.memory_space<smem>>
    %214 = vector.extract_strided_slice %182 {offsets = [6, 0, 0], sizes = [16, 16, 2], strides = [1, 1, 1]} : vector<22x16x2xf32> to vector<16x16x2xf32>
    %215 = vector.broadcast %213 : f32 to vector<16x16x2xf32>
    %216 = arith.mulf %215, %214 : vector<16x16x2xf32>
    %217 = arith.addf %212, %216 : vector<16x16x2xf32>
    %c0_19 = arith.constant 0 : index
    %c6 = arith.constant 6 : index
    %c0_20 = arith.constant 0 : index
    %218 = vector.load %arg3[%c0_19, %c6, %c0_20] : memref<22x22x2xf32, #tpu.memory_space<vmem>>, vector<22x16x2xf32>
    %c6_21 = arith.constant 6 : index
    %219 = memref.load %arg1[%c6_21] : memref<49xf32, #tpu.memory_space<smem>>
    %220 = vector.extract_strided_slice %218 {offsets = [0, 0, 0], sizes = [16, 16, 2], strides = [1, 1, 1]} : vector<22x16x2xf32> to vector<16x16x2xf32>
    %221 = vector.broadcast %219 : f32 to vector<16x16x2xf32>
    %222 = arith.mulf %221, %220 : vector<16x16x2xf32>
    %223 = arith.addf %217, %222 : vector<16x16x2xf32>
    %c13 = arith.constant 13 : index
    %224 = memref.load %arg1[%c13] : memref<49xf32, #tpu.memory_space<smem>>
    %225 = vector.extract_strided_slice %218 {offsets = [1, 0, 0], sizes = [16, 16, 2], strides = [1, 1, 1]} : vector<22x16x2xf32> to vector<16x16x2xf32>
    %226 = vector.broadcast %224 : f32 to vector<16x16x2xf32>
    %227 = arith.mulf %226, %225 : vector<16x16x2xf32>
    %228 = arith.addf %223, %227 : vector<16x16x2xf32>
    %c20 = arith.constant 20 : index
    %229 = memref.load %arg1[%c20] : memref<49xf32, #tpu.memory_space<smem>>
    %230 = vector.extract_strided_slice %218 {offsets = [2, 0, 0], sizes = [16, 16, 2], strides = [1, 1, 1]} : vector<22x16x2xf32> to vector<16x16x2xf32>
    %231 = vector.broadcast %229 : f32 to vector<16x16x2xf32>
    %232 = arith.mulf %231, %230 : vector<16x16x2xf32>
    %233 = arith.addf %228, %232 : vector<16x16x2xf32>
    %c27 = arith.constant 27 : index
    %234 = memref.load %arg1[%c27] : memref<49xf32, #tpu.memory_space<smem>>
    %235 = vector.extract_strided_slice %218 {offsets = [3, 0, 0], sizes = [16, 16, 2], strides = [1, 1, 1]} : vector<22x16x2xf32> to vector<16x16x2xf32>
    %236 = vector.broadcast %234 : f32 to vector<16x16x2xf32>
    %237 = arith.mulf %236, %235 : vector<16x16x2xf32>
    %238 = arith.addf %233, %237 : vector<16x16x2xf32>
    %c34 = arith.constant 34 : index
    %239 = memref.load %arg1[%c34] : memref<49xf32, #tpu.memory_space<smem>>
    %240 = vector.extract_strided_slice %218 {offsets = [4, 0, 0], sizes = [16, 16, 2], strides = [1, 1, 1]} : vector<22x16x2xf32> to vector<16x16x2xf32>
    %241 = vector.broadcast %239 : f32 to vector<16x16x2xf32>
    %242 = arith.mulf %241, %240 : vector<16x16x2xf32>
    %243 = arith.addf %238, %242 : vector<16x16x2xf32>
    %c41 = arith.constant 41 : index
    %244 = memref.load %arg1[%c41] : memref<49xf32, #tpu.memory_space<smem>>
    %245 = vector.extract_strided_slice %218 {offsets = [5, 0, 0], sizes = [16, 16, 2], strides = [1, 1, 1]} : vector<22x16x2xf32> to vector<16x16x2xf32>
    %246 = vector.broadcast %244 : f32 to vector<16x16x2xf32>
    %247 = arith.mulf %246, %245 : vector<16x16x2xf32>
    %248 = arith.addf %243, %247 : vector<16x16x2xf32>
    %c48 = arith.constant 48 : index
    %249 = memref.load %arg1[%c48] : memref<49xf32, #tpu.memory_space<smem>>
    %250 = vector.extract_strided_slice %218 {offsets = [6, 0, 0], sizes = [16, 16, 2], strides = [1, 1, 1]} : vector<22x16x2xf32> to vector<16x16x2xf32>
    %251 = vector.broadcast %249 : f32 to vector<16x16x2xf32>
    %252 = arith.mulf %251, %250 : vector<16x16x2xf32>
    %253 = arith.addf %248, %252 : vector<16x16x2xf32>
    %254 = arith.negf %253 : vector<16x16x2xf32>
    %255 = math.exp %254 : vector<16x16x2xf32>
    %cst = arith.constant 1.000000e+00 : f32
    %256 = vector.broadcast %cst : f32 to vector<16x16x2xf32>
    %257 = arith.addf %256, %255 : vector<16x16x2xf32>
    %258 = arith.divf %256, %257 : vector<16x16x2xf32>
    %c3_22 = arith.constant 3 : index
    %c3_23 = arith.constant 3 : index
    %c0_24 = arith.constant 0 : index
    %259 = vector.load %arg3[%c3_22, %c3_23, %c0_24] : memref<22x22x2xf32, #tpu.memory_space<vmem>>, vector<16x16x2xf32>
    %260 = arith.mulf %259, %258 : vector<16x16x2xf32>
    %c0_25 = arith.constant 0 : index
    %c0_26 = arith.constant 0 : index
    %c0_27 = arith.constant 0 : index
    %261 = vector.load %arg4[%c0_25, %c0_26, %c0_27] : memref<16x16x2xf32, #tpu.memory_space<vmem>>, vector<16x16x2xf32>
    tpu.vector_store %arg4[%c0_25, %c0_26, %c0_27], %260 {strides = array<i32>} : memref<16x16x2xf32, #tpu.memory_space<vmem>>, vector<16x16x2xf32>,
    return
  }
  func.func @transform_0(%arg0: i32) -> i32 {
    %c0_i32 = arith.constant 0 : i32
    %c0_i32_0 = arith.constant 0 : i32
    return %c0_i32 : i32
  }
  func.func @transform_1(%arg0: i32) -> i32 {
    %c0_i32 = arith.constant 0 : i32
    %c0_i32_0 = arith.constant 0 : i32
    return %c0_i32 : i32
  }
  func.func @transform_2(%arg0: i32) -> (i32, i32, i32) {
    %c0_i32 = arith.constant 0 : i32
    %c0_i32_0 = arith.constant 0 : i32
    %c0_i32_1 = arith.constant 0 : i32
    return %c0_i32, %c0_i32_0, %arg0 : i32, i32, i32
  }
  func.func @transform_3(%arg0: i32) -> (i32, i32, i32) {
    %c0_i32 = arith.constant 0 : i32
    %c0_i32_0 = arith.constant 0 : i32
    %c0_i32_1 = arith.constant 0 : i32
    return %c0_i32, %c0_i32_0, %arg0 : i32, i32, i32
  }
}

</mosaic_0001>

<bundles_post_ra>
// kernel: tpu_custom_call.1
= control target key start
LH: loop header
LB: loop body
LE: loop exit
PB: predicated region body
PF: predicated region fallthrough
CT: control target
= control target key end

     0   :  { %9 = vsyncpa [#allocation4], 0  ;;  %s13398_s0 = inlined_call_operand.vmem [shape: f32[49], index: 0, kind: input, shape index: {}]   ;;  %s13399_s1 = inlined_call_operand.<no memory space> [shape: f32[1], index: 1, kind: input, shape index: {}]   ;;  %s13400_s2 = inlined_call_operand.vmem [shape: f32[22,22,2], index: 2, kind: input, shape index: {}]   ;;  %s13401_s3 = inlined_call_operand.vmem [shape: f32[16,16,2], index: 3, kind: output, shape index: {}]  }
   0x1   :  { %s16_s14 = sshll.u32 %s13398_s0, 4  ;;  %s17_s14 = int_to_ptr.vmem [resolvable:$true] %s16_s14 }
   0x2   :  { %s4108_s15 = scalar_lea.vmem %s17_s14, 16  ;;  %p4113_p1 = scmp.lt.s32.totalorder %s17_s14, %s17_s14 }
   0x3   :  { %p4109_p0 = scmp.ne.s32.totalorder %s17_s14, %s4108_s15  ;;  %p4114_p2 = scmp.lt.s32.totalorder %s4108_s15, %s4108_s15 }
   0x5   :  { %p4115_p3 = por %p4114_p2, %p4113_p1 }
   0x7   :  { %p4116_p4 = pnand %p4115_p3, %p4109_p0 }
   0x9   :  { %4119 = shalt.err (!%p4116_p4)
}
   0xa   :  { %s4122_s16 = smov [#allocation3]  }
   0xb   :  { %19 = dma.vmem_to_smem %s17_s14, 16, %s4122_s16, [#allocation4]  }
   0xc   :  { %4120 = dma.done.wait [#allocation4], 16  }
   0xd   :  { %4121 = vsyncadd [#allocation4], 4294967280 }
   0xe   :  { %27 = sfence }
   0xf   :  { %s74_s17 = sld [smem:[#allocation3]]  ;;  %v30_v0 = vld [vmem:[%s13400_s2] sm:$0xff]  ;;  %v31_v1 = vld [vmem:[%s13400_s2 + $0x8] sm:$0xff]  ;;  %v4155_v2 = vld [vmem:[%s13400_s2 + $0x18] sm:$0xff]  ;;  %v4215_v15 = vstv %s13399_s1  ;;  %vm3829_vm0 = vcmask 15360  }
  0x10   :  { %v4160_v3 = vld [vmem:[%s13400_s2 + $0x20] sm:$0xff]  ;;  %v4165_v4 = vld [vmem:[%s13400_s2 + $0x30] sm:$0xff]  ;;  %v4170_v5 = vld [vmem:[%s13400_s2 + $0x38] sm:$0xff]  ;;  %s4329_s26 = sld [smem:[#allocation3 + $0x7]] }
  0x11   :  { %13948 = vst [vmem:[#allocation6_spill] sm:$0xff] %v4165_v4  ;;  %13949 = vst [vmem:[#allocation7_spill] sm:$0xff] %v4170_v5  ;;  %v4175_v6 = vld [vmem:[%s13400_s2 + $0x48] sm:$0xff]  ;;  %v4180_v7 = vld [vmem:[%s13400_s2 + $0x50] sm:$0xff]  ;;  %s4335_s1 = sld [smem:[#allocation3 + $0xe]] }
  0x12   :  { %13950 = vst [vmem:[#allocation8_spill] sm:$0xff] %v4175_v6  ;;  %13951 = vst [vmem:[#allocation9_spill] sm:$0xff] %v4180_v7  ;;  %v4185_v8 = vld [vmem:[%s13400_s2 + $0x60] sm:$0xff]  ;;  %v4190_v9 = vld [vmem:[%s13400_s2 + $0x68] sm:$0xff]  ;;  %s4341_s27 = sld [smem:[#allocation3 + $0x15]] }
  0x13   :  { %13952 = vst [vmem:[#allocation10_spill] sm:$0xff] %v4185_v8  ;;  %13953 = vst [vmem:[#allocation11_spill] sm:$0xff] %v4190_v9  ;;  %v4195_v10 = vld [vmem:[%s13400_s2 + $0x78] sm:$0xff]  ;;  %v4200_v12 = vld [vmem:[%s13400_s2 + $0x80] sm:$0xff]  ;;  %s4355_s28 = sld [smem:[#allocation3 + $0x1c]] }
  0x14   :  { %13954 = vst [vmem:[#allocation12_spill] sm:$0xff] %v4195_v10  ;;  %13955 = vst [vmem:[#allocation13_spill] sm:$0xff] %v4200_v12  ;;  %v4205_v13 = vld [vmem:[%s13400_s2 + $0x90] sm:$0xff]  ;;  %v4210_v14 = vld [vmem:[%s13400_s2 + $0x98] sm:$0xff]  ;;  %s4987_s19 = sld [smem:[#allocation3 + $0x23]] }
  0x15   :  { %v75_v11 = vstv %s74_s17  ;;  %13956 = vst [vmem:[#allocation14_spill] sm:$0xff] %v4205_v13  ;;  %13957 = vst [vmem:[#allocation15_spill] sm:$0xff] %v4210_v14  ;;  %v4220_v16 = vld [vmem:[%s13400_s2 + $0xa8] sm:$0xff]  ;;  %v4225_v17 = vld [vmem:[%s13400_s2 + $0xb0] sm:$0xff]  ;;  %s4997_s20 = sld [smem:[#allocation3 + $0x2a]] }
  0x16   :  { %13958 = vst [vmem:[#allocation16_spill] sm:$0xff] %v4220_v16  ;;  %13959 = vst [vmem:[#allocation17_spill] sm:$0xff] %v4225_v17  ;;  %v4230_v18 = vld [vmem:[%s13400_s2 + $0xc0] sm:$0xff]  ;;  %v4235_v19 = vld [vmem:[%s13400_s2 + $0xc8] sm:$0xff]  ;;  %v76_v22 = vmul.f32 %v75_v11, %v30_v0  ;;  %v77_v23 = vmul.f32 %v75_v11, %v31_v1  ;;  %v78_v24 = vmul.f32 %v75_v11, %v4155_v2  ;;  %s5007_s17 = sld [smem:[#allocation3 + $0x1]] }
  0x17   :  { %13960 = vst [vmem:[#allocation18_spill] sm:$0xff] %v4230_v18  ;;  %13961 = vst [vmem:[#allocation19_spill] sm:$0xff] %v4235_v19  ;;  %v4240_v20 = vld [vmem:[%s13400_s2 + $0xd8] sm:$0xff]  ;;  %v4245_v21 = vld [vmem:[%s13400_s2 + $0xe0] sm:$0xff]  ;;  %v79_v25 = vmul.f32 %v75_v11, %v4160_v3  ;;  %v80_v29 = vmul.f32 %v75_v11, %v4165_v4  ;;  %v81_v30 = vmul.f32 %v75_v11, %v4170_v5  ;;  %s5021_s0 = sld [smem:[#allocation3 + $0x8]] }
  0x18   :  { %13962 = vst [vmem:[#allocation20_spill] sm:$0xff] %v4240_v20  ;;  %13963 = vst [vmem:[#allocation21_spill] sm:$0xff] %v4245_v21  ;;  %v4252_v26 = vld [vmem:[%s13400_s2 + $0xf0] sm:$0xff]  ;;  %v4257_v27 = vld [vmem:[%s13400_s2 + $0xf8] sm:$0xff]  ;;  %v82_v31 = vmul.f32 %v75_v11, %v4175_v6  ;;  %v83_v32 = vmul.f32 %v75_v11, %v4180_v7  ;;  %v84_v36 = vmul.f32 %v75_v11, %v4185_v8  ;;  %s5791_s11 = sld [smem:[#allocation3 + $0xf]] }
  0x19   :  { %13964 = vst [vmem:[#allocation22_spill] sm:$0xff] %v4252_v26  ;;  %13965 = vst [vmem:[#allocation23_spill] sm:$0xff] %v4257_v27  ;;  %v4262_v28 = vld [vmem:[%s13400_s2 + $0x108] sm:$0xff]  ;;  %v4271_v33 = vld [vmem:[%s13400_s2 + $0x110] sm:$0xff]  ;;  %v85_v37 = vmul.f32 %v75_v11, %v4190_v9  ;;  %v86_v38 = vmul.f32 %v75_v11, %v4195_v10  ;;  %v87_v39 = vmul.f32 %v75_v11, %v4200_v12  ;;  %s5801_s12 = sld [smem:[#allocation3 + $0x16]] }
  0x1a   :  { %13966 = vst [vmem:[#allocation24_spill] sm:$0xff] %v4262_v28  ;;  %13967 = vst [vmem:[#allocation25_spill] sm:$0xff] %v4271_v33  ;;  %v4276_v34 = vld [vmem:[%s13400_s2 + $0x120] sm:$0xff]  ;;  %v4281_v35 = vld [vmem:[%s13400_s2 + $0x128] sm:$0xff]  ;;  %v88_v43 = vmul.f32 %v75_v11, %v4205_v13  ;;  %v89_v44 = vmul.f32 %v75_v11, %v4210_v14  ;;  %v90_v45 = vmul.f32 %v75_v11, %v4220_v16  ;;  %s5811_s13 = sld [smem:[#allocation3 + $0x1d]] }
  0x1b   :  { %13968 = vst [vmem:[#allocation26_spill] sm:$0xff] %v4276_v34  ;;  %13969 = vst [vmem:[#allocation27_spill] sm:$0xff] %v4281_v35  ;;  %v4290_v40 = vld [vmem:[%s13400_s2 + $0x138] sm:$0xff]  ;;  %v4295_v41 = vld [vmem:[%s13400_s2 + $0x140] sm:$0xff]  ;;  %v91_v46 = vmul.f32 %v75_v11, %v4225_v17  ;;  %v92_v50 = vmul.f32 %v75_v11, %v4230_v18  ;;  %v93_v51 = vmul.f32 %v75_v11, %v4235_v19  ;;  %s5825_s14 = sld [smem:[#allocation3 + $0x24]] }
  0x1c   :  { %13970 = vst [vmem:[#allocation28_spill] sm:$0xff] %v4290_v40  ;;  %13971 = vst [vmem:[#allocation29_spill] sm:$0xff] %v4295_v41  ;;  %v4300_v42 = vld [vmem:[%s13400_s2 + $0x150] sm:$0xff]  ;;  %v4309_v47 = vld [vmem:[%s13400_s2 + $0x158] sm:$0xff]  ;;  %v94_v52 = vmul.f32 %v75_v11, %v4240_v20  ;;  %v95_v53 = vmul.f32 %v75_v11, %v4245_v21  ;;  %v96_v54 = vmul.f32 %v75_v11, %v4252_v26  ;;  %s6457_s29 = sld [smem:[#allocation3 + $0x2b]] }
  0x1d   :  { %13972 = vst [vmem:[#allocation30_spill] sm:$0xff] %v4300_v42  ;;  %13973 = vst [vmem:[#allocation31_spill] sm:$0xff] %v4309_v47  ;;  %v4314_v48 = vld [vmem:[%s13400_s2 + $0x168] sm:$0xff]  ;;  %v4319_v49 = vld [vmem:[%s13400_s2 + $0x170] sm:$0xff]  ;;  %v97_v55 = vmul.f32 %v75_v11, %v4257_v27  ;;  %v98_v56 = vmul.f32 %v75_v11, %v4262_v28  ;;  %v99_v57 = vmul.f32 %v75_v11, %v4271_v33  ;;  %s6467_s30 = sld [smem:[#allocation3 + $0x2]] }
  0x1e   :  { %13974 = vst [vmem:[#allocation32_spill] sm:$0xff] %v4314_v48  ;;  %13975 = vst [vmem:[#allocation33_spill] sm:$0xff] %v4319_v49  ;;  %v100_v58 = vmul.f32 %v75_v11, %v4276_v34  ;;  %v101_v59 = vmul.f32 %v75_v11, %v4281_v35  ;;  %v102_v60 = vmul.f32 %v75_v11, %v4290_v40  ;;  %s6477_s4 = sld [smem:[#allocation3 + $0x9]] }
  0x1f   :  { %v103_v61 = vmul.f32 %v75_v11, %v4295_v41  ;;  %v104_v62 = vmul.f32 %v75_v11, %v4300_v42  ;;  %v105_v63 = vmul.f32 %v75_v11, %v4309_v47  ;;  %v106_v0 = vmul.f32 %v75_v11, %v4314_v48  ;;  %s6491_s5 = sld [smem:[#allocation3 + $0x10]] }
  0x20   :  { %v107_v1 = vmul.f32 %v75_v11, %v4319_v49  ;;  %v4344_v34 = vadd.f32 %v76_v22, %v4215_v15  ;;  %v4347_v35 = vadd.f32 %v77_v23, %v4215_v15  ;;  %v4350_v41 = vadd.f32 %v78_v24, %v4215_v15  ;;  %s7261_s23 = sld [smem:[#allocation3 + $0x17]] }
  0x21   :  { %v4353_v40 = vadd.f32 %v79_v25, %v4215_v15  ;;  %v4358_v48 = vadd.f32 %v80_v29, %v4215_v15  ;;  %v4361_v11 = vadd.f32 %v81_v30, %v4215_v15  ;;  %v4364_v22 = vadd.f32 %v82_v31, %v4215_v15  ;;  %s7271_s24 = sld [smem:[#allocation3 + $0x1e]] }
  0x22   :  { %v4367_v23 = vadd.f32 %v83_v32, %v4215_v15  ;;  %v4370_v24 = vadd.f32 %v84_v36, %v4215_v15  ;;  %v4373_v25 = vadd.f32 %v85_v37, %v4215_v15  ;;  %v4379_v29 = vadd.f32 %v87_v39, %v4215_v15  ;;  %s7281_s25 = sld [smem:[#allocation3 + $0x25]] }
  0x23   :  { %13976 = vst [vmem:[#allocation34_spill] sm:$0xff] %v4353_v40  ;;  %v4376_v40 = vadd.f32 %v86_v38, %v4215_v15  ;;  %v4382_v30 = vadd.f32 %v88_v43, %v4215_v15  ;;  %v4385_v31 = vadd.f32 %v89_v44, %v4215_v15  ;;  %v4388_v32 = vadd.f32 %v90_v45, %v4215_v15  ;;  %s7923_s15 = sld [smem:[#allocation3 + $0x3]] }
  0x24   :  { %v4391_v36 = vadd.f32 %v91_v46, %v4215_v15  ;;  %v4394_v37 = vadd.f32 %v92_v50, %v4215_v15  ;;  %v4397_v38 = vadd.f32 %v93_v51, %v4215_v15  ;;  %v4400_v39 = vadd.f32 %v94_v52, %v4215_v15  ;;  %s7933_s16 = sld [smem:[#allocation3 + $0xa]] }
  0x25   :  { %v4403_v43 = vadd.f32 %v95_v53, %v4215_v15  ;;  %v4406_v44 = vadd.f32 %v96_v54, %v4215_v15  ;;  %v4409_v45 = vadd.f32 %v97_v55, %v4215_v15  ;;  %v4412_v46 = vadd.f32 %v98_v56, %v4215_v15  ;;  %s7941_s18 = sld [smem:[#allocation3 + $0x11]] }
  0x26   :  { %v4415_v50 = vadd.f32 %v99_v57, %v4215_v15  ;;  %v4418_v51 = vadd.f32 %v100_v58, %v4215_v15  ;;  %v4421_v52 = vadd.f32 %v101_v59, %v4215_v15  ;;  %v4424_v53 = vadd.f32 %v102_v60, %v4215_v15  ;;  %s8731_s8 = sld [smem:[#allocation3 + $0x1f]] }
  0x27   :  { %13977 = vst [vmem:[#allocation35_spill] sm:$0xff] %v4406_v44  ;;  %v141_v54 = vstv %s4329_s26  ;;  %v4428_v44 = vadd.f32 %v103_v61, %v4215_v15  ;;  %v4431_v55 = vadd.f32 %v104_v62, %v4215_v15  ;;  %v4434_v56 = vadd.f32 %v105_v63, %v4215_v15  ;;  %s7295_s26 = sld [smem:[#allocation3 + $0x2c]] }
  0x28   :  { %13978 = vst [vmem:[#allocation36_spill] sm:$0xff] %v4415_v50  ;;  %13979 = vst [vmem:[#allocation37_spill] sm:$0xff] %v4418_v51  ;;  %v4437_v57 = vadd.f32 %v106_v0, %v4215_v15  ;;  %v4440_v58 = vadd.f32 %v107_v1, %v4215_v15  ;;  %v4443_v59 = vstv %s4335_s1  ;;  %v4446_v60 = vstv %s4341_s27  ;;  %v13996_v50 = vld [vmem:[#allocation32_spill] sm:$0xff]  ;;  %s8741_s9 = sld [smem:[#allocation3 + $0x26]] }
  0x29   :  { %13980 = vst [vmem:[#allocation38_spill] sm:$0xff] %v4421_v52  ;;  %13981 = vst [vmem:[#allocation39_spill] sm:$0xff] %v4424_v53  ;;  %v4449_v53 = vstv %s4355_s28  ;;  %v142_v61 = vmul.f32 %v141_v54, %v4155_v2  ;;  %v143_v62 = vmul.f32 %v141_v54, %v4160_v3  ;;  %v145_v63 = vmul.f32 %v141_v54, %v4170_v5  ;;  %v13995_v52 = vld [vmem:[#allocation29_spill] sm:$0xff]  ;;  %s8751_s10 = sld [smem:[#allocation3 + $0x2d]] }
  0x2a   :  { %13982 = vst [vmem:[#allocation40_spill] sm:$0xff] %v4428_v44  ;;  %13983 = vst [vmem:[#allocation41_spill] sm:$0xff] %v4431_v55  ;;  %v144_v55 = vmul.f32 %v141_v54, %v4165_v4  ;;  %v146_v0 = vmul.f32 %v141_v54, %v4175_v6  ;;  %v148_v15 = vmul.f32 %v141_v54, %v4185_v8  ;;  %v13993_v4 = vld [vmem:[#allocation27_spill] sm:$0xff]  ;;  %s11681_s6 = sld [smem:[#allocation3 + $0x6]] }
  0x2b   :  { %13984 = vst [vmem:[#allocation42_spill] sm:$0xff] %v4434_v56  ;;  %13985 = vst [vmem:[#allocation43_spill] sm:$0xff] %v4437_v57  ;;  %v147_v57 = vmul.f32 %v141_v54, %v4180_v7  ;;  %v149_v1 = vmul.f32 %v141_v54, %v4190_v9  ;;  %v152_v2 = vmul.f32 %v141_v54, %v4205_v13  ;;  %v4470_v9 = vld [vmem:[%s13400_s2 + $0x180] sm:$0xff]  ;;  %v13994_v56 = vld [vmem:[#allocation28_spill] sm:$0xff]  ;;  %s11691_s7 = sld [smem:[#allocation3 + $0xd]] }
  0x2c   :  { %13986 = vst [vmem:[#allocation44_spill] sm:$0xff] %v4440_v58  ;;  %13987 = vst [vmem:[#allocation45_spill] sm:$0xff] %v4443_v59  ;;  %v153_v3 = vmul.f32 %v141_v54, %v4210_v14  ;;  %v154_v59 = vmul.f32 %v141_v54, %v4220_v16  ;;  %v155_v5 = vmul.f32 %v141_v54, %v4225_v17  ;;  %s12475_s28 = sld [smem:[#allocation3 + $0x1b]] }
  0x2d   :  { %13988 = vst [vmem:[#allocation46_spill] sm:$0xff] %v4446_v60  ;;  %13989 = vst [vmem:[#allocation47_spill] sm:$0xff] %v4449_v53  ;;  %v150_v60 = vmul.f32 %v141_v54, %v4195_v10  ;;  %v151_v53 = vmul.f32 %v141_v54, %v4200_v12  ;;  %v156_v6 = vmul.f32 %v141_v54, %v4230_v18  ;;  %v4475_v12 = vld [vmem:[%s13400_s2 + $0x188] sm:$0xff]  ;;  %v13992_v10 = vld [vmem:[#allocation26_spill] sm:$0xff] }
  0x2e   :  { %v157_v7 = vmul.f32 %v141_v54, %v4235_v19  ;;  %13990 = vst [vmem:[#allocation48_spill] sm:$0xff] %v4470_v9  ;;  %13991 = vst [vmem:[#allocation49_spill] sm:$0xff] %v4475_v12  ;;  %v158_v14 = vmul.f32 %v141_v54, %v4240_v20  ;;  %v159_v16 = vmul.f32 %v141_v54, %v4245_v21 }
  0x2f   :  { %v160_v17 = vmul.f32 %v141_v54, %v4252_v26  ;;  %v161_v18 = vmul.f32 %v141_v54, %v4257_v27  ;;  %v162_v19 = vmul.f32 %v141_v54, %v4262_v28  ;;  %v163_v13 = vmul.f32 %v141_v54, %v4271_v33 }
  0x30   :  { %v164_v8 = vmul.f32 %v141_v54, %v13992_v10  ;;  %v165_v58 = vmul.f32 %v141_v54, %v13993_v4  ;;  %v166_v44 = vmul.f32 %v141_v54, %v13994_v56  ;;  %v167_v51 = vmul.f32 %v141_v54, %v13995_v52 }
  0x31   :  { %v168_v20 = vmul.f32 %v141_v54, %v4300_v42  ;;  %v169_v21 = vmul.f32 %v141_v54, %v4309_v47  ;;  %v170_v26 = vmul.f32 %v141_v54, %v13996_v50  ;;  %v171_v27 = vmul.f32 %v141_v54, %v4319_v49  ;;  %v13997_v42 = vld [vmem:[#allocation34_spill] sm:$0xff] }
  0x32   :  { %v172_v28 = vmul.f32 %v141_v54, %v4470_v9  ;;  %v173_v33 = vmul.f32 %v141_v54, %v4475_v12  ;;  %v4494_v10 = vadd.f32 %v142_v61, %v4344_v34  ;;  %v4497_v4 = vadd.f32 %v143_v62, %v4347_v35 }
  0x33   :  { %v4500_v52 = vadd.f32 %v144_v55, %v4350_v41  ;;  %v4503_v56 = vadd.f32 %v145_v63, %v13997_v42  ;;  %v4506_v50 = vadd.f32 %v146_v0, %v4358_v48  ;;  %v4509_v49 = vadd.f32 %v147_v57, %v4361_v11  ;;  %v14017_v57 = vld [vmem:[#allocation45_spill] sm:$0xff] }
  0x34   :  { %v4512_v54 = vadd.f32 %v148_v15, %v4364_v22  ;;  %v4515_v34 = vadd.f32 %v149_v1, %v4367_v23  ;;  %v4518_v35 = vadd.f32 %v150_v60, %v4370_v24  ;;  %v4521_v41 = vadd.f32 %v151_v53, %v4373_v25  ;;  %v14024_v15 = vld [vmem:[#allocation13_spill] sm:$0xff] }
  0x35   :  { %v4524_v42 = vadd.f32 %v152_v2, %v4376_v40  ;;  %v4527_v48 = vadd.f32 %v153_v3, %v4379_v29  ;;  %v4530_v11 = vadd.f32 %v154_v59, %v4382_v30  ;;  %v4533_v22 = vadd.f32 %v155_v5, %v4385_v31  ;;  %v13998_v5 = vld [vmem:[#allocation35_spill] sm:$0xff]  ;;  %v14025_v2 = vld [vmem:[#allocation14_spill] sm:$0xff] }
  0x36   :  { %v4536_v23 = vadd.f32 %v156_v6, %v4388_v32  ;;  %v4539_v24 = vadd.f32 %v157_v7, %v4391_v36  ;;  %v4542_v25 = vadd.f32 %v158_v14, %v4394_v37  ;;  %v4545_v40 = vadd.f32 %v159_v16, %v4397_v38  ;;  %v13999_v14 = vld [vmem:[#allocation36_spill] sm:$0xff]  ;;  %v14000_v16 = vld [vmem:[#allocation37_spill] sm:$0xff] }
  0x37   :  { %v4548_v29 = vadd.f32 %v160_v17, %v4400_v39  ;;  %v4551_v30 = vadd.f32 %v161_v18, %v4403_v43  ;;  %v4554_v31 = vadd.f32 %v162_v19, %v13998_v5  ;;  %v4557_v6 = vadd.f32 %v163_v13, %v4409_v45  ;;  %v14002_v17 = vld [vmem:[#allocation38_spill] sm:$0xff]  ;;  %v14004_v18 = vld [vmem:[#allocation39_spill] sm:$0xff]  ;;  %v14006_v19 = vld [vmem:[#allocation40_spill] sm:$0xff] }
  0x38   :  { %v4560_v7 = vadd.f32 %v164_v8, %v4412_v46  ;;  %v4563_v32 = vadd.f32 %v165_v58, %v13999_v14  ;;  %v4566_v36 = vadd.f32 %v166_v44, %v14000_v16  ;;  %v4569_v37 = vadd.f32 %v167_v51, %v14002_v17  ;;  %v14008_v13 = vld [vmem:[#allocation41_spill] sm:$0xff]  ;;  %v14010_v8 = vld [vmem:[#allocation42_spill] sm:$0xff]  ;;  %v14012_v46 = vld [vmem:[#allocation43_spill] sm:$0xff] }
  0x39   :  { %v4572_v38 = vadd.f32 %v168_v20, %v14004_v18  ;;  %v4575_v39 = vadd.f32 %v169_v21, %v14006_v19  ;;  %v4578_v43 = vadd.f32 %v170_v26, %v14008_v13  ;;  %v4581_v45 = vadd.f32 %v171_v27, %v14010_v8  ;;  %v14014_v44 = vld [vmem:[#allocation44_spill] sm:$0xff]  ;;  %v14016_v51 = vld [vmem:[#allocation6_spill] sm:$0xff]  ;;  %v14018_v20 = vld [vmem:[#allocation7_spill] sm:$0xff] }
  0x3a   :  { %14001 = vst [vmem:[#allocation34_spill] sm:$0xff] %v4566_v36  ;;  %14003 = vst [vmem:[#allocation35_spill] sm:$0xff] %v4569_v37  ;;  %v4584_v53 = vadd.f32 %v172_v28, %v14012_v46  ;;  %v4587_v55 = vadd.f32 %v173_v33, %v14014_v44  ;;  %v208_v58 = vmul.f32 %v14017_v57, %v14016_v51  ;;  %v14019_v21 = vld [vmem:[#allocation8_spill] sm:$0xff]  ;;  %v14020_v26 = vld [vmem:[#allocation9_spill] sm:$0xff] }
  0x3b   :  { %14005 = vst [vmem:[#allocation36_spill] sm:$0xff] %v4572_v38  ;;  %14007 = vst [vmem:[#allocation37_spill] sm:$0xff] %v4575_v39  ;;  %v209_v59 = vmul.f32 %v14017_v57, %v14018_v20  ;;  %v210_v60 = vmul.f32 %v14017_v57, %v14019_v21  ;;  %v211_v61 = vmul.f32 %v14017_v57, %v14020_v26  ;;  %v14021_v27 = vld [vmem:[#allocation10_spill] sm:$0xff]  ;;  %v14022_v28 = vld [vmem:[#allocation11_spill] sm:$0xff] }
  0x3c   :  { %14009 = vst [vmem:[#allocation38_spill] sm:$0xff] %v4578_v43  ;;  %14011 = vst [vmem:[#allocation39_spill] sm:$0xff] %v4581_v45  ;;  %v212_v62 = vmul.f32 %v14017_v57, %v14021_v27  ;;  %v213_v63 = vmul.f32 %v14017_v57, %v14022_v28  ;;  %v14023_v33 = vld [vmem:[#allocation12_spill] sm:$0xff]  ;;  %v215_v1 = vmul.f32 %v14017_v57, %v14024_v15  ;;  %v14026_v5 = vld [vmem:[#allocation15_spill] sm:$0xff] }
  0x3d   :  { %14013 = vst [vmem:[#allocation40_spill] sm:$0xff] %v4584_v53  ;;  %14015 = vst [vmem:[#allocation41_spill] sm:$0xff] %v4587_v55  ;;  %v214_v0 = vmul.f32 %v14017_v57, %v14023_v33  ;;  %v216_v3 = vmul.f32 %v14017_v57, %v14025_v2  ;;  %v217_v14 = vmul.f32 %v14017_v57, %v14026_v5  ;;  %v14027_v16 = vld [vmem:[#allocation16_spill] sm:$0xff]  ;;  %v14028_v18 = vld [vmem:[#allocation17_spill] sm:$0xff] }
  0x3e   :  { %v218_v17 = vmul.f32 %v14017_v57, %v14027_v16  ;;  %v219_v19 = vmul.f32 %v14017_v57, %v14028_v18  ;;  %v14029_v13 = vld [vmem:[#allocation18_spill] sm:$0xff]  ;;  %v14030_v46 = vld [vmem:[#allocation19_spill] sm:$0xff]  ;;  %v14031_v51 = vld [vmem:[#allocation20_spill] sm:$0xff] }
  0x3f   :  { %v220_v8 = vmul.f32 %v14017_v57, %v14029_v13  ;;  %v221_v44 = vmul.f32 %v14017_v57, %v14030_v46  ;;  %v222_v20 = vmul.f32 %v14017_v57, %v14031_v51  ;;  %v14032_v15 = vld [vmem:[#allocation21_spill] sm:$0xff]  ;;  %v4629_v18 = vld [vmem:[%s13400_s2 + $0x1a0] sm:$0xff]  ;;  %v14036_v46 = vld [vmem:[#allocation23_spill] sm:$0xff] }
  0x40   :  { %v223_v2 = vmul.f32 %v14017_v57, %v14032_v15  ;;  %v4624_v5 = vld [vmem:[%s13400_s2 + $0x198] sm:$0xff]  ;;  %14034 = vst [vmem:[#allocation43_spill] sm:$0xff] %v4629_v18  ;;  %v14035_v13 = vld [vmem:[#allocation22_spill] sm:$0xff]  ;;  %v225_v33 = vmul.f32 %v14017_v57, %v14036_v46  ;;  %v14037_v51 = vld [vmem:[#allocation24_spill] sm:$0xff] }
  0x41   :  { %14033 = vst [vmem:[#allocation42_spill] sm:$0xff] %v4624_v5  ;;  %v224_v16 = vmul.f32 %v14017_v57, %v14035_v13  ;;  %v226_v28 = vmul.f32 %v14017_v57, %v14037_v51  ;;  %v14038_v15 = vld [vmem:[#allocation25_spill] sm:$0xff]  ;;  %v14039_v26 = vld [vmem:[#allocation26_spill] sm:$0xff]  ;;  %v14040_v55 = vld [vmem:[#allocation27_spill] sm:$0xff]  ;;  %v233_v51 = vmul.f32 %v14017_v57, %v4309_v47  ;;  %v4664_v47 = vadd.f32 %v208_v58, %v4494_v10 }
  0x42   :  { %v227_v27 = vmul.f32 %v14017_v57, %v14038_v15  ;;  %v228_v21 = vmul.f32 %v14017_v57, %v14039_v26  ;;  %v229_v53 = vmul.f32 %v14017_v57, %v14040_v55  ;;  %v14041_v45 = vld [vmem:[#allocation28_spill] sm:$0xff]  ;;  %v14042_v39 = vld [vmem:[#allocation29_spill] sm:$0xff]  ;;  %v14043_v38 = vld [vmem:[#allocation30_spill] sm:$0xff]  ;;  %v236_v55 = vmul.f32 %v14017_v57, %v4470_v9 }
  0x43   :  { %v230_v43 = vmul.f32 %v14017_v57, %v14041_v45  ;;  %v231_v13 = vmul.f32 %v14017_v57, %v14042_v39  ;;  %v232_v46 = vmul.f32 %v14017_v57, %v14043_v38  ;;  %v14044_v37 = vld [vmem:[#allocation32_spill] sm:$0xff]  ;;  %v14045_v36 = vld [vmem:[#allocation33_spill] sm:$0xff]  ;;  %v237_v45 = vmul.f32 %v14017_v57, %v4475_v12 }
  0x44   :  { %v234_v15 = vmul.f32 %v14017_v57, %v14044_v37  ;;  %v235_v26 = vmul.f32 %v14017_v57, %v14045_v36  ;;  %v238_v39 = vmul.f32 %v14017_v57, %v4624_v5  ;;  %v239_v38 = vmul.f32 %v14017_v57, %v4629_v18 }
  0x45   :  { %v4667_v37 = vadd.f32 %v209_v59, %v4497_v4  ;;  %v4670_v36 = vadd.f32 %v210_v60, %v4500_v52  ;;  %v4673_v9 = vadd.f32 %v211_v61, %v4503_v56  ;;  %v4676_v12 = vadd.f32 %v212_v62, %v4506_v50 }
  0x46   :  { %v4679_v5 = vadd.f32 %v213_v63, %v4509_v49  ;;  %v4682_v57 = vadd.f32 %v214_v0, %v4512_v54  ;;  %v4685_v10 = vadd.f32 %v215_v1, %v4515_v34  ;;  %v4688_v4 = vadd.f32 %v216_v3, %v4518_v35  ;;  %v14063_v63 = vld [vmem:[#allocation46_spill] sm:$0xff]  ;;  %v14064_v0 = vld [vmem:[#allocation9_spill] sm:$0xff] }
  0x47   :  { %v4691_v52 = vadd.f32 %v217_v14, %v4521_v41  ;;  %v4694_v56 = vadd.f32 %v218_v17, %v4524_v42  ;;  %v4697_v50 = vadd.f32 %v219_v19, %v4527_v48  ;;  %v4700_v49 = vadd.f32 %v220_v8, %v4530_v11  ;;  %v14070_v17 = vld [vmem:[#allocation15_spill] sm:$0xff] }
  0x48   :  { %v4703_v54 = vadd.f32 %v221_v44, %v4533_v22  ;;  %v4706_v34 = vadd.f32 %v222_v20, %v4536_v23  ;;  %v4709_v35 = vadd.f32 %v223_v2, %v4539_v24  ;;  %v4712_v41 = vadd.f32 %v224_v16, %v4542_v25 }
  0x49   :  { %v4715_v42 = vadd.f32 %v225_v33, %v4545_v40  ;;  %v4718_v48 = vadd.f32 %v226_v28, %v4548_v29  ;;  %v4721_v11 = vadd.f32 %v227_v27, %v4551_v30  ;;  %v4724_v22 = vadd.f32 %v228_v21, %v4554_v31  ;;  %v14046_v40 = vld [vmem:[#allocation34_spill] sm:$0xff]  ;;  %v14048_v29 = vld [vmem:[#allocation35_spill] sm:$0xff]  ;;  %v14050_v30 = vld [vmem:[#allocation36_spill] sm:$0xff] }
  0x4a   :  { %v4727_v23 = vadd.f32 %v229_v53, %v4557_v6  ;;  %v4730_v24 = vadd.f32 %v230_v43, %v4560_v7  ;;  %v4733_v25 = vadd.f32 %v231_v13, %v4563_v32  ;;  %v4736_v58 = vadd.f32 %v232_v46, %v14046_v40  ;;  %v14052_v31 = vld [vmem:[#allocation37_spill] sm:$0xff]  ;;  %v14054_v6 = vld [vmem:[#allocation38_spill] sm:$0xff]  ;;  %v14056_v7 = vld [vmem:[#allocation39_spill] sm:$0xff] }
  0x4b   :  { %v4739_v59 = vadd.f32 %v233_v51, %v14048_v29  ;;  %v4742_v60 = vadd.f32 %v234_v15, %v14050_v30  ;;  %v4745_v21 = vadd.f32 %v235_v26, %v14052_v31  ;;  %v4748_v53 = vadd.f32 %v236_v55, %v14054_v6  ;;  %v14058_v32 = vld [vmem:[#allocation40_spill] sm:$0xff]  ;;  %v14060_v27 = vld [vmem:[#allocation41_spill] sm:$0xff]  ;;  %v14065_v26 = vld [vmem:[#allocation10_spill] sm:$0xff] }
  0x4c   :  { %14047 = vst [vmem:[#allocation44_spill] sm:$0xff] %v4736_v58  ;;  %v4751_v43 = vadd.f32 %v237_v45, %v14056_v7  ;;  %v4754_v61 = vadd.f32 %v238_v39, %v14058_v32  ;;  %v4757_v62 = vadd.f32 %v239_v38, %v14060_v27  ;;  %v14062_v28 = vld [vmem:[#allocation8_spill] sm:$0xff]  ;;  %v275_v15 = vmul.f32 %v14063_v63, %v14064_v0  ;;  %v14066_v55 = vld [vmem:[#allocation11_spill] sm:$0xff]  ;;  %v14068_v39 = vld [vmem:[#allocation13_spill] sm:$0xff] }
  0x4d   :  { %14049 = vst [vmem:[#allocation6_spill] sm:$0xff] %v4739_v59  ;;  %14051 = vst [vmem:[#allocation45_spill] sm:$0xff] %v4742_v60  ;;  %v274_v33 = vmul.f32 %v14063_v63, %v14062_v28  ;;  %v276_v1 = vmul.f32 %v14063_v63, %v14065_v26  ;;  %v277_v2 = vmul.f32 %v14063_v63, %v14066_v55  ;;  %v14067_v45 = vld [vmem:[#allocation12_spill] sm:$0xff]  ;;  %v14069_v38 = vld [vmem:[#allocation14_spill] sm:$0xff] }
  0x4e   :  { %14053 = vst [vmem:[#allocation7_spill] sm:$0xff] %v4745_v21  ;;  %14055 = vst [vmem:[#allocation34_spill] sm:$0xff] %v4748_v53  ;;  %v278_v3 = vmul.f32 %v14063_v63, %v14067_v45  ;;  %v279_v14 = vmul.f32 %v14063_v63, %v14068_v39  ;;  %v280_v16 = vmul.f32 %v14063_v63, %v14069_v38  ;;  %v14071_v13 = vld [vmem:[#allocation16_spill] sm:$0xff]  ;;  %v14072_v46 = vld [vmem:[#allocation17_spill] sm:$0xff] }
  0x4f   :  { %14057 = vst [vmem:[#allocation35_spill] sm:$0xff] %v4751_v43  ;;  %14059 = vst [vmem:[#allocation36_spill] sm:$0xff] %v4754_v61  ;;  %v281_v19 = vmul.f32 %v14063_v63, %v14070_v17  ;;  %v282_v8 = vmul.f32 %v14063_v63, %v14071_v13  ;;  %v283_v44 = vmul.f32 %v14063_v63, %v14072_v46  ;;  %v14073_v51 = vld [vmem:[#allocation18_spill] sm:$0xff]  ;;  %v14074_v40 = vld [vmem:[#allocation19_spill] sm:$0xff] }
  0x50   :  { %14061 = vst [vmem:[#allocation37_spill] sm:$0xff] %v4757_v62  ;;  %v284_v20 = vmul.f32 %v14063_v63, %v14073_v51  ;;  %v285_v29 = vmul.f32 %v14063_v63, %v14074_v40  ;;  %v14075_v30 = vld [vmem:[#allocation20_spill] sm:$0xff]  ;;  %v14076_v6 = vld [vmem:[#allocation21_spill] sm:$0xff]  ;;  %v14077_v32 = vld [vmem:[#allocation22_spill] sm:$0xff] }
  0x51   :  { %v286_v31 = vmul.f32 %v14063_v63, %v14075_v30  ;;  %v287_v7 = vmul.f32 %v14063_v63, %v14076_v6  ;;  %v288_v27 = vmul.f32 %v14063_v63, %v14077_v32  ;;  %v14078_v28 = vld [vmem:[#allocation23_spill] sm:$0xff]  ;;  %v4794_v46 = vld [vmem:[%s13400_s2 + $0x1b0] sm:$0xff]  ;;  %v4799_v40 = vld [vmem:[%s13400_s2 + $0x1b8] sm:$0xff] }
  0x52   :  { %v289_v0 = vmul.f32 %v14063_v63, %v14078_v28  ;;  %14079 = vst [vmem:[#allocation38_spill] sm:$0xff] %v4794_v46  ;;  %v14080_v30 = vld [vmem:[#allocation24_spill] sm:$0xff]  ;;  %v14081_v6 = vld [vmem:[#allocation25_spill] sm:$0xff]  ;;  %v14082_v32 = vld [vmem:[#allocation26_spill] sm:$0xff] }
  0x53   :  { %v290_v51 = vmul.f32 %v14063_v63, %v14080_v30  ;;  %v291_v13 = vmul.f32 %v14063_v63, %v14081_v6  ;;  %v292_v17 = vmul.f32 %v14063_v63, %v14082_v32  ;;  %v14083_v28 = vld [vmem:[#allocation27_spill] sm:$0xff]  ;;  %v14084_v39 = vld [vmem:[#allocation28_spill] sm:$0xff]  ;;  %v14085_v55 = vld [vmem:[#allocation29_spill] sm:$0xff] }
  0x54   :  { %v293_v38 = vmul.f32 %v14063_v63, %v14083_v28  ;;  %v294_v45 = vmul.f32 %v14063_v63, %v14084_v39  ;;  %v295_v26 = vmul.f32 %v14063_v63, %v14085_v55  ;;  %v14086_v62 = vld [vmem:[#allocation30_spill] sm:$0xff]  ;;  %v14087_v43 = vld [vmem:[#allocation31_spill] sm:$0xff]  ;;  %v14088_v53 = vld [vmem:[#allocation32_spill] sm:$0xff] }
  0x55   :  { %v296_v61 = vmul.f32 %v14063_v63, %v14086_v62  ;;  %v297_v30 = vmul.f32 %v14063_v63, %v14087_v43  ;;  %v298_v6 = vmul.f32 %v14063_v63, %v14088_v53  ;;  %v14089_v21 = vld [vmem:[#allocation33_spill] sm:$0xff]  ;;  %v14090_v60 = vld [vmem:[#allocation48_spill] sm:$0xff]  ;;  %v14092_v58 = vld [vmem:[#allocation42_spill] sm:$0xff]  ;;  %v303_v62 = vmul.f32 %v14063_v63, %v4629_v18 }
  0x56   :  { %v299_v32 = vmul.f32 %v14063_v63, %v14089_v21  ;;  %v300_v28 = vmul.f32 %v14063_v63, %v14090_v60  ;;  %v14091_v59 = vld [vmem:[#allocation49_spill] sm:$0xff]  ;;  %v302_v55 = vmul.f32 %v14063_v63, %v14092_v58  ;;  %v304_v43 = vmul.f32 %v14063_v63, %v4794_v46 }
  0x57   :  { %v301_v39 = vmul.f32 %v14063_v63, %v14091_v59  ;;  %v305_v53 = vmul.f32 %v14063_v63, %v4799_v40  ;;  %v4834_v21 = vadd.f32 %v274_v33, %v4664_v47  ;;  %v4837_v60 = vadd.f32 %v275_v15, %v4667_v37 }
  0x58   :  { %v4840_v59 = vadd.f32 %v276_v1, %v4670_v36  ;;  %v4843_v58 = vadd.f32 %v277_v2, %v4673_v9  ;;  %v4846_v18 = vadd.f32 %v278_v3, %v4676_v12  ;;  %v4849_v46 = vadd.f32 %v279_v14, %v4679_v5  ;;  %v14107_v3 = vld [vmem:[#allocation37_spill] sm:$0xff] }
  0x59   :  { %v4852_v63 = vadd.f32 %v280_v16, %v4682_v57  ;;  %v4855_v47 = vadd.f32 %v281_v19, %v4685_v10  ;;  %v4858_v37 = vadd.f32 %v282_v8, %v4688_v4  ;;  %v4861_v36 = vadd.f32 %v283_v44, %v4691_v52  ;;  %v14110_v16 = vld [vmem:[#allocation47_spill] sm:$0xff] }
  0x5a   :  { %v4864_v9 = vadd.f32 %v284_v20, %v4694_v56  ;;  %v4867_v12 = vadd.f32 %v285_v29, %v4697_v50  ;;  %v4870_v5 = vadd.f32 %v286_v31, %v4700_v49  ;;  %v4873_v57 = vadd.f32 %v287_v7, %v4703_v54  ;;  %v14111_v19 = vld [vmem:[#allocation11_spill] sm:$0xff] }
  0x5b   :  { %v4876_v10 = vadd.f32 %v288_v27, %v4706_v34  ;;  %v4879_v4 = vadd.f32 %v289_v0, %v4709_v35  ;;  %v4882_v52 = vadd.f32 %v290_v51, %v4712_v41  ;;  %v4885_v56 = vadd.f32 %v291_v13, %v4715_v42  ;;  %v14093_v42 = vld [vmem:[#allocation44_spill] sm:$0xff] }
  0x5c   :  { %v4888_v50 = vadd.f32 %v292_v17, %v4718_v48  ;;  %v4891_v49 = vadd.f32 %v293_v38, %v4721_v11  ;;  %v4894_v54 = vadd.f32 %v294_v45, %v4724_v22  ;;  %v4897_v34 = vadd.f32 %v295_v26, %v4727_v23  ;;  %v14095_v48 = vld [vmem:[#allocation6_spill] sm:$0xff]  ;;  %v14097_v11 = vld [vmem:[#allocation45_spill] sm:$0xff]  ;;  %v14099_v22 = vld [vmem:[#allocation7_spill] sm:$0xff] }
  0x5d   :  { %v4900_v35 = vadd.f32 %v296_v61, %v4730_v24  ;;  %v4903_v41 = vadd.f32 %v297_v30, %v4733_v25  ;;  %v4906_v33 = vadd.f32 %v298_v6, %v14093_v42  ;;  %v4909_v15 = vadd.f32 %v299_v32, %v14095_v48  ;;  %v14101_v23 = vld [vmem:[#allocation34_spill] sm:$0xff]  ;;  %v14103_v24 = vld [vmem:[#allocation35_spill] sm:$0xff]  ;;  %v14105_v25 = vld [vmem:[#allocation36_spill] sm:$0xff] }
  0x5e   :  { %v4912_v1 = vadd.f32 %v300_v28, %v14097_v11  ;;  %v4915_v2 = vadd.f32 %v301_v39, %v14099_v22  ;;  %v4918_v26 = vadd.f32 %v302_v55, %v14101_v23  ;;  %v4921_v61 = vadd.f32 %v303_v62, %v14103_v24  ;;  %v14109_v38 = vld [vmem:[#allocation10_spill] sm:$0xff]  ;;  %v14112_v39 = vld [vmem:[#allocation12_spill] sm:$0xff]  ;;  %v14113_v55 = vld [vmem:[#allocation13_spill] sm:$0xff] }
  0x5f   :  { %14094 = vst [vmem:[#allocation39_spill] sm:$0xff] %v4906_v33  ;;  %14096 = vst [vmem:[#allocation40_spill] sm:$0xff] %v4909_v15  ;;  %v4924_v45 = vadd.f32 %v304_v43, %v14105_v25  ;;  %v4927_v14 = vadd.f32 %v305_v53, %v14107_v3  ;;  %v340_v17 = vmul.f32 %v14110_v16, %v14109_v38  ;;  %v14114_v62 = vld [vmem:[#allocation14_spill] sm:$0xff]  ;;  %v14115_v43 = vld [vmem:[#allocation15_spill] sm:$0xff] }
  0x60   :  { %14098 = vst [vmem:[#allocation41_spill] sm:$0xff] %v4912_v1  ;;  %14100 = vst [vmem:[#allocation8_spill] sm:$0xff] %v4915_v2  ;;  %v341_v13 = vmul.f32 %v14110_v16, %v14111_v19  ;;  %v342_v8 = vmul.f32 %v14110_v16, %v14112_v39  ;;  %v343_v44 = vmul.f32 %v14110_v16, %v14113_v55  ;;  %v14116_v53 = vld [vmem:[#allocation16_spill] sm:$0xff]  ;;  %v14117_v30 = vld [vmem:[#allocation17_spill] sm:$0xff] }
  0x61   :  { %14102 = vst [vmem:[#allocation46_spill] sm:$0xff] %v4918_v26  ;;  %14104 = vst [vmem:[#allocation9_spill] sm:$0xff] %v4921_v61  ;;  %v344_v51 = vmul.f32 %v14110_v16, %v14114_v62  ;;  %v345_v20 = vmul.f32 %v14110_v16, %v14115_v43  ;;  %v346_v29 = vmul.f32 %v14110_v16, %v14116_v53  ;;  %v14118_v6 = vld [vmem:[#allocation18_spill] sm:$0xff]  ;;  %v14119_v32 = vld [vmem:[#allocation19_spill] sm:$0xff] }
  0x62   :  { %14106 = vst [vmem:[#allocation44_spill] sm:$0xff] %v4924_v45  ;;  %14108 = vst [vmem:[#allocation6_spill] sm:$0xff] %v4927_v14  ;;  %v347_v31 = vmul.f32 %v14110_v16, %v14117_v30  ;;  %v348_v7 = vmul.f32 %v14110_v16, %v14118_v6  ;;  %v349_v27 = vmul.f32 %v14110_v16, %v14119_v32  ;;  %v14120_v28 = vld [vmem:[#allocation20_spill] sm:$0xff]  ;;  %v14121_v42 = vld [vmem:[#allocation21_spill] sm:$0xff] }
  0x63   :  { %v350_v0 = vmul.f32 %v14110_v16, %v14120_v28  ;;  %v351_v48 = vmul.f32 %v14110_v16, %v14121_v42  ;;  %v14122_v11 = vld [vmem:[#allocation22_spill] sm:$0xff]  ;;  %v14123_v23 = vld [vmem:[#allocation23_spill] sm:$0xff]  ;;  %v14124_v25 = vld [vmem:[#allocation24_spill] sm:$0xff]  ;;  %v5016_v33 = vadd.f32 %v342_v8, %v4840_v59 }
  0x64   :  { %v352_v22 = vmul.f32 %v14110_v16, %v14122_v11  ;;  %v353_v24 = vmul.f32 %v14110_v16, %v14123_v23  ;;  %v354_v3 = vmul.f32 %v14110_v16, %v14124_v25  ;;  %v14125_v38 = vld [vmem:[#allocation25_spill] sm:$0xff]  ;;  %v4964_v32 = vld [vmem:[%s13400_s2 + $0x1c8] sm:$0xff]  ;;  %v4969_v42 = vld [vmem:[%s13400_s2 + $0x1d0] sm:$0xff]  ;;  %v5036_v59 = vadd.f32 %v348_v7, %v4858_v37 }
  0x65   :  { %v355_v19 = vmul.f32 %v14110_v16, %v14125_v38  ;;  %14126 = vst [vmem:[#allocation45_spill] sm:$0xff] %v4964_v32  ;;  %14127 = vst [vmem:[#allocation7_spill] sm:$0xff] %v4969_v42  ;;  %v14128_v11 = vld [vmem:[#allocation26_spill] sm:$0xff]  ;;  %v14129_v23 = vld [vmem:[#allocation27_spill] sm:$0xff] }
  0x66   :  { %v356_v28 = vmul.f32 %v14110_v16, %v14128_v11  ;;  %v357_v6 = vmul.f32 %v14110_v16, %v14129_v23  ;;  %v14130_v25 = vld [vmem:[#allocation28_spill] sm:$0xff]  ;;  %v14131_v38 = vld [vmem:[#allocation29_spill] sm:$0xff]  ;;  %v14132_v43 = vld [vmem:[#allocation30_spill] sm:$0xff] }
  0x67   :  { %v358_v30 = vmul.f32 %v14110_v16, %v14130_v25  ;;  %v359_v53 = vmul.f32 %v14110_v16, %v14131_v38  ;;  %v360_v62 = vmul.f32 %v14110_v16, %v14132_v43  ;;  %v14133_v55 = vld [vmem:[#allocation31_spill] sm:$0xff]  ;;  %v14134_v14 = vld [vmem:[#allocation32_spill] sm:$0xff]  ;;  %v14135_v61 = vld [vmem:[#allocation33_spill] sm:$0xff]  ;;  %v5057_v37 = vadd.f32 %v355_v19, %v4879_v4 }
  0x68   :  { %v361_v39 = vmul.f32 %v14110_v16, %v14133_v55  ;;  %v362_v45 = vmul.f32 %v14110_v16, %v14134_v14  ;;  %v363_v11 = vmul.f32 %v14110_v16, %v14135_v61  ;;  %v14136_v23 = vld [vmem:[#allocation48_spill] sm:$0xff]  ;;  %v14137_v26 = vld [vmem:[#allocation49_spill] sm:$0xff]  ;;  %v14138_v2 = vld [vmem:[#allocation42_spill] sm:$0xff]  ;;  %v369_v61 = vmul.f32 %v14110_v16, %v4799_v40 }
  0x69   :  { %v364_v25 = vmul.f32 %v14110_v16, %v14136_v23  ;;  %v365_v38 = vmul.f32 %v14110_v16, %v14137_v26  ;;  %v366_v43 = vmul.f32 %v14110_v16, %v14138_v2  ;;  %v14139_v1 = vld [vmem:[#allocation43_spill] sm:$0xff]  ;;  %v14140_v14 = vld [vmem:[#allocation38_spill] sm:$0xff]  ;;  %v370_v23 = vmul.f32 %v14110_v16, %v4964_v32  ;;  %v14164_v7 = vld [vmem:[#allocation13_spill] sm:$0xff] }
  0x6a   :  { %v367_v55 = vmul.f32 %v14110_v16, %v14139_v1  ;;  %v368_v15 = vmul.f32 %v14110_v16, %v14140_v14  ;;  %v371_v26 = vmul.f32 %v14110_v16, %v4969_v42  ;;  %v5010_v2 = vadd.f32 %v340_v17, %v4834_v21 }
  0x6b   :  { %v5013_v1 = vadd.f32 %v341_v13, %v4837_v60  ;;  %v5019_v14 = vadd.f32 %v343_v44, %v4843_v58  ;;  %v5024_v32 = vadd.f32 %v344_v51, %v4846_v18  ;;  %v5027_v16 = vadd.f32 %v345_v20, %v4849_v46  ;;  %v14146_v13 = vld [vmem:[#allocation40_spill] sm:$0xff] }
  0x6c   :  { %v5030_v21 = vadd.f32 %v346_v29, %v4852_v63  ;;  %v5033_v60 = vadd.f32 %v347_v31, %v4855_v47  ;;  %v5039_v58 = vadd.f32 %v349_v27, %v4861_v36  ;;  %v5042_v17 = vadd.f32 %v350_v0, %v4864_v9  ;;  %v14165_v27 = vld [vmem:[#allocation14_spill] sm:$0xff] }
  0x6d   :  { %v5045_v18 = vadd.f32 %v351_v48, %v4867_v12  ;;  %v5048_v46 = vadd.f32 %v352_v22, %v4870_v5  ;;  %v5051_v63 = vadd.f32 %v353_v24, %v4873_v57  ;;  %v5054_v47 = vadd.f32 %v354_v3, %v4876_v10  ;;  %v14167_v48 = vld [vmem:[#allocation16_spill] sm:$0xff]  ;;  %v14168_v22 = vld [vmem:[#allocation17_spill] sm:$0xff] }
  0x6e   :  { %v5060_v36 = vadd.f32 %v356_v28, %v4882_v52  ;;  %v5063_v9 = vadd.f32 %v357_v6, %v4885_v56  ;;  %v5066_v12 = vadd.f32 %v358_v30, %v4888_v50  ;;  %v5069_v5 = vadd.f32 %v359_v53, %v4891_v49  ;;  %v14144_v56 = vld [vmem:[#allocation39_spill] sm:$0xff]  ;;  %v14148_v49 = vld [vmem:[#allocation41_spill] sm:$0xff]  ;;  %v14158_v53 = vld [vmem:[#allocation6_spill] sm:$0xff] }
  0x6f   :  { %v5072_v57 = vadd.f32 %v360_v62, %v4894_v54  ;;  %v5075_v10 = vadd.f32 %v361_v39, %v4897_v34  ;;  %v5078_v4 = vadd.f32 %v362_v45, %v4900_v35  ;;  %v5081_v52 = vadd.f32 %v363_v11, %v4903_v41  ;;  %v14150_v62 = vld [vmem:[#allocation8_spill] sm:$0xff]  ;;  %v14152_v34 = vld [vmem:[#allocation46_spill] sm:$0xff]  ;;  %v14154_v35 = vld [vmem:[#allocation9_spill] sm:$0xff] }
  0x70   :  { %v5084_v50 = vadd.f32 %v364_v25, %v14144_v56  ;;  %v5087_v8 = vadd.f32 %v365_v38, %v14146_v13  ;;  %v5090_v44 = vadd.f32 %v366_v43, %v14148_v49  ;;  %v405_v54 = vstv %s4987_s19  ;;  %v14156_v41 = vld [vmem:[#allocation44_spill] sm:$0xff]  ;;  %v14170_v25 = vld [vmem:[#allocation19_spill] sm:$0xff]  ;;  %v14172_v56 = vld [vmem:[#allocation21_spill] sm:$0xff]  ;;  %s7955_s19 = sld [smem:[#allocation3 + $0x18]] }
  0x71   :  { %14141 = vst [vmem:[#allocation34_spill] sm:$0xff] %v5075_v10  ;;  %14142 = vst [vmem:[#allocation35_spill] sm:$0xff] %v5078_v4  ;;  %v5094_v51 = vadd.f32 %v367_v55, %v14150_v62  ;;  %v5097_v39 = vadd.f32 %v368_v15, %v14152_v34  ;;  %v5100_v45 = vadd.f32 %v369_v61, %v14154_v35  ;;  %v5109_v30 = vstv %s4997_s20  ;;  %v14163_v55 = vld [vmem:[#allocation12_spill] sm:$0xff]  ;;  %v14166_v61 = vld [vmem:[#allocation15_spill] sm:$0xff]  ;;  %s11015_s20 = sld [smem:[#allocation3 + $0x1a]] }
  0x72   :  { %14143 = vst [vmem:[#allocation36_spill] sm:$0xff] %v5081_v52  ;;  %14145 = vst [vmem:[#allocation37_spill] sm:$0xff] %v5084_v50  ;;  %v5103_v20 = vadd.f32 %v370_v23, %v14156_v41  ;;  %v5106_v29 = vadd.f32 %v371_v26, %v14158_v53  ;;  %v5112_v43 = vstv %s5007_s17  ;;  %v5115_v31 = vstv %s5021_s0  ;;  %v14169_v26 = vld [vmem:[#allocation18_spill] sm:$0xff]  ;;  %v14171_v38 = vld [vmem:[#allocation20_spill] sm:$0xff]  ;;  %s11025_s17 = sld [smem:[#allocation3 + $0x21]] }
  0x73   :  { %14147 = vst [vmem:[#allocation10_spill] sm:$0xff] %v5087_v8  ;;  %14149 = vst [vmem:[#allocation47_spill] sm:$0xff] %v5090_v44  ;;  %v406_v6 = vmul.f32 %v405_v54, %v14163_v55  ;;  %v407_v15 = vmul.f32 %v405_v54, %v14164_v7  ;;  %v408_v28 = vmul.f32 %v405_v54, %v14165_v27  ;;  %v14173_v49 = vld [vmem:[#allocation22_spill] sm:$0xff]  ;;  %v14174_v34 = vld [vmem:[#allocation23_spill] sm:$0xff]  ;;  %s11039_s0 = sld [smem:[#allocation3 + $0x28]] }
  0x74   :  { %14151 = vst [vmem:[#allocation11_spill] sm:$0xff] %v5094_v51  ;;  %14153 = vst [vmem:[#allocation39_spill] sm:$0xff] %v5097_v39  ;;  %v409_v0 = vmul.f32 %v405_v54, %v14166_v61  ;;  %v410_v11 = vmul.f32 %v405_v54, %v14167_v48  ;;  %v411_v23 = vmul.f32 %v405_v54, %v14168_v22  ;;  %v14175_v41 = vld [vmem:[#allocation24_spill] sm:$0xff]  ;;  %v14176_v55 = vld [vmem:[#allocation25_spill] sm:$0xff] }
  0x75   :  { %14155 = vst [vmem:[#allocation40_spill] sm:$0xff] %v5100_v45  ;;  %14157 = vst [vmem:[#allocation41_spill] sm:$0xff] %v5103_v20  ;;  %v412_v24 = vmul.f32 %v405_v54, %v14169_v26  ;;  %v413_v3 = vmul.f32 %v405_v54, %v14170_v25  ;;  %v414_v19 = vmul.f32 %v405_v54, %v14171_v38  ;;  %v14178_v48 = vld [vmem:[#allocation27_spill] sm:$0xff]  ;;  %v5136_v25 = vld [vmem:[%s13400_s2 + $0x1e0] sm:$0xff] }
  0x76   :  { %14159 = vst [vmem:[#allocation8_spill] sm:$0xff] %v5106_v29  ;;  %14160 = vst [vmem:[#allocation46_spill] sm:$0xff] %v5109_v30  ;;  %v415_v13 = vmul.f32 %v405_v54, %v14172_v56  ;;  %v416_v62 = vmul.f32 %v405_v54, %v14173_v49  ;;  %v417_v35 = vmul.f32 %v405_v54, %v14174_v34  ;;  %v5141_v56 = vld [vmem:[%s13400_s2 + $0x1e8] sm:$0xff]  ;;  %v14179_v49 = vld [vmem:[#allocation28_spill] sm:$0xff] }
  0x77   :  { %14161 = vst [vmem:[#allocation9_spill] sm:$0xff] %v5112_v43  ;;  %14162 = vst [vmem:[#allocation44_spill] sm:$0xff] %v5115_v31  ;;  %v418_v53 = vmul.f32 %v405_v54, %v14175_v41  ;;  %v419_v7 = vmul.f32 %v405_v54, %v14176_v55  ;;  %v14177_v31 = vld [vmem:[#allocation26_spill] sm:$0xff]  ;;  %v421_v22 = vmul.f32 %v405_v54, %v14178_v48  ;;  %v14180_v38 = vld [vmem:[#allocation29_spill] sm:$0xff] }
  0x78   :  { %v420_v43 = vmul.f32 %v405_v54, %v14177_v31  ;;  %v422_v34 = vmul.f32 %v405_v54, %v14179_v49  ;;  %v423_v41 = vmul.f32 %v405_v54, %v14180_v38  ;;  %v14181_v26 = vld [vmem:[#allocation30_spill] sm:$0xff]  ;;  %v14182_v61 = vld [vmem:[#allocation31_spill] sm:$0xff]  ;;  %v14183_v30 = vld [vmem:[#allocation32_spill] sm:$0xff]  ;;  %v433_v38 = vmul.f32 %v405_v54, %v4799_v40 }
  0x79   :  { %v424_v55 = vmul.f32 %v405_v54, %v14181_v26  ;;  %v425_v31 = vmul.f32 %v405_v54, %v14182_v61  ;;  %v426_v48 = vmul.f32 %v405_v54, %v14183_v30  ;;  %v14184_v27 = vld [vmem:[#allocation33_spill] sm:$0xff]  ;;  %v14185_v20 = vld [vmem:[#allocation48_spill] sm:$0xff]  ;;  %v14187_v44 = vld [vmem:[#allocation42_spill] sm:$0xff]  ;;  %v435_v61 = vmul.f32 %v405_v54, %v4969_v42 }
  0x7a   :  { %v427_v29 = vmul.f32 %v405_v54, %v14184_v27  ;;  %v428_v45 = vmul.f32 %v405_v54, %v14185_v20  ;;  %v14186_v39 = vld [vmem:[#allocation49_spill] sm:$0xff]  ;;  %v430_v8 = vmul.f32 %v405_v54, %v14187_v44  ;;  %v14188_v50 = vld [vmem:[#allocation43_spill] sm:$0xff]  ;;  %v14189_v4 = vld [vmem:[#allocation38_spill] sm:$0xff]  ;;  %v436_v30 = vmul.f32 %v405_v54, %v5136_v25 }
  0x7b   :  { %v429_v51 = vmul.f32 %v405_v54, %v14186_v39  ;;  %v431_v52 = vmul.f32 %v405_v54, %v14188_v50  ;;  %v432_v49 = vmul.f32 %v405_v54, %v14189_v4  ;;  %v14190_v10 = vld [vmem:[#allocation45_spill] sm:$0xff]  ;;  %v437_v27 = vmul.f32 %v405_v54, %v5141_v56 }
  0x7c   :  { %v434_v26 = vmul.f32 %v405_v54, %v14190_v10  ;;  %v5160_v20 = vadd.f32 %v406_v6, %v5010_v2  ;;  %v5163_v39 = vadd.f32 %v407_v15, %v5013_v1  ;;  %v5166_v50 = vadd.f32 %v408_v28, %v5016_v33 }
  0x7d   :  { %v5169_v4 = vadd.f32 %v409_v0, %v5019_v14  ;;  %v5172_v10 = vadd.f32 %v410_v11, %v5024_v32  ;;  %v5175_v42 = vadd.f32 %v411_v23, %v5027_v16  ;;  %v5178_v54 = vadd.f32 %v412_v24, %v5030_v21 }
  0x7e   :  { %v5181_v2 = vadd.f32 %v413_v3, %v5033_v60  ;;  %v5184_v1 = vadd.f32 %v414_v19, %v5036_v59  ;;  %v5187_v33 = vadd.f32 %v415_v13, %v5039_v58  ;;  %v5190_v14 = vadd.f32 %v416_v62, %v5042_v17  ;;  %v14212_v3 = vld [vmem:[#allocation46_spill] sm:$0xff]  ;;  %v14213_v13 = vld [vmem:[#allocation15_spill] sm:$0xff] }
  0x7f   :  { %v5193_v32 = vadd.f32 %v417_v35, %v5045_v18  ;;  %v5196_v16 = vadd.f32 %v418_v53, %v5048_v46  ;;  %v5199_v21 = vadd.f32 %v419_v7, %v5051_v63  ;;  %v5202_v60 = vadd.f32 %v420_v43, %v5054_v47  ;;  %v14191_v47 = vld [vmem:[#allocation34_spill] sm:$0xff] }
  0x80   :  { %v5205_v59 = vadd.f32 %v421_v22, %v5057_v37  ;;  %v5208_v58 = vadd.f32 %v422_v34, %v5060_v36  ;;  %v5211_v17 = vadd.f32 %v423_v41, %v5063_v9  ;;  %v5214_v18 = vadd.f32 %v424_v55, %v5066_v12  ;;  %v14192_v37 = vld [vmem:[#allocation35_spill] sm:$0xff]  ;;  %v14193_v36 = vld [vmem:[#allocation36_spill] sm:$0xff]  ;;  %v14195_v9 = vld [vmem:[#allocation37_spill] sm:$0xff] }
  0x81   :  { %v5217_v46 = vadd.f32 %v425_v31, %v5069_v5  ;;  %v5220_v63 = vadd.f32 %v426_v48, %v5072_v57  ;;  %v5223_v43 = vadd.f32 %v427_v29, %v14191_v47  ;;  %v5226_v6 = vadd.f32 %v428_v45, %v14192_v37  ;;  %v14197_v12 = vld [vmem:[#allocation10_spill] sm:$0xff]  ;;  %v14199_v5 = vld [vmem:[#allocation47_spill] sm:$0xff]  ;;  %v14205_v45 = vld [vmem:[#allocation40_spill] sm:$0xff] }
  0x82   :  { %v5229_v15 = vadd.f32 %v429_v51, %v14193_v36  ;;  %v5232_v28 = vadd.f32 %v430_v8, %v14195_v9  ;;  %v5235_v0 = vadd.f32 %v431_v52, %v14197_v12  ;;  %v5238_v31 = vadd.f32 %v432_v49, %v14199_v5  ;;  %v14201_v57 = vld [vmem:[#allocation11_spill] sm:$0xff]  ;;  %v14207_v51 = vld [vmem:[#allocation41_spill] sm:$0xff]  ;;  %v14209_v8 = vld [vmem:[#allocation8_spill] sm:$0xff] }
  0x83   :  { %v5241_v48 = vadd.f32 %v433_v38, %v14201_v57  ;;  %v14203_v29 = vld [vmem:[#allocation39_spill] sm:$0xff]  ;;  %v5247_v22 = vadd.f32 %v435_v61, %v14205_v45  ;;  %v5250_v23 = vadd.f32 %v436_v30, %v14207_v51  ;;  %v5253_v24 = vadd.f32 %v437_v27, %v14209_v8  ;;  %v14211_v52 = vld [vmem:[#allocation14_spill] sm:$0xff]  ;;  %v14214_v38 = vld [vmem:[#allocation16_spill] sm:$0xff] }
  0x84   :  { %14194 = vst [vmem:[#allocation6_spill] sm:$0xff] %v5229_v15  ;;  %14196 = vst [vmem:[#allocation12_spill] sm:$0xff] %v5232_v28  ;;  %v5244_v11 = vadd.f32 %v434_v26, %v14203_v29  ;;  %v472_v19 = vmul.f32 %v14212_v3, %v14211_v52  ;;  %v473_v49 = vmul.f32 %v14212_v3, %v14213_v13  ;;  %v14215_v26 = vld [vmem:[#allocation17_spill] sm:$0xff]  ;;  %v14216_v61 = vld [vmem:[#allocation18_spill] sm:$0xff] }
  0x85   :  { %14198 = vst [vmem:[#allocation13_spill] sm:$0xff] %v5235_v0  ;;  %14200 = vst [vmem:[#allocation42_spill] sm:$0xff] %v5238_v31  ;;  %v474_v62 = vmul.f32 %v14212_v3, %v14214_v38  ;;  %v475_v34 = vmul.f32 %v14212_v3, %v14215_v26  ;;  %v476_v35 = vmul.f32 %v14212_v3, %v14216_v61  ;;  %v14217_v30 = vld [vmem:[#allocation19_spill] sm:$0xff]  ;;  %v14218_v27 = vld [vmem:[#allocation20_spill] sm:$0xff] }
  0x86   :  { %14202 = vst [vmem:[#allocation34_spill] sm:$0xff] %v5241_v48  ;;  %14204 = vst [vmem:[#allocation35_spill] sm:$0xff] %v5244_v11  ;;  %v477_v41 = vmul.f32 %v14212_v3, %v14217_v30  ;;  %v478_v53 = vmul.f32 %v14212_v3, %v14218_v27  ;;  %v14219_v55 = vld [vmem:[#allocation21_spill] sm:$0xff]  ;;  %v14220_v47 = vld [vmem:[#allocation22_spill] sm:$0xff]  ;;  %v494_v11 = vmul.f32 %v14212_v3, %v14187_v44 }
  0x87   :  { %14206 = vst [vmem:[#allocation36_spill] sm:$0xff] %v5247_v22  ;;  %14208 = vst [vmem:[#allocation37_spill] sm:$0xff] %v5250_v23  ;;  %v479_v7 = vmul.f32 %v14212_v3, %v14219_v55  ;;  %v480_v37 = vmul.f32 %v14212_v3, %v14220_v47  ;;  %v14221_v36 = vld [vmem:[#allocation23_spill] sm:$0xff]  ;;  %v14222_v12 = vld [vmem:[#allocation24_spill] sm:$0xff]  ;;  %v501_v44 = vmul.f32 %v14212_v3, %v5141_v56 }
  0x88   :  { %14210 = vst [vmem:[#allocation10_spill] sm:$0xff] %v5253_v24  ;;  %v481_v9 = vmul.f32 %v14212_v3, %v14221_v36  ;;  %v482_v5 = vmul.f32 %v14212_v3, %v14222_v12  ;;  %v14223_v57 = vld [vmem:[#allocation25_spill] sm:$0xff]  ;;  %v14224_v45 = vld [vmem:[#allocation26_spill] sm:$0xff]  ;;  %v14225_v8 = vld [vmem:[#allocation27_spill] sm:$0xff]  ;;  %v5339_v56 = vadd.f32 %v477_v41, %v5175_v42 }
  0x89   :  { %v483_v29 = vmul.f32 %v14212_v3, %v14223_v57  ;;  %v484_v51 = vmul.f32 %v14212_v3, %v14224_v45  ;;  %v485_v52 = vmul.f32 %v14212_v3, %v14225_v8  ;;  %v14226_v13 = vld [vmem:[#allocation28_spill] sm:$0xff]  ;;  %v14227_v26 = vld [vmem:[#allocation29_spill] sm:$0xff]  ;;  %v73_v27 = vld [vmem:[%s13400_s2 + $0x200] sm:$0xff] }
  0x8a   :  { %v486_v38 = vmul.f32 %v14212_v3, %v14226_v13  ;;  %v487_v61 = vmul.f32 %v14212_v3, %v14227_v26  ;;  %v72_v30 = vld [vmem:[%s13400_s2 + $0x1f8] sm:$0xff]  ;;  %v14228_v55 = vld [vmem:[#allocation30_spill] sm:$0xff]  ;;  %v14229_v36 = vld [vmem:[#allocation31_spill] sm:$0xff]  ;;  %v503_v15 = vmul.f32 %v14212_v3, %v73_v27 }
  0x8b   :  { %v488_v47 = vmul.f32 %v14212_v3, %v14228_v55  ;;  %v489_v12 = vmul.f32 %v14212_v3, %v14229_v36  ;;  %v14230_v57 = vld [vmem:[#allocation32_spill] sm:$0xff]  ;;  %v14231_v8 = vld [vmem:[#allocation33_spill] sm:$0xff]  ;;  %v14234_v48 = vld [vmem:[#allocation43_spill] sm:$0xff]  ;;  %v5360_v42 = vadd.f32 %v484_v51, %v5196_v16 }
  0x8c   :  { %v490_v45 = vmul.f32 %v14212_v3, %v14230_v57  ;;  %v491_v13 = vmul.f32 %v14212_v3, %v14231_v8  ;;  %v14232_v26 = vld [vmem:[#allocation48_spill] sm:$0xff]  ;;  %v14233_v23 = vld [vmem:[#allocation49_spill] sm:$0xff]  ;;  %v495_v55 = vmul.f32 %v14212_v3, %v14234_v48  ;;  %v14235_v31 = vld [vmem:[#allocation38_spill] sm:$0xff]  ;;  %v497_v57 = vmul.f32 %v14212_v3, %v4799_v40 }
  0x8d   :  { %v492_v24 = vmul.f32 %v14212_v3, %v14232_v26  ;;  %v493_v22 = vmul.f32 %v14212_v3, %v14233_v23  ;;  %v496_v36 = vmul.f32 %v14212_v3, %v14235_v31  ;;  %v14236_v0 = vld [vmem:[#allocation45_spill] sm:$0xff]  ;;  %v14237_v28 = vld [vmem:[#allocation7_spill] sm:$0xff]  ;;  %v500_v23 = vmul.f32 %v14212_v3, %v5136_v25 }
  0x8e   :  { %v498_v8 = vmul.f32 %v14212_v3, %v14236_v0  ;;  %v499_v26 = vmul.f32 %v14212_v3, %v14237_v28  ;;  %v502_v48 = vmul.f32 %v14212_v3, %v72_v30  ;;  %v5324_v31 = vadd.f32 %v472_v19, %v5160_v20  ;;  %v5385_v16 = vld [vmem:[%s13400_s2 + $0x21] sm:$0xff]  ;;  %v5466_v51 = vld [vmem:[%s13400_s2 + $0x91] sm:$0xff] }
  0x8f   :  { %v5327_v40 = vadd.f32 %v473_v49, %v5163_v39  ;;  %v5330_v0 = vadd.f32 %v474_v62, %v5166_v50  ;;  %v5333_v28 = vadd.f32 %v475_v34, %v5169_v4  ;;  %v5336_v25 = vadd.f32 %v476_v35, %v5172_v10  ;;  %14239 = vst [vmem:[#allocation11_spill] sm:$0xff] %v5385_v16  ;;  %v5402_v49 = vld [vmem:[%s13400_s2 + $0x31] sm:$0xff]  ;;  %v5407_v62 = vld [vmem:[%s13400_s2 + $0x39] sm:$0xff] }
  0x90   :  { %v5342_v3 = vadd.f32 %v478_v53, %v5178_v54  ;;  %v5345_v20 = vadd.f32 %v479_v7, %v5181_v2  ;;  %v5348_v39 = vadd.f32 %v480_v37, %v5184_v1  ;;  %v5351_v50 = vadd.f32 %v481_v9, %v5187_v33  ;;  %v536_v33 = vld [vmem:[%s13400_s2 + $0x1] sm:$0xff]  ;;  %14240 = vst [vmem:[#allocation39_spill] sm:$0xff] %v5402_v49  ;;  %v5439_v7 = vld [vmem:[%s13400_s2 + $0x69] sm:$0xff] }
  0x91   :  { %v5354_v4 = vadd.f32 %v482_v5, %v5190_v14  ;;  %v5357_v10 = vadd.f32 %v483_v29, %v5193_v32  ;;  %v5363_v54 = vadd.f32 %v485_v52, %v5199_v21  ;;  %v5366_v2 = vadd.f32 %v486_v38, %v5202_v60  ;;  %v537_v14 = vld [vmem:[%s13400_s2 + $0x9] sm:$0xff]  ;;  %v5380_v32 = vld [vmem:[%s13400_s2 + $0x19] sm:$0xff]  ;;  %14241 = vst [vmem:[#allocation40_spill] sm:$0xff] %v5407_v62  ;;  %v5434_v53 = vld [vmem:[%s13400_s2 + $0x61] sm:$0xff] }
  0x92   :  { %v5369_v1 = vadd.f32 %v487_v61, %v5205_v59  ;;  %14238 = vst [vmem:[#allocation47_spill] sm:$0xff] %v5380_v32  ;;  %v5388_v21 = vadd.f32 %v488_v47, %v5208_v58  ;;  %v5391_v60 = vadd.f32 %v489_v12, %v5211_v17  ;;  %v5394_v59 = vadd.f32 %v490_v45, %v5214_v18  ;;  %v5412_v58 = vld [vmem:[%s13400_s2 + $0x49] sm:$0xff]  ;;  %v5417_v17 = vld [vmem:[%s13400_s2 + $0x51] sm:$0xff]  ;;  %v14244_v35 = vld [vmem:[#allocation6_spill] sm:$0xff] }
  0x93   :  { %v5397_v19 = vadd.f32 %v491_v13, %v5217_v46  ;;  %14242 = vst [vmem:[#allocation41_spill] sm:$0xff] %v5412_v58  ;;  %14243 = vst [vmem:[#allocation8_spill] sm:$0xff] %v5417_v17  ;;  %v5420_v18 = vadd.f32 %v492_v24, %v5220_v63  ;;  %v5423_v46 = vadd.f32 %v493_v22, %v5223_v43  ;;  %v5444_v63 = vld [vmem:[%s13400_s2 + $0x79] sm:$0xff]  ;;  %v14248_v43 = vld [vmem:[#allocation12_spill] sm:$0xff] }
  0x94   :  { %v5426_v34 = vadd.f32 %v494_v11, %v5226_v6  ;;  %v5429_v41 = vadd.f32 %v495_v55, %v14244_v35  ;;  %14245 = vst [vmem:[#allocation14_spill] sm:$0xff] %v5434_v53  ;;  %14246 = vst [vmem:[#allocation46_spill] sm:$0xff] %v5439_v7  ;;  %v5447_v6 = vadd.f32 %v496_v36, %v14248_v43  ;;  %v14250_v11 = vld [vmem:[#allocation13_spill] sm:$0xff]  ;;  %v14252_v24 = vld [vmem:[#allocation42_spill] sm:$0xff] }
  0x95   :  { %14247 = vst [vmem:[#allocation15_spill] sm:$0xff] %v5444_v63  ;;  %v5450_v22 = vadd.f32 %v497_v57, %v14250_v11  ;;  %v5453_v37 = vadd.f32 %v498_v8, %v14252_v24  ;;  %v14254_v9 = vld [vmem:[#allocation34_spill] sm:$0xff]  ;;  %14257 = vst [vmem:[#allocation21_spill] sm:$0xff] %v5466_v51  ;;  %v14259_v38 = vld [vmem:[#allocation35_spill] sm:$0xff] }
  0x96   :  { %14249 = vst [vmem:[#allocation16_spill] sm:$0xff] %v5447_v6  ;;  %v5456_v5 = vadd.f32 %v499_v26, %v14254_v9  ;;  %v5461_v29 = vld [vmem:[%s13400_s2 + $0x81] sm:$0xff]  ;;  %v5471_v52 = vld [vmem:[%s13400_s2 + $0x99] sm:$0xff]  ;;  %v5474_v61 = vadd.f32 %v500_v23, %v14259_v38  ;;  %v14261_v30 = vld [vmem:[#allocation36_spill] sm:$0xff] }
  0x97   :  { %14251 = vst [vmem:[#allocation17_spill] sm:$0xff] %v5450_v22  ;;  %14253 = vst [vmem:[#allocation18_spill] sm:$0xff] %v5453_v37  ;;  %v5477_v27 = vadd.f32 %v501_v44, %v14261_v30  ;;  %v14263_v47 = vld [vmem:[#allocation37_spill] sm:$0xff]  ;;  %v14265_v45 = vld [vmem:[#allocation10_spill] sm:$0xff] }
  0x98   :  { %14255 = vst [vmem:[#allocation19_spill] sm:$0xff] %v5456_v5  ;;  %14256 = vst [vmem:[#allocation20_spill] sm:$0xff] %v5461_v29  ;;  %v5480_v12 = vadd.f32 %v502_v48, %v14263_v47  ;;  %v5483_v13 = vadd.f32 %v503_v15, %v14265_v45  ;;  %v5488_v55 = vld [vmem:[%s13400_s2 + $0xa9] sm:$0xff]  ;;  %v5493_v36 = vld [vmem:[%s13400_s2 + $0xb1] sm:$0xff] }
  0x99   :  { %14258 = vst [vmem:[#allocation22_spill] sm:$0xff] %v5471_v52  ;;  %14260 = vst [vmem:[#allocation23_spill] sm:$0xff] %v5474_v61  ;;  %v5498_v57 = vld [vmem:[%s13400_s2 + $0xc1] sm:$0xff]  ;;  %v5503_v15 = vld [vmem:[%s13400_s2 + $0xc9] sm:$0xff] }
  0x9a   :  { %14262 = vst [vmem:[#allocation24_spill] sm:$0xff] %v5477_v27  ;;  %14264 = vst [vmem:[#allocation25_spill] sm:$0xff] %v5480_v12  ;;  %v5508_v8 = vld [vmem:[%s13400_s2 + $0xd9] sm:$0xff]  ;;  %v5513_v26 = vld [vmem:[%s13400_s2 + $0xe1] sm:$0xff] }
  0x9b   :  { %14266 = vst [vmem:[#allocation26_spill] sm:$0xff] %v5483_v13  ;;  %14267 = vst [vmem:[#allocation27_spill] sm:$0xff] %v5488_v55  ;;  %v14273_v23 = vld [vmem:[#allocation9_spill] sm:$0xff]  ;;  %v5552_v45 = vld [vmem:[%s13400_s2 + $0x121] sm:$0xff] }
  0x9c   :  { %14268 = vst [vmem:[#allocation28_spill] sm:$0xff] %v5493_v36  ;;  %14269 = vst [vmem:[#allocation29_spill] sm:$0xff] %v5498_v57  ;;  %v582_v44 = vmul.f32 %v14273_v23, %v536_v33  ;;  %v583_v48 = vmul.f32 %v14273_v23, %v537_v14  ;;  %v584_v35 = vmul.f32 %v14273_v23, %v5380_v32  ;;  %v5524_v11 = vld [vmem:[%s13400_s2 + $0xf1] sm:$0xff]  ;;  %v5529_v24 = vld [vmem:[%s13400_s2 + $0xf9] sm:$0xff] }
  0x9d   :  { %14270 = vst [vmem:[#allocation30_spill] sm:$0xff] %v5503_v15  ;;  %14271 = vst [vmem:[#allocation31_spill] sm:$0xff] %v5508_v8  ;;  %v585_v43 = vmul.f32 %v14273_v23, %v5385_v16  ;;  %v5534_v33 = vld [vmem:[%s13400_s2 + $0x109] sm:$0xff]  ;;  %v586_v14 = vmul.f32 %v14273_v23, %v5402_v49  ;;  %v587_v9 = vmul.f32 %v14273_v23, %v5407_v62  ;;  %v5547_v47 = vld [vmem:[%s13400_s2 + $0x111] sm:$0xff] }
  0x9e   :  { %14272 = vst [vmem:[#allocation32_spill] sm:$0xff] %v5513_v26  ;;  %14274 = vst [vmem:[#allocation33_spill] sm:$0xff] %v5524_v11  ;;  %v588_v38 = vmul.f32 %v14273_v23, %v5412_v58  ;;  %v589_v30 = vmul.f32 %v14273_v23, %v5417_v17  ;;  %v5557_v62 = vld [vmem:[%s13400_s2 + $0x129] sm:$0xff]  ;;  %v590_v58 = vmul.f32 %v14273_v23, %v5434_v53  ;;  %v5570_v32 = vld [vmem:[%s13400_s2 + $0x139] sm:$0xff] }
  0x9f   :  { %14275 = vst [vmem:[#allocation48_spill] sm:$0xff] %v5529_v24  ;;  %14276 = vst [vmem:[#allocation49_spill] sm:$0xff] %v5534_v33  ;;  %v591_v17 = vmul.f32 %v14273_v23, %v5439_v7  ;;  %v592_v49 = vmul.f32 %v14273_v23, %v5444_v63  ;;  %v593_v16 = vmul.f32 %v14273_v23, %v5461_v29  ;;  %v5575_v13 = vld [vmem:[%s13400_s2 + $0x141] sm:$0xff]  ;;  %v5580_v7 = vld [vmem:[%s13400_s2 + $0x151] sm:$0xff] }
  0xa0   :  { %14277 = vst [vmem:[#allocation43_spill] sm:$0xff] %v5547_v47  ;;  %14278 = vst [vmem:[#allocation38_spill] sm:$0xff] %v5552_v45  ;;  %v594_v63 = vmul.f32 %v14273_v23, %v5466_v51  ;;  %v595_v29 = vmul.f32 %v14273_v23, %v5471_v52  ;;  %v596_v53 = vmul.f32 %v14273_v23, %v5488_v55  ;;  %v5593_v27 = vld [vmem:[%s13400_s2 + $0x159] sm:$0xff]  ;;  %v5598_v61 = vld [vmem:[%s13400_s2 + $0x169] sm:$0xff] }
  0xa1   :  { %14279 = vst [vmem:[#allocation45_spill] sm:$0xff] %v5557_v62  ;;  %14280 = vst [vmem:[#allocation7_spill] sm:$0xff] %v5570_v32  ;;  %v597_v12 = vmul.f32 %v14273_v23, %v5493_v36  ;;  %v5603_v52 = vld [vmem:[%s13400_s2 + $0x171] sm:$0xff]  ;;  %v598_v55 = vmul.f32 %v14273_v23, %v5498_v57  ;;  %v599_v36 = vmul.f32 %v14273_v23, %v5503_v15 }
  0xa2   :  { %14281 = vst [vmem:[#allocation6_spill] sm:$0xff] %v5575_v13  ;;  %14282 = vst [vmem:[#allocation12_spill] sm:$0xff] %v5580_v7  ;;  %v600_v51 = vmul.f32 %v14273_v23, %v5508_v8  ;;  %v601_v5 = vmul.f32 %v14273_v23, %v5513_v26  ;;  %v602_v37 = vmul.f32 %v14273_v23, %v5524_v11 }
  0xa3   :  { %14283 = vst [vmem:[#allocation13_spill] sm:$0xff] %v5593_v27  ;;  %14284 = vst [vmem:[#allocation42_spill] sm:$0xff] %v5598_v61  ;;  %v603_v22 = vmul.f32 %v14273_v23, %v5529_v24  ;;  %v604_v6 = vmul.f32 %v14273_v23, %v5534_v33  ;;  %v605_v57 = vmul.f32 %v14273_v23, %v5547_v47 }
  0xa4   :  { %14285 = vst [vmem:[#allocation34_spill] sm:$0xff] %v5603_v52  ;;  %v606_v15 = vmul.f32 %v14273_v23, %v5552_v45  ;;  %v607_v8 = vmul.f32 %v14273_v23, %v5557_v62  ;;  %v608_v26 = vmul.f32 %v14273_v23, %v5570_v32  ;;  %v609_v11 = vmul.f32 %v14273_v23, %v5575_v13 }
  0xa5   :  { %v610_v24 = vmul.f32 %v14273_v23, %v5580_v7  ;;  %v611_v33 = vmul.f32 %v14273_v23, %v5593_v27  ;;  %v612_v47 = vmul.f32 %v14273_v23, %v5598_v61  ;;  %v613_v45 = vmul.f32 %v14273_v23, %v5603_v52 }
  0xa6   :  { %v5638_v62 = vadd.f32 %v582_v44, %v5324_v31  ;;  %v5641_v32 = vadd.f32 %v583_v48, %v5327_v40  ;;  %v5644_v13 = vadd.f32 %v584_v35, %v5330_v0  ;;  %v5647_v7 = vadd.f32 %v585_v43, %v5333_v28  ;;  %v14308_v48 = vld [vmem:[#allocation8_spill] sm:$0xff]  ;;  %v14309_v43 = vld [vmem:[#allocation14_spill] sm:$0xff] }
  0xa7   :  { %v5650_v27 = vadd.f32 %v586_v14, %v5336_v25  ;;  %v5653_v61 = vadd.f32 %v587_v9, %v5339_v56  ;;  %v5656_v23 = vadd.f32 %v588_v38, %v5342_v3  ;;  %v5659_v31 = vadd.f32 %v589_v30, %v5345_v20  ;;  %v14311_v14 = vld [vmem:[#allocation15_spill] sm:$0xff]  ;;  %v14312_v38 = vld [vmem:[#allocation20_spill] sm:$0xff] }
  0xa8   :  { %v5662_v40 = vadd.f32 %v590_v58, %v5348_v39  ;;  %v5665_v0 = vadd.f32 %v591_v17, %v5351_v50  ;;  %v5668_v28 = vadd.f32 %v592_v49, %v5354_v4  ;;  %v5671_v25 = vadd.f32 %v593_v16, %v5357_v10  ;;  %v14292_v17 = vld [vmem:[#allocation19_spill] sm:$0xff] }
  0xa9   :  { %v5674_v56 = vadd.f32 %v594_v63, %v5360_v42  ;;  %v5677_v3 = vadd.f32 %v595_v29, %v5363_v54  ;;  %v5680_v20 = vadd.f32 %v596_v53, %v5366_v2  ;;  %v5683_v39 = vadd.f32 %v597_v12, %v5369_v1  ;;  %v14303_v29 = vld [vmem:[#allocation44_spill] sm:$0xff]  ;;  %v14304_v12 = vld [vmem:[#allocation11_spill] sm:$0xff] }
  0xaa   :  { %v5686_v50 = vadd.f32 %v598_v55, %v5388_v21  ;;  %v5689_v4 = vadd.f32 %v599_v36, %v5391_v60  ;;  %v5692_v10 = vadd.f32 %v600_v51, %v5394_v59  ;;  %v5695_v42 = vadd.f32 %v601_v5, %v5397_v19  ;;  %v14286_v21 = vld [vmem:[#allocation16_spill] sm:$0xff]  ;;  %v14288_v59 = vld [vmem:[#allocation17_spill] sm:$0xff]  ;;  %v14290_v19 = vld [vmem:[#allocation18_spill] sm:$0xff] }
  0xab   :  { %v5698_v54 = vadd.f32 %v602_v37, %v5420_v18  ;;  %v5701_v2 = vadd.f32 %v603_v22, %v5423_v46  ;;  %v5704_v1 = vadd.f32 %v604_v6, %v5426_v34  ;;  %v5707_v16 = vadd.f32 %v605_v57, %v5429_v41  ;;  %v14294_v46 = vld [vmem:[#allocation23_spill] sm:$0xff]  ;;  %v14296_v34 = vld [vmem:[#allocation24_spill] sm:$0xff]  ;;  %v14298_v41 = vld [vmem:[#allocation25_spill] sm:$0xff] }
  0xac   :  { %v5710_v60 = vadd.f32 %v606_v15, %v14286_v21  ;;  %v5713_v49 = vadd.f32 %v607_v8, %v14288_v59  ;;  %v5716_v58 = vadd.f32 %v608_v26, %v14290_v19  ;;  %v5719_v18 = vadd.f32 %v609_v11, %v14292_v17  ;;  %v14300_v22 = vld [vmem:[#allocation26_spill] sm:$0xff]  ;;  %v14302_v5 = vld [vmem:[#allocation47_spill] sm:$0xff]  ;;  %v14306_v15 = vld [vmem:[#allocation40_spill] sm:$0xff] }
  0xad   :  { %v5722_v53 = vadd.f32 %v610_v24, %v14294_v46  ;;  %v5725_v63 = vadd.f32 %v611_v33, %v14296_v34  ;;  %v5728_v6 = vadd.f32 %v612_v47, %v14298_v41  ;;  %v5731_v37 = vadd.f32 %v613_v45, %v14300_v22  ;;  %v14305_v36 = vld [vmem:[#allocation39_spill] sm:$0xff]  ;;  %v14307_v26 = vld [vmem:[#allocation41_spill] sm:$0xff]  ;;  %v14310_v24 = vld [vmem:[#allocation46_spill] sm:$0xff] }
  0xae   :  { %14287 = vst [vmem:[#allocation35_spill] sm:$0xff] %v5710_v60  ;;  %14289 = vst [vmem:[#allocation36_spill] sm:$0xff] %v5713_v49  ;;  %v648_v51 = vmul.f32 %v14303_v29, %v14302_v5  ;;  %v649_v55 = vmul.f32 %v14303_v29, %v14304_v12  ;;  %v650_v57 = vmul.f32 %v14303_v29, %v14305_v36  ;;  %v14313_v47 = vld [vmem:[#allocation21_spill] sm:$0xff]  ;;  %v14314_v21 = vld [vmem:[#allocation22_spill] sm:$0xff] }
  0xaf   :  { %14291 = vst [vmem:[#allocation37_spill] sm:$0xff] %v5716_v58  ;;  %14293 = vst [vmem:[#allocation10_spill] sm:$0xff] %v5719_v18  ;;  %v651_v8 = vmul.f32 %v14303_v29, %v14306_v15  ;;  %v652_v44 = vmul.f32 %v14303_v29, %v14307_v26  ;;  %v653_v35 = vmul.f32 %v14303_v29, %v14308_v48  ;;  %v14315_v19 = vld [vmem:[#allocation27_spill] sm:$0xff]  ;;  %v14316_v46 = vld [vmem:[#allocation28_spill] sm:$0xff] }
  0xb0   :  { %14295 = vst [vmem:[#allocation9_spill] sm:$0xff] %v5722_v53  ;;  %14297 = vst [vmem:[#allocation16_spill] sm:$0xff] %v5725_v63  ;;  %v654_v11 = vmul.f32 %v14303_v29, %v14309_v43  ;;  %v655_v33 = vmul.f32 %v14303_v29, %v14310_v24  ;;  %v656_v9 = vmul.f32 %v14303_v29, %v14311_v14  ;;  %v14317_v41 = vld [vmem:[#allocation29_spill] sm:$0xff]  ;;  %v14318_v5 = vld [vmem:[#allocation30_spill] sm:$0xff] }
  0xb1   :  { %14299 = vst [vmem:[#allocation17_spill] sm:$0xff] %v5728_v6  ;;  %14301 = vst [vmem:[#allocation18_spill] sm:$0xff] %v5731_v37  ;;  %v657_v30 = vmul.f32 %v14303_v29, %v14312_v38  ;;  %v658_v45 = vmul.f32 %v14303_v29, %v14313_v47  ;;  %v659_v59 = vmul.f32 %v14303_v29, %v14314_v21  ;;  %v5768_v38 = vld [vmem:[%s13400_s2 + $0x181] sm:$0xff]  ;;  %v5773_v21 = vld [vmem:[%s13400_s2 + $0x189] sm:$0xff] }
  0xb2   :  { %v660_v17 = vmul.f32 %v14303_v29, %v14315_v19  ;;  %v661_v34 = vmul.f32 %v14303_v29, %v14316_v46  ;;  %v662_v22 = vmul.f32 %v14303_v29, %v14317_v41  ;;  %v663_v12 = vmul.f32 %v14303_v29, %v14318_v5  ;;  %14319 = vst [vmem:[#allocation19_spill] sm:$0xff] %v5768_v38  ;;  %v14321_v19 = vld [vmem:[#allocation31_spill] sm:$0xff]  ;;  %v14322_v46 = vld [vmem:[#allocation32_spill] sm:$0xff]  ;;  %v14323_v41 = vld [vmem:[#allocation33_spill] sm:$0xff] }
  0xb3   :  { %14320 = vst [vmem:[#allocation23_spill] sm:$0xff] %v5773_v21  ;;  %v664_v47 = vmul.f32 %v14303_v29, %v14321_v19  ;;  %v665_v14 = vmul.f32 %v14303_v29, %v14322_v46  ;;  %v666_v24 = vmul.f32 %v14303_v29, %v14323_v41  ;;  %v14324_v5 = vld [vmem:[#allocation48_spill] sm:$0xff]  ;;  %v14325_v48 = vld [vmem:[#allocation49_spill] sm:$0xff]  ;;  %v14326_v15 = vld [vmem:[#allocation43_spill] sm:$0xff]  ;;  %v5820_v60 = vadd.f32 %v650_v57, %v5644_v13 }
  0xb4   :  { %v667_v43 = vmul.f32 %v14303_v29, %v14324_v5  ;;  %v668_v26 = vmul.f32 %v14303_v29, %v14325_v48  ;;  %v669_v36 = vmul.f32 %v14303_v29, %v14326_v15  ;;  %v14327_v37 = vld [vmem:[#allocation38_spill] sm:$0xff]  ;;  %v14328_v63 = vld [vmem:[#allocation45_spill] sm:$0xff]  ;;  %v14329_v46 = vld [vmem:[#allocation7_spill] sm:$0xff]  ;;  %v5840_v13 = vadd.f32 %v656_v9, %v5662_v40 }
  0xb5   :  { %v670_v6 = vmul.f32 %v14303_v29, %v14327_v37  ;;  %v671_v19 = vmul.f32 %v14303_v29, %v14328_v63  ;;  %v672_v41 = vmul.f32 %v14303_v29, %v14329_v46  ;;  %v14330_v53 = vld [vmem:[#allocation6_spill] sm:$0xff]  ;;  %v14331_v18 = vld [vmem:[#allocation12_spill] sm:$0xff]  ;;  %v14332_v58 = vld [vmem:[#allocation13_spill] sm:$0xff]  ;;  %v677_v63 = vmul.f32 %v14303_v29, %v5603_v52 }
  0xb6   :  { %v673_v5 = vmul.f32 %v14303_v29, %v14330_v53  ;;  %v674_v48 = vmul.f32 %v14303_v29, %v14331_v18  ;;  %v675_v15 = vmul.f32 %v14303_v29, %v14332_v58  ;;  %v14333_v37 = vld [vmem:[#allocation42_spill] sm:$0xff]  ;;  %v678_v46 = vmul.f32 %v14303_v29, %v5768_v38  ;;  %v14357_v9 = vld [vmem:[#allocation40_spill] sm:$0xff] }
  0xb7   :  { %v676_v49 = vmul.f32 %v14303_v29, %v14333_v37  ;;  %v679_v53 = vmul.f32 %v14303_v29, %v5773_v21  ;;  %v5814_v18 = vadd.f32 %v648_v51, %v5638_v62  ;;  %v5817_v58 = vadd.f32 %v649_v55, %v5641_v32  ;;  %v14339_v55 = vld [vmem:[#allocation36_spill] sm:$0xff] }
  0xb8   :  { %v5823_v37 = vadd.f32 %v651_v8, %v5647_v7  ;;  %v5828_v38 = vadd.f32 %v652_v44, %v5650_v27  ;;  %v5831_v29 = vadd.f32 %v653_v35, %v5653_v61  ;;  %v5834_v62 = vadd.f32 %v654_v11, %v5656_v23 }
  0xb9   :  { %v5837_v32 = vadd.f32 %v655_v33, %v5659_v31  ;;  %v5843_v7 = vadd.f32 %v657_v30, %v5665_v0  ;;  %v5846_v51 = vadd.f32 %v658_v45, %v5668_v28  ;;  %v5849_v27 = vadd.f32 %v659_v59, %v5671_v25  ;;  %v14358_v30 = vld [vmem:[#allocation41_spill] sm:$0xff]  ;;  %v14360_v59 = vld [vmem:[#allocation14_spill] sm:$0xff] }
  0xba   :  { %v5852_v61 = vadd.f32 %v660_v17, %v5674_v56  ;;  %v5855_v23 = vadd.f32 %v661_v34, %v5677_v3  ;;  %v5858_v31 = vadd.f32 %v662_v22, %v5680_v20  ;;  %v5861_v40 = vadd.f32 %v663_v12, %v5683_v39  ;;  %v14361_v17 = vld [vmem:[#allocation46_spill] sm:$0xff] }
  0xbb   :  { %v5864_v0 = vadd.f32 %v664_v47, %v5686_v50  ;;  %v5867_v28 = vadd.f32 %v665_v14, %v5689_v4  ;;  %v5870_v25 = vadd.f32 %v666_v24, %v5692_v10  ;;  %v5873_v56 = vadd.f32 %v667_v43, %v5695_v42  ;;  %v14337_v4 = vld [vmem:[#allocation35_spill] sm:$0xff]  ;;  %v14341_v42 = vld [vmem:[#allocation37_spill] sm:$0xff]  ;;  %v14351_v43 = vld [vmem:[#allocation18_spill] sm:$0xff] }
  0xbc   :  { %v5876_v3 = vadd.f32 %v668_v26, %v5698_v54  ;;  %v5879_v20 = vadd.f32 %v669_v36, %v5701_v2  ;;  %v5882_v39 = vadd.f32 %v670_v6, %v5704_v1  ;;  %v5885_v50 = vadd.f32 %v671_v19, %v5707_v16  ;;  %v14343_v26 = vld [vmem:[#allocation10_spill] sm:$0xff]  ;;  %v14345_v2 = vld [vmem:[#allocation9_spill] sm:$0xff]  ;;  %v14347_v1 = vld [vmem:[#allocation16_spill] sm:$0xff] }
  0xbd   :  { %v5888_v10 = vadd.f32 %v672_v41, %v14337_v4  ;;  %v5891_v57 = vadd.f32 %v673_v5, %v14339_v55  ;;  %v5894_v8 = vadd.f32 %v674_v48, %v14341_v42  ;;  %v713_v54 = vstv %s5791_s11  ;;  %v14349_v16 = vld [vmem:[#allocation17_spill] sm:$0xff]  ;;  %v14363_v41 = vld [vmem:[#allocation20_spill] sm:$0xff]  ;;  %v14365_v4 = vld [vmem:[#allocation22_spill] sm:$0xff]  ;;  %s8765_s11 = sld [smem:[#allocation3 + $0x4]] }
  0xbe   :  { %14334 = vst [vmem:[#allocation24_spill] sm:$0xff] %v5879_v20  ;;  %14335 = vst [vmem:[#allocation25_spill] sm:$0xff] %v5882_v39  ;;  %v5898_v44 = vadd.f32 %v675_v15, %v14343_v26  ;;  %v5901_v36 = vadd.f32 %v676_v49, %v14345_v2  ;;  %v5904_v6 = vadd.f32 %v677_v63, %v14347_v1  ;;  %v5913_v24 = vstv %s5801_s12  ;;  %v14356_v15 = vld [vmem:[#allocation39_spill] sm:$0xff]  ;;  %v14359_v63 = vld [vmem:[#allocation8_spill] sm:$0xff] }
  0xbf   :  { %14336 = vst [vmem:[#allocation26_spill] sm:$0xff] %v5885_v50  ;;  %14338 = vst [vmem:[#allocation47_spill] sm:$0xff] %v5888_v10  ;;  %v5907_v35 = vadd.f32 %v678_v46, %v14349_v16  ;;  %v5910_v11 = vadd.f32 %v679_v53, %v14351_v43  ;;  %v5916_v48 = vstv %s5811_s13  ;;  %v5919_v33 = vstv %s5825_s14  ;;  %v14362_v53 = vld [vmem:[#allocation15_spill] sm:$0xff]  ;;  %v14364_v5 = vld [vmem:[#allocation21_spill] sm:$0xff]  ;;  %s11005_s14 = sld [smem:[#allocation3 + $0x13]] }
  0xc0   :  { %14340 = vst [vmem:[#allocation44_spill] sm:$0xff] %v5891_v57  ;;  %14342 = vst [vmem:[#allocation11_spill] sm:$0xff] %v5894_v8  ;;  %v714_v14 = vmul.f32 %v713_v54, %v14356_v15  ;;  %v715_v49 = vmul.f32 %v713_v54, %v14357_v9  ;;  %v716_v47 = vmul.f32 %v713_v54, %v14358_v30  ;;  %v14366_v42 = vld [vmem:[#allocation27_spill] sm:$0xff]  ;;  %v14367_v2 = vld [vmem:[#allocation28_spill] sm:$0xff] }
  0xc1   :  { %14344 = vst [vmem:[#allocation35_spill] sm:$0xff] %v5898_v44  ;;  %14346 = vst [vmem:[#allocation36_spill] sm:$0xff] %v5901_v36  ;;  %v717_v45 = vmul.f32 %v713_v54, %v14359_v63  ;;  %v718_v19 = vmul.f32 %v713_v54, %v14360_v59  ;;  %v719_v46 = vmul.f32 %v713_v54, %v14361_v17  ;;  %v14368_v16 = vld [vmem:[#allocation29_spill] sm:$0xff]  ;;  %v14369_v15 = vld [vmem:[#allocation30_spill] sm:$0xff] }
  0xc2   :  { %14348 = vst [vmem:[#allocation37_spill] sm:$0xff] %v5904_v6  ;;  %14350 = vst [vmem:[#allocation10_spill] sm:$0xff] %v5907_v35  ;;  %v720_v34 = vmul.f32 %v713_v54, %v14362_v53  ;;  %v721_v22 = vmul.f32 %v713_v54, %v14363_v41  ;;  %v722_v12 = vmul.f32 %v713_v54, %v14364_v5  ;;  %v14371_v59 = vld [vmem:[#allocation32_spill] sm:$0xff]  ;;  %v5940_v41 = vld [vmem:[%s13400_s2 + $0x199] sm:$0xff] }
  0xc3   :  { %14352 = vst [vmem:[#allocation9_spill] sm:$0xff] %v5910_v11  ;;  %14353 = vst [vmem:[#allocation16_spill] sm:$0xff] %v5913_v24  ;;  %v723_v55 = vmul.f32 %v713_v54, %v14365_v4  ;;  %v724_v26 = vmul.f32 %v713_v54, %v14366_v42  ;;  %v725_v1 = vmul.f32 %v713_v54, %v14367_v2  ;;  %v5945_v4 = vld [vmem:[%s13400_s2 + $0x1a1] sm:$0xff]  ;;  %v14374_v42 = vld [vmem:[#allocation33_spill] sm:$0xff] }
  0xc4   :  { %14354 = vst [vmem:[#allocation17_spill] sm:$0xff] %v5916_v48  ;;  %14355 = vst [vmem:[#allocation18_spill] sm:$0xff] %v5919_v33  ;;  %v726_v43 = vmul.f32 %v713_v54, %v14368_v16  ;;  %v727_v9 = vmul.f32 %v713_v54, %v14369_v15  ;;  %v14370_v33 = vld [vmem:[#allocation31_spill] sm:$0xff]  ;;  %v729_v17 = vmul.f32 %v713_v54, %v14371_v59  ;;  %v14375_v5 = vld [vmem:[#allocation48_spill] sm:$0xff] }
  0xc5   :  { %v728_v48 = vmul.f32 %v713_v54, %v14370_v33  ;;  %14372 = vst [vmem:[#allocation39_spill] sm:$0xff] %v5940_v41  ;;  %14373 = vst [vmem:[#allocation40_spill] sm:$0xff] %v5945_v4  ;;  %v730_v2 = vmul.f32 %v713_v54, %v14374_v42  ;;  %v731_v16 = vmul.f32 %v713_v54, %v14375_v5  ;;  %v14376_v53 = vld [vmem:[#allocation49_spill] sm:$0xff]  ;;  %v14377_v63 = vld [vmem:[#allocation43_spill] sm:$0xff] }
  0xc6   :  { %v732_v15 = vmul.f32 %v713_v54, %v14376_v53  ;;  %v733_v33 = vmul.f32 %v713_v54, %v14377_v63  ;;  %v14378_v24 = vld [vmem:[#allocation38_spill] sm:$0xff]  ;;  %v14379_v30 = vld [vmem:[#allocation45_spill] sm:$0xff]  ;;  %v14380_v35 = vld [vmem:[#allocation7_spill] sm:$0xff]  ;;  %v741_v5 = vmul.f32 %v713_v54, %v5603_v52  ;;  %v743_v63 = vmul.f32 %v713_v54, %v5773_v21 }
  0xc7   :  { %v734_v59 = vmul.f32 %v713_v54, %v14378_v24  ;;  %v735_v11 = vmul.f32 %v713_v54, %v14379_v30  ;;  %v736_v6 = vmul.f32 %v713_v54, %v14380_v35  ;;  %v14381_v36 = vld [vmem:[#allocation6_spill] sm:$0xff]  ;;  %v14382_v8 = vld [vmem:[#allocation12_spill] sm:$0xff]  ;;  %v14383_v10 = vld [vmem:[#allocation13_spill] sm:$0xff]  ;;  %v744_v24 = vmul.f32 %v713_v54, %v5940_v41 }
  0xc8   :  { %v737_v44 = vmul.f32 %v713_v54, %v14381_v36  ;;  %v738_v57 = vmul.f32 %v713_v54, %v14382_v8  ;;  %v739_v50 = vmul.f32 %v713_v54, %v14383_v10  ;;  %v14384_v39 = vld [vmem:[#allocation42_spill] sm:$0xff]  ;;  %v14385_v20 = vld [vmem:[#allocation19_spill] sm:$0xff]  ;;  %v745_v30 = vmul.f32 %v713_v54, %v5945_v4 }
  0xc9   :  { %v740_v42 = vmul.f32 %v713_v54, %v14384_v39  ;;  %v742_v53 = vmul.f32 %v713_v54, %v14385_v20  ;;  %v5964_v35 = vadd.f32 %v714_v14, %v5814_v18  ;;  %v5967_v36 = vadd.f32 %v715_v49, %v5817_v58 }
  0xca   :  { %v5970_v10 = vadd.f32 %v716_v47, %v5820_v60  ;;  %v5973_v39 = vadd.f32 %v717_v45, %v5823_v37  ;;  %v5976_v20 = vadd.f32 %v718_v19, %v5828_v38  ;;  %v5979_v21 = vadd.f32 %v719_v46, %v5831_v29 }
  0xcb   :  { %v5982_v54 = vadd.f32 %v720_v34, %v5834_v62  ;;  %v5985_v18 = vadd.f32 %v721_v22, %v5837_v32  ;;  %v5988_v58 = vadd.f32 %v722_v12, %v5840_v13  ;;  %v5991_v60 = vadd.f32 %v723_v55, %v5843_v7  ;;  %v14406_v22 = vld [vmem:[#allocation16_spill] sm:$0xff] }
  0xcc   :  { %v5994_v37 = vadd.f32 %v724_v26, %v5846_v51  ;;  %v5997_v38 = vadd.f32 %v725_v1, %v5849_v27  ;;  %v6000_v29 = vadd.f32 %v726_v43, %v5852_v61  ;;  %v6003_v62 = vadd.f32 %v727_v9, %v5855_v23  ;;  %v14407_v55 = vld [vmem:[#allocation8_spill] sm:$0xff] }
  0xcd   :  { %v6006_v32 = vadd.f32 %v728_v48, %v5858_v31  ;;  %v6009_v13 = vadd.f32 %v729_v17, %v5861_v40  ;;  %v6012_v7 = vadd.f32 %v730_v2, %v5864_v0  ;;  %v6015_v51 = vadd.f32 %v731_v16, %v5867_v28  ;;  %v14386_v31 = vld [vmem:[#allocation24_spill] sm:$0xff]  ;;  %v14387_v40 = vld [vmem:[#allocation25_spill] sm:$0xff]  ;;  %v14388_v0 = vld [vmem:[#allocation26_spill] sm:$0xff] }
  0xce   :  { %v6018_v27 = vadd.f32 %v732_v15, %v5870_v25  ;;  %v6021_v61 = vadd.f32 %v733_v33, %v5873_v56  ;;  %v6024_v23 = vadd.f32 %v734_v59, %v5876_v3  ;;  %v6027_v48 = vadd.f32 %v735_v11, %v14386_v31  ;;  %v14389_v28 = vld [vmem:[#allocation47_spill] sm:$0xff]  ;;  %v14391_v25 = vld [vmem:[#allocation44_spill] sm:$0xff]  ;;  %v14413_v15 = vld [vmem:[#allocation22_spill] sm:$0xff] }
  0xcf   :  { %v6030_v14 = vadd.f32 %v736_v6, %v14387_v40  ;;  %v6033_v49 = vadd.f32 %v737_v44, %v14388_v0  ;;  %v6036_v47 = vadd.f32 %v738_v57, %v14389_v28  ;;  %v6039_v45 = vadd.f32 %v739_v50, %v14391_v25  ;;  %v14393_v56 = vld [vmem:[#allocation11_spill] sm:$0xff]  ;;  %v14397_v11 = vld [vmem:[#allocation36_spill] sm:$0xff]  ;;  %v14399_v6 = vld [vmem:[#allocation37_spill] sm:$0xff] }
  0xd0   :  { %v6042_v33 = vadd.f32 %v740_v42, %v14393_v56  ;;  %v14395_v3 = vld [vmem:[#allocation35_spill] sm:$0xff]  ;;  %v6048_v19 = vadd.f32 %v742_v53, %v14397_v11  ;;  %v6051_v17 = vadd.f32 %v743_v63, %v14399_v6  ;;  %v14401_v44 = vld [vmem:[#allocation10_spill] sm:$0xff]  ;;  %v14403_v57 = vld [vmem:[#allocation9_spill] sm:$0xff]  ;;  %v781_v42 = vmul.f32 %v14406_v22, %v14407_v55 }
  0xd1   :  { %14390 = vst [vmem:[#allocation24_spill] sm:$0xff] %v6036_v47  ;;  %14392 = vst [vmem:[#allocation25_spill] sm:$0xff] %v6039_v45  ;;  %v6045_v59 = vadd.f32 %v741_v5, %v14395_v3  ;;  %v6054_v46 = vadd.f32 %v744_v24, %v14401_v44  ;;  %v6057_v34 = vadd.f32 %v745_v30, %v14403_v57  ;;  %v14405_v50 = vld [vmem:[#allocation41_spill] sm:$0xff]  ;;  %v14408_v5 = vld [vmem:[#allocation14_spill] sm:$0xff] }
  0xd2   :  { %14394 = vst [vmem:[#allocation26_spill] sm:$0xff] %v6042_v33  ;;  %14398 = vst [vmem:[#allocation44_spill] sm:$0xff] %v6048_v19  ;;  %v780_v12 = vmul.f32 %v14406_v22, %v14405_v50  ;;  %v782_v26 = vmul.f32 %v14406_v22, %v14408_v5  ;;  %v14409_v53 = vld [vmem:[#allocation46_spill] sm:$0xff]  ;;  %v14410_v63 = vld [vmem:[#allocation15_spill] sm:$0xff]  ;;  %v787_v9 = vmul.f32 %v14406_v22, %v14413_v15 }
  0xd3   :  { %14396 = vst [vmem:[#allocation47_spill] sm:$0xff] %v6045_v59  ;;  %14400 = vst [vmem:[#allocation11_spill] sm:$0xff] %v6051_v17  ;;  %v783_v2 = vmul.f32 %v14406_v22, %v14409_v53  ;;  %v784_v1 = vmul.f32 %v14406_v22, %v14410_v63  ;;  %v14411_v24 = vld [vmem:[#allocation20_spill] sm:$0xff]  ;;  %v14412_v30 = vld [vmem:[#allocation21_spill] sm:$0xff]  ;;  %v802_v19 = vmul.f32 %v14406_v22, %v14382_v8 }
  0xd4   :  { %14402 = vst [vmem:[#allocation35_spill] sm:$0xff] %v6054_v46  ;;  %14404 = vst [vmem:[#allocation36_spill] sm:$0xff] %v6057_v34  ;;  %v785_v16 = vmul.f32 %v14406_v22, %v14411_v24  ;;  %v786_v43 = vmul.f32 %v14406_v22, %v14412_v30  ;;  %v14414_v31 = vld [vmem:[#allocation27_spill] sm:$0xff]  ;;  %v14415_v0 = vld [vmem:[#allocation28_spill] sm:$0xff]  ;;  %v809_v8 = vmul.f32 %v14406_v22, %v5945_v4 }
  0xd5   :  { %v788_v40 = vmul.f32 %v14406_v22, %v14414_v31  ;;  %v789_v28 = vmul.f32 %v14406_v22, %v14415_v0  ;;  %v14416_v25 = vld [vmem:[#allocation29_spill] sm:$0xff]  ;;  %v14417_v3 = vld [vmem:[#allocation30_spill] sm:$0xff]  ;;  %v14418_v6 = vld [vmem:[#allocation31_spill] sm:$0xff]  ;;  %v6146_v4 = vadd.f32 %v784_v1, %v5976_v20 }
  0xd6   :  { %v790_v56 = vmul.f32 %v14406_v22, %v14416_v25  ;;  %v791_v11 = vmul.f32 %v14406_v22, %v14417_v3  ;;  %v792_v44 = vmul.f32 %v14406_v22, %v14418_v6  ;;  %v14419_v57 = vld [vmem:[#allocation32_spill] sm:$0xff]  ;;  %v14420_v55 = vld [vmem:[#allocation33_spill] sm:$0xff]  ;;  %v14428_v5 = vld [vmem:[#allocation7_spill] sm:$0xff] }
  0xd7   :  { %v793_v50 = vmul.f32 %v14406_v22, %v14419_v57  ;;  %v794_v15 = vmul.f32 %v14406_v22, %v14420_v55  ;;  %v14421_v30 = vld [vmem:[#allocation48_spill] sm:$0xff]  ;;  %v6099_v3 = vld [vmem:[%s13400_s2 + $0x1b9] sm:$0xff]  ;;  %v14425_v57 = vld [vmem:[#allocation43_spill] sm:$0xff]  ;;  %v800_v34 = vmul.f32 %v14406_v22, %v14428_v5 }
  0xd8   :  { %v795_v31 = vmul.f32 %v14406_v22, %v14421_v30  ;;  %v6094_v0 = vld [vmem:[%s13400_s2 + $0x1b1] sm:$0xff]  ;;  %14423 = vst [vmem:[#allocation10_spill] sm:$0xff] %v6099_v3  ;;  %v797_v24 = vmul.f32 %v14406_v22, %v14425_v57  ;;  %v14426_v55 = vld [vmem:[#allocation38_spill] sm:$0xff]  ;;  %v14432_v45 = vld [vmem:[#allocation19_spill] sm:$0xff]  ;;  %v6167_v20 = vadd.f32 %v791_v11, %v5997_v38 }
  0xd9   :  { %14422 = vst [vmem:[#allocation37_spill] sm:$0xff] %v6094_v0  ;;  %v14424_v6 = vld [vmem:[#allocation49_spill] sm:$0xff]  ;;  %v798_v63 = vmul.f32 %v14406_v22, %v14426_v55  ;;  %v14429_v46 = vld [vmem:[#allocation6_spill] sm:$0xff]  ;;  %v805_v55 = vmul.f32 %v14406_v22, %v5603_v52  ;;  %v14433_v47 = vld [vmem:[#allocation23_spill] sm:$0xff]  ;;  %v6134_v52 = vadd.f32 %v780_v12, %v5964_v35  ;;  %v6155_v35 = vadd.f32 %v787_v9, %v5985_v18 }
  0xda   :  { %v796_v25 = vmul.f32 %v14406_v22, %v14424_v6  ;;  %v14427_v30 = vld [vmem:[#allocation45_spill] sm:$0xff]  ;;  %v801_v17 = vmul.f32 %v14406_v22, %v14429_v46  ;;  %v14431_v33 = vld [vmem:[#allocation42_spill] sm:$0xff]  ;;  %v807_v5 = vmul.f32 %v14406_v22, %v14433_v47  ;;  %v808_v46 = vmul.f32 %v14406_v22, %v5940_v41 }
  0xdb   :  { %v799_v53 = vmul.f32 %v14406_v22, %v14427_v30  ;;  %v14430_v59 = vld [vmem:[#allocation13_spill] sm:$0xff]  ;;  %v804_v57 = vmul.f32 %v14406_v22, %v14431_v33  ;;  %v806_v30 = vmul.f32 %v14406_v22, %v14432_v45  ;;  %v811_v33 = vmul.f32 %v14406_v22, %v6099_v3  ;;  %v14450_v1 = vld [vmem:[#allocation14_spill] sm:$0xff] }
  0xdc   :  { %v803_v6 = vmul.f32 %v14406_v22, %v14430_v59  ;;  %v810_v59 = vmul.f32 %v14406_v22, %v6094_v0  ;;  %v6137_v45 = vadd.f32 %v781_v42, %v5967_v36  ;;  %v6140_v47 = vadd.f32 %v782_v26, %v5970_v10  ;;  %v14459_v11 = vld [vmem:[#allocation29_spill] sm:$0xff] }
  0xdd   :  { %v6143_v41 = vadd.f32 %v783_v2, %v5973_v39  ;;  %v6149_v0 = vadd.f32 %v785_v16, %v5979_v21  ;;  %v6152_v22 = vadd.f32 %v786_v43, %v5982_v54  ;;  %v6158_v36 = vadd.f32 %v788_v40, %v5988_v58  ;;  %v14448_v2 = vld [vmem:[#allocation36_spill] sm:$0xff] }
  0xde   :  { %v6161_v10 = vadd.f32 %v789_v28, %v5991_v60  ;;  %v6164_v39 = vadd.f32 %v790_v56, %v5994_v37  ;;  %v6170_v21 = vadd.f32 %v792_v44, %v6000_v29  ;;  %v6173_v54 = vadd.f32 %v793_v50, %v6003_v62  ;;  %v14460_v44 = vld [vmem:[#allocation30_spill] sm:$0xff]  ;;  %v14461_v50 = vld [vmem:[#allocation31_spill] sm:$0xff] }
  0xdf   :  { %v6176_v18 = vadd.f32 %v794_v15, %v6006_v32  ;;  %v6179_v58 = vadd.f32 %v795_v31, %v6009_v13  ;;  %v6182_v60 = vadd.f32 %v796_v25, %v6012_v7  ;;  %v6185_v37 = vadd.f32 %v797_v24, %v6015_v51  ;;  %v14434_v51 = vld [vmem:[#allocation24_spill] sm:$0xff]  ;;  %v14451_v24 = vld [vmem:[#allocation17_spill] sm:$0xff] }
  0xe0   :  { %v6188_v38 = vadd.f32 %v798_v63, %v6018_v27  ;;  %v6191_v29 = vadd.f32 %v799_v53, %v6021_v61  ;;  %v6194_v62 = vadd.f32 %v800_v34, %v6024_v23  ;;  %v6197_v32 = vadd.f32 %v801_v17, %v6027_v48  ;;  %v14436_v27 = vld [vmem:[#allocation25_spill] sm:$0xff]  ;;  %v14438_v61 = vld [vmem:[#allocation26_spill] sm:$0xff]  ;;  %v14440_v23 = vld [vmem:[#allocation47_spill] sm:$0xff] }
  0xe1   :  { %v6200_v13 = vadd.f32 %v802_v19, %v6030_v14  ;;  %v6203_v7 = vadd.f32 %v803_v6, %v6033_v49  ;;  %v6206_v12 = vadd.f32 %v804_v57, %v14434_v51  ;;  %v6209_v42 = vadd.f32 %v805_v55, %v14436_v27  ;;  %v14442_v48 = vld [vmem:[#allocation44_spill] sm:$0xff]  ;;  %v14444_v14 = vld [vmem:[#allocation11_spill] sm:$0xff] }
  0xe2   :  { %v6212_v26 = vadd.f32 %v806_v30, %v14438_v61  ;;  %v6215_v34 = vadd.f32 %v807_v5, %v14440_v23  ;;  %v6218_v17 = vadd.f32 %v808_v46, %v14442_v48  ;;  %v6221_v19 = vadd.f32 %v809_v8, %v14444_v14  ;;  %v14446_v49 = vld [vmem:[#allocation35_spill] sm:$0xff]  ;;  %v14452_v30 = vld [vmem:[#allocation46_spill] sm:$0xff]  ;;  %v14454_v46 = vld [vmem:[#allocation20_spill] sm:$0xff] }
  0xe3   :  { %14435 = vst [vmem:[#allocation9_spill] sm:$0xff] %v6206_v12  ;;  %14437 = vst [vmem:[#allocation41_spill] sm:$0xff] %v6209_v42  ;;  %v6224_v53 = vadd.f32 %v810_v59, %v14446_v49  ;;  %v6227_v63 = vadd.f32 %v811_v33, %v14448_v2  ;;  %v846_v16 = vmul.f32 %v14451_v24, %v14450_v1  ;;  %v14453_v5 = vld [vmem:[#allocation15_spill] sm:$0xff]  ;;  %v14455_v8 = vld [vmem:[#allocation21_spill] sm:$0xff] }
  0xe4   :  { %14439 = vst [vmem:[#allocation16_spill] sm:$0xff] %v6212_v26  ;;  %14441 = vst [vmem:[#allocation8_spill] sm:$0xff] %v6215_v34  ;;  %v847_v43 = vmul.f32 %v14451_v24, %v14452_v30  ;;  %v848_v15 = vmul.f32 %v14451_v24, %v14453_v5  ;;  %v849_v9 = vmul.f32 %v14451_v24, %v14454_v46  ;;  %v14456_v59 = vld [vmem:[#allocation22_spill] sm:$0xff]  ;;  %v14457_v33 = vld [vmem:[#allocation27_spill] sm:$0xff] }
  0xe5   :  { %14443 = vst [vmem:[#allocation24_spill] sm:$0xff] %v6218_v17  ;;  %14445 = vst [vmem:[#allocation25_spill] sm:$0xff] %v6221_v19  ;;  %v850_v31 = vmul.f32 %v14451_v24, %v14455_v8  ;;  %v851_v40 = vmul.f32 %v14451_v24, %v14456_v59  ;;  %v852_v28 = vmul.f32 %v14451_v24, %v14457_v33  ;;  %v14458_v25 = vld [vmem:[#allocation28_spill] sm:$0xff]  ;;  %v14463_v61 = vld [vmem:[#allocation33_spill] sm:$0xff] }
  0xe6   :  { %14447 = vst [vmem:[#allocation26_spill] sm:$0xff] %v6224_v53  ;;  %14449 = vst [vmem:[#allocation47_spill] sm:$0xff] %v6227_v63  ;;  %v853_v56 = vmul.f32 %v14451_v24, %v14458_v25  ;;  %v854_v6 = vmul.f32 %v14451_v24, %v14459_v11  ;;  %v855_v57 = vmul.f32 %v14451_v24, %v14460_v44  ;;  %v14462_v51 = vld [vmem:[#allocation32_spill] sm:$0xff]  ;;  %v14465_v49 = vld [vmem:[#allocation49_spill] sm:$0xff] }
  0xe7   :  { %v856_v55 = vmul.f32 %v14451_v24, %v14461_v50  ;;  %v857_v27 = vmul.f32 %v14451_v24, %v14462_v51  ;;  %v858_v23 = vmul.f32 %v14451_v24, %v14463_v61  ;;  %v14464_v48 = vld [vmem:[#allocation48_spill] sm:$0xff]  ;;  %v860_v2 = vmul.f32 %v14451_v24, %v14465_v49  ;;  %v14466_v1 = vld [vmem:[#allocation43_spill] sm:$0xff]  ;;  %v14468_v61 = vld [vmem:[#allocation38_spill] sm:$0xff] }
  0xe8   :  { %v859_v14 = vmul.f32 %v14451_v24, %v14464_v48  ;;  %v861_v30 = vmul.f32 %v14451_v24, %v14466_v1  ;;  %v6264_v44 = vld [vmem:[%s13400_s2 + $0x1c9] sm:$0xff]  ;;  %v6269_v51 = vld [vmem:[%s13400_s2 + $0x1d1] sm:$0xff]  ;;  %v862_v50 = vmul.f32 %v14451_v24, %v14468_v61  ;;  %v14471_v1 = vld [vmem:[#allocation6_spill] sm:$0xff] }
  0xe9   :  { %14467 = vst [vmem:[#allocation44_spill] sm:$0xff] %v6264_v44  ;;  %v14469_v48 = vld [vmem:[#allocation45_spill] sm:$0xff]  ;;  %v14470_v49 = vld [vmem:[#allocation7_spill] sm:$0xff]  ;;  %v865_v33 = vmul.f32 %v14451_v24, %v14471_v1  ;;  %v14472_v59 = vld [vmem:[#allocation12_spill] sm:$0xff] }
  0xea   :  { %v863_v11 = vmul.f32 %v14451_v24, %v14469_v48  ;;  %v864_v25 = vmul.f32 %v14451_v24, %v14470_v49  ;;  %v866_v8 = vmul.f32 %v14451_v24, %v14472_v59  ;;  %v14473_v46 = vld [vmem:[#allocation13_spill] sm:$0xff]  ;;  %v14474_v63 = vld [vmem:[#allocation42_spill] sm:$0xff]  ;;  %v14476_v17 = vld [vmem:[#allocation19_spill] sm:$0xff] }
  0xeb   :  { %v867_v5 = vmul.f32 %v14451_v24, %v14473_v46  ;;  %v868_v53 = vmul.f32 %v14451_v24, %v14474_v63  ;;  %v14475_v19 = vld [vmem:[#allocation34_spill] sm:$0xff]  ;;  %v870_v48 = vmul.f32 %v14451_v24, %v14476_v17  ;;  %v14477_v34 = vld [vmem:[#allocation23_spill] sm:$0xff]  ;;  %v14479_v42 = vld [vmem:[#allocation40_spill] sm:$0xff]  ;;  %v875_v63 = vmul.f32 %v14451_v24, %v6099_v3 }
  0xec   :  { %v869_v61 = vmul.f32 %v14451_v24, %v14475_v19  ;;  %v871_v49 = vmul.f32 %v14451_v24, %v14477_v34  ;;  %v14478_v26 = vld [vmem:[#allocation39_spill] sm:$0xff]  ;;  %v873_v59 = vmul.f32 %v14451_v24, %v14479_v42  ;;  %v14480_v12 = vld [vmem:[#allocation37_spill] sm:$0xff]  ;;  %v876_v19 = vmul.f32 %v14451_v24, %v6264_v44 }
  0xed   :  { %v872_v1 = vmul.f32 %v14451_v24, %v14478_v26  ;;  %v874_v46 = vmul.f32 %v14451_v24, %v14480_v12  ;;  %v877_v17 = vmul.f32 %v14451_v24, %v6269_v51  ;;  %v6304_v34 = vadd.f32 %v846_v16, %v6134_v52 }
  0xee   :  { %v6307_v26 = vadd.f32 %v847_v43, %v6137_v45  ;;  %v6310_v42 = vadd.f32 %v848_v15, %v6140_v47  ;;  %v6313_v12 = vadd.f32 %v849_v9, %v6143_v41  ;;  %v6316_v3 = vadd.f32 %v850_v31, %v6146_v4  ;;  %v14495_v31 = vld [vmem:[#allocation47_spill] sm:$0xff] }
  0xef   :  { %v6319_v44 = vadd.f32 %v851_v40, %v6149_v0  ;;  %v6322_v24 = vadd.f32 %v852_v28, %v6152_v22  ;;  %v6325_v52 = vadd.f32 %v853_v56, %v6155_v35  ;;  %v6328_v45 = vadd.f32 %v854_v6, %v6158_v36  ;;  %v14498_v28 = vld [vmem:[#allocation18_spill] sm:$0xff]  ;;  %v14499_v56 = vld [vmem:[#allocation20_spill] sm:$0xff] }
  0xf0   :  { %v6331_v47 = vadd.f32 %v855_v57, %v6161_v10  ;;  %v6334_v41 = vadd.f32 %v856_v55, %v6164_v39  ;;  %v6337_v4 = vadd.f32 %v857_v27, %v6167_v20  ;;  %v6340_v0 = vadd.f32 %v858_v23, %v6170_v21 }
  0xf1   :  { %v6343_v22 = vadd.f32 %v859_v14, %v6173_v54  ;;  %v6346_v35 = vadd.f32 %v860_v2, %v6176_v18  ;;  %v6349_v36 = vadd.f32 %v861_v30, %v6179_v58  ;;  %v6352_v10 = vadd.f32 %v862_v50, %v6182_v60 }
  0xf2   :  { %v6355_v39 = vadd.f32 %v863_v11, %v6185_v37  ;;  %v6358_v20 = vadd.f32 %v864_v25, %v6188_v38  ;;  %v6361_v21 = vadd.f32 %v865_v33, %v6191_v29  ;;  %v6364_v54 = vadd.f32 %v866_v8, %v6194_v62  ;;  %v14481_v37 = vld [vmem:[#allocation9_spill] sm:$0xff]  ;;  %v14485_v29 = vld [vmem:[#allocation16_spill] sm:$0xff]  ;;  %v14497_v33 = vld [vmem:[#allocation15_spill] sm:$0xff] }
  0xf3   :  { %v6367_v18 = vadd.f32 %v867_v5, %v6197_v32  ;;  %v6370_v58 = vadd.f32 %v868_v53, %v6200_v13  ;;  %v6373_v60 = vadd.f32 %v869_v61, %v6203_v7  ;;  %v6376_v16 = vadd.f32 %v870_v48, %v14481_v37  ;;  %v14483_v38 = vld [vmem:[#allocation41_spill] sm:$0xff]  ;;  %v14487_v62 = vld [vmem:[#allocation8_spill] sm:$0xff]  ;;  %v14493_v7 = vld [vmem:[#allocation26_spill] sm:$0xff] }
  0xf4   :  { %v6379_v43 = vadd.f32 %v871_v49, %v14483_v38  ;;  %v6382_v15 = vadd.f32 %v872_v1, %v14485_v29  ;;  %v6385_v9 = vadd.f32 %v873_v59, %v14487_v62  ;;  %v14489_v32 = vld [vmem:[#allocation24_spill] sm:$0xff]  ;;  %v14491_v13 = vld [vmem:[#allocation25_spill] sm:$0xff]  ;;  %v6394_v8 = vadd.f32 %v876_v19, %v14493_v7  ;;  %v14505_v61 = vld [vmem:[#allocation30_spill] sm:$0xff] }
  0xf5   :  { %14482 = vst [vmem:[#allocation11_spill] sm:$0xff] %v6376_v16  ;;  %v6388_v5 = vadd.f32 %v874_v46, %v14489_v32  ;;  %v6391_v53 = vadd.f32 %v875_v63, %v14491_v13  ;;  %v6397_v40 = vadd.f32 %v877_v17, %v14495_v31  ;;  %v912_v25 = vmul.f32 %v14498_v28, %v14497_v33  ;;  %v14500_v59 = vld [vmem:[#allocation21_spill] sm:$0xff]  ;;  %v14501_v46 = vld [vmem:[#allocation22_spill] sm:$0xff]  ;;  %v14502_v63 = vld [vmem:[#allocation27_spill] sm:$0xff] }
  0xf6   :  { %14484 = vst [vmem:[#allocation35_spill] sm:$0xff] %v6379_v43  ;;  %14486 = vst [vmem:[#allocation36_spill] sm:$0xff] %v6382_v15  ;;  %v913_v11 = vmul.f32 %v14498_v28, %v14499_v56  ;;  %v914_v6 = vmul.f32 %v14498_v28, %v14500_v59  ;;  %v915_v57 = vmul.f32 %v14498_v28, %v14501_v46  ;;  %v14503_v19 = vld [vmem:[#allocation28_spill] sm:$0xff]  ;;  %v14504_v17 = vld [vmem:[#allocation29_spill] sm:$0xff] }
  0xf7   :  { %14488 = vst [vmem:[#allocation14_spill] sm:$0xff] %v6385_v9  ;;  %14490 = vst [vmem:[#allocation17_spill] sm:$0xff] %v6388_v5  ;;  %v916_v50 = vmul.f32 %v14498_v28, %v14502_v63  ;;  %v917_v55 = vmul.f32 %v14498_v28, %v14503_v19  ;;  %v918_v27 = vmul.f32 %v14498_v28, %v14504_v17  ;;  %v14506_v48 = vld [vmem:[#allocation31_spill] sm:$0xff]  ;;  %v14507_v49 = vld [vmem:[#allocation32_spill] sm:$0xff] }
  0xf8   :  { %14492 = vst [vmem:[#allocation46_spill] sm:$0xff] %v6391_v53  ;;  %14494 = vst [vmem:[#allocation9_spill] sm:$0xff] %v6394_v8  ;;  %v919_v23 = vmul.f32 %v14498_v28, %v14505_v61  ;;  %v920_v14 = vmul.f32 %v14498_v28, %v14506_v48  ;;  %v921_v2 = vmul.f32 %v14498_v28, %v14507_v49  ;;  %v14508_v1 = vld [vmem:[#allocation33_spill] sm:$0xff]  ;;  %v14509_v37 = vld [vmem:[#allocation48_spill] sm:$0xff] }
  0xf9   :  { %14496 = vst [vmem:[#allocation41_spill] sm:$0xff] %v6397_v40  ;;  %v922_v30 = vmul.f32 %v14498_v28, %v14508_v1  ;;  %v923_v38 = vmul.f32 %v14498_v28, %v14509_v37  ;;  %v14510_v29 = vld [vmem:[#allocation49_spill] sm:$0xff]  ;;  %v14511_v32 = vld [vmem:[#allocation43_spill] sm:$0xff]  ;;  %v14512_v7 = vld [vmem:[#allocation38_spill] sm:$0xff]  ;;  %v6486_v16 = vadd.f32 %v914_v6, %v6310_v42 }
  0xfa   :  { %v924_v62 = vmul.f32 %v14498_v28, %v14510_v29  ;;  %v925_v13 = vmul.f32 %v14498_v28, %v14511_v32  ;;  %v926_v31 = vmul.f32 %v14498_v28, %v14512_v7  ;;  %v14513_v33 = vld [vmem:[#allocation45_spill] sm:$0xff]  ;;  %v6434_v49 = vld [vmem:[%s13400_s2 + $0x1e1] sm:$0xff]  ;;  %v6439_v37 = vld [vmem:[%s13400_s2 + $0x1e9] sm:$0xff]  ;;  %v6506_v42 = vadd.f32 %v920_v14, %v6328_v45 }
  0xfb   :  { %v927_v56 = vmul.f32 %v14498_v28, %v14513_v33  ;;  %14514 = vst [vmem:[#allocation16_spill] sm:$0xff] %v6434_v49  ;;  %v14515_v29 = vld [vmem:[#allocation7_spill] sm:$0xff]  ;;  %v14516_v32 = vld [vmem:[#allocation6_spill] sm:$0xff]  ;;  %v14517_v7 = vld [vmem:[#allocation12_spill] sm:$0xff] }
  0xfc   :  { %v928_v1 = vmul.f32 %v14498_v28, %v14515_v29  ;;  %v929_v48 = vmul.f32 %v14498_v28, %v14516_v32  ;;  %v930_v61 = vmul.f32 %v14498_v28, %v14517_v7  ;;  %v14518_v33 = vld [vmem:[#allocation13_spill] sm:$0xff]  ;;  %v14519_v19 = vld [vmem:[#allocation42_spill] sm:$0xff]  ;;  %v14521_v40 = vld [vmem:[#allocation19_spill] sm:$0xff] }
  0xfd   :  { %v931_v17 = vmul.f32 %v14498_v28, %v14518_v33  ;;  %v932_v63 = vmul.f32 %v14498_v28, %v14519_v19  ;;  %v14520_v46 = vld [vmem:[#allocation34_spill] sm:$0xff]  ;;  %v934_v8 = vmul.f32 %v14498_v28, %v14521_v40  ;;  %v14522_v53 = vld [vmem:[#allocation23_spill] sm:$0xff]  ;;  %v14524_v5 = vld [vmem:[#allocation40_spill] sm:$0xff]  ;;  %v6527_v45 = vadd.f32 %v927_v56, %v6349_v36 }
  0xfe   :  { %v933_v59 = vmul.f32 %v14498_v28, %v14520_v46  ;;  %v935_v29 = vmul.f32 %v14498_v28, %v14522_v53  ;;  %v14523_v32 = vld [vmem:[#allocation39_spill] sm:$0xff]  ;;  %v937_v33 = vmul.f32 %v14498_v28, %v14524_v5  ;;  %v14525_v9 = vld [vmem:[#allocation37_spill] sm:$0xff]  ;;  %v14526_v15 = vld [vmem:[#allocation10_spill] sm:$0xff]  ;;  %v941_v53 = vmul.f32 %v14498_v28, %v6269_v51 }
  0xff   :  { %v936_v7 = vmul.f32 %v14498_v28, %v14523_v32  ;;  %v938_v19 = vmul.f32 %v14498_v28, %v14525_v9  ;;  %v939_v46 = vmul.f32 %v14498_v28, %v14526_v15  ;;  %v14527_v40 = vld [vmem:[#allocation44_spill] sm:$0xff]  ;;  %v942_v32 = vmul.f32 %v14498_v28, %v6434_v49  ;;  %v14552_v14 = vld [vmem:[#allocation22_spill] sm:$0xff] }
 0x100   :  { %v940_v43 = vmul.f32 %v14498_v28, %v14527_v40  ;;  %v943_v5 = vmul.f32 %v14498_v28, %v6439_v37  ;;  %v6480_v9 = vadd.f32 %v912_v25, %v6304_v34  ;;  %v6483_v15 = vadd.f32 %v913_v11, %v6307_v26  ;;  %v14534_v11 = vld [vmem:[#allocation35_spill] sm:$0xff] }
 0x101   :  { %v6489_v40 = vadd.f32 %v915_v57, %v6313_v12  ;;  %v6494_v49 = vadd.f32 %v916_v50, %v6316_v3  ;;  %v6497_v28 = vadd.f32 %v917_v55, %v6319_v44  ;;  %v6500_v34 = vadd.f32 %v918_v27, %v6322_v24 }
 0x102   :  { %v6503_v26 = vadd.f32 %v919_v23, %v6325_v52  ;;  %v6509_v12 = vadd.f32 %v921_v2, %v6331_v47  ;;  %v6512_v25 = vadd.f32 %v922_v30, %v6334_v41  ;;  %v6515_v3 = vadd.f32 %v923_v38, %v6337_v4  ;;  %v14553_v2 = vld [vmem:[#allocation27_spill] sm:$0xff]  ;;  %v14555_v38 = vld [vmem:[#allocation29_spill] sm:$0xff] }
 0x103   :  { %v6518_v44 = vadd.f32 %v924_v62, %v6340_v0  ;;  %v6521_v24 = vadd.f32 %v925_v13, %v6343_v22  ;;  %v6524_v52 = vadd.f32 %v926_v31, %v6346_v35  ;;  %v6530_v47 = vadd.f32 %v928_v1, %v6352_v10  ;;  %v14556_v62 = vld [vmem:[#allocation30_spill] sm:$0xff] }
 0x104   :  { %v6533_v41 = vadd.f32 %v929_v48, %v6355_v39  ;;  %v6536_v4 = vadd.f32 %v930_v61, %v6358_v20  ;;  %v6539_v0 = vadd.f32 %v931_v17, %v6361_v21  ;;  %v6542_v22 = vadd.f32 %v932_v63, %v6364_v54  ;;  %v14532_v39 = vld [vmem:[#allocation11_spill] sm:$0xff]  ;;  %v14536_v21 = vld [vmem:[#allocation36_spill] sm:$0xff]  ;;  %v14538_v63 = vld [vmem:[#allocation14_spill] sm:$0xff] }
 0x105   :  { %v6545_v35 = vadd.f32 %v933_v59, %v6367_v18  ;;  %v6548_v36 = vadd.f32 %v934_v8, %v6370_v58  ;;  %v6551_v10 = vadd.f32 %v935_v29, %v6373_v60  ;;  %v6554_v20 = vadd.f32 %v936_v7, %v14532_v39  ;;  %v14540_v18 = vld [vmem:[#allocation17_spill] sm:$0xff]  ;;  %v14542_v58 = vld [vmem:[#allocation46_spill] sm:$0xff]  ;;  %v14558_v7 = vld [vmem:[#allocation32_spill] sm:$0xff] }
 0x106   :  { %14528 = vst [vmem:[#allocation8_spill] sm:$0xff] %v6542_v22  ;;  %v6557_v6 = vadd.f32 %v937_v33, %v14534_v11  ;;  %v6560_v57 = vadd.f32 %v938_v19, %v14536_v21  ;;  %v977_v54 = vstv %s6457_s29  ;;  %v6564_v50 = vadd.f32 %v939_v46, %v14538_v63  ;;  %v14544_v60 = vld [vmem:[#allocation9_spill] sm:$0xff]  ;;  %v14560_v39 = vld [vmem:[#allocation48_spill] sm:$0xff]  ;;  %s12485_s29 = sld [smem:[#allocation3 + $0x22]] }
 0x107   :  { %14529 = vst [vmem:[#allocation24_spill] sm:$0xff] %v6545_v35  ;;  %14530 = vst [vmem:[#allocation25_spill] sm:$0xff] %v6548_v36  ;;  %v6567_v59 = vadd.f32 %v940_v43, %v14540_v18  ;;  %v6570_v8 = vadd.f32 %v941_v53, %v14542_v58  ;;  %v6573_v55 = vadd.f32 %v942_v32, %v14544_v60  ;;  %v14546_v17 = vld [vmem:[#allocation41_spill] sm:$0xff]  ;;  %v6579_v61 = vstv %s6467_s30  ;;  %v14554_v53 = vld [vmem:[#allocation28_spill] sm:$0xff]  ;;  %s12495_s30 = sld [smem:[#allocation3 + $0x29]] }
 0x108   :  { %14531 = vst [vmem:[#allocation26_spill] sm:$0xff] %v6551_v10  ;;  %14533 = vst [vmem:[#allocation47_spill] sm:$0xff] %v6554_v20  ;;  %v6576_v27 = vadd.f32 %v943_v5, %v14546_v17  ;;  %v6582_v19 = vstv %s6477_s4  ;;  %v6585_v23 = vstv %s6491_s5  ;;  %v14551_v46 = vld [vmem:[#allocation21_spill] sm:$0xff]  ;;  %v979_v43 = vmul.f32 %v977_v54, %v14552_v14  ;;  %v14557_v5 = vld [vmem:[#allocation31_spill] sm:$0xff]  ;;  %s9569_s4 = sld [smem:[#allocation3 + $0x20]] }
 0x109   :  { %14535 = vst [vmem:[#allocation15_spill] sm:$0xff] %v6557_v6  ;;  %14537 = vst [vmem:[#allocation18_spill] sm:$0xff] %v6560_v57  ;;  %v978_v48 = vmul.f32 %v977_v54, %v14551_v46  ;;  %v980_v1 = vmul.f32 %v977_v54, %v14553_v2  ;;  %v981_v30 = vmul.f32 %v977_v54, %v14554_v53  ;;  %v14559_v33 = vld [vmem:[#allocation33_spill] sm:$0xff]  ;;  %v14562_v18 = vld [vmem:[#allocation43_spill] sm:$0xff]  ;;  %s11671_s5 = sld [smem:[#allocation3 + $0x2f]] }
 0x10a   :  { %14539 = vst [vmem:[#allocation20_spill] sm:$0xff] %v6564_v50  ;;  %14541 = vst [vmem:[#allocation11_spill] sm:$0xff] %v6567_v59  ;;  %v982_v29 = vmul.f32 %v977_v54, %v14555_v38  ;;  %v983_v32 = vmul.f32 %v977_v54, %v14556_v62  ;;  %v984_v13 = vmul.f32 %v977_v54, %v14557_v5  ;;  %v14561_v21 = vld [vmem:[#allocation49_spill] sm:$0xff]  ;;  %v14563_v60 = vld [vmem:[#allocation38_spill] sm:$0xff] }
 0x10b   :  { %14543 = vst [vmem:[#allocation35_spill] sm:$0xff] %v6570_v8  ;;  %14545 = vst [vmem:[#allocation36_spill] sm:$0xff] %v6573_v55  ;;  %v985_v31 = vmul.f32 %v977_v54, %v14558_v7  ;;  %v986_v56 = vmul.f32 %v977_v54, %v14559_v33  ;;  %v987_v11 = vmul.f32 %v977_v54, %v14560_v39  ;;  %v14564_v46 = vld [vmem:[#allocation45_spill] sm:$0xff]  ;;  %v14565_v2 = vld [vmem:[#allocation7_spill] sm:$0xff] }
 0x10c   :  { %14547 = vst [vmem:[#allocation14_spill] sm:$0xff] %v6576_v27  ;;  %14548 = vst [vmem:[#allocation17_spill] sm:$0xff] %v6579_v61  ;;  %v988_v63 = vmul.f32 %v977_v54, %v14561_v21  ;;  %v989_v58 = vmul.f32 %v977_v54, %v14562_v18  ;;  %v990_v17 = vmul.f32 %v977_v54, %v14563_v60  ;;  %v14566_v38 = vld [vmem:[#allocation6_spill] sm:$0xff]  ;;  %v14567_v33 = vld [vmem:[#allocation12_spill] sm:$0xff] }
 0x10d   :  { %14549 = vst [vmem:[#allocation46_spill] sm:$0xff] %v6582_v19  ;;  %14550 = vst [vmem:[#allocation9_spill] sm:$0xff] %v6585_v23  ;;  %v991_v14 = vmul.f32 %v977_v54, %v14564_v46  ;;  %v992_v53 = vmul.f32 %v977_v54, %v14565_v2  ;;  %v993_v62 = vmul.f32 %v977_v54, %v14566_v38  ;;  %v578_v5 = vld [vmem:[%s13400_s2 + $0x1f9] sm:$0xff]  ;;  %v579_v7 = vld [vmem:[%s13400_s2 + $0x201] sm:$0xff] }
 0x10e   :  { %v994_v39 = vmul.f32 %v977_v54, %v14567_v33  ;;  %v14568_v21 = vld [vmem:[#allocation13_spill] sm:$0xff]  ;;  %v14569_v23 = vld [vmem:[#allocation42_spill] sm:$0xff]  ;;  %v14571_v61 = vld [vmem:[#allocation19_spill] sm:$0xff]  ;;  %v1008_v22 = vmul.f32 %v977_v54, %v578_v5 }
 0x10f   :  { %v995_v18 = vmul.f32 %v977_v54, %v14568_v21  ;;  %v996_v60 = vmul.f32 %v977_v54, %v14569_v23  ;;  %v14570_v19 = vld [vmem:[#allocation34_spill] sm:$0xff]  ;;  %v998_v2 = vmul.f32 %v977_v54, %v14571_v61  ;;  %v14572_v27 = vld [vmem:[#allocation23_spill] sm:$0xff]  ;;  %v14574_v59 = vld [vmem:[#allocation40_spill] sm:$0xff]  ;;  %v1005_v21 = vmul.f32 %v977_v54, %v6269_v51 }
 0x110   :  { %v997_v46 = vmul.f32 %v977_v54, %v14570_v19  ;;  %v999_v38 = vmul.f32 %v977_v54, %v14572_v27  ;;  %v14573_v55 = vld [vmem:[#allocation39_spill] sm:$0xff]  ;;  %v1001_v50 = vmul.f32 %v977_v54, %v14574_v59  ;;  %v14575_v57 = vld [vmem:[#allocation37_spill] sm:$0xff]  ;;  %v14576_v20 = vld [vmem:[#allocation10_spill] sm:$0xff]  ;;  %v1007_v19 = vmul.f32 %v977_v54, %v6439_v37 }
 0x111   :  { %v1000_v8 = vmul.f32 %v977_v54, %v14573_v55  ;;  %v1002_v6 = vmul.f32 %v977_v54, %v14575_v57  ;;  %v1003_v10 = vmul.f32 %v977_v54, %v14576_v20  ;;  %v14577_v36 = vld [vmem:[#allocation44_spill] sm:$0xff]  ;;  %v1009_v61 = vmul.f32 %v977_v54, %v579_v7  ;;  %v6707_v59 = vld [vmem:[%s13400_s2 + $0x3a] sm:$0xff] }
 0x112   :  { %v1004_v33 = vmul.f32 %v977_v54, %v14577_v36  ;;  %v14578_v35 = vld [vmem:[#allocation16_spill] sm:$0xff]  ;;  %v6624_v27 = vadd.f32 %v978_v48, %v6480_v9  ;;  %v6627_v55 = vadd.f32 %v979_v43, %v6483_v15  ;;  %v6630_v57 = vadd.f32 %v980_v1, %v6486_v16  ;;  %14582 = vst [vmem:[#allocation27_spill] sm:$0xff] %v6707_v59  ;;  %v14587_v1 = vld [vmem:[#allocation25_spill] sm:$0xff] }
 0x113   :  { %v1006_v23 = vmul.f32 %v977_v54, %v14578_v35  ;;  %v6633_v20 = vadd.f32 %v981_v30, %v6489_v40  ;;  %v6636_v51 = vadd.f32 %v982_v29, %v6494_v49  ;;  %v6639_v35 = vadd.f32 %v983_v32, %v6497_v28  ;;  %v6702_v54 = vld [vmem:[%s13400_s2 + $0x32] sm:$0xff]  ;;  %v14588_v29 = vld [vmem:[#allocation26_spill] sm:$0xff] }
 0x114   :  { %v6642_v37 = vadd.f32 %v984_v13, %v6500_v34  ;;  %v6645_v9 = vadd.f32 %v985_v31, %v6503_v26  ;;  %v6648_v15 = vadd.f32 %v986_v56, %v6506_v42  ;;  %v6651_v16 = vadd.f32 %v987_v11, %v6509_v12  ;;  %v1042_v12 = vld [vmem:[%s13400_s2 + $0x2] sm:$0xff]  ;;  %14581 = vst [vmem:[#allocation22_spill] sm:$0xff] %v6702_v54  ;;  %v14586_v48 = vld [vmem:[#allocation24_spill] sm:$0xff]  ;;  %v6744_v56 = vld [vmem:[%s13400_s2 + $0x7a] sm:$0xff] }
 0x115   :  { %v6654_v40 = vadd.f32 %v988_v63, %v6512_v25  ;;  %v6657_v49 = vadd.f32 %v989_v58, %v6515_v3  ;;  %v6660_v28 = vadd.f32 %v990_v17, %v6518_v44  ;;  %v6663_v34 = vadd.f32 %v991_v14, %v6521_v24  ;;  %v1043_v25 = vld [vmem:[%s13400_s2 + $0xa] sm:$0xff]  ;;  %v6680_v3 = vld [vmem:[%s13400_s2 + $0x1a] sm:$0xff]  ;;  %v6685_v44 = vld [vmem:[%s13400_s2 + $0x22] sm:$0xff]  ;;  %14591 = vst [vmem:[#allocation32_spill] sm:$0xff] %v6744_v56 }
 0x116   :  { %v6666_v26 = vadd.f32 %v992_v53, %v6524_v52  ;;  %v6669_v42 = vadd.f32 %v993_v62, %v6527_v45  ;;  %14579 = vst [vmem:[#allocation41_spill] sm:$0xff] %v6680_v3  ;;  %14580 = vst [vmem:[#allocation21_spill] sm:$0xff] %v6685_v44  ;;  %v6688_v24 = vadd.f32 %v994_v39, %v6530_v47  ;;  %v6712_v47 = vld [vmem:[%s13400_s2 + $0x4a] sm:$0xff]  ;;  %v6734_v13 = vld [vmem:[%s13400_s2 + $0x62] sm:$0xff] }
 0x117   :  { %v6691_v52 = vadd.f32 %v995_v18, %v6533_v41  ;;  %v6694_v45 = vadd.f32 %v996_v60, %v6536_v4  ;;  %v6697_v36 = vadd.f32 %v997_v46, %v6539_v0  ;;  %14583 = vst [vmem:[#allocation28_spill] sm:$0xff] %v6712_v47  ;;  %v6717_v41 = vld [vmem:[%s13400_s2 + $0x52] sm:$0xff]  ;;  %v6723_v43 = vadd.f32 %v999_v38, %v14586_v48  ;;  %v6739_v31 = vld [vmem:[%s13400_s2 + $0x6a] sm:$0xff]  ;;  %v14596_v58 = vld [vmem:[#allocation18_spill] sm:$0xff] }
 0x118   :  { %14584 = vst [vmem:[#allocation29_spill] sm:$0xff] %v6717_v41  ;;  %v14585_v4 = vld [vmem:[#allocation8_spill] sm:$0xff]  ;;  %v6726_v30 = vadd.f32 %v1000_v8, %v14587_v1  ;;  %v6729_v32 = vadd.f32 %v1001_v50, %v14588_v29  ;;  %14589 = vst [vmem:[#allocation30_spill] sm:$0xff] %v6734_v13  ;;  %v14592_v8 = vld [vmem:[#allocation47_spill] sm:$0xff]  ;;  %v6753_v17 = vadd.f32 %v1004_v33, %v14596_v58 }
 0x119   :  { %v6720_v0 = vadd.f32 %v998_v2, %v14585_v4  ;;  %14590 = vst [vmem:[#allocation31_spill] sm:$0xff] %v6739_v31  ;;  %v6747_v11 = vadd.f32 %v1002_v6, %v14592_v8  ;;  %v14594_v50 = vld [vmem:[#allocation15_spill] sm:$0xff]  ;;  %v14598_v14 = vld [vmem:[#allocation20_spill] sm:$0xff]  ;;  %v14609_v2 = vld [vmem:[#allocation14_spill] sm:$0xff] }
 0x11a   :  { %v6750_v63 = vadd.f32 %v1003_v10, %v14594_v50  ;;  %14597 = vst [vmem:[#allocation49_spill] sm:$0xff] %v6753_v17  ;;  %v6756_v53 = vadd.f32 %v1005_v21, %v14598_v14  ;;  %v6761_v62 = vld [vmem:[%s13400_s2 + $0x82] sm:$0xff]  ;;  %v6766_v5 = vld [vmem:[%s13400_s2 + $0x92] sm:$0xff]  ;;  %v6771_v10 = vld [vmem:[%s13400_s2 + $0x9a] sm:$0xff]  ;;  %v6783_v38 = vadd.f32 %v1009_v61, %v14609_v2 }
 0x11b   :  { %14593 = vst [vmem:[#allocation33_spill] sm:$0xff] %v6747_v11  ;;  %14600 = vst [vmem:[#allocation38_spill] sm:$0xff] %v6761_v62  ;;  %v14603_v6 = vld [vmem:[#allocation11_spill] sm:$0xff]  ;;  %v14607_v60 = vld [vmem:[#allocation36_spill] sm:$0xff] }
 0x11c   :  { %14595 = vst [vmem:[#allocation48_spill] sm:$0xff] %v6750_v63  ;;  %14599 = vst [vmem:[#allocation43_spill] sm:$0xff] %v6756_v53  ;;  %v6774_v7 = vadd.f32 %v1006_v23, %v14603_v6  ;;  %v14605_v39 = vld [vmem:[#allocation35_spill] sm:$0xff]  ;;  %v6780_v46 = vadd.f32 %v1008_v22, %v14607_v60  ;;  %v6793_v21 = vld [vmem:[%s13400_s2 + $0xb2] sm:$0xff] }
 0x11d   :  { %14601 = vst [vmem:[#allocation45_spill] sm:$0xff] %v6766_v5  ;;  %14602 = vst [vmem:[#allocation7_spill] sm:$0xff] %v6771_v10  ;;  %v6777_v18 = vadd.f32 %v1007_v19, %v14605_v39  ;;  %v6788_v33 = vld [vmem:[%s13400_s2 + $0xaa] sm:$0xff]  ;;  %v6798_v23 = vld [vmem:[%s13400_s2 + $0xc2] sm:$0xff] }
 0x11e   :  { %14604 = vst [vmem:[#allocation6_spill] sm:$0xff] %v6774_v7  ;;  %14608 = vst [vmem:[#allocation13_spill] sm:$0xff] %v6780_v46  ;;  %v6803_v22 = vld [vmem:[%s13400_s2 + $0xca] sm:$0xff]  ;;  %v6808_v19 = vld [vmem:[%s13400_s2 + $0xda] sm:$0xff] }
 0x11f   :  { %14606 = vst [vmem:[#allocation12_spill] sm:$0xff] %v6777_v18  ;;  %14610 = vst [vmem:[#allocation42_spill] sm:$0xff] %v6783_v38  ;;  %v6813_v61 = vld [vmem:[%s13400_s2 + $0xe2] sm:$0xff]  ;;  %v14617_v4 = vld [vmem:[#allocation17_spill] sm:$0xff] }
 0x120   :  { %14611 = vst [vmem:[#allocation34_spill] sm:$0xff] %v6788_v33  ;;  %14612 = vst [vmem:[#allocation19_spill] sm:$0xff] %v6793_v21  ;;  %v1088_v48 = vmul.f32 %v14617_v4, %v1042_v12  ;;  %v1089_v1 = vmul.f32 %v14617_v4, %v1043_v25  ;;  %v1090_v29 = vmul.f32 %v14617_v4, %v6680_v3  ;;  %v6824_v50 = vld [vmem:[%s13400_s2 + $0xf2] sm:$0xff]  ;;  %v6829_v58 = vld [vmem:[%s13400_s2 + $0xfa] sm:$0xff] }
 0x121   :  { %14613 = vst [vmem:[#allocation23_spill] sm:$0xff] %v6798_v23  ;;  %14614 = vst [vmem:[#allocation39_spill] sm:$0xff] %v6803_v22  ;;  %v1091_v8 = vmul.f32 %v14617_v4, %v6685_v44  ;;  %v6834_v12 = vld [vmem:[%s13400_s2 + $0x10a] sm:$0xff]  ;;  %v1092_v25 = vmul.f32 %v14617_v4, %v6702_v54  ;;  %v1093_v14 = vmul.f32 %v14617_v4, %v6707_v59  ;;  %v6847_v60 = vld [vmem:[%s13400_s2 + $0x112] sm:$0xff] }
 0x122   :  { %14615 = vst [vmem:[#allocation40_spill] sm:$0xff] %v6808_v19  ;;  %14616 = vst [vmem:[#allocation37_spill] sm:$0xff] %v6813_v61  ;;  %v1094_v6 = vmul.f32 %v14617_v4, %v6712_v47  ;;  %v1095_v39 = vmul.f32 %v14617_v4, %v6717_v41  ;;  %v6852_v2 = vld [vmem:[%s13400_s2 + $0x122] sm:$0xff]  ;;  %v6857_v59 = vld [vmem:[%s13400_s2 + $0x12a] sm:$0xff]  ;;  %v1096_v47 = vmul.f32 %v14617_v4, %v6734_v13 }
 0x123   :  { %14618 = vst [vmem:[#allocation10_spill] sm:$0xff] %v6824_v50  ;;  %14619 = vst [vmem:[#allocation44_spill] sm:$0xff] %v6829_v58  ;;  %v1097_v41 = vmul.f32 %v14617_v4, %v6739_v31  ;;  %v1098_v54 = vmul.f32 %v14617_v4, %v6744_v56  ;;  %v1099_v44 = vmul.f32 %v14617_v4, %v6761_v62  ;;  %v6870_v3 = vld [vmem:[%s13400_s2 + $0x13a] sm:$0xff]  ;;  %v6875_v38 = vld [vmem:[%s13400_s2 + $0x142] sm:$0xff] }
 0x124   :  { %14620 = vst [vmem:[#allocation16_spill] sm:$0xff] %v6834_v12  ;;  %14621 = vst [vmem:[#allocation8_spill] sm:$0xff] %v6847_v60  ;;  %v6880_v31 = vld [vmem:[%s13400_s2 + $0x152] sm:$0xff]  ;;  %v1100_v56 = vmul.f32 %v14617_v4, %v6766_v5  ;;  %v1101_v62 = vmul.f32 %v14617_v4, %v6771_v10  ;;  %v1102_v13 = vmul.f32 %v14617_v4, %v6788_v33  ;;  %v6893_v18 = vld [vmem:[%s13400_s2 + $0x15a] sm:$0xff] }
 0x125   :  { %14622 = vst [vmem:[#allocation24_spill] sm:$0xff] %v6852_v2  ;;  %14623 = vst [vmem:[#allocation25_spill] sm:$0xff] %v6857_v59  ;;  %v1103_v46 = vmul.f32 %v14617_v4, %v6793_v21  ;;  %v6898_v7 = vld [vmem:[%s13400_s2 + $0x16a] sm:$0xff]  ;;  %v6903_v10 = vld [vmem:[%s13400_s2 + $0x172] sm:$0xff]  ;;  %v1104_v33 = vmul.f32 %v14617_v4, %v6798_v23  ;;  %v1105_v21 = vmul.f32 %v14617_v4, %v6803_v22 }
 0x126   :  { %14624 = vst [vmem:[#allocation26_spill] sm:$0xff] %v6870_v3  ;;  %14625 = vst [vmem:[#allocation47_spill] sm:$0xff] %v6875_v38  ;;  %v1106_v5 = vmul.f32 %v14617_v4, %v6808_v19  ;;  %v1107_v53 = vmul.f32 %v14617_v4, %v6813_v61  ;;  %v1108_v17 = vmul.f32 %v14617_v4, %v6824_v50 }
 0x127   :  { %14626 = vst [vmem:[#allocation15_spill] sm:$0xff] %v6880_v31  ;;  %14627 = vst [vmem:[#allocation18_spill] sm:$0xff] %v6893_v18  ;;  %v1109_v63 = vmul.f32 %v14617_v4, %v6829_v58  ;;  %v1110_v11 = vmul.f32 %v14617_v4, %v6834_v12  ;;  %v1111_v23 = vmul.f32 %v14617_v4, %v6847_v60 }
 0x128   :  { %14628 = vst [vmem:[#allocation20_spill] sm:$0xff] %v6898_v7  ;;  %14629 = vst [vmem:[#allocation11_spill] sm:$0xff] %v6903_v10  ;;  %v1112_v22 = vmul.f32 %v14617_v4, %v6852_v2  ;;  %v1113_v19 = vmul.f32 %v14617_v4, %v6857_v59  ;;  %v1114_v61 = vmul.f32 %v14617_v4, %v6870_v3 }
 0x129   :  { %v1115_v50 = vmul.f32 %v14617_v4, %v6875_v38  ;;  %v1116_v58 = vmul.f32 %v14617_v4, %v6880_v31  ;;  %v1117_v12 = vmul.f32 %v14617_v4, %v6893_v18  ;;  %v1118_v60 = vmul.f32 %v14617_v4, %v6898_v7 }
 0x12a   :  { %v1119_v2 = vmul.f32 %v14617_v4, %v6903_v10  ;;  %v6938_v59 = vadd.f32 %v1088_v48, %v6624_v27  ;;  %v6941_v3 = vadd.f32 %v1089_v1, %v6627_v55  ;;  %v6944_v38 = vadd.f32 %v1090_v29, %v6630_v57  ;;  %v14652_v1 = vld [vmem:[#allocation29_spill] sm:$0xff] }
 0x12b   :  { %v6947_v31 = vadd.f32 %v1091_v8, %v6633_v20  ;;  %v6950_v18 = vadd.f32 %v1092_v25, %v6636_v51  ;;  %v6953_v7 = vadd.f32 %v1093_v14, %v6639_v35  ;;  %v6956_v4 = vadd.f32 %v1094_v6, %v6642_v37  ;;  %v14653_v8 = vld [vmem:[#allocation30_spill] sm:$0xff]  ;;  %v14655_v25 = vld [vmem:[#allocation32_spill] sm:$0xff] }
 0x12c   :  { %v6959_v27 = vadd.f32 %v1095_v39, %v6645_v9  ;;  %v6962_v55 = vadd.f32 %v1096_v47, %v6648_v15  ;;  %v6965_v57 = vadd.f32 %v1097_v41, %v6651_v16  ;;  %v6968_v20 = vadd.f32 %v1098_v54, %v6654_v40  ;;  %v14636_v41 = vld [vmem:[#allocation43_spill] sm:$0xff]  ;;  %v14656_v6 = vld [vmem:[#allocation38_spill] sm:$0xff] }
 0x12d   :  { %v6971_v51 = vadd.f32 %v1099_v44, %v6657_v49  ;;  %v6974_v35 = vadd.f32 %v1100_v56, %v6660_v28  ;;  %v6977_v37 = vadd.f32 %v1101_v62, %v6663_v34  ;;  %v6980_v9 = vadd.f32 %v1102_v13, %v6666_v26  ;;  %v14647_v62 = vld [vmem:[#allocation46_spill] sm:$0xff] }
 0x12e   :  { %v6983_v15 = vadd.f32 %v1103_v46, %v6669_v42  ;;  %v6986_v16 = vadd.f32 %v1104_v33, %v6688_v24  ;;  %v6989_v40 = vadd.f32 %v1105_v21, %v6691_v52  ;;  %v6992_v49 = vadd.f32 %v1106_v5, %v6694_v45  ;;  %v14630_v24 = vld [vmem:[#allocation33_spill] sm:$0xff]  ;;  %v14632_v45 = vld [vmem:[#allocation48_spill] sm:$0xff]  ;;  %v14649_v21 = vld [vmem:[#allocation22_spill] sm:$0xff] }
 0x12f   :  { %v6995_v28 = vadd.f32 %v1107_v53, %v6697_v36  ;;  %v6998_v34 = vadd.f32 %v1108_v17, %v6720_v0  ;;  %v7001_v26 = vadd.f32 %v1109_v63, %v6723_v43  ;;  %v7004_v42 = vadd.f32 %v1110_v11, %v6726_v30  ;;  %v14634_v36 = vld [vmem:[#allocation49_spill] sm:$0xff]  ;;  %v14638_v43 = vld [vmem:[#allocation6_spill] sm:$0xff]  ;;  %v14640_v30 = vld [vmem:[#allocation12_spill] sm:$0xff] }
 0x130   :  { %v7007_v44 = vadd.f32 %v1111_v23, %v6729_v32  ;;  %v7010_v52 = vadd.f32 %v1112_v22, %v14630_v24  ;;  %v7013_v54 = vadd.f32 %v1113_v19, %v14632_v45  ;;  %v7016_v47 = vadd.f32 %v1114_v61, %v14634_v36  ;;  %v14642_v32 = vld [vmem:[#allocation13_spill] sm:$0xff]  ;;  %v14644_v63 = vld [vmem:[#allocation42_spill] sm:$0xff]  ;;  %v14650_v22 = vld [vmem:[#allocation27_spill] sm:$0xff] }
 0x131   :  { %v7019_v0 = vadd.f32 %v1115_v50, %v14636_v41  ;;  %v7022_v13 = vadd.f32 %v1116_v58, %v14638_v43  ;;  %v7025_v56 = vadd.f32 %v1117_v12, %v14640_v30  ;;  %v7028_v11 = vadd.f32 %v1118_v60, %v14642_v32  ;;  %v14646_v53 = vld [vmem:[#allocation41_spill] sm:$0xff]  ;;  %v14651_v61 = vld [vmem:[#allocation28_spill] sm:$0xff]  ;;  %v14654_v58 = vld [vmem:[#allocation31_spill] sm:$0xff] }
 0x132   :  { %14631 = vst [vmem:[#allocation35_spill] sm:$0xff] %v7010_v52  ;;  %14633 = vst [vmem:[#allocation36_spill] sm:$0xff] %v7013_v54  ;;  %v7031_v17 = vadd.f32 %v1119_v2, %v14644_v63  ;;  %v1154_v5 = vmul.f32 %v14647_v62, %v14646_v53  ;;  %v14648_v46 = vld [vmem:[#allocation21_spill] sm:$0xff]  ;;  %v1156_v23 = vmul.f32 %v14647_v62, %v14649_v21  ;;  %v14658_v24 = vld [vmem:[#allocation7_spill] sm:$0xff] }
 0x133   :  { %14635 = vst [vmem:[#allocation14_spill] sm:$0xff] %v7016_v47  ;;  %14637 = vst [vmem:[#allocation17_spill] sm:$0xff] %v7019_v0  ;;  %v1155_v33 = vmul.f32 %v14647_v62, %v14648_v46  ;;  %v1157_v19 = vmul.f32 %v14647_v62, %v14650_v22  ;;  %v1158_v48 = vmul.f32 %v14647_v62, %v14651_v61  ;;  %v14657_v60 = vld [vmem:[#allocation45_spill] sm:$0xff]  ;;  %v14659_v36 = vld [vmem:[#allocation34_spill] sm:$0xff] }
 0x134   :  { %14639 = vst [vmem:[#allocation33_spill] sm:$0xff] %v7022_v13  ;;  %14641 = vst [vmem:[#allocation48_spill] sm:$0xff] %v7025_v56  ;;  %v1159_v29 = vmul.f32 %v14647_v62, %v14652_v1  ;;  %v1160_v50 = vmul.f32 %v14647_v62, %v14653_v8  ;;  %v1161_v12 = vmul.f32 %v14647_v62, %v14654_v58  ;;  %v14660_v43 = vld [vmem:[#allocation19_spill] sm:$0xff]  ;;  %v14669_v1 = vld [vmem:[#allocation16_spill] sm:$0xff] }
 0x135   :  { %14643 = vst [vmem:[#allocation49_spill] sm:$0xff] %v7028_v11  ;;  %14645 = vst [vmem:[#allocation43_spill] sm:$0xff] %v7031_v17  ;;  %v1162_v14 = vmul.f32 %v14647_v62, %v14655_v25  ;;  %v1163_v39 = vmul.f32 %v14647_v62, %v14656_v6  ;;  %v1164_v2 = vmul.f32 %v14647_v62, %v14657_v60  ;;  %v14661_v32 = vld [vmem:[#allocation23_spill] sm:$0xff]  ;;  %v14670_v22 = vld [vmem:[#allocation8_spill] sm:$0xff] }
 0x136   :  { %v1165_v45 = vmul.f32 %v14647_v62, %v14658_v24  ;;  %v1166_v41 = vmul.f32 %v14647_v62, %v14659_v36  ;;  %v1167_v30 = vmul.f32 %v14647_v62, %v14660_v43  ;;  %v1168_v63 = vmul.f32 %v14647_v62, %v14661_v32  ;;  %v14662_v53 = vld [vmem:[#allocation39_spill] sm:$0xff]  ;;  %v14665_v36 = vld [vmem:[#allocation40_spill] sm:$0xff]  ;;  %v14666_v43 = vld [vmem:[#allocation37_spill] sm:$0xff] }
 0x137   :  { %v1169_v46 = vmul.f32 %v14647_v62, %v14662_v53  ;;  %v7068_v6 = vld [vmem:[%s13400_s2 + $0x182] sm:$0xff]  ;;  %v7073_v24 = vld [vmem:[%s13400_s2 + $0x18a] sm:$0xff]  ;;  %v1170_v60 = vmul.f32 %v14647_v62, %v14665_v36  ;;  %v1171_v25 = vmul.f32 %v14647_v62, %v14666_v43  ;;  %v1174_v61 = vmul.f32 %v14647_v62, %v14669_v1  ;;  %v14672_v56 = vld [vmem:[#allocation25_spill] sm:$0xff] }
 0x138   :  { %14663 = vst [vmem:[#allocation6_spill] sm:$0xff] %v7068_v6  ;;  %14664 = vst [vmem:[#allocation12_spill] sm:$0xff] %v7073_v24  ;;  %v14667_v32 = vld [vmem:[#allocation10_spill] sm:$0xff]  ;;  %v14668_v53 = vld [vmem:[#allocation44_spill] sm:$0xff]  ;;  %v1175_v21 = vmul.f32 %v14647_v62, %v14670_v22  ;;  %v1177_v36 = vmul.f32 %v14647_v62, %v14672_v56  ;;  %v1184_v56 = vmul.f32 %v14647_v62, %v7068_v6 }
 0x139   :  { %v1172_v58 = vmul.f32 %v14647_v62, %v14667_v32  ;;  %v1173_v8 = vmul.f32 %v14647_v62, %v14668_v53  ;;  %v14671_v17 = vld [vmem:[#allocation24_spill] sm:$0xff]  ;;  %v14673_v13 = vld [vmem:[#allocation26_spill] sm:$0xff]  ;;  %v14674_v0 = vld [vmem:[#allocation47_spill] sm:$0xff]  ;;  %v7123_v6 = vadd.f32 %v1159_v29, %v6953_v7  ;;  %v7144_v7 = vadd.f32 %v1166_v41, %v6974_v35 }
 0x13a   :  { %v1176_v11 = vmul.f32 %v14647_v62, %v14671_v17  ;;  %v1178_v43 = vmul.f32 %v14647_v62, %v14673_v13  ;;  %v1179_v32 = vmul.f32 %v14647_v62, %v14674_v0  ;;  %v14675_v47 = vld [vmem:[#allocation15_spill] sm:$0xff]  ;;  %v14676_v54 = vld [vmem:[#allocation18_spill] sm:$0xff]  ;;  %v14677_v52 = vld [vmem:[#allocation20_spill] sm:$0xff]  ;;  %v1183_v17 = vmul.f32 %v14647_v62, %v6903_v10 }
 0x13b   :  { %v1180_v53 = vmul.f32 %v14647_v62, %v14675_v47  ;;  %v1181_v1 = vmul.f32 %v14647_v62, %v14676_v54  ;;  %v1182_v22 = vmul.f32 %v14647_v62, %v14677_v52  ;;  %v1185_v13 = vmul.f32 %v14647_v62, %v7073_v24 }
 0x13c   :  { %v7108_v0 = vadd.f32 %v1154_v5, %v6938_v59  ;;  %v7111_v47 = vadd.f32 %v1155_v33, %v6941_v3  ;;  %v7114_v54 = vadd.f32 %v1156_v23, %v6944_v38  ;;  %v7117_v52 = vadd.f32 %v1157_v19, %v6947_v31 }
 0x13d   :  { %v7120_v10 = vadd.f32 %v1158_v48, %v6950_v18  ;;  %v7126_v62 = vadd.f32 %v1160_v50, %v6956_v4  ;;  %v7129_v59 = vadd.f32 %v1161_v12, %v6959_v27  ;;  %v7132_v3 = vadd.f32 %v1162_v14, %v6962_v55  ;;  %v14692_v48 = vld [vmem:[#allocation43_spill] sm:$0xff]  ;;  %v14695_v50 = vld [vmem:[#allocation9_spill] sm:$0xff] }
 0x13e   :  { %v7135_v38 = vadd.f32 %v1163_v39, %v6965_v57  ;;  %v7138_v31 = vadd.f32 %v1164_v2, %v6968_v20  ;;  %v7141_v18 = vadd.f32 %v1165_v45, %v6971_v51  ;;  %v7147_v4 = vadd.f32 %v1167_v30, %v6977_v37  ;;  %v14696_v12 = vld [vmem:[#allocation27_spill] sm:$0xff] }
 0x13f   :  { %v7150_v27 = vadd.f32 %v1168_v63, %v6980_v9  ;;  %v7153_v55 = vadd.f32 %v1169_v46, %v6983_v15  ;;  %v7156_v57 = vadd.f32 %v1170_v60, %v6986_v16  ;;  %v7159_v20 = vadd.f32 %v1171_v25, %v6989_v40  ;;  %v14678_v40 = vld [vmem:[#allocation35_spill] sm:$0xff] }
 0x140   :  { %v7162_v51 = vadd.f32 %v1172_v58, %v6992_v49  ;;  %v7165_v35 = vadd.f32 %v1173_v8, %v6995_v28  ;;  %v7168_v37 = vadd.f32 %v1174_v61, %v6998_v34  ;;  %v7171_v9 = vadd.f32 %v1175_v21, %v7001_v26  ;;  %v14680_v49 = vld [vmem:[#allocation36_spill] sm:$0xff]  ;;  %v14682_v28 = vld [vmem:[#allocation14_spill] sm:$0xff]  ;;  %v14684_v34 = vld [vmem:[#allocation17_spill] sm:$0xff] }
 0x141   :  { %v7174_v15 = vadd.f32 %v1176_v11, %v7004_v42  ;;  %v7177_v16 = vadd.f32 %v1177_v36, %v7007_v44  ;;  %v7180_v5 = vadd.f32 %v1178_v43, %v14678_v40  ;;  %v7183_v33 = vadd.f32 %v1179_v32, %v14680_v49  ;;  %v14686_v26 = vld [vmem:[#allocation33_spill] sm:$0xff]  ;;  %v14688_v42 = vld [vmem:[#allocation48_spill] sm:$0xff]  ;;  %v14694_v8 = vld [vmem:[#allocation22_spill] sm:$0xff] }
 0x142   :  { %v7186_v23 = vadd.f32 %v1180_v53, %v14682_v28  ;;  %v7189_v19 = vadd.f32 %v1181_v1, %v14684_v34  ;;  %v7192_v21 = vadd.f32 %v1182_v22, %v14686_v26  ;;  %v7195_v11 = vadd.f32 %v1183_v17, %v14688_v42  ;;  %v14690_v44 = vld [vmem:[#allocation49_spill] sm:$0xff]  ;;  %v14697_v1 = vld [vmem:[#allocation28_spill] sm:$0xff]  ;;  %v14699_v17 = vld [vmem:[#allocation30_spill] sm:$0xff] }
 0x143   :  { %14679 = vst [vmem:[#allocation13_spill] sm:$0xff] %v7180_v5  ;;  %14681 = vst [vmem:[#allocation42_spill] sm:$0xff] %v7183_v33  ;;  %v7198_v61 = vadd.f32 %v1184_v56, %v14690_v44  ;;  %v7201_v29 = vadd.f32 %v1185_v13, %v14692_v48  ;;  %v1220_v58 = vmul.f32 %v14695_v50, %v14694_v8  ;;  %v14698_v22 = vld [vmem:[#allocation29_spill] sm:$0xff]  ;;  %v14700_v56 = vld [vmem:[#allocation31_spill] sm:$0xff] }
 0x144   :  { %14683 = vst [vmem:[#allocation41_spill] sm:$0xff] %v7186_v23  ;;  %14685 = vst [vmem:[#allocation46_spill] sm:$0xff] %v7189_v19  ;;  %v1221_v25 = vmul.f32 %v14695_v50, %v14696_v12  ;;  %v1222_v14 = vmul.f32 %v14695_v50, %v14697_v1  ;;  %v1223_v39 = vmul.f32 %v14695_v50, %v14698_v22  ;;  %v14701_v13 = vld [vmem:[#allocation32_spill] sm:$0xff]  ;;  %v14702_v36 = vld [vmem:[#allocation38_spill] sm:$0xff] }
 0x145   :  { %14687 = vst [vmem:[#allocation21_spill] sm:$0xff] %v7192_v21  ;;  %14689 = vst [vmem:[#allocation35_spill] sm:$0xff] %v7195_v11  ;;  %v1224_v60 = vmul.f32 %v14695_v50, %v14699_v17  ;;  %v1225_v2 = vmul.f32 %v14695_v50, %v14700_v56  ;;  %v1226_v45 = vmul.f32 %v14695_v50, %v14701_v13  ;;  %v14703_v43 = vld [vmem:[#allocation45_spill] sm:$0xff]  ;;  %v14704_v32 = vld [vmem:[#allocation7_spill] sm:$0xff] }
 0x146   :  { %14691 = vst [vmem:[#allocation36_spill] sm:$0xff] %v7198_v61  ;;  %14693 = vst [vmem:[#allocation14_spill] sm:$0xff] %v7201_v29  ;;  %v1227_v41 = vmul.f32 %v14695_v50, %v14702_v36  ;;  %v1228_v30 = vmul.f32 %v14695_v50, %v14703_v43  ;;  %v1229_v63 = vmul.f32 %v14695_v50, %v14704_v32  ;;  %v14705_v53 = vld [vmem:[#allocation34_spill] sm:$0xff]  ;;  %v14706_v40 = vld [vmem:[#allocation19_spill] sm:$0xff] }
 0x147   :  { %v1230_v46 = vmul.f32 %v14695_v50, %v14705_v53  ;;  %v1231_v49 = vmul.f32 %v14695_v50, %v14706_v40  ;;  %v14707_v28 = vld [vmem:[#allocation23_spill] sm:$0xff]  ;;  %v14709_v44 = vld [vmem:[#allocation40_spill] sm:$0xff]  ;;  %v14710_v8 = vld [vmem:[#allocation37_spill] sm:$0xff]  ;;  %v7290_v5 = vadd.f32 %v1222_v14, %v7114_v54 }
 0x148   :  { %v1232_v34 = vmul.f32 %v14695_v50, %v14707_v28  ;;  %v14708_v26 = vld [vmem:[#allocation39_spill] sm:$0xff]  ;;  %v1234_v48 = vmul.f32 %v14695_v50, %v14709_v44  ;;  %v1235_v12 = vmul.f32 %v14695_v50, %v14710_v8  ;;  %v7238_v32 = vld [vmem:[%s13400_s2 + $0x19a] sm:$0xff]  ;;  %v14715_v44 = vld [vmem:[#allocation16_spill] sm:$0xff]  ;;  %v7310_v54 = vadd.f32 %v1228_v30, %v7132_v3 }
 0x149   :  { %v1233_v42 = vmul.f32 %v14695_v50, %v14708_v26  ;;  %14711 = vst [vmem:[#allocation17_spill] sm:$0xff] %v7238_v32  ;;  %v7243_v40 = vld [vmem:[%s13400_s2 + $0x1a2] sm:$0xff]  ;;  %v14714_v26 = vld [vmem:[#allocation44_spill] sm:$0xff]  ;;  %v1238_v36 = vmul.f32 %v14695_v50, %v14715_v44  ;;  %v14718_v22 = vld [vmem:[#allocation25_spill] sm:$0xff] }
 0x14a   :  { %14712 = vst [vmem:[#allocation33_spill] sm:$0xff] %v7243_v40  ;;  %v14713_v28 = vld [vmem:[#allocation10_spill] sm:$0xff]  ;;  %v1237_v43 = vmul.f32 %v14695_v50, %v14714_v26  ;;  %v14716_v8 = vld [vmem:[#allocation8_spill] sm:$0xff]  ;;  %v1241_v1 = vmul.f32 %v14695_v50, %v14718_v22  ;;  %v14720_v11 = vld [vmem:[#allocation47_spill] sm:$0xff]  ;;  %v7331_v3 = vadd.f32 %v1235_v12, %v7153_v55 }
 0x14b   :  { %v1236_v53 = vmul.f32 %v14695_v50, %v14713_v28  ;;  %v1239_v13 = vmul.f32 %v14695_v50, %v14716_v8  ;;  %v14717_v56 = vld [vmem:[#allocation24_spill] sm:$0xff]  ;;  %v14719_v29 = vld [vmem:[#allocation26_spill] sm:$0xff]  ;;  %v1243_v28 = vmul.f32 %v14695_v50, %v14720_v11  ;;  %v14721_v26 = vld [vmem:[#allocation15_spill] sm:$0xff]  ;;  %v1249_v11 = vmul.f32 %v14695_v50, %v7073_v24 }
 0x14c   :  { %v1240_v17 = vmul.f32 %v14695_v50, %v14717_v56  ;;  %v1242_v61 = vmul.f32 %v14695_v50, %v14719_v29  ;;  %v1244_v44 = vmul.f32 %v14695_v50, %v14721_v26  ;;  %v14722_v21 = vld [vmem:[#allocation18_spill] sm:$0xff]  ;;  %v14723_v19 = vld [vmem:[#allocation20_spill] sm:$0xff]  ;;  %v14724_v23 = vld [vmem:[#allocation11_spill] sm:$0xff]  ;;  %v1250_v26 = vmul.f32 %v14695_v50, %v7238_v32 }
 0x14d   :  { %v1245_v8 = vmul.f32 %v14695_v50, %v14722_v21  ;;  %v1246_v56 = vmul.f32 %v14695_v50, %v14723_v19  ;;  %v1247_v22 = vmul.f32 %v14695_v50, %v14724_v23  ;;  %v14725_v29 = vld [vmem:[#allocation6_spill] sm:$0xff]  ;;  %v1251_v21 = vmul.f32 %v14695_v50, %v7243_v40  ;;  %v14749_v30 = vld [vmem:[#allocation29_spill] sm:$0xff] }
 0x14e   :  { %v1248_v33 = vmul.f32 %v14695_v50, %v14725_v29  ;;  %v7284_v19 = vadd.f32 %v1220_v58, %v7108_v0  ;;  %v7287_v23 = vadd.f32 %v1221_v25, %v7111_v47  ;;  %v7293_v29 = vadd.f32 %v1223_v39, %v7117_v52  ;;  %v14731_v25 = vld [vmem:[#allocation42_spill] sm:$0xff] }
 0x14f   :  { %v7298_v32 = vadd.f32 %v1224_v60, %v7120_v10  ;;  %v7301_v50 = vadd.f32 %v1225_v2, %v7123_v6  ;;  %v7304_v0 = vadd.f32 %v1226_v45, %v7126_v62  ;;  %v7307_v47 = vadd.f32 %v1227_v41, %v7129_v59 }
 0x150   :  { %v7313_v52 = vadd.f32 %v1229_v63, %v7135_v38  ;;  %v7316_v58 = vadd.f32 %v1230_v46, %v7138_v31  ;;  %v7319_v10 = vadd.f32 %v1231_v49, %v7141_v18  ;;  %v7322_v6 = vadd.f32 %v1232_v34, %v7144_v7  ;;  %v14750_v63 = vld [vmem:[#allocation30_spill] sm:$0xff]  ;;  %v14752_v49 = vld [vmem:[#allocation32_spill] sm:$0xff] }
 0x151   :  { %v7325_v62 = vadd.f32 %v1233_v42, %v7147_v4  ;;  %v7328_v59 = vadd.f32 %v1234_v48, %v7150_v27  ;;  %v7334_v38 = vadd.f32 %v1236_v53, %v7156_v57  ;;  %v7337_v31 = vadd.f32 %v1237_v43, %v7159_v20  ;;  %v14729_v20 = vld [vmem:[#allocation13_spill] sm:$0xff]  ;;  %v14753_v34 = vld [vmem:[#allocation38_spill] sm:$0xff] }
 0x152   :  { %v7340_v18 = vadd.f32 %v1238_v36, %v7162_v51  ;;  %v7343_v7 = vadd.f32 %v1239_v13, %v7165_v35  ;;  %v7346_v4 = vadd.f32 %v1240_v17, %v7168_v37  ;;  %v7349_v27 = vadd.f32 %v1241_v1, %v7171_v9  ;;  %v14733_v35 = vld [vmem:[#allocation41_spill] sm:$0xff]  ;;  %v14735_v17 = vld [vmem:[#allocation46_spill] sm:$0xff] }
 0x153   :  { %v7352_v55 = vadd.f32 %v1242_v61, %v7174_v15  ;;  %v7355_v57 = vadd.f32 %v1243_v28, %v7177_v16  ;;  %v7358_v51 = vadd.f32 %v1244_v44, %v14729_v20  ;;  %v7361_v14 = vadd.f32 %v1245_v8, %v14731_v25  ;;  %v14737_v9 = vld [vmem:[#allocation21_spill] sm:$0xff]  ;;  %v14739_v15 = vld [vmem:[#allocation35_spill] sm:$0xff]  ;;  %v14741_v16 = vld [vmem:[#allocation36_spill] sm:$0xff] }
 0x154   :  { %14726 = vst [vmem:[#allocation48_spill] sm:$0xff] %v7349_v27  ;;  %v7364_v39 = vadd.f32 %v1246_v56, %v14733_v35  ;;  %v1285_v37 = vstv %s7261_s23  ;;  %v7368_v60 = vadd.f32 %v1247_v22, %v14735_v17  ;;  %v7371_v1 = vadd.f32 %v1248_v33, %v14737_v9  ;;  %v14743_v13 = vld [vmem:[#allocation14_spill] sm:$0xff]  ;;  %v14748_v22 = vld [vmem:[#allocation28_spill] sm:$0xff]  ;;  %v14755_v44 = vld [vmem:[#allocation7_spill] sm:$0xff]  ;;  %s10201_s23 = sld [smem:[#allocation3 + $0x27]] }
 0x155   :  { %14727 = vst [vmem:[#allocation49_spill] sm:$0xff] %v7352_v55  ;;  %14728 = vst [vmem:[#allocation43_spill] sm:$0xff] %v7355_v57  ;;  %v7374_v61 = vadd.f32 %v1249_v11, %v14739_v15  ;;  %v7377_v2 = vadd.f32 %v1250_v26, %v14741_v16  ;;  %v7380_v45 = vadd.f32 %v1251_v21, %v14743_v13  ;;  %v7383_v36 = vstv %s7271_s24  ;;  %v14751_v11 = vld [vmem:[#allocation31_spill] sm:$0xff]  ;;  %v14754_v21 = vld [vmem:[#allocation45_spill] sm:$0xff]  ;;  %s10211_s24 = sld [smem:[#allocation3 + $0x2e]] }
 0x156   :  { %14730 = vst [vmem:[#allocation22_spill] sm:$0xff] %v7358_v51  ;;  %14732 = vst [vmem:[#allocation9_spill] sm:$0xff] %v7361_v14  ;;  %v7386_v56 = vstv %s7281_s25  ;;  %v7389_v41 = vstv %s7295_s26  ;;  %v1286_v43 = vmul.f32 %v1285_v37, %v14748_v22  ;;  %v1287_v33 = vmul.f32 %v1285_v37, %v14749_v30  ;;  %v14756_v8 = vld [vmem:[#allocation34_spill] sm:$0xff]  ;;  %v14757_v20 = vld [vmem:[#allocation19_spill] sm:$0xff]  ;;  %s10221_s25 = sld [smem:[#allocation3 + $0x5]] }
 0x157   :  { %14734 = vst [vmem:[#allocation27_spill] sm:$0xff] %v7364_v39  ;;  %14736 = vst [vmem:[#allocation13_spill] sm:$0xff] %v7368_v60  ;;  %v1288_v53 = vmul.f32 %v1285_v37, %v14750_v63  ;;  %v1289_v46 = vmul.f32 %v1285_v37, %v14751_v11  ;;  %v1290_v28 = vmul.f32 %v1285_v37, %v14752_v49  ;;  %v14758_v35 = vld [vmem:[#allocation23_spill] sm:$0xff]  ;;  %v14760_v16 = vld [vmem:[#allocation40_spill] sm:$0xff]  ;;  %s10235_s26 = sld [smem:[#allocation3 + $0xc]] }
 0x158   :  { %14738 = vst [vmem:[#allocation42_spill] sm:$0xff] %v7371_v1  ;;  %14740 = vst [vmem:[#allocation41_spill] sm:$0xff] %v7374_v61  ;;  %v1291_v26 = vmul.f32 %v1285_v37, %v14753_v34  ;;  %v1292_v42 = vmul.f32 %v1285_v37, %v14754_v21  ;;  %v1293_v48 = vmul.f32 %v1285_v37, %v14755_v44  ;;  %v14759_v9 = vld [vmem:[#allocation39_spill] sm:$0xff]  ;;  %v14761_v22 = vld [vmem:[#allocation37_spill] sm:$0xff] }
 0x159   :  { %14742 = vst [vmem:[#allocation46_spill] sm:$0xff] %v7377_v2  ;;  %14744 = vst [vmem:[#allocation21_spill] sm:$0xff] %v7380_v45  ;;  %v1294_v12 = vmul.f32 %v1285_v37, %v14756_v8  ;;  %v1295_v25 = vmul.f32 %v1285_v37, %v14757_v20  ;;  %v1296_v17 = vmul.f32 %v1285_v37, %v14758_v35  ;;  %v14763_v49 = vld [vmem:[#allocation44_spill] sm:$0xff]  ;;  %v7415_v20 = vld [vmem:[%s13400_s2 + $0x1ba] sm:$0xff] }
 0x15a   :  { %14745 = vst [vmem:[#allocation35_spill] sm:$0xff] %v7383_v36  ;;  %14746 = vst [vmem:[#allocation36_spill] sm:$0xff] %v7386_v56  ;;  %v1297_v15 = vmul.f32 %v1285_v37, %v14759_v9  ;;  %v1298_v13 = vmul.f32 %v1285_v37, %v14760_v16  ;;  %v1299_v30 = vmul.f32 %v1285_v37, %v14761_v22  ;;  %v7410_v44 = vld [vmem:[%s13400_s2 + $0x1b2] sm:$0xff]  ;;  %v14770_v36 = vld [vmem:[#allocation26_spill] sm:$0xff] }
 0x15b   :  { %14747 = vst [vmem:[#allocation14_spill] sm:$0xff] %v7389_v41  ;;  %v14762_v41 = vld [vmem:[#allocation10_spill] sm:$0xff]  ;;  %v1301_v34 = vmul.f32 %v1285_v37, %v14763_v49  ;;  %14764 = vst [vmem:[#allocation28_spill] sm:$0xff] %v7410_v44  ;;  %v14766_v35 = vld [vmem:[#allocation16_spill] sm:$0xff]  ;;  %v1306_v49 = vmul.f32 %v1285_v37, %v14770_v36  ;;  %v1316_v36 = vmul.f32 %v1285_v37, %v7410_v44 }
 0x15c   :  { %v1300_v56 = vmul.f32 %v1285_v37, %v14762_v41  ;;  %14765 = vst [vmem:[#allocation29_spill] sm:$0xff] %v7415_v20  ;;  %v1302_v9 = vmul.f32 %v1285_v37, %v14766_v35  ;;  %v14767_v8 = vld [vmem:[#allocation8_spill] sm:$0xff]  ;;  %v14769_v11 = vld [vmem:[#allocation25_spill] sm:$0xff]  ;;  %v14771_v63 = vld [vmem:[#allocation47_spill] sm:$0xff] }
 0x15d   :  { %v1303_v16 = vmul.f32 %v1285_v37, %v14767_v8  ;;  %v14768_v21 = vld [vmem:[#allocation24_spill] sm:$0xff]  ;;  %v1305_v41 = vmul.f32 %v1285_v37, %v14769_v11  ;;  %v1307_v45 = vmul.f32 %v1285_v37, %v14771_v63  ;;  %v14772_v2 = vld [vmem:[#allocation15_spill] sm:$0xff]  ;;  %v14773_v1 = vld [vmem:[#allocation18_spill] sm:$0xff]  ;;  %v1313_v8 = vmul.f32 %v1285_v37, %v7073_v24 }
 0x15e   :  { %v1304_v22 = vmul.f32 %v1285_v37, %v14768_v21  ;;  %v1308_v61 = vmul.f32 %v1285_v37, %v14772_v2  ;;  %v1309_v60 = vmul.f32 %v1285_v37, %v14773_v1  ;;  %v14774_v39 = vld [vmem:[#allocation20_spill] sm:$0xff]  ;;  %v14775_v51 = vld [vmem:[#allocation11_spill] sm:$0xff]  ;;  %v14776_v55 = vld [vmem:[#allocation6_spill] sm:$0xff]  ;;  %v1315_v11 = vmul.f32 %v1285_v37, %v7243_v40 }
 0x15f   :  { %v1310_v14 = vmul.f32 %v1285_v37, %v14774_v39  ;;  %v1311_v57 = vmul.f32 %v1285_v37, %v14775_v51  ;;  %v1312_v35 = vmul.f32 %v1285_v37, %v14776_v55  ;;  %v14777_v27 = vld [vmem:[#allocation17_spill] sm:$0xff]  ;;  %v1317_v63 = vmul.f32 %v1285_v37, %v7415_v20 }
 0x160   :  { %v1314_v21 = vmul.f32 %v1285_v37, %v14777_v27  ;;  %v7434_v2 = vadd.f32 %v1286_v43, %v7284_v19  ;;  %v7437_v1 = vadd.f32 %v1287_v33, %v7287_v23  ;;  %v7440_v51 = vadd.f32 %v1288_v53, %v7290_v5 }
 0x161   :  { %v7443_v55 = vadd.f32 %v1289_v46, %v7293_v29  ;;  %v7446_v27 = vadd.f32 %v1290_v28, %v7298_v32  ;;  %v7449_v40 = vadd.f32 %v1291_v26, %v7301_v50  ;;  %v7452_v37 = vadd.f32 %v1292_v42, %v7304_v0 }
 0x162   :  { %v7455_v19 = vadd.f32 %v1293_v48, %v7307_v47  ;;  %v7458_v23 = vadd.f32 %v1294_v12, %v7310_v54  ;;  %v7461_v5 = vadd.f32 %v1295_v25, %v7313_v52  ;;  %v7464_v29 = vadd.f32 %v1296_v17, %v7316_v58  ;;  %v14798_v48 = vld [vmem:[#allocation35_spill] sm:$0xff] }
 0x163   :  { %v7467_v32 = vadd.f32 %v1297_v15, %v7319_v10  ;;  %v7470_v50 = vadd.f32 %v1298_v13, %v7322_v6  ;;  %v7473_v0 = vadd.f32 %v1299_v30, %v7325_v62  ;;  %v7476_v47 = vadd.f32 %v1300_v56, %v7328_v59  ;;  %v14778_v59 = vld [vmem:[#allocation48_spill] sm:$0xff]  ;;  %v14799_v25 = vld [vmem:[#allocation31_spill] sm:$0xff] }
 0x164   :  { %v7479_v54 = vadd.f32 %v1301_v34, %v7331_v3  ;;  %v7482_v52 = vadd.f32 %v1302_v9, %v7334_v38  ;;  %v7485_v58 = vadd.f32 %v1303_v16, %v7337_v31  ;;  %v7488_v10 = vadd.f32 %v1304_v22, %v7340_v18  ;;  %v14779_v3 = vld [vmem:[#allocation49_spill] sm:$0xff]  ;;  %v14780_v38 = vld [vmem:[#allocation43_spill] sm:$0xff]  ;;  %v14781_v31 = vld [vmem:[#allocation22_spill] sm:$0xff] }
 0x165   :  { %v7491_v6 = vadd.f32 %v1305_v41, %v7343_v7  ;;  %v7494_v62 = vadd.f32 %v1306_v49, %v7346_v4  ;;  %v7497_v56 = vadd.f32 %v1307_v45, %v14778_v59  ;;  %v7500_v43 = vadd.f32 %v1308_v61, %v14779_v3  ;;  %v14783_v18 = vld [vmem:[#allocation9_spill] sm:$0xff]  ;;  %v14785_v7 = vld [vmem:[#allocation27_spill] sm:$0xff]  ;;  %v14789_v45 = vld [vmem:[#allocation42_spill] sm:$0xff] }
 0x166   :  { %v7503_v33 = vadd.f32 %v1309_v60, %v14780_v38  ;;  %v7506_v53 = vadd.f32 %v1310_v14, %v14781_v31  ;;  %v7509_v46 = vadd.f32 %v1311_v57, %v14783_v18  ;;  %v7512_v41 = vadd.f32 %v1312_v35, %v14785_v7  ;;  %v14787_v4 = vld [vmem:[#allocation13_spill] sm:$0xff]  ;;  %v14793_v60 = vld [vmem:[#allocation46_spill] sm:$0xff]  ;;  %v14805_v22 = vld [vmem:[#allocation19_spill] sm:$0xff] }
 0x167   :  { %v7515_v49 = vadd.f32 %v1313_v8, %v14787_v4  ;;  %v7518_v28 = vadd.f32 %v1314_v21, %v14789_v45  ;;  %v14791_v61 = vld [vmem:[#allocation41_spill] sm:$0xff]  ;;  %v7524_v26 = vadd.f32 %v1316_v36, %v14793_v60  ;;  %v14797_v57 = vld [vmem:[#allocation30_spill] sm:$0xff]  ;;  %v1353_v35 = vmul.f32 %v14798_v48, %v14799_v25  ;;  %v14800_v8 = vld [vmem:[#allocation32_spill] sm:$0xff] }
 0x168   :  { %14782 = vst [vmem:[#allocation48_spill] sm:$0xff] %v7506_v53  ;;  %14784 = vst [vmem:[#allocation49_spill] sm:$0xff] %v7509_v46  ;;  %v7521_v34 = vadd.f32 %v1315_v11, %v14791_v61  ;;  %v14795_v14 = vld [vmem:[#allocation21_spill] sm:$0xff]  ;;  %v1352_v12 = vmul.f32 %v14798_v48, %v14797_v57  ;;  %v1354_v17 = vmul.f32 %v14798_v48, %v14800_v8  ;;  %v14801_v21 = vld [vmem:[#allocation38_spill] sm:$0xff] }
 0x169   :  { %14786 = vst [vmem:[#allocation43_spill] sm:$0xff] %v7512_v41  ;;  %14788 = vst [vmem:[#allocation22_spill] sm:$0xff] %v7515_v49  ;;  %v7527_v42 = vadd.f32 %v1317_v63, %v14795_v14  ;;  %v1355_v9 = vmul.f32 %v14798_v48, %v14801_v21  ;;  %v14802_v11 = vld [vmem:[#allocation45_spill] sm:$0xff]  ;;  %v14803_v36 = vld [vmem:[#allocation7_spill] sm:$0xff]  ;;  %v1359_v30 = vmul.f32 %v14798_v48, %v14805_v22 }
 0x16a   :  { %14790 = vst [vmem:[#allocation9_spill] sm:$0xff] %v7518_v28  ;;  %14792 = vst [vmem:[#allocation27_spill] sm:$0xff] %v7521_v34  ;;  %v1356_v15 = vmul.f32 %v14798_v48, %v14802_v11  ;;  %v1357_v16 = vmul.f32 %v14798_v48, %v14803_v36  ;;  %v14804_v63 = vld [vmem:[#allocation34_spill] sm:$0xff]  ;;  %v14806_v59 = vld [vmem:[#allocation23_spill] sm:$0xff]  ;;  %v1374_v28 = vmul.f32 %v14798_v48, %v14774_v39 }
 0x16b   :  { %14794 = vst [vmem:[#allocation13_spill] sm:$0xff] %v7524_v26  ;;  %14796 = vst [vmem:[#allocation42_spill] sm:$0xff] %v7527_v42  ;;  %v1358_v13 = vmul.f32 %v14798_v48, %v14804_v63  ;;  %v1360_v3 = vmul.f32 %v14798_v48, %v14806_v59  ;;  %v14807_v38 = vld [vmem:[#allocation39_spill] sm:$0xff]  ;;  %v14808_v18 = vld [vmem:[#allocation40_spill] sm:$0xff]  ;;  %v1381_v39 = vmul.f32 %v14798_v48, %v7415_v20 }
 0x16c   :  { %v1361_v31 = vmul.f32 %v14798_v48, %v14807_v38  ;;  %v1362_v7 = vmul.f32 %v14798_v48, %v14808_v18  ;;  %v14809_v4 = vld [vmem:[#allocation37_spill] sm:$0xff]  ;;  %v14810_v61 = vld [vmem:[#allocation10_spill] sm:$0xff]  ;;  %v14811_v14 = vld [vmem:[#allocation44_spill] sm:$0xff]  ;;  %v7616_v20 = vadd.f32 %v1356_v15, %v7446_v27 }
 0x16d   :  { %v1363_v45 = vmul.f32 %v14798_v48, %v14809_v4  ;;  %v1364_v60 = vmul.f32 %v14798_v48, %v14810_v61  ;;  %v1365_v57 = vmul.f32 %v14798_v48, %v14811_v14  ;;  %v14812_v25 = vld [vmem:[#allocation16_spill] sm:$0xff]  ;;  %v14817_v14 = vld [vmem:[#allocation25_spill] sm:$0xff]  ;;  %v14820_v8 = vld [vmem:[#allocation15_spill] sm:$0xff] }
 0x16e   :  { %v1366_v22 = vmul.f32 %v14798_v48, %v14812_v25  ;;  %v14813_v63 = vld [vmem:[#allocation8_spill] sm:$0xff]  ;;  %v1369_v36 = vmul.f32 %v14798_v48, %v14817_v14  ;;  %v14818_v25 = vld [vmem:[#allocation26_spill] sm:$0xff]  ;;  %v1372_v42 = vmul.f32 %v14798_v48, %v14820_v8  ;;  %v14822_v49 = vld [vmem:[#allocation11_spill] sm:$0xff] }
 0x16f   :  { %v1367_v59 = vmul.f32 %v14798_v48, %v14813_v63  ;;  %v7564_v38 = vld [vmem:[%s13400_s2 + $0x1ca] sm:$0xff]  ;;  %v7569_v4 = vld [vmem:[%s13400_s2 + $0x1d2] sm:$0xff]  ;;  %v1370_v11 = vmul.f32 %v14798_v48, %v14818_v25  ;;  %v14821_v26 = vld [vmem:[#allocation18_spill] sm:$0xff]  ;;  %v1377_v25 = vmul.f32 %v14798_v48, %v7073_v24  ;;  %v7604_v24 = vadd.f32 %v1352_v12, %v7434_v2 }
 0x170   :  { %14814 = vst [vmem:[#allocation41_spill] sm:$0xff] %v7564_v38  ;;  %14815 = vst [vmem:[#allocation46_spill] sm:$0xff] %v7569_v4  ;;  %v14816_v61 = vld [vmem:[#allocation24_spill] sm:$0xff]  ;;  %v14819_v63 = vld [vmem:[#allocation47_spill] sm:$0xff]  ;;  %v1373_v34 = vmul.f32 %v14798_v48, %v14821_v26  ;;  %v1380_v26 = vmul.f32 %v14798_v48, %v7410_v44  ;;  %v7613_v44 = vadd.f32 %v1355_v9, %v7443_v55 }
 0x171   :  { %v1368_v18 = vmul.f32 %v14798_v48, %v14816_v61  ;;  %v1371_v21 = vmul.f32 %v14798_v48, %v14819_v63  ;;  %v1375_v61 = vmul.f32 %v14798_v48, %v14822_v49  ;;  %v14823_v41 = vld [vmem:[#allocation6_spill] sm:$0xff]  ;;  %v14824_v46 = vld [vmem:[#allocation17_spill] sm:$0xff]  ;;  %v1382_v49 = vmul.f32 %v14798_v48, %v7564_v38  ;;  %v14842_v15 = vld [vmem:[#allocation32_spill] sm:$0xff] }
 0x172   :  { %v1376_v14 = vmul.f32 %v14798_v48, %v14823_v41  ;;  %v1378_v63 = vmul.f32 %v14798_v48, %v14824_v46  ;;  %v14825_v53 = vld [vmem:[#allocation33_spill] sm:$0xff]  ;;  %v1383_v41 = vmul.f32 %v14798_v48, %v7569_v4  ;;  %v7607_v46 = vadd.f32 %v1353_v35, %v7437_v1  ;;  %v14840_v9 = vld [vmem:[#allocation42_spill] sm:$0xff] }
 0x173   :  { %v1379_v8 = vmul.f32 %v14798_v48, %v14825_v53  ;;  %v7610_v53 = vadd.f32 %v1354_v17, %v7440_v51  ;;  %v7619_v38 = vadd.f32 %v1357_v16, %v7449_v40  ;;  %v7622_v48 = vadd.f32 %v1358_v13, %v7452_v37 }
 0x174   :  { %v7625_v2 = vadd.f32 %v1359_v30, %v7455_v19  ;;  %v7628_v1 = vadd.f32 %v1360_v3, %v7458_v23  ;;  %v7631_v51 = vadd.f32 %v1361_v31, %v7461_v5  ;;  %v7634_v55 = vadd.f32 %v1362_v7, %v7464_v29 }
 0x175   :  { %v7637_v27 = vadd.f32 %v1363_v45, %v7467_v32  ;;  %v7640_v40 = vadd.f32 %v1364_v60, %v7470_v50  ;;  %v7643_v37 = vadd.f32 %v1365_v57, %v7473_v0  ;;  %v7646_v19 = vadd.f32 %v1366_v22, %v7476_v47  ;;  %v14851_v45 = vld [vmem:[#allocation40_spill] sm:$0xff]  ;;  %v14852_v60 = vld [vmem:[#allocation37_spill] sm:$0xff]  ;;  %v14853_v57 = vld [vmem:[#allocation10_spill] sm:$0xff] }
 0x176   :  { %v7649_v23 = vadd.f32 %v1367_v59, %v7479_v54  ;;  %v7652_v5 = vadd.f32 %v1368_v18, %v7482_v52  ;;  %v7655_v29 = vadd.f32 %v1369_v36, %v7485_v58  ;;  %v7658_v32 = vadd.f32 %v1370_v11, %v7488_v10  ;;  %v14826_v58 = vld [vmem:[#allocation48_spill] sm:$0xff]  ;;  %v14828_v10 = vld [vmem:[#allocation49_spill] sm:$0xff]  ;;  %v14850_v18 = vld [vmem:[#allocation39_spill] sm:$0xff] }
 0x177   :  { %v7661_v50 = vadd.f32 %v1371_v21, %v7491_v6  ;;  %v7664_v0 = vadd.f32 %v1372_v42, %v7494_v62  ;;  %v7667_v47 = vadd.f32 %v1373_v34, %v7497_v56  ;;  %v7670_v54 = vadd.f32 %v1374_v28, %v7500_v43  ;;  %v14830_v6 = vld [vmem:[#allocation43_spill] sm:$0xff]  ;;  %v14832_v62 = vld [vmem:[#allocation22_spill] sm:$0xff]  ;;  %v14834_v56 = vld [vmem:[#allocation9_spill] sm:$0xff] }
 0x178   :  { %v7673_v52 = vadd.f32 %v1375_v61, %v7503_v33  ;;  %v7676_v12 = vadd.f32 %v1376_v14, %v14826_v58  ;;  %v7679_v35 = vadd.f32 %v1377_v25, %v14828_v10  ;;  %v7682_v17 = vadd.f32 %v1378_v63, %v14830_v6  ;;  %v14836_v43 = vld [vmem:[#allocation27_spill] sm:$0xff]  ;;  %v14838_v33 = vld [vmem:[#allocation13_spill] sm:$0xff]  ;;  %v14843_v36 = vld [vmem:[#allocation36_spill] sm:$0xff] }
 0x179   :  { %v7685_v42 = vadd.f32 %v1379_v8, %v14832_v62  ;;  %v7688_v34 = vadd.f32 %v1380_v26, %v14834_v56  ;;  %v7691_v28 = vadd.f32 %v1381_v39, %v14836_v43  ;;  %v7694_v21 = vadd.f32 %v1382_v49, %v14838_v33  ;;  %v14844_v63 = vld [vmem:[#allocation38_spill] sm:$0xff]  ;;  %v14845_v8 = vld [vmem:[#allocation45_spill] sm:$0xff]  ;;  %v14846_v26 = vld [vmem:[#allocation7_spill] sm:$0xff] }
 0x17a   :  { %14827 = vst [vmem:[#allocation21_spill] sm:$0xff] %v7676_v12  ;;  %14829 = vst [vmem:[#allocation30_spill] sm:$0xff] %v7679_v35  ;;  %v7697_v11 = vadd.f32 %v1383_v41, %v14840_v9  ;;  %v1418_v16 = vmul.f32 %v14843_v36, %v14842_v15  ;;  %v1419_v13 = vmul.f32 %v14843_v36, %v14844_v63  ;;  %v14847_v39 = vld [vmem:[#allocation34_spill] sm:$0xff]  ;;  %v14848_v49 = vld [vmem:[#allocation19_spill] sm:$0xff] }
 0x17b   :  { %14831 = vst [vmem:[#allocation35_spill] sm:$0xff] %v7682_v17  ;;  %14833 = vst [vmem:[#allocation31_spill] sm:$0xff] %v7685_v42  ;;  %v1420_v22 = vmul.f32 %v14843_v36, %v14845_v8  ;;  %v1421_v30 = vmul.f32 %v14843_v36, %v14846_v26  ;;  %v1422_v59 = vmul.f32 %v14843_v36, %v14847_v39  ;;  %v14849_v41 = vld [vmem:[#allocation23_spill] sm:$0xff]  ;;  %v14854_v58 = vld [vmem:[#allocation44_spill] sm:$0xff] }
 0x17c   :  { %14835 = vst [vmem:[#allocation48_spill] sm:$0xff] %v7688_v34  ;;  %14837 = vst [vmem:[#allocation49_spill] sm:$0xff] %v7691_v28  ;;  %v1423_v3 = vmul.f32 %v14843_v36, %v14848_v49  ;;  %v1424_v31 = vmul.f32 %v14843_v36, %v14849_v41  ;;  %v1425_v7 = vmul.f32 %v14843_v36, %v14850_v18  ;;  %v14855_v6 = vld [vmem:[#allocation16_spill] sm:$0xff]  ;;  %v14858_v15 = vld [vmem:[#allocation25_spill] sm:$0xff] }
 0x17d   :  { %14839 = vst [vmem:[#allocation43_spill] sm:$0xff] %v7694_v21  ;;  %14841 = vst [vmem:[#allocation22_spill] sm:$0xff] %v7697_v11  ;;  %v1426_v61 = vmul.f32 %v14843_v36, %v14851_v45  ;;  %v1427_v14 = vmul.f32 %v14843_v36, %v14852_v60  ;;  %v1428_v25 = vmul.f32 %v14843_v36, %v14853_v57  ;;  %v14856_v56 = vld [vmem:[#allocation8_spill] sm:$0xff]  ;;  %v7734_v60 = vld [vmem:[%s13400_s2 + $0x1e2] sm:$0xff] }
 0x17e   :  { %v1429_v10 = vmul.f32 %v14843_v36, %v14854_v58  ;;  %v1430_v62 = vmul.f32 %v14843_v36, %v14855_v6  ;;  %v1431_v43 = vmul.f32 %v14843_v36, %v14856_v56  ;;  %v14857_v33 = vld [vmem:[#allocation24_spill] sm:$0xff]  ;;  %v1433_v63 = vmul.f32 %v14843_v36, %v14858_v15  ;;  %14859 = vst [vmem:[#allocation9_spill] sm:$0xff] %v7734_v60  ;;  %v14860_v6 = vld [vmem:[#allocation26_spill] sm:$0xff]  ;;  %v14861_v56 = vld [vmem:[#allocation47_spill] sm:$0xff] }
 0x17f   :  { %v1432_v9 = vmul.f32 %v14843_v36, %v14857_v33  ;;  %v7739_v58 = vld [vmem:[%s13400_s2 + $0x1ea] sm:$0xff]  ;;  %v1434_v57 = vmul.f32 %v14843_v36, %v14860_v6  ;;  %v1435_v45 = vmul.f32 %v14843_v36, %v14861_v56  ;;  %v14863_v15 = vld [vmem:[#allocation18_spill] sm:$0xff]  ;;  %v14868_v34 = vld [vmem:[#allocation17_spill] sm:$0xff] }
 0x180   :  { %v14862_v33 = vld [vmem:[#allocation15_spill] sm:$0xff]  ;;  %v1437_v41 = vmul.f32 %v14843_v36, %v14863_v15  ;;  %v14864_v49 = vld [vmem:[#allocation20_spill] sm:$0xff]  ;;  %v14866_v11 = vld [vmem:[#allocation6_spill] sm:$0xff]  ;;  %v1442_v56 = vmul.f32 %v14843_v36, %v14868_v34  ;;  %v1449_v34 = vmul.f32 %v14843_v36, %v7739_v58 }
 0x181   :  { %v1436_v18 = vmul.f32 %v14843_v36, %v14862_v33  ;;  %v1438_v39 = vmul.f32 %v14843_v36, %v14864_v49  ;;  %v14865_v26 = vld [vmem:[#allocation11_spill] sm:$0xff]  ;;  %v1440_v21 = vmul.f32 %v14843_v36, %v14866_v11  ;;  %v14867_v28 = vld [vmem:[#allocation12_spill] sm:$0xff]  ;;  %v14869_v42 = vld [vmem:[#allocation33_spill] sm:$0xff]  ;;  %v1447_v11 = vmul.f32 %v14843_v36, %v7569_v4 }
 0x182   :  { %v1439_v8 = vmul.f32 %v14843_v36, %v14865_v26  ;;  %v1441_v6 = vmul.f32 %v14843_v36, %v14867_v28  ;;  %v1443_v33 = vmul.f32 %v14843_v36, %v14869_v42  ;;  %v14870_v17 = vld [vmem:[#allocation28_spill] sm:$0xff]  ;;  %v14871_v35 = vld [vmem:[#allocation29_spill] sm:$0xff]  ;;  %v1448_v28 = vmul.f32 %v14843_v36, %v7734_v60 }
 0x183   :  { %v1444_v15 = vmul.f32 %v14843_v36, %v14870_v17  ;;  %v1445_v49 = vmul.f32 %v14843_v36, %v14871_v35  ;;  %v14872_v12 = vld [vmem:[#allocation41_spill] sm:$0xff]  ;;  %v7774_v42 = vadd.f32 %v1418_v16, %v7604_v24  ;;  %v7777_v17 = vadd.f32 %v1419_v13, %v7607_v46 }
 0x184   :  { %v1446_v26 = vmul.f32 %v14843_v36, %v14872_v12  ;;  %v7780_v35 = vadd.f32 %v1420_v22, %v7610_v53  ;;  %v7783_v12 = vadd.f32 %v1421_v30, %v7613_v44  ;;  %v7786_v4 = vadd.f32 %v1422_v59, %v7616_v20  ;;  %v14887_v59 = vld [vmem:[#allocation22_spill] sm:$0xff] }
 0x185   :  { %v7789_v60 = vadd.f32 %v1423_v3, %v7619_v38  ;;  %v7792_v36 = vadd.f32 %v1424_v31, %v7622_v48  ;;  %v7795_v24 = vadd.f32 %v1425_v7, %v7625_v2  ;;  %v7798_v46 = vadd.f32 %v1426_v61, %v7628_v1  ;;  %v14890_v31 = vld [vmem:[#allocation14_spill] sm:$0xff]  ;;  %v14891_v7 = vld [vmem:[#allocation7_spill] sm:$0xff] }
 0x186   :  { %v7801_v53 = vadd.f32 %v1427_v14, %v7631_v51  ;;  %v7804_v44 = vadd.f32 %v1428_v25, %v7634_v55  ;;  %v7807_v20 = vadd.f32 %v1429_v10, %v7637_v27  ;;  %v7810_v38 = vadd.f32 %v1430_v62, %v7640_v40 }
 0x187   :  { %v7813_v48 = vadd.f32 %v1431_v43, %v7643_v37  ;;  %v7816_v2 = vadd.f32 %v1432_v9, %v7646_v19  ;;  %v7819_v1 = vadd.f32 %v1433_v63, %v7649_v23  ;;  %v7822_v51 = vadd.f32 %v1434_v57, %v7652_v5 }
 0x188   :  { %v7825_v55 = vadd.f32 %v1435_v45, %v7655_v29  ;;  %v7828_v27 = vadd.f32 %v1436_v18, %v7658_v32  ;;  %v7831_v40 = vadd.f32 %v1437_v41, %v7661_v50  ;;  %v7834_v37 = vadd.f32 %v1438_v39, %v7664_v0  ;;  %v14873_v29 = vld [vmem:[#allocation21_spill] sm:$0xff]  ;;  %v14875_v32 = vld [vmem:[#allocation30_spill] sm:$0xff]  ;;  %v14877_v50 = vld [vmem:[#allocation35_spill] sm:$0xff] }
 0x189   :  { %v7837_v19 = vadd.f32 %v1439_v8, %v7667_v47  ;;  %v7840_v23 = vadd.f32 %v1440_v21, %v7670_v54  ;;  %v7843_v5 = vadd.f32 %v1441_v6, %v7673_v52  ;;  %v7846_v16 = vadd.f32 %v1442_v56, %v14873_v29  ;;  %v14879_v0 = vld [vmem:[#allocation31_spill] sm:$0xff]  ;;  %v14881_v47 = vld [vmem:[#allocation48_spill] sm:$0xff]  ;;  %v14883_v54 = vld [vmem:[#allocation49_spill] sm:$0xff] }
 0x18a   :  { %v7849_v13 = vadd.f32 %v1443_v33, %v14875_v32  ;;  %v7852_v22 = vadd.f32 %v1444_v15, %v14877_v50  ;;  %v7855_v30 = vadd.f32 %v1445_v49, %v14879_v0  ;;  %v7858_v8 = vadd.f32 %v1446_v26, %v14881_v47  ;;  %v14885_v52 = vld [vmem:[#allocation43_spill] sm:$0xff]  ;;  %v14889_v41 = vld [vmem:[#allocation45_spill] sm:$0xff]  ;;  %v14892_v49 = vld [vmem:[#allocation34_spill] sm:$0xff] }
 0x18b   :  { %14874 = vst [vmem:[#allocation27_spill] sm:$0xff] %v7846_v16  ;;  %v7861_v21 = vadd.f32 %v1447_v11, %v14883_v54  ;;  %v7864_v39 = vadd.f32 %v1448_v28, %v14885_v52  ;;  %v7867_v3 = vadd.f32 %v1449_v34, %v14887_v59  ;;  %v1484_v18 = vmul.f32 %v14890_v31, %v14889_v41  ;;  %v14893_v26 = vld [vmem:[#allocation19_spill] sm:$0xff]  ;;  %v14896_v34 = vld [vmem:[#allocation40_spill] sm:$0xff]  ;;  %v14897_v6 = vld [vmem:[#allocation37_spill] sm:$0xff] }
 0x18c   :  { %14876 = vst [vmem:[#allocation13_spill] sm:$0xff] %v7849_v13  ;;  %14878 = vst [vmem:[#allocation42_spill] sm:$0xff] %v7852_v22  ;;  %v1485_v45 = vmul.f32 %v14890_v31, %v14891_v7  ;;  %v1486_v61 = vmul.f32 %v14890_v31, %v14892_v49  ;;  %v1487_v14 = vmul.f32 %v14890_v31, %v14893_v26  ;;  %v14894_v11 = vld [vmem:[#allocation23_spill] sm:$0xff]  ;;  %v14898_v56 = vld [vmem:[#allocation10_spill] sm:$0xff] }
 0x18d   :  { %14880 = vst [vmem:[#allocation32_spill] sm:$0xff] %v7855_v30  ;;  %14882 = vst [vmem:[#allocation36_spill] sm:$0xff] %v7858_v8  ;;  %v1488_v57 = vmul.f32 %v14890_v31, %v14894_v11  ;;  %v14895_v28 = vld [vmem:[#allocation39_spill] sm:$0xff]  ;;  %v1490_v10 = vmul.f32 %v14890_v31, %v14896_v34  ;;  %v1491_v62 = vmul.f32 %v14890_v31, %v14897_v6  ;;  %v14899_v33 = vld [vmem:[#allocation44_spill] sm:$0xff] }
 0x18e   :  { %14884 = vst [vmem:[#allocation38_spill] sm:$0xff] %v7861_v21  ;;  %14886 = vst [vmem:[#allocation21_spill] sm:$0xff] %v7864_v39  ;;  %v1489_v25 = vmul.f32 %v14890_v31, %v14895_v28  ;;  %v1492_v43 = vmul.f32 %v14890_v31, %v14898_v56  ;;  %v1493_v9 = vmul.f32 %v14890_v31, %v14899_v33  ;;  %v14900_v15 = vld [vmem:[#allocation16_spill] sm:$0xff]  ;;  %v14903_v47 = vld [vmem:[#allocation25_spill] sm:$0xff] }
 0x18f   :  { %14888 = vst [vmem:[#allocation30_spill] sm:$0xff] %v7867_v3  ;;  %v1494_v63 = vmul.f32 %v14890_v31, %v14900_v15  ;;  %v14901_v29 = vld [vmem:[#allocation8_spill] sm:$0xff]  ;;  %v1497_v54 = vmul.f32 %v14890_v31, %v14903_v47  ;;  %v14904_v52 = vld [vmem:[#allocation26_spill] sm:$0xff]  ;;  %v14905_v41 = vld [vmem:[#allocation47_spill] sm:$0xff] }
 0x190   :  { %v1495_v32 = vmul.f32 %v14890_v31, %v14901_v29  ;;  %v14902_v50 = vld [vmem:[#allocation24_spill] sm:$0xff]  ;;  %v1498_v59 = vmul.f32 %v14890_v31, %v14904_v52  ;;  %v1499_v7 = vmul.f32 %v14890_v31, %v14905_v41  ;;  %v1084_v49 = vld [vmem:[%s13400_s2 + $0x1fa] sm:$0xff]  ;;  %v1085_v26 = vld [vmem:[%s13400_s2 + $0x202] sm:$0xff] }
 0x191   :  { %v1496_v0 = vmul.f32 %v14890_v31, %v14902_v50  ;;  %v14906_v11 = vld [vmem:[#allocation15_spill] sm:$0xff]  ;;  %v14907_v34 = vld [vmem:[#allocation18_spill] sm:$0xff]  ;;  %v14908_v56 = vld [vmem:[#allocation20_spill] sm:$0xff]  ;;  %v1514_v16 = vmul.f32 %v14890_v31, %v1084_v49 }
 0x192   :  { %v1500_v28 = vmul.f32 %v14890_v31, %v14906_v11  ;;  %v1501_v6 = vmul.f32 %v14890_v31, %v14907_v34  ;;  %v1502_v33 = vmul.f32 %v14890_v31, %v14908_v56  ;;  %v14909_v15 = vld [vmem:[#allocation11_spill] sm:$0xff]  ;;  %v14910_v50 = vld [vmem:[#allocation6_spill] sm:$0xff]  ;;  %v14911_v52 = vld [vmem:[#allocation12_spill] sm:$0xff] }
 0x193   :  { %v1503_v29 = vmul.f32 %v14890_v31, %v14909_v15  ;;  %v1504_v47 = vmul.f32 %v14890_v31, %v14910_v50  ;;  %v1505_v41 = vmul.f32 %v14890_v31, %v14911_v52  ;;  %v14912_v3 = vld [vmem:[#allocation17_spill] sm:$0xff]  ;;  %v14914_v34 = vld [vmem:[#allocation28_spill] sm:$0xff]  ;;  %v14917_v22 = vld [vmem:[#allocation46_spill] sm:$0xff] }
 0x194   :  { %v1506_v39 = vmul.f32 %v14890_v31, %v14912_v3  ;;  %v14913_v21 = vld [vmem:[#allocation33_spill] sm:$0xff]  ;;  %v1508_v56 = vmul.f32 %v14890_v31, %v14914_v34  ;;  %v1511_v52 = vmul.f32 %v14890_v31, %v14917_v22  ;;  %v1515_v34 = vmul.f32 %v14890_v31, %v1085_v26 }
 0x195   :  { %v1507_v11 = vmul.f32 %v14890_v31, %v14913_v21  ;;  %v14915_v8 = vld [vmem:[#allocation29_spill] sm:$0xff]  ;;  %v1513_v21 = vmul.f32 %v14890_v31, %v7739_v58  ;;  %v7950_v22 = vadd.f32 %v1486_v61, %v7780_v35  ;;  %v7958_v58 = vadd.f32 %v1488_v57, %v7786_v4  ;;  %v14942_v49 = vld [vmem:[#allocation38_spill] sm:$0xff] }
 0x196   :  { %v1509_v15 = vmul.f32 %v14890_v31, %v14915_v8  ;;  %v14916_v30 = vld [vmem:[#allocation41_spill] sm:$0xff]  ;;  %v7944_v8 = vadd.f32 %v1484_v18, %v7774_v42  ;;  %v7964_v42 = vadd.f32 %v1490_v10, %v7792_v36  ;;  %v7970_v35 = vadd.f32 %v1492_v43, %v7798_v46  ;;  %v8070_v43 = vld [vmem:[%s13400_s2 + $0x6b] sm:$0xff] }
 0x197   :  { %v1510_v50 = vmul.f32 %v14890_v31, %v14916_v30  ;;  %v14918_v3 = vld [vmem:[#allocation9_spill] sm:$0xff]  ;;  %v7947_v30 = vadd.f32 %v1485_v45, %v7777_v17  ;;  %v7967_v17 = vadd.f32 %v1491_v62, %v7795_v24  ;;  %v7976_v18 = vadd.f32 %v1494_v63, %v7804_v44  ;;  %v8065_v62 = vld [vmem:[%s13400_s2 + $0x63] sm:$0xff]  ;;  %14935 = vst [vmem:[#allocation40_spill] sm:$0xff] %v8070_v43 }
 0x198   :  { %v1512_v13 = vmul.f32 %v14890_v31, %v14918_v3  ;;  %v7953_v3 = vadd.f32 %v1487_v14, %v7783_v12  ;;  %v7961_v31 = vadd.f32 %v1489_v25, %v7789_v60  ;;  %v7973_v12 = vadd.f32 %v1493_v9, %v7801_v53  ;;  %v8036_v61 = vld [vmem:[%s13400_s2 + $0x33] sm:$0xff]  ;;  %v8041_v14 = vld [vmem:[%s13400_s2 + $0x3b] sm:$0xff]  ;;  %14934 = vst [vmem:[#allocation39_spill] sm:$0xff] %v8065_v62  ;;  %v8080_v63 = vld [vmem:[%s13400_s2 + $0x83] sm:$0xff] }
 0x199   :  { %v7979_v4 = vadd.f32 %v1495_v32, %v7807_v20  ;;  %v7982_v60 = vadd.f32 %v1496_v0, %v7810_v38  ;;  %v7985_v36 = vadd.f32 %v1497_v54, %v7813_v48  ;;  %v7988_v24 = vadd.f32 %v1498_v59, %v7816_v2  ;;  %v1548_v48 = vld [vmem:[%s13400_s2 + $0x3] sm:$0xff]  ;;  %v1549_v2 = vld [vmem:[%s13400_s2 + $0xb] sm:$0xff]  ;;  %14924 = vst [vmem:[#allocation22_spill] sm:$0xff] %v8036_v61  ;;  %v8075_v9 = vld [vmem:[%s13400_s2 + $0x7b] sm:$0xff] }
 0x19a   :  { %v7991_v46 = vadd.f32 %v1499_v7, %v7819_v1  ;;  %v7994_v53 = vadd.f32 %v1500_v28, %v7822_v51  ;;  %v7997_v44 = vadd.f32 %v1501_v6, %v7825_v55  ;;  %v8000_v20 = vadd.f32 %v1502_v33, %v7828_v27  ;;  %v8014_v1 = vld [vmem:[%s13400_s2 + $0x1b] sm:$0xff]  ;;  %v8019_v51 = vld [vmem:[%s13400_s2 + $0x23] sm:$0xff]  ;;  %14925 = vst [vmem:[#allocation45_spill] sm:$0xff] %v8041_v14  ;;  %v14938_v0 = vld [vmem:[#allocation32_spill] sm:$0xff] }
 0x19b   :  { %v8003_v38 = vadd.f32 %v1503_v29, %v7831_v40  ;;  %14919 = vst [vmem:[#allocation35_spill] sm:$0xff] %v8014_v1  ;;  %14920 = vst [vmem:[#allocation31_spill] sm:$0xff] %v8019_v51  ;;  %v8022_v55 = vadd.f32 %v1504_v47, %v7834_v37  ;;  %v8025_v27 = vadd.f32 %v1505_v41, %v7837_v19  ;;  %v8046_v37 = vld [vmem:[%s13400_s2 + $0x4b] sm:$0xff]  ;;  %v8051_v19 = vld [vmem:[%s13400_s2 + $0x53] sm:$0xff]  ;;  %v1593_v32 = vstv %s7923_s15 }
 0x19c   :  { %v8028_v40 = vadd.f32 %v1506_v39, %v7840_v23  ;;  %v8031_v45 = vadd.f32 %v1507_v11, %v7843_v5  ;;  %14926 = vst [vmem:[#allocation14_spill] sm:$0xff] %v8046_v37  ;;  %14927 = vst [vmem:[#allocation7_spill] sm:$0xff] %v8051_v19  ;;  %v14928_v23 = vld [vmem:[#allocation27_spill] sm:$0xff]  ;;  %v14930_v39 = vld [vmem:[#allocation13_spill] sm:$0xff]  ;;  %v8084_v54 = vadd.f32 %v1511_v52, %v14938_v0 }
 0x19d   :  { %14921 = vst [vmem:[#allocation48_spill] sm:$0xff] %v8025_v27  ;;  %v8054_v5 = vadd.f32 %v1508_v56, %v14928_v23  ;;  %v8057_v57 = vadd.f32 %v1509_v15, %v14930_v39  ;;  %v14932_v25 = vld [vmem:[#allocation42_spill] sm:$0xff]  ;;  %14936 = vst [vmem:[#allocation37_spill] sm:$0xff] %v8075_v9  ;;  %v14940_v59 = vld [vmem:[#allocation36_spill] sm:$0xff]  ;;  %v8090_v26 = vadd.f32 %v1513_v21, %v14942_v49  ;;  %v8124_v56 = vstv %s7933_s16  ;;  %s9535_s16 = sld [smem:[#allocation3 + $0xb]] }
 0x19e   :  { %14922 = vst [vmem:[#allocation49_spill] sm:$0xff] %v8028_v40  ;;  %14923 = vst [vmem:[#allocation43_spill] sm:$0xff] %v8031_v45  ;;  %v8060_v10 = vadd.f32 %v1510_v50, %v14932_v25  ;;  %v8087_v7 = vadd.f32 %v1512_v13, %v14940_v59  ;;  %v14944_v28 = vld [vmem:[#allocation21_spill] sm:$0xff]  ;;  %v8108_v13 = vld [vmem:[%s13400_s2 + $0xab] sm:$0xff]  ;;  %v8127_v15 = vstv %s7941_s18  ;;  %v8130_v50 = vstv %s7955_s19  ;;  %s9545_s18 = sld [smem:[#allocation3 + $0x12]] }
 0x19f   :  { %14929 = vst [vmem:[#allocation34_spill] sm:$0xff] %v8054_v5  ;;  %14931 = vst [vmem:[#allocation19_spill] sm:$0xff] %v8057_v57  ;;  %v8093_v6 = vadd.f32 %v1514_v16, %v14944_v28  ;;  %v8098_v33 = vld [vmem:[%s13400_s2 + $0x93] sm:$0xff]  ;;  %v8103_v29 = vld [vmem:[%s13400_s2 + $0x9b] sm:$0xff]  ;;  %v1594_v23 = vmul.f32 %v1593_v32, %v1548_v48  ;;  %v1595_v39 = vmul.f32 %v1593_v32, %v1549_v2  ;;  %s9555_s19 = sld [smem:[#allocation3 + $0x19]] }
 0x1a0   :  { %14933 = vst [vmem:[#allocation23_spill] sm:$0xff] %v8060_v10  ;;  %14937 = vst [vmem:[#allocation10_spill] sm:$0xff] %v8080_v63  ;;  %v8113_v16 = vld [vmem:[%s13400_s2 + $0xb3] sm:$0xff]  ;;  %v14950_v47 = vld [vmem:[#allocation30_spill] sm:$0xff]  ;;  %v1596_v25 = vmul.f32 %v1593_v32, %v8014_v1  ;;  %v1597_v0 = vmul.f32 %v1593_v32, %v8019_v51  ;;  %v1598_v48 = vmul.f32 %v1593_v32, %v8036_v61 }
 0x1a1   :  { %14939 = vst [vmem:[#allocation44_spill] sm:$0xff] %v8084_v54  ;;  %14941 = vst [vmem:[#allocation16_spill] sm:$0xff] %v8087_v7  ;;  %v8116_v41 = vadd.f32 %v1515_v34, %v14950_v47  ;;  %v8121_v11 = vld [vmem:[%s13400_s2 + $0xc3] sm:$0xff]  ;;  %v8135_v52 = vld [vmem:[%s13400_s2 + $0xcb] sm:$0xff]  ;;  %v1599_v2 = vmul.f32 %v1593_v32, %v8041_v14  ;;  %v1600_v47 = vmul.f32 %v1593_v32, %v8046_v37 }
 0x1a2   :  { %14943 = vst [vmem:[#allocation8_spill] sm:$0xff] %v8090_v26  ;;  %14945 = vst [vmem:[#allocation24_spill] sm:$0xff] %v8093_v6  ;;  %v8140_v21 = vld [vmem:[%s13400_s2 + $0xdb] sm:$0xff]  ;;  %v8145_v34 = vld [vmem:[%s13400_s2 + $0xe3] sm:$0xff]  ;;  %v1602_v14 = vmul.f32 %v1593_v32, %v8065_v62  ;;  %v1603_v37 = vmul.f32 %v1593_v32, %v8070_v43  ;;  %v1606_v43 = vmul.f32 %v1593_v32, %v8098_v33 }
 0x1a3   :  { %14946 = vst [vmem:[#allocation25_spill] sm:$0xff] %v8098_v33  ;;  %14947 = vst [vmem:[#allocation26_spill] sm:$0xff] %v8103_v29  ;;  %v8152_v59 = vld [vmem:[%s13400_s2 + $0xf3] sm:$0xff]  ;;  %v8157_v49 = vld [vmem:[%s13400_s2 + $0xfb] sm:$0xff]  ;;  %v1609_v6 = vmul.f32 %v1593_v32, %v8113_v16  ;;  %v1613_v54 = vmul.f32 %v1593_v32, %v8145_v34 }
 0x1a4   :  { %14948 = vst [vmem:[#allocation47_spill] sm:$0xff] %v8108_v13  ;;  %14949 = vst [vmem:[#allocation15_spill] sm:$0xff] %v8113_v16  ;;  %v8162_v28 = vld [vmem:[%s13400_s2 + $0x10b] sm:$0xff]  ;;  %v8176_v51 = vld [vmem:[%s13400_s2 + $0x123] sm:$0xff]  ;;  %v1612_v16 = vmul.f32 %v1593_v32, %v8140_v21  ;;  %v1614_v10 = vmul.f32 %v1593_v32, %v8152_v59  ;;  %v1615_v57 = vmul.f32 %v1593_v32, %v8157_v49 }
 0x1a5   :  { %14951 = vst [vmem:[#allocation18_spill] sm:$0xff] %v8116_v41  ;;  %14952 = vst [vmem:[#allocation20_spill] sm:$0xff] %v8121_v11  ;;  %v8181_v61 = vld [vmem:[%s13400_s2 + $0x12b] sm:$0xff]  ;;  %v8190_v1 = vld [vmem:[%s13400_s2 + $0x13b] sm:$0xff]  ;;  %v1616_v5 = vmul.f32 %v1593_v32, %v8162_v28  ;;  %v1618_v40 = vmul.f32 %v1593_v32, %v8176_v51 }
 0x1a6   :  { %14953 = vst [vmem:[#allocation11_spill] sm:$0xff] %v8124_v56  ;;  %14954 = vst [vmem:[#allocation6_spill] sm:$0xff] %v8127_v15  ;;  %v8171_v15 = vld [vmem:[%s13400_s2 + $0x113] sm:$0xff]  ;;  %v1605_v56 = vmul.f32 %v1593_v32, %v8080_v63  ;;  %v8195_v41 = vld [vmem:[%s13400_s2 + $0x143] sm:$0xff]  ;;  %v1608_v63 = vmul.f32 %v1593_v32, %v8108_v13  ;;  %v1611_v13 = vmul.f32 %v1593_v32, %v8135_v52 }
 0x1a7   :  { %14955 = vst [vmem:[#allocation12_spill] sm:$0xff] %v8130_v50  ;;  %14956 = vst [vmem:[#allocation17_spill] sm:$0xff] %v8135_v52  ;;  %v1601_v50 = vmul.f32 %v1593_v32, %v8051_v19  ;;  %v1604_v19 = vmul.f32 %v1593_v32, %v8075_v9  ;;  %v8200_v62 = vld [vmem:[%s13400_s2 + $0x153] sm:$0xff]  ;;  %v1607_v9 = vmul.f32 %v1593_v32, %v8103_v29  ;;  %v8209_v26 = vld [vmem:[%s13400_s2 + $0x15b] sm:$0xff] }
 0x1a8   :  { %14957 = vst [vmem:[#allocation33_spill] sm:$0xff] %v8140_v21  ;;  %14958 = vst [vmem:[#allocation28_spill] sm:$0xff] %v8145_v34  ;;  %v8214_v7 = vld [vmem:[%s13400_s2 + $0x16b] sm:$0xff]  ;;  %v8219_v33 = vld [vmem:[%s13400_s2 + $0x173] sm:$0xff]  ;;  %v1610_v29 = vmul.f32 %v1593_v32, %v8121_v11  ;;  %v1617_v45 = vmul.f32 %v1593_v32, %v8171_v15  ;;  %v1619_v27 = vmul.f32 %v1593_v32, %v8181_v61 }
 0x1a9   :  { %14959 = vst [vmem:[#allocation29_spill] sm:$0xff] %v8152_v59  ;;  %14960 = vst [vmem:[#allocation41_spill] sm:$0xff] %v8157_v49  ;;  %v1620_v11 = vmul.f32 %v1593_v32, %v8190_v1  ;;  %v1621_v52 = vmul.f32 %v1593_v32, %v8195_v41  ;;  %v1622_v21 = vmul.f32 %v1593_v32, %v8200_v62 }
 0x1aa   :  { %14961 = vst [vmem:[#allocation46_spill] sm:$0xff] %v8162_v28  ;;  %14962 = vst [vmem:[#allocation9_spill] sm:$0xff] %v8171_v15  ;;  %v1623_v34 = vmul.f32 %v1593_v32, %v8209_v26  ;;  %v1624_v59 = vmul.f32 %v1593_v32, %v8214_v7  ;;  %v1625_v49 = vmul.f32 %v1593_v32, %v8219_v33 }
 0x1ab   :  { %14963 = vst [vmem:[#allocation27_spill] sm:$0xff] %v8176_v51  ;;  %14964 = vst [vmem:[#allocation13_spill] sm:$0xff] %v8181_v61  ;;  %v8238_v28 = vadd.f32 %v1594_v23, %v7944_v8  ;;  %v8241_v15 = vadd.f32 %v1595_v39, %v7947_v30  ;;  %v8244_v61 = vadd.f32 %v1596_v25, %v7950_v22 }
 0x1ac   :  { %14965 = vst [vmem:[#allocation42_spill] sm:$0xff] %v8190_v1  ;;  %14966 = vst [vmem:[#allocation32_spill] sm:$0xff] %v8195_v41  ;;  %v8247_v1 = vadd.f32 %v1597_v0, %v7953_v3  ;;  %v8256_v32 = vadd.f32 %v1600_v47, %v7964_v42  ;;  %v8259_v8 = vadd.f32 %v1601_v50, %v7967_v17  ;;  %v14996_v0 = vld [vmem:[#allocation7_spill] sm:$0xff] }
 0x1ad   :  { %14967 = vst [vmem:[#allocation36_spill] sm:$0xff] %v8200_v62  ;;  %14968 = vst [vmem:[#allocation38_spill] sm:$0xff] %v8209_v26  ;;  %v8250_v62 = vadd.f32 %v1598_v48, %v7958_v58  ;;  %v8253_v26 = vadd.f32 %v1599_v2, %v7961_v31  ;;  %v8262_v30 = vadd.f32 %v1602_v14, %v7970_v35  ;;  %v14998_v2 = vld [vmem:[#allocation40_spill] sm:$0xff] }
 0x1ae   :  { %14969 = vst [vmem:[#allocation21_spill] sm:$0xff] %v8214_v7  ;;  %14970 = vst [vmem:[#allocation30_spill] sm:$0xff] %v8219_v33  ;;  %v8265_v22 = vadd.f32 %v1603_v37, %v7973_v12  ;;  %v8268_v3 = vadd.f32 %v1604_v19, %v7976_v18  ;;  %v8271_v58 = vadd.f32 %v1605_v56, %v7979_v4 }
 0x1af   :  { %v8274_v31 = vadd.f32 %v1606_v43, %v7982_v60  ;;  %v8277_v42 = vadd.f32 %v1607_v9, %v7985_v36  ;;  %v8280_v17 = vadd.f32 %v1608_v63, %v7988_v24  ;;  %v8283_v35 = vadd.f32 %v1609_v6, %v7991_v46  ;;  %v14971_v24 = vld [vmem:[#allocation48_spill] sm:$0xff]  ;;  %v14972_v46 = vld [vmem:[#allocation49_spill] sm:$0xff] }
 0x1b0   :  { %v8286_v12 = vadd.f32 %v1610_v29, %v7994_v53  ;;  %v8289_v18 = vadd.f32 %v1611_v13, %v7997_v44  ;;  %v8292_v4 = vadd.f32 %v1612_v16, %v8000_v20  ;;  %v8295_v60 = vadd.f32 %v1613_v54, %v8003_v38  ;;  %v14973_v53 = vld [vmem:[#allocation43_spill] sm:$0xff]  ;;  %v14974_v44 = vld [vmem:[#allocation34_spill] sm:$0xff] }
 0x1b1   :  { %v8298_v36 = vadd.f32 %v1614_v10, %v8022_v55  ;;  %v8301_v14 = vadd.f32 %v1615_v57, %v14971_v24  ;;  %v8304_v37 = vadd.f32 %v1616_v5, %v14972_v46  ;;  %v8307_v19 = vadd.f32 %v1617_v45, %v14973_v53  ;;  %v14976_v20 = vld [vmem:[#allocation19_spill] sm:$0xff]  ;;  %v14980_v55 = vld [vmem:[#allocation44_spill] sm:$0xff]  ;;  %v14999_v24 = vld [vmem:[#allocation37_spill] sm:$0xff] }
 0x1b2   :  { %v8310_v43 = vadd.f32 %v1618_v40, %v14974_v44  ;;  %v8313_v9 = vadd.f32 %v1619_v27, %v14976_v20  ;;  %v14978_v38 = vld [vmem:[#allocation23_spill] sm:$0xff]  ;;  %v8319_v10 = vadd.f32 %v1621_v52, %v14980_v55  ;;  %v14982_v57 = vld [vmem:[#allocation16_spill] sm:$0xff]  ;;  %v14988_v40 = vld [vmem:[#allocation18_spill] sm:$0xff] }
 0x1b3   :  { %v8316_v63 = vadd.f32 %v1620_v11, %v14978_v38  ;;  %v8322_v54 = vadd.f32 %v1622_v21, %v14982_v57  ;;  %v14984_v5 = vld [vmem:[#allocation8_spill] sm:$0xff]  ;;  %v8331_v13 = vadd.f32 %v1625_v49, %v14988_v40  ;;  %v14990_v27 = vld [vmem:[#allocation35_spill] sm:$0xff]  ;;  %v14993_v52 = vld [vmem:[#allocation22_spill] sm:$0xff] }
 0x1b4   :  { %14975 = vst [vmem:[#allocation48_spill] sm:$0xff] %v8310_v43  ;;  %14977 = vst [vmem:[#allocation49_spill] sm:$0xff] %v8313_v9  ;;  %v8325_v6 = vadd.f32 %v1623_v34, %v14984_v5  ;;  %v14986_v45 = vld [vmem:[#allocation24_spill] sm:$0xff]  ;;  %v14991_v16 = vld [vmem:[#allocation11_spill] sm:$0xff] }
 0x1b5   :  { %14979 = vst [vmem:[#allocation43_spill] sm:$0xff] %v8316_v63  ;;  %14981 = vst [vmem:[#allocation34_spill] sm:$0xff] %v8319_v10  ;;  %v8328_v29 = vadd.f32 %v1624_v59, %v14986_v45  ;;  %v1660_v56 = vmul.f32 %v14991_v16, %v14990_v27  ;;  %v14992_v11 = vld [vmem:[#allocation31_spill] sm:$0xff]  ;;  %v1662_v23 = vmul.f32 %v14991_v16, %v14993_v52  ;;  %v14994_v21 = vld [vmem:[#allocation45_spill] sm:$0xff] }
 0x1b6   :  { %14983 = vst [vmem:[#allocation19_spill] sm:$0xff] %v8322_v54  ;;  %14985 = vst [vmem:[#allocation23_spill] sm:$0xff] %v8325_v6  ;;  %v1661_v50 = vmul.f32 %v14991_v16, %v14992_v11  ;;  %v1663_v39 = vmul.f32 %v14991_v16, %v14994_v21  ;;  %v14995_v34 = vld [vmem:[#allocation14_spill] sm:$0xff]  ;;  %v1665_v59 = vmul.f32 %v14991_v16, %v14996_v0  ;;  %v14997_v49 = vld [vmem:[#allocation39_spill] sm:$0xff] }
 0x1b7   :  { %14987 = vst [vmem:[#allocation44_spill] sm:$0xff] %v8328_v29  ;;  %14989 = vst [vmem:[#allocation16_spill] sm:$0xff] %v8331_v13  ;;  %v1664_v25 = vmul.f32 %v14991_v16, %v14995_v34  ;;  %v1666_v48 = vmul.f32 %v14991_v16, %v14997_v49  ;;  %v1667_v47 = vmul.f32 %v14991_v16, %v14998_v2  ;;  %v15000_v53 = vld [vmem:[#allocation10_spill] sm:$0xff]  ;;  %v15001_v20 = vld [vmem:[#allocation25_spill] sm:$0xff] }
 0x1b8   :  { %v1668_v46 = vmul.f32 %v14991_v16, %v14999_v24  ;;  %v1669_v44 = vmul.f32 %v14991_v16, %v15000_v53  ;;  %v1670_v38 = vmul.f32 %v14991_v16, %v15001_v20  ;;  %v15002_v55 = vld [vmem:[#allocation26_spill] sm:$0xff]  ;;  %v15003_v5 = vld [vmem:[#allocation47_spill] sm:$0xff]  ;;  %v15005_v11 = vld [vmem:[#allocation20_spill] sm:$0xff]  ;;  %v1682_v54 = vmul.f32 %v14991_v16, %v8176_v51 }
 0x1b9   :  { %v1671_v57 = vmul.f32 %v14991_v16, %v15002_v55  ;;  %v1672_v45 = vmul.f32 %v14991_v16, %v15003_v5  ;;  %v15004_v40 = vld [vmem:[#allocation15_spill] sm:$0xff]  ;;  %v1674_v2 = vmul.f32 %v14991_v16, %v15005_v11  ;;  %v15006_v49 = vld [vmem:[#allocation17_spill] sm:$0xff]  ;;  %v15013_v52 = vld [vmem:[#allocation46_spill] sm:$0xff]  ;;  %v1689_v51 = vmul.f32 %v14991_v16, %v8219_v33 }
 0x1ba   :  { %v1673_v27 = vmul.f32 %v14991_v16, %v15004_v40  ;;  %v1675_v24 = vmul.f32 %v14991_v16, %v15006_v49  ;;  %v8368_v53 = vld [vmem:[%s13400_s2 + $0x183] sm:$0xff]  ;;  %v8373_v55 = vld [vmem:[%s13400_s2 + $0x18b] sm:$0xff]  ;;  %v15009_v5 = vld [vmem:[#allocation33_spill] sm:$0xff]  ;;  %v1680_v13 = vmul.f32 %v14991_v16, %v15013_v52  ;;  %v8420_v33 = vadd.f32 %v1664_v25, %v8250_v62 }
 0x1bb   :  { %15007 = vst [vmem:[#allocation8_spill] sm:$0xff] %v8368_v53  ;;  %15008 = vst [vmem:[#allocation24_spill] sm:$0xff] %v8373_v55  ;;  %v1676_v20 = vmul.f32 %v14991_v16, %v15009_v5  ;;  %v15010_v40 = vld [vmem:[#allocation28_spill] sm:$0xff]  ;;  %v15011_v11 = vld [vmem:[#allocation29_spill] sm:$0xff]  ;;  %v8441_v62 = vadd.f32 %v1671_v57, %v8271_v58 }
 0x1bc   :  { %v1677_v0 = vmul.f32 %v14991_v16, %v15010_v40  ;;  %v1678_v34 = vmul.f32 %v14991_v16, %v15011_v11  ;;  %v15012_v49 = vld [vmem:[#allocation41_spill] sm:$0xff]  ;;  %v15016_v63 = vld [vmem:[#allocation42_spill] sm:$0xff]  ;;  %v1685_v11 = vmul.f32 %v14991_v16, %v8195_v41  ;;  %v15017_v9 = vld [vmem:[#allocation36_spill] sm:$0xff]  ;;  %v8408_v41 = vadd.f32 %v1660_v56, %v8238_v28 }
 0x1bd   :  { %v1679_v21 = vmul.f32 %v14991_v16, %v15012_v49  ;;  %v15014_v29 = vld [vmem:[#allocation9_spill] sm:$0xff]  ;;  %v1684_v40 = vmul.f32 %v14991_v16, %v15016_v63  ;;  %v1686_v49 = vmul.f32 %v14991_v16, %v15017_v9  ;;  %v15018_v43 = vld [vmem:[#allocation38_spill] sm:$0xff]  ;;  %v1691_v63 = vmul.f32 %v14991_v16, %v8373_v55 }
 0x1be   :  { %v1681_v6 = vmul.f32 %v14991_v16, %v15014_v29  ;;  %v15015_v10 = vld [vmem:[#allocation13_spill] sm:$0xff]  ;;  %v1687_v52 = vmul.f32 %v14991_v16, %v15018_v43  ;;  %v1688_v29 = vmul.f32 %v14991_v16, %v8214_v7  ;;  %v8411_v9 = vadd.f32 %v1661_v50, %v8241_v15  ;;  %v15035_v25 = vld [vmem:[#allocation22_spill] sm:$0xff] }
 0x1bf   :  { %v1683_v5 = vmul.f32 %v14991_v16, %v15015_v10  ;;  %v1690_v10 = vmul.f32 %v14991_v16, %v8368_v53  ;;  %v8414_v43 = vadd.f32 %v1662_v23, %v8244_v61  ;;  %v8417_v7 = vadd.f32 %v1663_v39, %v8247_v1  ;;  %v15033_v39 = vld [vmem:[#allocation16_spill] sm:$0xff]  ;;  %v15044_v57 = vld [vmem:[#allocation25_spill] sm:$0xff] }
 0x1c0   :  { %v8423_v53 = vadd.f32 %v1665_v59, %v8253_v26  ;;  %v8426_v16 = vadd.f32 %v1666_v48, %v8256_v32  ;;  %v8429_v28 = vadd.f32 %v1667_v47, %v8259_v8  ;;  %v8432_v15 = vadd.f32 %v1668_v46, %v8262_v30 }
 0x1c1   :  { %v8435_v61 = vadd.f32 %v1669_v44, %v8265_v22  ;;  %v8438_v1 = vadd.f32 %v1670_v38, %v8268_v3  ;;  %v8444_v26 = vadd.f32 %v1672_v45, %v8274_v31  ;;  %v8447_v32 = vadd.f32 %v1673_v27, %v8277_v42  ;;  %v15045_v45 = vld [vmem:[#allocation26_spill] sm:$0xff]  ;;  %v15046_v27 = vld [vmem:[#allocation47_spill] sm:$0xff] }
 0x1c2   :  { %v8450_v8 = vadd.f32 %v1674_v2, %v8280_v17  ;;  %v8453_v30 = vadd.f32 %v1675_v24, %v8283_v35  ;;  %v8456_v22 = vadd.f32 %v1676_v20, %v8286_v12  ;;  %v8459_v3 = vadd.f32 %v1677_v0, %v8289_v18  ;;  %v15019_v18 = vld [vmem:[#allocation48_spill] sm:$0xff]  ;;  %v15036_v0 = vld [vmem:[#allocation6_spill] sm:$0xff] }
 0x1c3   :  { %v8462_v58 = vadd.f32 %v1678_v34, %v8292_v4  ;;  %v8465_v31 = vadd.f32 %v1679_v21, %v8295_v60  ;;  %v8468_v42 = vadd.f32 %v1680_v13, %v8298_v36  ;;  %v8471_v17 = vadd.f32 %v1681_v6, %v8301_v14  ;;  %v15021_v4 = vld [vmem:[#allocation49_spill] sm:$0xff]  ;;  %v15023_v60 = vld [vmem:[#allocation43_spill] sm:$0xff]  ;;  %v15025_v36 = vld [vmem:[#allocation34_spill] sm:$0xff] }
 0x1c4   :  { %v8474_v35 = vadd.f32 %v1682_v54, %v8304_v37  ;;  %v8477_v12 = vadd.f32 %v1683_v5, %v8307_v19  ;;  %v8480_v56 = vadd.f32 %v1684_v40, %v15019_v18  ;;  %v8483_v50 = vadd.f32 %v1685_v11, %v15021_v4  ;;  %v15027_v14 = vld [vmem:[#allocation19_spill] sm:$0xff]  ;;  %v15031_v19 = vld [vmem:[#allocation44_spill] sm:$0xff]  ;;  %v15043_v20 = vld [vmem:[#allocation10_spill] sm:$0xff] }
 0x1c5   :  { %v8486_v23 = vadd.f32 %v1686_v49, %v15023_v60  ;;  %v8489_v13 = vadd.f32 %v1687_v52, %v15025_v36  ;;  %v8492_v6 = vadd.f32 %v1688_v29, %v15027_v14  ;;  %v15029_v37 = vld [vmem:[#allocation23_spill] sm:$0xff]  ;;  %v8498_v21 = vadd.f32 %v1690_v10, %v15031_v19  ;;  %v15037_v49 = vld [vmem:[#allocation45_spill] sm:$0xff]  ;;  %v15038_v52 = vld [vmem:[#allocation14_spill] sm:$0xff] }
 0x1c6   :  { %15020 = vst [vmem:[#allocation18_spill] sm:$0xff] %v8480_v56  ;;  %15022 = vst [vmem:[#allocation35_spill] sm:$0xff] %v8483_v50  ;;  %v8495_v54 = vadd.f32 %v1689_v51, %v15029_v37  ;;  %v8501_v34 = vadd.f32 %v1691_v63, %v15033_v39  ;;  %v1726_v59 = vmul.f32 %v15036_v0, %v15035_v25  ;;  %v15039_v29 = vld [vmem:[#allocation7_spill] sm:$0xff]  ;;  %v15041_v10 = vld [vmem:[#allocation40_spill] sm:$0xff] }
 0x1c7   :  { %15024 = vst [vmem:[#allocation11_spill] sm:$0xff] %v8486_v23  ;;  %15026 = vst [vmem:[#allocation31_spill] sm:$0xff] %v8489_v13  ;;  %v1727_v48 = vmul.f32 %v15036_v0, %v15037_v49  ;;  %v1728_v2 = vmul.f32 %v15036_v0, %v15038_v52  ;;  %v1729_v47 = vmul.f32 %v15036_v0, %v15039_v29  ;;  %v15040_v51 = vld [vmem:[#allocation39_spill] sm:$0xff]  ;;  %v15042_v63 = vld [vmem:[#allocation37_spill] sm:$0xff] }
 0x1c8   :  { %15028 = vst [vmem:[#allocation48_spill] sm:$0xff] %v8492_v6  ;;  %15030 = vst [vmem:[#allocation49_spill] sm:$0xff] %v8495_v54  ;;  %v1730_v24 = vmul.f32 %v15036_v0, %v15040_v51  ;;  %v1731_v46 = vmul.f32 %v15036_v0, %v15041_v10  ;;  %v1732_v44 = vmul.f32 %v15036_v0, %v15042_v63  ;;  %v15047_v18 = vld [vmem:[#allocation15_spill] sm:$0xff]  ;;  %v15048_v60 = vld [vmem:[#allocation20_spill] sm:$0xff] }
 0x1c9   :  { %15032 = vst [vmem:[#allocation43_spill] sm:$0xff] %v8498_v21  ;;  %15034 = vst [vmem:[#allocation34_spill] sm:$0xff] %v8501_v34  ;;  %v1733_v38 = vmul.f32 %v15036_v0, %v15043_v20  ;;  %v1734_v5 = vmul.f32 %v15036_v0, %v15044_v57  ;;  %v1735_v40 = vmul.f32 %v15036_v0, %v15045_v45  ;;  %v15049_v14 = vld [vmem:[#allocation17_spill] sm:$0xff]  ;;  %v15051_v25 = vld [vmem:[#allocation28_spill] sm:$0xff] }
 0x1ca   :  { %v1736_v11 = vmul.f32 %v15036_v0, %v15046_v27  ;;  %v1737_v4 = vmul.f32 %v15036_v0, %v15047_v18  ;;  %v1738_v36 = vmul.f32 %v15036_v0, %v15048_v60  ;;  %v1739_v37 = vmul.f32 %v15036_v0, %v15049_v14  ;;  %v15050_v19 = vld [vmem:[#allocation33_spill] sm:$0xff]  ;;  %v8543_v18 = vld [vmem:[%s13400_s2 + $0x1a3] sm:$0xff]  ;;  %v15061_v54 = vld [vmem:[#allocation32_spill] sm:$0xff] }
 0x1cb   :  { %v1740_v39 = vmul.f32 %v15036_v0, %v15050_v19  ;;  %v1741_v49 = vmul.f32 %v15036_v0, %v15051_v25  ;;  %v8538_v45 = vld [vmem:[%s13400_s2 + $0x19b] sm:$0xff]  ;;  %15053 = vst [vmem:[#allocation23_spill] sm:$0xff] %v8543_v18  ;;  %v15058_v10 = vld [vmem:[#allocation27_spill] sm:$0xff]  ;;  %v15062_v6 = vld [vmem:[#allocation36_spill] sm:$0xff] }
 0x1cc   :  { %15052 = vst [vmem:[#allocation19_spill] sm:$0xff] %v8538_v45  ;;  %v15054_v60 = vld [vmem:[#allocation29_spill] sm:$0xff]  ;;  %v15056_v19 = vld [vmem:[#allocation46_spill] sm:$0xff]  ;;  %v1746_v51 = vmul.f32 %v15036_v0, %v15058_v10  ;;  %v15066_v56 = vld [vmem:[#allocation8_spill] sm:$0xff] }
 0x1cd   :  { %v1742_v27 = vmul.f32 %v15036_v0, %v15054_v60  ;;  %v15055_v14 = vld [vmem:[#allocation41_spill] sm:$0xff]  ;;  %v1744_v20 = vmul.f32 %v15036_v0, %v15056_v19  ;;  %v15060_v34 = vld [vmem:[#allocation42_spill] sm:$0xff]  ;;  %v1749_v60 = vmul.f32 %v15036_v0, %v15061_v54  ;;  %v1756_v54 = vmul.f32 %v15036_v0, %v8538_v45 }
 0x1ce   :  { %v1743_v57 = vmul.f32 %v15036_v0, %v15055_v14  ;;  %v15057_v25 = vld [vmem:[#allocation9_spill] sm:$0xff]  ;;  %v1748_v21 = vmul.f32 %v15036_v0, %v15060_v34  ;;  %v1750_v14 = vmul.f32 %v15036_v0, %v15062_v6  ;;  %v15063_v13 = vld [vmem:[#allocation38_spill] sm:$0xff]  ;;  %v1755_v34 = vmul.f32 %v15036_v0, %v8373_v55 }
 0x1cf   :  { %v1745_v63 = vmul.f32 %v15036_v0, %v15057_v25  ;;  %v15059_v29 = vld [vmem:[#allocation13_spill] sm:$0xff]  ;;  %v1751_v19 = vmul.f32 %v15036_v0, %v15063_v13  ;;  %v15065_v50 = vld [vmem:[#allocation30_spill] sm:$0xff]  ;;  %v1757_v6 = vmul.f32 %v15036_v0, %v8543_v18  ;;  %v8578_v13 = vadd.f32 %v1726_v59, %v8408_v41 }
 0x1d0   :  { %v1747_v52 = vmul.f32 %v15036_v0, %v15059_v29  ;;  %v15064_v23 = vld [vmem:[#allocation21_spill] sm:$0xff]  ;;  %v1753_v10 = vmul.f32 %v15036_v0, %v15065_v50  ;;  %v1754_v29 = vmul.f32 %v15036_v0, %v15066_v56  ;;  %v8584_v50 = vadd.f32 %v1728_v2, %v8414_v43 }
 0x1d1   :  { %v1752_v25 = vmul.f32 %v15036_v0, %v15064_v23  ;;  %v8581_v23 = vadd.f32 %v1727_v48, %v8411_v9  ;;  %v8587_v56 = vadd.f32 %v1729_v47, %v8417_v7  ;;  %v8590_v55 = vadd.f32 %v1730_v24, %v8420_v33  ;;  %v15081_v24 = vld [vmem:[#allocation34_spill] sm:$0xff] }
 0x1d2   :  { %v8593_v45 = vadd.f32 %v1731_v46, %v8423_v53  ;;  %v8596_v0 = vadd.f32 %v1732_v44, %v8426_v16  ;;  %v8599_v41 = vadd.f32 %v1733_v38, %v8429_v28  ;;  %v8602_v9 = vadd.f32 %v1734_v5, %v8432_v15  ;;  %v15084_v44 = vld [vmem:[#allocation12_spill] sm:$0xff]  ;;  %v15085_v38 = vld [vmem:[#allocation7_spill] sm:$0xff] }
 0x1d3   :  { %v8605_v43 = vadd.f32 %v1735_v40, %v8435_v61  ;;  %v8608_v7 = vadd.f32 %v1736_v11, %v8438_v1  ;;  %v8611_v33 = vadd.f32 %v1737_v4, %v8441_v62  ;;  %v8614_v53 = vadd.f32 %v1738_v36, %v8444_v26 }
 0x1d4   :  { %v8617_v16 = vadd.f32 %v1739_v37, %v8447_v32  ;;  %v8620_v28 = vadd.f32 %v1740_v39, %v8450_v8  ;;  %v8623_v15 = vadd.f32 %v1741_v49, %v8453_v30  ;;  %v8626_v61 = vadd.f32 %v1742_v27, %v8456_v22 }
 0x1d5   :  { %v8629_v1 = vadd.f32 %v1743_v57, %v8459_v3  ;;  %v8632_v62 = vadd.f32 %v1744_v20, %v8462_v58  ;;  %v8635_v26 = vadd.f32 %v1745_v63, %v8465_v31  ;;  %v8638_v32 = vadd.f32 %v1746_v51, %v8468_v42  ;;  %v15067_v3 = vld [vmem:[#allocation18_spill] sm:$0xff]  ;;  %v15069_v58 = vld [vmem:[#allocation35_spill] sm:$0xff] }
 0x1d6   :  { %v8641_v8 = vadd.f32 %v1747_v52, %v8471_v17  ;;  %v8644_v30 = vadd.f32 %v1748_v21, %v8474_v35  ;;  %v8647_v22 = vadd.f32 %v1749_v60, %v8477_v12  ;;  %v8650_v59 = vadd.f32 %v1750_v14, %v15067_v3  ;;  %v15071_v31 = vld [vmem:[#allocation11_spill] sm:$0xff]  ;;  %v15075_v17 = vld [vmem:[#allocation48_spill] sm:$0xff]  ;;  %v15077_v35 = vld [vmem:[#allocation49_spill] sm:$0xff] }
 0x1d7   :  { %v8653_v48 = vadd.f32 %v1751_v19, %v15069_v58  ;;  %v8656_v2 = vadd.f32 %v1752_v25, %v15071_v31  ;;  %v15073_v42 = vld [vmem:[#allocation31_spill] sm:$0xff]  ;;  %v8662_v52 = vadd.f32 %v1754_v29, %v15075_v17  ;;  %v8665_v21 = vadd.f32 %v1755_v34, %v15077_v35  ;;  %v15083_v63 = vld [vmem:[#allocation14_spill] sm:$0xff]  ;;  %v15087_v29 = vld [vmem:[#allocation40_spill] sm:$0xff] }
 0x1d8   :  { %15068 = vst [vmem:[#allocation44_spill] sm:$0xff] %v8650_v59  ;;  %v8659_v47 = vadd.f32 %v1753_v10, %v15073_v42  ;;  %v15079_v12 = vld [vmem:[#allocation43_spill] sm:$0xff]  ;;  %v8671_v46 = vadd.f32 %v1757_v6, %v15081_v24  ;;  %v1792_v20 = vmul.f32 %v15084_v44, %v15083_v63  ;;  %v1793_v57 = vmul.f32 %v15084_v44, %v15085_v38  ;;  %v15088_v34 = vld [vmem:[#allocation37_spill] sm:$0xff]  ;;  %v15091_v60 = vld [vmem:[#allocation26_spill] sm:$0xff] }
 0x1d9   :  { %15070 = vst [vmem:[#allocation16_spill] sm:$0xff] %v8653_v48  ;;  %15072 = vst [vmem:[#allocation22_spill] sm:$0xff] %v8656_v2  ;;  %v8668_v51 = vadd.f32 %v1756_v54, %v15079_v12  ;;  %v15086_v10 = vld [vmem:[#allocation39_spill] sm:$0xff]  ;;  %v1795_v40 = vmul.f32 %v15084_v44, %v15087_v29  ;;  %v1796_v27 = vmul.f32 %v15084_v44, %v15088_v34  ;;  %v15089_v54 = vld [vmem:[#allocation10_spill] sm:$0xff] }
 0x1da   :  { %15074 = vst [vmem:[#allocation6_spill] sm:$0xff] %v8659_v47  ;;  %15076 = vst [vmem:[#allocation45_spill] sm:$0xff] %v8662_v52  ;;  %v1794_v5 = vmul.f32 %v15084_v44, %v15086_v10  ;;  %v1797_v11 = vmul.f32 %v15084_v44, %v15089_v54  ;;  %v15090_v6 = vld [vmem:[#allocation25_spill] sm:$0xff]  ;;  %v1799_v36 = vmul.f32 %v15084_v44, %v15091_v60  ;;  %v15092_v14 = vld [vmem:[#allocation47_spill] sm:$0xff] }
 0x1db   :  { %15078 = vst [vmem:[#allocation18_spill] sm:$0xff] %v8665_v21  ;;  %15080 = vst [vmem:[#allocation35_spill] sm:$0xff] %v8668_v51  ;;  %v1798_v4 = vmul.f32 %v15084_v44, %v15090_v6  ;;  %v1800_v37 = vmul.f32 %v15084_v44, %v15092_v14  ;;  %v15093_v19 = vld [vmem:[#allocation15_spill] sm:$0xff]  ;;  %v15094_v25 = vld [vmem:[#allocation20_spill] sm:$0xff] }
 0x1dc   :  { %15082 = vst [vmem:[#allocation11_spill] sm:$0xff] %v8671_v46  ;;  %v1801_v39 = vmul.f32 %v15084_v44, %v15093_v19  ;;  %v1802_v49 = vmul.f32 %v15084_v44, %v15094_v25  ;;  %v15095_v3 = vld [vmem:[#allocation17_spill] sm:$0xff]  ;;  %v15097_v17 = vld [vmem:[#allocation28_spill] sm:$0xff]  ;;  %v15106_v54 = vld [vmem:[#allocation42_spill] sm:$0xff]  ;;  %v8760_v59 = vadd.f32 %v1794_v5, %v8584_v50 }
 0x1dd   :  { %v1803_v58 = vmul.f32 %v15084_v44, %v15095_v3  ;;  %v15096_v31 = vld [vmem:[#allocation33_spill] sm:$0xff]  ;;  %v1805_v35 = vmul.f32 %v15084_v44, %v15097_v17  ;;  %v1812_v34 = vmul.f32 %v15084_v44, %v15106_v54  ;;  %v15107_v29 = vld [vmem:[#allocation32_spill] sm:$0xff]  ;;  %v15109_v21 = vld [vmem:[#allocation38_spill] sm:$0xff]  ;;  %v8780_v50 = vadd.f32 %v1800_v37, %v8602_v9 }
 0x1de   :  { %v1804_v42 = vmul.f32 %v15084_v44, %v15096_v31  ;;  %v15098_v12 = vld [vmem:[#allocation29_spill] sm:$0xff]  ;;  %v15102_v31 = vld [vmem:[#allocation46_spill] sm:$0xff]  ;;  %v1813_v10 = vmul.f32 %v15084_v44, %v15107_v29  ;;  %v15108_v46 = vld [vmem:[#allocation36_spill] sm:$0xff] }
 0x1df   :  { %v1806_v24 = vmul.f32 %v15084_v44, %v15098_v12  ;;  %v15099_v63 = vld [vmem:[#allocation41_spill] sm:$0xff]  ;;  %v1808_v25 = vmul.f32 %v15084_v44, %v15102_v31  ;;  %v15104_v12 = vld [vmem:[#allocation27_spill] sm:$0xff]  ;;  %v1814_v51 = vmul.f32 %v15084_v44, %v15108_v46  ;;  %v1815_v31 = vmul.f32 %v15084_v44, %v15109_v21  ;;  %v15111_v52 = vld [vmem:[#allocation30_spill] sm:$0xff] }
 0x1e0   :  { %v1807_v38 = vmul.f32 %v15084_v44, %v15099_v63  ;;  %v8708_v19 = vld [vmem:[%s13400_s2 + $0x1b3] sm:$0xff]  ;;  %v8713_v3 = vld [vmem:[%s13400_s2 + $0x1bb] sm:$0xff]  ;;  %v1810_v60 = vmul.f32 %v15084_v44, %v15104_v12  ;;  %v15114_v46 = vld [vmem:[#allocation19_spill] sm:$0xff]  ;;  %v1821_v21 = vmul.f32 %v15084_v44, %v8543_v18 }
 0x1e1   :  { %15100 = vst [vmem:[#allocation31_spill] sm:$0xff] %v8708_v19  ;;  %15101 = vst [vmem:[#allocation48_spill] sm:$0xff] %v8713_v3  ;;  %v15103_v17 = vld [vmem:[#allocation9_spill] sm:$0xff]  ;;  %v15112_v47 = vld [vmem:[#allocation8_spill] sm:$0xff]  ;;  %v1820_v48 = vmul.f32 %v15084_v44, %v15114_v46  ;;  %v8763_v46 = vadd.f32 %v1795_v40, %v8587_v56  ;;  %v8783_v56 = vadd.f32 %v1801_v39, %v8605_v43 }
 0x1e2   :  { %v1809_v14 = vmul.f32 %v15084_v44, %v15103_v17  ;;  %v15105_v63 = vld [vmem:[#allocation13_spill] sm:$0xff]  ;;  %v1818_v54 = vmul.f32 %v15084_v44, %v15112_v47  ;;  %v15113_v2 = vld [vmem:[#allocation24_spill] sm:$0xff]  ;;  %v8754_v47 = vadd.f32 %v1792_v20, %v8578_v13  ;;  %v8774_v13 = vadd.f32 %v1798_v4, %v8596_v0 }
 0x1e3   :  { %v1811_v6 = vmul.f32 %v15084_v44, %v15105_v63  ;;  %v15110_v17 = vld [vmem:[#allocation21_spill] sm:$0xff]  ;;  %v1817_v63 = vmul.f32 %v15084_v44, %v15111_v52  ;;  %v1819_v29 = vmul.f32 %v15084_v44, %v15113_v2  ;;  %v1823_v52 = vmul.f32 %v15084_v44, %v8713_v3  ;;  %v15138_v37 = vld [vmem:[#allocation40_spill] sm:$0xff] }
 0x1e4   :  { %v1816_v12 = vmul.f32 %v15084_v44, %v15110_v17  ;;  %v1822_v17 = vmul.f32 %v15084_v44, %v8708_v19  ;;  %v8757_v2 = vadd.f32 %v1793_v57, %v8581_v23  ;;  %v8768_v19 = vadd.f32 %v1796_v27, %v8590_v55  ;;  %v15120_v57 = vld [vmem:[#allocation16_spill] sm:$0xff]  ;;  %v15139_v39 = vld [vmem:[#allocation37_spill] sm:$0xff] }
 0x1e5   :  { %v8771_v44 = vadd.f32 %v1797_v11, %v8593_v45  ;;  %v8777_v23 = vadd.f32 %v1799_v36, %v8599_v41  ;;  %v8786_v20 = vadd.f32 %v1802_v49, %v8608_v7  ;;  %v8789_v55 = vadd.f32 %v1803_v58, %v8611_v33  ;;  %v15141_v58 = vld [vmem:[#allocation25_spill] sm:$0xff] }
 0x1e6   :  { %v8792_v45 = vadd.f32 %v1804_v42, %v8614_v53  ;;  %v8795_v0 = vadd.f32 %v1805_v35, %v8617_v16  ;;  %v8798_v41 = vadd.f32 %v1806_v24, %v8620_v28  ;;  %v8801_v9 = vadd.f32 %v1807_v38, %v8623_v15  ;;  %v15142_v42 = vld [vmem:[#allocation26_spill] sm:$0xff] }
 0x1e7   :  { %v8804_v43 = vadd.f32 %v1808_v25, %v8626_v61  ;;  %v8807_v7 = vadd.f32 %v1809_v14, %v8629_v1  ;;  %v8810_v33 = vadd.f32 %v1810_v60, %v8632_v62  ;;  %v8813_v53 = vadd.f32 %v1811_v6, %v8635_v26  ;;  %v15118_v1 = vld [vmem:[#allocation44_spill] sm:$0xff]  ;;  %v15122_v26 = vld [vmem:[#allocation22_spill] sm:$0xff]  ;;  %v15132_v6 = vld [vmem:[#allocation11_spill] sm:$0xff] }
 0x1e8   :  { %v8816_v16 = vadd.f32 %v1812_v34, %v8638_v32  ;;  %v8819_v28 = vadd.f32 %v1813_v10, %v8641_v8  ;;  %v8822_v15 = vadd.f32 %v1814_v51, %v8644_v30  ;;  %v8825_v61 = vadd.f32 %v1815_v31, %v8647_v22  ;;  %v15124_v34 = vld [vmem:[#allocation6_spill] sm:$0xff]  ;;  %v15126_v8 = vld [vmem:[#allocation45_spill] sm:$0xff]  ;;  %v15130_v22 = vld [vmem:[#allocation35_spill] sm:$0xff] }
 0x1e9   :  { %v8828_v62 = vadd.f32 %v1816_v12, %v15118_v1  ;;  %v8831_v5 = vadd.f32 %v1817_v63, %v15120_v57  ;;  %v8834_v40 = vadd.f32 %v1818_v54, %v15122_v26  ;;  %v1857_v32 = vstv %s8731_s8  ;;  %v15128_v30 = vld [vmem:[#allocation18_spill] sm:$0xff]  ;;  %v15144_v12 = vld [vmem:[#allocation15_spill] sm:$0xff]  ;;  %v15145_v63 = vld [vmem:[#allocation20_spill] sm:$0xff]  ;;  %s11705_s8 = sld [smem:[#allocation3 + $0x14]] }
 0x1ea   :  { %15115 = vst [vmem:[#allocation49_spill] sm:$0xff] %v8819_v28  ;;  %15116 = vst [vmem:[#allocation43_spill] sm:$0xff] %v8822_v15  ;;  %v8838_v27 = vadd.f32 %v1819_v29, %v15124_v34  ;;  %v8841_v10 = vadd.f32 %v1820_v48, %v15126_v8  ;;  %v8844_v51 = vadd.f32 %v1821_v21, %v15128_v30  ;;  %v8853_v60 = vstv %s8741_s9  ;;  %v15137_v29 = vld [vmem:[#allocation39_spill] sm:$0xff]  ;;  %v15140_v21 = vld [vmem:[#allocation10_spill] sm:$0xff] }
 0x1eb   :  { %15117 = vst [vmem:[#allocation34_spill] sm:$0xff] %v8825_v61  ;;  %15119 = vst [vmem:[#allocation14_spill] sm:$0xff] %v8828_v62  ;;  %v8847_v11 = vadd.f32 %v1822_v17, %v15130_v22  ;;  %v8850_v4 = vadd.f32 %v1823_v52, %v15132_v6  ;;  %v8856_v54 = vstv %s8751_s10  ;;  %v8859_v36 = vstv %s8765_s11  ;;  %v15143_v52 = vld [vmem:[#allocation47_spill] sm:$0xff]  ;;  %v15146_v1 = vld [vmem:[#allocation17_spill] sm:$0xff] }
 0x1ec   :  { %15121 = vst [vmem:[#allocation12_spill] sm:$0xff] %v8831_v5  ;;  %15123 = vst [vmem:[#allocation7_spill] sm:$0xff] %v8834_v40  ;;  %v1858_v14 = vmul.f32 %v1857_v32, %v15137_v29  ;;  %v1859_v48 = vmul.f32 %v1857_v32, %v15138_v37  ;;  %v1860_v25 = vmul.f32 %v1857_v32, %v15139_v39  ;;  %v15147_v26 = vld [vmem:[#allocation33_spill] sm:$0xff]  ;;  %v15148_v8 = vld [vmem:[#allocation28_spill] sm:$0xff] }
 0x1ed   :  { %15125 = vst [vmem:[#allocation44_spill] sm:$0xff] %v8838_v27  ;;  %15127 = vst [vmem:[#allocation16_spill] sm:$0xff] %v8841_v10  ;;  %v1861_v49 = vmul.f32 %v1857_v32, %v15140_v21  ;;  %v1862_v31 = vmul.f32 %v1857_v32, %v15141_v58  ;;  %v1863_v17 = vmul.f32 %v1857_v32, %v15142_v42  ;;  %v15149_v22 = vld [vmem:[#allocation29_spill] sm:$0xff]  ;;  %v15158_v21 = vld [vmem:[#allocation32_spill] sm:$0xff] }
 0x1ee   :  { %15129 = vst [vmem:[#allocation22_spill] sm:$0xff] %v8844_v51  ;;  %15131 = vst [vmem:[#allocation6_spill] sm:$0xff] %v8847_v11  ;;  %v1864_v35 = vmul.f32 %v1857_v32, %v15143_v52  ;;  %v1865_v24 = vmul.f32 %v1857_v32, %v15144_v12  ;;  %v1866_v38 = vmul.f32 %v1857_v32, %v15145_v63  ;;  %v15150_v29 = vld [vmem:[#allocation41_spill] sm:$0xff]  ;;  %v8880_v12 = vld [vmem:[%s13400_s2 + $0x1cb] sm:$0xff] }
 0x1ef   :  { %15133 = vst [vmem:[#allocation45_spill] sm:$0xff] %v8850_v4  ;;  %15134 = vst [vmem:[#allocation18_spill] sm:$0xff] %v8853_v60  ;;  %v1867_v57 = vmul.f32 %v1857_v32, %v15146_v1  ;;  %v1868_v34 = vmul.f32 %v1857_v32, %v15147_v26  ;;  %v1869_v30 = vmul.f32 %v1857_v32, %v15148_v8  ;;  %v15152_v58 = vld [vmem:[#allocation9_spill] sm:$0xff]  ;;  %v15155_v26 = vld [vmem:[#allocation27_spill] sm:$0xff] }
 0x1f0   :  { %15135 = vst [vmem:[#allocation35_spill] sm:$0xff] %v8856_v54  ;;  %15136 = vst [vmem:[#allocation11_spill] sm:$0xff] %v8859_v36  ;;  %v1870_v6 = vmul.f32 %v1857_v32, %v15149_v22  ;;  %v1871_v37 = vmul.f32 %v1857_v32, %v15150_v29  ;;  %v15151_v36 = vld [vmem:[#allocation46_spill] sm:$0xff]  ;;  %v1873_v42 = vmul.f32 %v1857_v32, %v15152_v58  ;;  %v8885_v1 = vld [vmem:[%s13400_s2 + $0x1d3] sm:$0xff] }
 0x1f1   :  { %v1872_v54 = vmul.f32 %v1857_v32, %v15151_v36  ;;  %15153 = vst [vmem:[#allocation39_spill] sm:$0xff] %v8880_v12  ;;  %15154 = vst [vmem:[#allocation40_spill] sm:$0xff] %v8885_v1  ;;  %v1874_v8 = vmul.f32 %v1857_v32, %v15155_v26  ;;  %v15156_v63 = vld [vmem:[#allocation13_spill] sm:$0xff]  ;;  %v15157_v52 = vld [vmem:[#allocation42_spill] sm:$0xff]  ;;  %v1877_v36 = vmul.f32 %v1857_v32, %v15158_v21 }
 0x1f2   :  { %v1875_v22 = vmul.f32 %v1857_v32, %v15156_v63  ;;  %v1876_v29 = vmul.f32 %v1857_v32, %v15157_v52  ;;  %v15159_v60 = vld [vmem:[#allocation36_spill] sm:$0xff]  ;;  %v15160_v39 = vld [vmem:[#allocation38_spill] sm:$0xff]  ;;  %v15161_v11 = vld [vmem:[#allocation21_spill] sm:$0xff]  ;;  %v1885_v63 = vmul.f32 %v1857_v32, %v8543_v18  ;;  %v1887_v21 = vmul.f32 %v1857_v32, %v8713_v3 }
 0x1f3   :  { %v1878_v58 = vmul.f32 %v1857_v32, %v15159_v60  ;;  %v1879_v4 = vmul.f32 %v1857_v32, %v15160_v39  ;;  %v1880_v51 = vmul.f32 %v1857_v32, %v15161_v11  ;;  %v15162_v10 = vld [vmem:[#allocation30_spill] sm:$0xff]  ;;  %v15163_v40 = vld [vmem:[#allocation8_spill] sm:$0xff]  ;;  %v15165_v15 = vld [vmem:[#allocation19_spill] sm:$0xff]  ;;  %v1888_v60 = vmul.f32 %v1857_v32, %v8880_v12 }
 0x1f4   :  { %v1881_v27 = vmul.f32 %v1857_v32, %v15162_v10  ;;  %v1882_v5 = vmul.f32 %v1857_v32, %v15163_v40  ;;  %v15164_v62 = vld [vmem:[#allocation24_spill] sm:$0xff]  ;;  %v1884_v26 = vmul.f32 %v1857_v32, %v15165_v15  ;;  %v15166_v28 = vld [vmem:[#allocation31_spill] sm:$0xff]  ;;  %v1889_v39 = vmul.f32 %v1857_v32, %v8885_v1 }
 0x1f5   :  { %v1883_v61 = vmul.f32 %v1857_v32, %v15164_v62  ;;  %v1886_v52 = vmul.f32 %v1857_v32, %v15166_v28  ;;  %v8904_v11 = vadd.f32 %v1858_v14, %v8754_v47  ;;  %v8907_v10 = vadd.f32 %v1859_v48, %v8757_v2 }
 0x1f6   :  { %v8910_v62 = vadd.f32 %v1860_v25, %v8760_v59  ;;  %v8913_v15 = vadd.f32 %v1861_v49, %v8763_v46  ;;  %v8916_v28 = vadd.f32 %v1862_v31, %v8768_v19  ;;  %v8919_v3 = vadd.f32 %v1863_v17, %v8771_v44 }
 0x1f7   :  { %v8922_v32 = vadd.f32 %v1864_v35, %v8774_v13  ;;  %v8925_v47 = vadd.f32 %v1865_v24, %v8777_v23  ;;  %v8928_v2 = vadd.f32 %v1866_v38, %v8780_v50  ;;  %v8931_v59 = vadd.f32 %v1867_v57, %v8783_v56  ;;  %v15187_v24 = vld [vmem:[#allocation18_spill] sm:$0xff] }
 0x1f8   :  { %v8934_v46 = vadd.f32 %v1868_v34, %v8786_v20  ;;  %v8937_v19 = vadd.f32 %v1869_v30, %v8789_v55  ;;  %v8940_v44 = vadd.f32 %v1870_v6, %v8792_v45  ;;  %v8943_v13 = vadd.f32 %v1871_v37, %v8795_v0  ;;  %v15188_v57 = vld [vmem:[#allocation10_spill] sm:$0xff] }
 0x1f9   :  { %v8946_v23 = vadd.f32 %v1872_v54, %v8798_v41  ;;  %v8949_v50 = vadd.f32 %v1873_v42, %v8801_v9  ;;  %v8952_v56 = vadd.f32 %v1874_v8, %v8804_v43  ;;  %v8955_v20 = vadd.f32 %v1875_v22, %v8807_v7  ;;  %v15167_v41 = vld [vmem:[#allocation49_spill] sm:$0xff]  ;;  %v15168_v9 = vld [vmem:[#allocation43_spill] sm:$0xff]  ;;  %v15169_v43 = vld [vmem:[#allocation34_spill] sm:$0xff] }
 0x1fa   :  { %v8958_v55 = vadd.f32 %v1876_v29, %v8810_v33  ;;  %v8961_v45 = vadd.f32 %v1877_v36, %v8813_v53  ;;  %v8964_v0 = vadd.f32 %v1878_v58, %v8816_v16  ;;  %v8967_v54 = vadd.f32 %v1879_v4, %v15167_v41  ;;  %v15170_v7 = vld [vmem:[#allocation14_spill] sm:$0xff]  ;;  %v15172_v33 = vld [vmem:[#allocation12_spill] sm:$0xff]  ;;  %v15174_v53 = vld [vmem:[#allocation7_spill] sm:$0xff] }
 0x1fb   :  { %v8970_v14 = vadd.f32 %v1880_v51, %v15168_v9  ;;  %v8973_v48 = vadd.f32 %v1881_v27, %v15169_v43  ;;  %v8976_v25 = vadd.f32 %v1882_v5, %v15170_v7  ;;  %v8979_v49 = vadd.f32 %v1883_v61, %v15172_v33  ;;  %v15176_v16 = vld [vmem:[#allocation44_spill] sm:$0xff]  ;;  %v15180_v51 = vld [vmem:[#allocation22_spill] sm:$0xff]  ;;  %v15184_v5 = vld [vmem:[#allocation45_spill] sm:$0xff] }
 0x1fc   :  { %v8982_v36 = vadd.f32 %v1884_v26, %v15174_v53  ;;  %v8985_v58 = vadd.f32 %v1885_v63, %v15176_v16  ;;  %v15178_v4 = vld [vmem:[#allocation16_spill] sm:$0xff]  ;;  %v8991_v42 = vadd.f32 %v1887_v21, %v15180_v51  ;;  %v15182_v27 = vld [vmem:[#allocation6_spill] sm:$0xff]  ;;  %v8997_v35 = vadd.f32 %v1889_v39, %v15184_v5  ;;  %v15186_v61 = vld [vmem:[#allocation37_spill] sm:$0xff] }
 0x1fd   :  { %15171 = vst [vmem:[#allocation49_spill] sm:$0xff] %v8976_v25  ;;  %15173 = vst [vmem:[#allocation43_spill] sm:$0xff] %v8979_v49  ;;  %v8988_v31 = vadd.f32 %v1886_v52, %v15178_v4  ;;  %v8994_v17 = vadd.f32 %v1888_v60, %v15182_v27  ;;  %v1924_v38 = vmul.f32 %v15187_v24, %v15186_v61  ;;  %v15189_v63 = vld [vmem:[#allocation25_spill] sm:$0xff]  ;;  %v15190_v52 = vld [vmem:[#allocation26_spill] sm:$0xff] }
 0x1fe   :  { %15175 = vst [vmem:[#allocation34_spill] sm:$0xff] %v8982_v36  ;;  %15177 = vst [vmem:[#allocation14_spill] sm:$0xff] %v8985_v58  ;;  %v1925_v26 = vmul.f32 %v15187_v24, %v15188_v57  ;;  %v1926_v34 = vmul.f32 %v15187_v24, %v15189_v63  ;;  %v1927_v8 = vmul.f32 %v15187_v24, %v15190_v52  ;;  %v15191_v21 = vld [vmem:[#allocation47_spill] sm:$0xff]  ;;  %v15193_v39 = vld [vmem:[#allocation20_spill] sm:$0xff] }
 0x1ff   :  { %15179 = vst [vmem:[#allocation12_spill] sm:$0xff] %v8988_v31  ;;  %15181 = vst [vmem:[#allocation7_spill] sm:$0xff] %v8991_v42  ;;  %v1928_v30 = vmul.f32 %v15187_v24, %v15191_v21  ;;  %v15192_v60 = vld [vmem:[#allocation15_spill] sm:$0xff]  ;;  %v1930_v6 = vmul.f32 %v15187_v24, %v15193_v39  ;;  %v15194_v29 = vld [vmem:[#allocation17_spill] sm:$0xff]  ;;  %v1946_v31 = vmul.f32 %v15187_v24, %v15163_v40 }
 0x200   :  { %15183 = vst [vmem:[#allocation44_spill] sm:$0xff] %v8994_v17  ;;  %15185 = vst [vmem:[#allocation16_spill] sm:$0xff] %v8997_v35  ;;  %v1929_v22 = vmul.f32 %v15187_v24, %v15192_v60  ;;  %v1931_v37 = vmul.f32 %v15187_v24, %v15194_v29  ;;  %v15195_v41 = vld [vmem:[#allocation33_spill] sm:$0xff]  ;;  %v15196_v43 = vld [vmem:[#allocation28_spill] sm:$0xff]  ;;  %v1953_v40 = vmul.f32 %v15187_v24, %v8885_v1 }
 0x201   :  { %v1932_v9 = vmul.f32 %v15187_v24, %v15195_v41  ;;  %v1933_v7 = vmul.f32 %v15187_v24, %v15196_v43  ;;  %v15197_v33 = vld [vmem:[#allocation29_spill] sm:$0xff]  ;;  %v15199_v51 = vld [vmem:[#allocation46_spill] sm:$0xff]  ;;  %v15201_v57 = vld [vmem:[#allocation27_spill] sm:$0xff]  ;;  %v9086_v1 = vadd.f32 %v1928_v30, %v8916_v28 }
 0x202   :  { %v1934_v53 = vmul.f32 %v15187_v24, %v15197_v33  ;;  %v15198_v16 = vld [vmem:[#allocation41_spill] sm:$0xff]  ;;  %v1936_v27 = vmul.f32 %v15187_v24, %v15199_v51  ;;  %v1938_v29 = vmul.f32 %v15187_v24, %v15201_v57  ;;  %v9034_v43 = vld [vmem:[%s13400_s2 + $0x1e3] sm:$0xff]  ;;  %v15206_v57 = vld [vmem:[#allocation36_spill] sm:$0xff] }
 0x203   :  { %v1935_v4 = vmul.f32 %v15187_v24, %v15198_v16  ;;  %v15200_v5 = vld [vmem:[#allocation9_spill] sm:$0xff]  ;;  %15203 = vst [vmem:[#allocation22_spill] sm:$0xff] %v9034_v43  ;;  %v9039_v16 = vld [vmem:[%s13400_s2 + $0x1eb] sm:$0xff]  ;;  %v15204_v51 = vld [vmem:[#allocation42_spill] sm:$0xff]  ;;  %v1942_v21 = vmul.f32 %v15187_v24, %v15206_v57  ;;  %v1949_v57 = vmul.f32 %v15187_v24, %v8543_v18  ;;  %v9074_v18 = vadd.f32 %v1924_v38, %v8904_v11 }
 0x204   :  { %v1937_v61 = vmul.f32 %v15187_v24, %v15200_v5  ;;  %v15202_v39 = vld [vmem:[#allocation13_spill] sm:$0xff]  ;;  %v1940_v33 = vmul.f32 %v15187_v24, %v15204_v51  ;;  %v15205_v5 = vld [vmem:[#allocation32_spill] sm:$0xff]  ;;  %v15209_v17 = vld [vmem:[#allocation30_spill] sm:$0xff]  ;;  %v9095_v11 = vadd.f32 %v1931_v37, %v8925_v47  ;;  %v9116_v47 = vadd.f32 %v1938_v29, %v8946_v23 }
 0x205   :  { %v1939_v41 = vmul.f32 %v15187_v24, %v15202_v39  ;;  %v1941_v60 = vmul.f32 %v15187_v24, %v15205_v5  ;;  %v15207_v39 = vld [vmem:[#allocation38_spill] sm:$0xff]  ;;  %v15208_v63 = vld [vmem:[#allocation21_spill] sm:$0xff]  ;;  %v1945_v42 = vmul.f32 %v15187_v24, %v15209_v17  ;;  %v15210_v58 = vld [vmem:[#allocation24_spill] sm:$0xff]  ;;  %v1952_v17 = vmul.f32 %v15187_v24, %v8880_v12 }
 0x206   :  { %v1943_v52 = vmul.f32 %v15187_v24, %v15207_v39  ;;  %v1944_v35 = vmul.f32 %v15187_v24, %v15208_v63  ;;  %v1947_v51 = vmul.f32 %v15187_v24, %v15210_v58  ;;  %v15211_v36 = vld [vmem:[#allocation19_spill] sm:$0xff]  ;;  %v15213_v25 = vld [vmem:[#allocation48_spill] sm:$0xff]  ;;  %v1954_v58 = vmul.f32 %v15187_v24, %v9034_v43  ;;  %v15231_v30 = vld [vmem:[#allocation25_spill] sm:$0xff] }
 0x207   :  { %v1948_v5 = vmul.f32 %v15187_v24, %v15211_v36  ;;  %v15212_v49 = vld [vmem:[#allocation31_spill] sm:$0xff]  ;;  %v1951_v63 = vmul.f32 %v15187_v24, %v15213_v25  ;;  %v1955_v36 = vmul.f32 %v15187_v24, %v9039_v16  ;;  %v9080_v25 = vadd.f32 %v1926_v34, %v8910_v62 }
 0x208   :  { %v1950_v39 = vmul.f32 %v15187_v24, %v15212_v49  ;;  %v9077_v49 = vadd.f32 %v1925_v26, %v8907_v10  ;;  %v9083_v12 = vadd.f32 %v1927_v8, %v8913_v15  ;;  %v9089_v43 = vadd.f32 %v1929_v22, %v8919_v3  ;;  %v15229_v8 = vld [vmem:[#allocation16_spill] sm:$0xff] }
 0x209   :  { %v9092_v24 = vadd.f32 %v1930_v6, %v8922_v32  ;;  %v9098_v10 = vadd.f32 %v1932_v9, %v8928_v2  ;;  %v9101_v62 = vadd.f32 %v1933_v7, %v8931_v59  ;;  %v9104_v15 = vadd.f32 %v1934_v53, %v8934_v46 }
 0x20a   :  { %v9107_v28 = vadd.f32 %v1935_v4, %v8937_v19  ;;  %v9110_v3 = vadd.f32 %v1936_v27, %v8940_v44  ;;  %v9113_v32 = vadd.f32 %v1937_v61, %v8943_v13  ;;  %v9119_v2 = vadd.f32 %v1939_v41, %v8949_v50  ;;  %v15240_v4 = vld [vmem:[#allocation29_spill] sm:$0xff]  ;;  %v15242_v61 = vld [vmem:[#allocation46_spill] sm:$0xff] }
 0x20b   :  { %v9122_v59 = vadd.f32 %v1940_v33, %v8952_v56  ;;  %v9125_v46 = vadd.f32 %v1941_v60, %v8955_v20  ;;  %v9128_v19 = vadd.f32 %v1942_v21, %v8958_v55  ;;  %v9131_v44 = vadd.f32 %v1943_v52, %v8961_v45  ;;  %v15215_v20 = vld [vmem:[#allocation49_spill] sm:$0xff]  ;;  %v15217_v55 = vld [vmem:[#allocation43_spill] sm:$0xff]  ;;  %v15219_v45 = vld [vmem:[#allocation34_spill] sm:$0xff] }
 0x20c   :  { %v9134_v13 = vadd.f32 %v1944_v35, %v8964_v0  ;;  %v9137_v23 = vadd.f32 %v1945_v42, %v8967_v54  ;;  %v9140_v50 = vadd.f32 %v1946_v31, %v8970_v14  ;;  %v9143_v56 = vadd.f32 %v1947_v51, %v8973_v48  ;;  %v15221_v0 = vld [vmem:[#allocation14_spill] sm:$0xff]  ;;  %v15223_v54 = vld [vmem:[#allocation12_spill] sm:$0xff]  ;;  %v15225_v14 = vld [vmem:[#allocation7_spill] sm:$0xff] }
 0x20d   :  { %v9146_v38 = vadd.f32 %v1948_v5, %v15215_v20  ;;  %v9149_v26 = vadd.f32 %v1949_v57, %v15217_v55  ;;  %v9152_v34 = vadd.f32 %v1950_v39, %v15219_v45  ;;  %v9155_v35 = vadd.f32 %v1951_v63, %v15221_v0  ;;  %v15227_v48 = vld [vmem:[#allocation44_spill] sm:$0xff]  ;;  %v15232_v60 = vld [vmem:[#allocation35_spill] sm:$0xff]  ;;  %v15233_v39 = vld [vmem:[#allocation26_spill] sm:$0xff] }
 0x20e   :  { %15214 = vst [vmem:[#allocation6_spill] sm:$0xff] %v9143_v56  ;;  %v9158_v42 = vadd.f32 %v1952_v17, %v15223_v54  ;;  %v9161_v31 = vadd.f32 %v1953_v40, %v15225_v14  ;;  %v9164_v52 = vadd.f32 %v1954_v58, %v15227_v48  ;;  %v9167_v21 = vadd.f32 %v1955_v36, %v15229_v8  ;;  %v15234_v63 = vld [vmem:[#allocation47_spill] sm:$0xff]  ;;  %v15236_v40 = vld [vmem:[#allocation20_spill] sm:$0xff]  ;;  %v15237_v58 = vld [vmem:[#allocation17_spill] sm:$0xff] }
 0x20f   :  { %15216 = vst [vmem:[#allocation45_spill] sm:$0xff] %v9146_v38  ;;  %15218 = vst [vmem:[#allocation37_spill] sm:$0xff] %v9149_v26  ;;  %v1990_v22 = vmul.f32 %v15232_v60, %v15231_v30  ;;  %v1991_v6 = vmul.f32 %v15232_v60, %v15233_v39  ;;  %v1992_v29 = vmul.f32 %v15232_v60, %v15234_v63  ;;  %v15235_v17 = vld [vmem:[#allocation15_spill] sm:$0xff]  ;;  %v15238_v36 = vld [vmem:[#allocation33_spill] sm:$0xff] }
 0x210   :  { %15220 = vst [vmem:[#allocation18_spill] sm:$0xff] %v9152_v34  ;;  %15222 = vst [vmem:[#allocation10_spill] sm:$0xff] %v9155_v35  ;;  %v1993_v37 = vmul.f32 %v15232_v60, %v15235_v17  ;;  %v1994_v41 = vmul.f32 %v15232_v60, %v15236_v40  ;;  %v1995_v9 = vmul.f32 %v15232_v60, %v15237_v58  ;;  %v15239_v33 = vld [vmem:[#allocation28_spill] sm:$0xff]  ;;  %v15241_v27 = vld [vmem:[#allocation41_spill] sm:$0xff] }
 0x211   :  { %15224 = vst [vmem:[#allocation49_spill] sm:$0xff] %v9158_v42  ;;  %15226 = vst [vmem:[#allocation43_spill] sm:$0xff] %v9161_v31  ;;  %v1996_v7 = vmul.f32 %v15232_v60, %v15238_v36  ;;  %v1997_v53 = vmul.f32 %v15232_v60, %v15239_v33  ;;  %v1998_v51 = vmul.f32 %v15232_v60, %v15240_v4  ;;  %v15243_v20 = vld [vmem:[#allocation9_spill] sm:$0xff]  ;;  %v15244_v45 = vld [vmem:[#allocation27_spill] sm:$0xff] }
 0x212   :  { %15228 = vst [vmem:[#allocation34_spill] sm:$0xff] %v9164_v52  ;;  %15230 = vst [vmem:[#allocation14_spill] sm:$0xff] %v9167_v21  ;;  %v1999_v5 = vmul.f32 %v15232_v60, %v15241_v27  ;;  %v2000_v57 = vmul.f32 %v15232_v60, %v15242_v61  ;;  %v2001_v55 = vmul.f32 %v15232_v60, %v15243_v20  ;;  %v15245_v54 = vld [vmem:[#allocation13_spill] sm:$0xff]  ;;  %v15246_v48 = vld [vmem:[#allocation42_spill] sm:$0xff] }
 0x213   :  { %v2002_v0 = vmul.f32 %v15232_v60, %v15244_v45  ;;  %v2003_v14 = vmul.f32 %v15232_v60, %v15245_v54  ;;  %v2004_v8 = vmul.f32 %v15232_v60, %v15246_v48  ;;  %v15247_v30 = vld [vmem:[#allocation32_spill] sm:$0xff]  ;;  %v1590_v63 = vld [vmem:[%s13400_s2 + $0x1fb] sm:$0xff]  ;;  %v1591_v17 = vld [vmem:[%s13400_s2 + $0x203] sm:$0xff] }
 0x214   :  { %v2005_v39 = vmul.f32 %v15232_v60, %v15247_v30  ;;  %v15248_v40 = vld [vmem:[#allocation36_spill] sm:$0xff]  ;;  %v15249_v36 = vld [vmem:[#allocation38_spill] sm:$0xff]  ;;  %v15250_v4 = vld [vmem:[#allocation21_spill] sm:$0xff]  ;;  %v2021_v56 = vmul.f32 %v15232_v60, %v1591_v17 }
 0x215   :  { %v2006_v58 = vmul.f32 %v15232_v60, %v15248_v40  ;;  %v2007_v33 = vmul.f32 %v15232_v60, %v15249_v36  ;;  %v2008_v27 = vmul.f32 %v15232_v60, %v15250_v4  ;;  %v15251_v61 = vld [vmem:[#allocation30_spill] sm:$0xff]  ;;  %v15252_v45 = vld [vmem:[#allocation8_spill] sm:$0xff]  ;;  %v15254_v21 = vld [vmem:[#allocation19_spill] sm:$0xff] }
 0x216   :  { %v2009_v20 = vmul.f32 %v15232_v60, %v15251_v61  ;;  %v2010_v54 = vmul.f32 %v15232_v60, %v15252_v45  ;;  %v15253_v48 = vld [vmem:[#allocation24_spill] sm:$0xff]  ;;  %v2012_v52 = vmul.f32 %v15232_v60, %v15254_v21  ;;  %v15255_v31 = vld [vmem:[#allocation23_spill] sm:$0xff]  ;;  %v15260_v38 = vld [vmem:[#allocation22_spill] sm:$0xff]  ;;  %v2019_v21 = vmul.f32 %v15232_v60, %v9039_v16 }
 0x217   :  { %v2011_v30 = vmul.f32 %v15232_v60, %v15253_v48  ;;  %v2013_v40 = vmul.f32 %v15232_v60, %v15255_v31  ;;  %v15256_v42 = vld [vmem:[#allocation31_spill] sm:$0xff]  ;;  %v15257_v35 = vld [vmem:[#allocation48_spill] sm:$0xff]  ;;  %v2018_v48 = vmul.f32 %v15232_v60, %v15260_v38  ;;  %v2020_v31 = vmul.f32 %v15232_v60, %v1590_v63 }
 0x218   :  { %v2014_v36 = vmul.f32 %v15232_v60, %v15256_v42  ;;  %v2015_v4 = vmul.f32 %v15232_v60, %v15257_v35  ;;  %v15258_v34 = vld [vmem:[#allocation39_spill] sm:$0xff]  ;;  %v15259_v26 = vld [vmem:[#allocation40_spill] sm:$0xff]  ;;  %v9238_v42 = vadd.f32 %v1990_v22, %v9074_v18  ;;  %v9241_v35 = vadd.f32 %v1991_v6, %v9077_v49  ;;  %v15282_v63 = vld [vmem:[#allocation49_spill] sm:$0xff] }
 0x219   :  { %v2016_v61 = vmul.f32 %v15232_v60, %v15258_v34  ;;  %v2017_v45 = vmul.f32 %v15232_v60, %v15259_v26  ;;  %v9244_v34 = vadd.f32 %v1992_v29, %v9080_v25  ;;  %v9247_v26 = vadd.f32 %v1993_v37, %v9083_v12  ;;  %v9316_v6 = vld [vmem:[%s13400_s2 + $0x34] sm:$0xff]  ;;  %v9321_v29 = vld [vmem:[%s13400_s2 + $0x3c] sm:$0xff] }
 0x21a   :  { %v9250_v38 = vadd.f32 %v1994_v41, %v9086_v1  ;;  %v9253_v16 = vadd.f32 %v1995_v9, %v9089_v43  ;;  %v9256_v60 = vadd.f32 %v1996_v7, %v9092_v24  ;;  %v9259_v18 = vadd.f32 %v1997_v53, %v9095_v11  ;;  %15263 = vst [vmem:[#allocation44_spill] sm:$0xff] %v9316_v6  ;;  %v15267_v41 = vld [vmem:[#allocation6_spill] sm:$0xff]  ;;  %v9353_v53 = vld [vmem:[%s13400_s2 + $0x6c] sm:$0xff] }
 0x21b   :  { %v9262_v49 = vadd.f32 %v1998_v51, %v9098_v10  ;;  %v9265_v25 = vadd.f32 %v1999_v5, %v9101_v62  ;;  %v9268_v12 = vadd.f32 %v2000_v57, %v9104_v15  ;;  %v9271_v1 = vadd.f32 %v2001_v55, %v9107_v28  ;;  %v2054_v62 = vld [vmem:[%s13400_s2 + $0x4] sm:$0xff]  ;;  %v2055_v15 = vld [vmem:[%s13400_s2 + $0xc] sm:$0xff]  ;;  %v9294_v28 = vld [vmem:[%s13400_s2 + $0x1c] sm:$0xff]  ;;  %15264 = vst [vmem:[#allocation16_spill] sm:$0xff] %v9321_v29 }
 0x21c   :  { %v9274_v43 = vadd.f32 %v2002_v0, %v9110_v3  ;;  %v9277_v24 = vadd.f32 %v2003_v14, %v9113_v32  ;;  %v9280_v11 = vadd.f32 %v2004_v8, %v9116_v47  ;;  %v9283_v10 = vadd.f32 %v2005_v39, %v9119_v2  ;;  %15261 = vst [vmem:[#allocation12_spill] sm:$0xff] %v9294_v28  ;;  %v9299_v3 = vld [vmem:[%s13400_s2 + $0x24] sm:$0xff]  ;;  %v9380_v8 = vld [vmem:[%s13400_s2 + $0x94] sm:$0xff]  ;;  %v9385_v39 = vld [vmem:[%s13400_s2 + $0x9c] sm:$0xff] }
 0x21d   :  { %15262 = vst [vmem:[#allocation7_spill] sm:$0xff] %v9299_v3  ;;  %v9302_v32 = vadd.f32 %v2006_v58, %v9122_v59  ;;  %v9305_v47 = vadd.f32 %v2007_v33, %v9125_v46  ;;  %v9308_v2 = vadd.f32 %v2008_v27, %v9128_v19  ;;  %v9311_v22 = vadd.f32 %v2009_v20, %v9131_v44  ;;  %v9326_v59 = vld [vmem:[%s13400_s2 + $0x4c] sm:$0xff]  ;;  %v9331_v46 = vld [vmem:[%s13400_s2 + $0x54] sm:$0xff]  ;;  %v9348_v7 = vld [vmem:[%s13400_s2 + $0x64] sm:$0xff] }
 0x21e   :  { %15265 = vst [vmem:[#allocation25_spill] sm:$0xff] %v9326_v59  ;;  %15266 = vst [vmem:[#allocation35_spill] sm:$0xff] %v9331_v46  ;;  %v9334_v19 = vadd.f32 %v2010_v54, %v9134_v13  ;;  %v9337_v44 = vadd.f32 %v2011_v30, %v9137_v23  ;;  %v9340_v37 = vadd.f32 %v2012_v52, %v9140_v50  ;;  %v9358_v13 = vld [vmem:[%s13400_s2 + $0x7c] sm:$0xff]  ;;  %v9375_v14 = vld [vmem:[%s13400_s2 + $0x84] sm:$0xff] }
 0x21f   :  { %v9343_v9 = vadd.f32 %v2013_v40, %v15267_v41  ;;  %15268 = vst [vmem:[#allocation26_spill] sm:$0xff] %v9348_v7  ;;  %15269 = vst [vmem:[#allocation47_spill] sm:$0xff] %v9353_v53  ;;  %v15271_v23 = vld [vmem:[#allocation45_spill] sm:$0xff]  ;;  %v15275_v5 = vld [vmem:[#allocation18_spill] sm:$0xff]  ;;  %v9388_v17 = vadd.f32 %v2018_v48, %v15282_v63 }
 0x220   :  { %15270 = vst [vmem:[#allocation15_spill] sm:$0xff] %v9358_v13  ;;  %v9361_v50 = vadd.f32 %v2014_v36, %v15271_v23  ;;  %v15273_v52 = vld [vmem:[#allocation37_spill] sm:$0xff]  ;;  %v9367_v57 = vadd.f32 %v2016_v61, %v15275_v5  ;;  %v15277_v55 = vld [vmem:[#allocation10_spill] sm:$0xff]  ;;  %15279 = vst [vmem:[#allocation29_spill] sm:$0xff] %v9375_v14 }
 0x221   :  { %v9364_v51 = vadd.f32 %v2015_v4, %v15273_v52  ;;  %v9370_v0 = vadd.f32 %v2017_v45, %v15277_v55  ;;  %15280 = vst [vmem:[#allocation41_spill] sm:$0xff] %v9380_v8  ;;  %15281 = vst [vmem:[#allocation46_spill] sm:$0xff] %v9385_v39  ;;  %v15284_v58 = vld [vmem:[#allocation43_spill] sm:$0xff]  ;;  %v15286_v27 = vld [vmem:[#allocation34_spill] sm:$0xff] }
 0x222   :  { %15272 = vst [vmem:[#allocation20_spill] sm:$0xff] %v9361_v50  ;;  %15276 = vst [vmem:[#allocation33_spill] sm:$0xff] %v9367_v57  ;;  %v9391_v33 = vadd.f32 %v2019_v21, %v15284_v58  ;;  %v9394_v20 = vadd.f32 %v2020_v31, %v15286_v27  ;;  %v15288_v54 = vld [vmem:[#allocation14_spill] sm:$0xff]  ;;  %v9402_v40 = vld [vmem:[%s13400_s2 + $0xac] sm:$0xff] }
 0x223   :  { %15274 = vst [vmem:[#allocation17_spill] sm:$0xff] %v9364_v51  ;;  %15278 = vst [vmem:[#allocation28_spill] sm:$0xff] %v9370_v0  ;;  %v9397_v30 = vadd.f32 %v2021_v56, %v15288_v54  ;;  %v9407_v36 = vld [vmem:[%s13400_s2 + $0xb4] sm:$0xff]  ;;  %v9412_v4 = vld [vmem:[%s13400_s2 + $0xc4] sm:$0xff] }
 0x224   :  { %15283 = vst [vmem:[#allocation9_spill] sm:$0xff] %v9388_v17  ;;  %15285 = vst [vmem:[#allocation27_spill] sm:$0xff] %v9391_v33  ;;  %v9417_v56 = vld [vmem:[%s13400_s2 + $0xcc] sm:$0xff]  ;;  %v9422_v61 = vld [vmem:[%s13400_s2 + $0xdc] sm:$0xff] }
 0x225   :  { %15287 = vst [vmem:[#allocation13_spill] sm:$0xff] %v9394_v20  ;;  %15289 = vst [vmem:[#allocation42_spill] sm:$0xff] %v9397_v30  ;;  %v9427_v45 = vld [vmem:[%s13400_s2 + $0xe4] sm:$0xff]  ;;  %v9438_v52 = vld [vmem:[%s13400_s2 + $0xf4] sm:$0xff] }
 0x226   :  { %15290 = vst [vmem:[#allocation32_spill] sm:$0xff] %v9402_v40  ;;  %15291 = vst [vmem:[#allocation36_spill] sm:$0xff] %v9407_v36  ;;  %v15296_v48 = vld [vmem:[#allocation11_spill] sm:$0xff]  ;;  %v9443_v5 = vld [vmem:[%s13400_s2 + $0xfc] sm:$0xff] }
 0x227   :  { %15292 = vst [vmem:[#allocation38_spill] sm:$0xff] %v9412_v4  ;;  %15293 = vst [vmem:[#allocation21_spill] sm:$0xff] %v9417_v56  ;;  %v2100_v21 = vmul.f32 %v15296_v48, %v2054_v62  ;;  %v2101_v31 = vmul.f32 %v15296_v48, %v2055_v15  ;;  %v2102_v41 = vmul.f32 %v15296_v48, %v9294_v28  ;;  %v9448_v62 = vld [vmem:[%s13400_s2 + $0x10c] sm:$0xff]  ;;  %v9461_v27 = vld [vmem:[%s13400_s2 + $0x114] sm:$0xff] }
 0x228   :  { %15294 = vst [vmem:[#allocation30_spill] sm:$0xff] %v9422_v61  ;;  %15295 = vst [vmem:[#allocation8_spill] sm:$0xff] %v9427_v45  ;;  %v2103_v23 = vmul.f32 %v15296_v48, %v9299_v3  ;;  %v2104_v15 = vmul.f32 %v15296_v48, %v9316_v6  ;;  %v2105_v55 = vmul.f32 %v15296_v48, %v9321_v29  ;;  %v9466_v54 = vld [vmem:[%s13400_s2 + $0x124] sm:$0xff]  ;;  %v9471_v29 = vld [vmem:[%s13400_s2 + $0x12c] sm:$0xff] }
 0x229   :  { %15297 = vst [vmem:[#allocation24_spill] sm:$0xff] %v9438_v52  ;;  %15298 = vst [vmem:[#allocation19_spill] sm:$0xff] %v9443_v5  ;;  %v2106_v63 = vmul.f32 %v15296_v48, %v9326_v59  ;;  %v2107_v58 = vmul.f32 %v15296_v48, %v9331_v46  ;;  %v2108_v59 = vmul.f32 %v15296_v48, %v9348_v7  ;;  %v9484_v28 = vld [vmem:[%s13400_s2 + $0x13c] sm:$0xff]  ;;  %v9489_v30 = vld [vmem:[%s13400_s2 + $0x144] sm:$0xff] }
 0x22a   :  { %15299 = vst [vmem:[#allocation23_spill] sm:$0xff] %v9448_v62  ;;  %15300 = vst [vmem:[#allocation31_spill] sm:$0xff] %v9461_v27  ;;  %v2109_v46 = vmul.f32 %v15296_v48, %v9353_v53  ;;  %v2110_v6 = vmul.f32 %v15296_v48, %v9358_v13  ;;  %v2111_v3 = vmul.f32 %v15296_v48, %v9375_v14  ;;  %v9494_v53 = vld [vmem:[%s13400_s2 + $0x154] sm:$0xff]  ;;  %v9507_v33 = vld [vmem:[%s13400_s2 + $0x15c] sm:$0xff] }
 0x22b   :  { %15301 = vst [vmem:[#allocation48_spill] sm:$0xff] %v9466_v54  ;;  %15302 = vst [vmem:[#allocation39_spill] sm:$0xff] %v9471_v29  ;;  %v2112_v13 = vmul.f32 %v15296_v48, %v9380_v8  ;;  %v2113_v14 = vmul.f32 %v15296_v48, %v9385_v39  ;;  %v2114_v7 = vmul.f32 %v15296_v48, %v9402_v40  ;;  %v9512_v17 = vld [vmem:[%s13400_s2 + $0x16c] sm:$0xff]  ;;  %v9517_v39 = vld [vmem:[%s13400_s2 + $0x174] sm:$0xff] }
 0x22c   :  { %15303 = vst [vmem:[#allocation40_spill] sm:$0xff] %v9484_v28  ;;  %15304 = vst [vmem:[#allocation22_spill] sm:$0xff] %v9489_v30  ;;  %v2115_v20 = vmul.f32 %v15296_v48, %v9407_v36  ;;  %v2116_v40 = vmul.f32 %v15296_v48, %v9412_v4  ;;  %v2117_v36 = vmul.f32 %v15296_v48, %v9417_v56 }
 0x22d   :  { %15305 = vst [vmem:[#allocation6_spill] sm:$0xff] %v9494_v53  ;;  %15306 = vst [vmem:[#allocation45_spill] sm:$0xff] %v9507_v33  ;;  %v2118_v8 = vmul.f32 %v15296_v48, %v9422_v61  ;;  %v2119_v0 = vmul.f32 %v15296_v48, %v9427_v45  ;;  %v2120_v57 = vmul.f32 %v15296_v48, %v9438_v52 }
 0x22e   :  { %15307 = vst [vmem:[#allocation37_spill] sm:$0xff] %v9512_v17  ;;  %15308 = vst [vmem:[#allocation18_spill] sm:$0xff] %v9517_v39  ;;  %v2121_v51 = vmul.f32 %v15296_v48, %v9443_v5  ;;  %v2122_v50 = vmul.f32 %v15296_v48, %v9448_v62  ;;  %v2123_v4 = vmul.f32 %v15296_v48, %v9461_v27 }
 0x22f   :  { %v2124_v61 = vmul.f32 %v15296_v48, %v9466_v54  ;;  %v2125_v45 = vmul.f32 %v15296_v48, %v9471_v29  ;;  %v2126_v52 = vmul.f32 %v15296_v48, %v9484_v28  ;;  %v2127_v5 = vmul.f32 %v15296_v48, %v9489_v30 }
 0x230   :  { %v2128_v62 = vmul.f32 %v15296_v48, %v9494_v53  ;;  %v2129_v27 = vmul.f32 %v15296_v48, %v9507_v33  ;;  %v2130_v54 = vmul.f32 %v15296_v48, %v9512_v17  ;;  %v2131_v29 = vmul.f32 %v15296_v48, %v9517_v39 }
 0x231   :  { %v9558_v28 = vadd.f32 %v2100_v21, %v9238_v42  ;;  %v9561_v30 = vadd.f32 %v2101_v31, %v9241_v35  ;;  %v9564_v56 = vadd.f32 %v2102_v41, %v9244_v34  ;;  %v9567_v53 = vadd.f32 %v2103_v23, %v9247_v26  ;;  %v15334_v41 = vld [vmem:[#allocation16_spill] sm:$0xff] }
 0x232   :  { %v9572_v17 = vadd.f32 %v2104_v15, %v9250_v38  ;;  %v9575_v48 = vadd.f32 %v2105_v55, %v9253_v16  ;;  %v9578_v42 = vadd.f32 %v2106_v63, %v9256_v60  ;;  %v9581_v35 = vadd.f32 %v2107_v58, %v9259_v18  ;;  %v15338_v63 = vld [vmem:[#allocation47_spill] sm:$0xff] }
 0x233   :  { %v9584_v34 = vadd.f32 %v2108_v59, %v9262_v49  ;;  %v9587_v26 = vadd.f32 %v2109_v46, %v9265_v25  ;;  %v9590_v21 = vadd.f32 %v2110_v6, %v9268_v12  ;;  %v9593_v38 = vadd.f32 %v2111_v3, %v9271_v1 }
 0x234   :  { %v9596_v16 = vadd.f32 %v2112_v13, %v9274_v43  ;;  %v9599_v60 = vadd.f32 %v2113_v14, %v9277_v24  ;;  %v9602_v18 = vadd.f32 %v2114_v7, %v9280_v11  ;;  %v9605_v49 = vadd.f32 %v2115_v20, %v9283_v10 }
 0x235   :  { %v9608_v25 = vadd.f32 %v2116_v40, %v9302_v32  ;;  %v9611_v12 = vadd.f32 %v2117_v36, %v9305_v47  ;;  %v9614_v1 = vadd.f32 %v2118_v8, %v9308_v2  ;;  %v9617_v43 = vadd.f32 %v2119_v0, %v9311_v22  ;;  %v15312_v32 = vld [vmem:[#allocation20_spill] sm:$0xff]  ;;  %v15314_v2 = vld [vmem:[#allocation17_spill] sm:$0xff] }
 0x236   :  { %v9620_v24 = vadd.f32 %v2120_v57, %v9334_v19  ;;  %v9623_v11 = vadd.f32 %v2121_v51, %v9337_v44  ;;  %v9626_v10 = vadd.f32 %v2122_v50, %v9340_v37  ;;  %v9629_v3 = vadd.f32 %v2123_v4, %v9343_v9  ;;  %v15316_v22 = vld [vmem:[#allocation33_spill] sm:$0xff]  ;;  %v15318_v19 = vld [vmem:[#allocation28_spill] sm:$0xff]  ;;  %v15322_v37 = vld [vmem:[#allocation27_spill] sm:$0xff] }
 0x237   :  { %v9632_v47 = vadd.f32 %v2124_v61, %v15312_v32  ;;  %v9635_v6 = vadd.f32 %v2125_v45, %v15314_v2  ;;  %v9638_v59 = vadd.f32 %v2126_v52, %v15316_v22  ;;  %v2165_v46 = vstv %s9535_s16  ;;  %v15320_v44 = vld [vmem:[#allocation9_spill] sm:$0xff]  ;;  %v15326_v57 = vld [vmem:[#allocation42_spill] sm:$0xff]  ;;  %v15331_v40 = vld [vmem:[#allocation12_spill] sm:$0xff]  ;;  %s12509_s16 = sld [smem:[#allocation3 + $0x30]] }
 0x238   :  { %15309 = vst [vmem:[#allocation10_spill] sm:$0xff] %v9623_v11  ;;  %15310 = vst [vmem:[#allocation49_spill] sm:$0xff] %v9626_v10  ;;  %v9642_v7 = vadd.f32 %v2127_v5, %v15318_v19  ;;  %v9645_v13 = vadd.f32 %v2128_v62, %v15320_v44  ;;  %v9648_v50 = vadd.f32 %v2129_v27, %v15322_v37  ;;  %v15324_v9 = vld [vmem:[#allocation13_spill] sm:$0xff]  ;;  %v9657_v14 = vstv %s9545_s18  ;;  %v15332_v4 = vld [vmem:[#allocation7_spill] sm:$0xff] }
 0x239   :  { %15311 = vst [vmem:[#allocation43_spill] sm:$0xff] %v9629_v3  ;;  %15313 = vst [vmem:[#allocation34_spill] sm:$0xff] %v9632_v47  ;;  %v9651_v51 = vadd.f32 %v2130_v54, %v15324_v9  ;;  %v9654_v0 = vadd.f32 %v2131_v29, %v15326_v57  ;;  %v9660_v8 = vstv %s9555_s19  ;;  %v9663_v20 = vstv %s9569_s4  ;;  %v15333_v45 = vld [vmem:[#allocation44_spill] sm:$0xff]  ;;  %v15335_v52 = vld [vmem:[#allocation25_spill] sm:$0xff] }
 0x23a   :  { %15315 = vst [vmem:[#allocation14_spill] sm:$0xff] %v9635_v6  ;;  %15317 = vst [vmem:[#allocation11_spill] sm:$0xff] %v9638_v59  ;;  %v2166_v36 = vmul.f32 %v2165_v46, %v15331_v40  ;;  %v2167_v61 = vmul.f32 %v2165_v46, %v15332_v4  ;;  %v2168_v31 = vmul.f32 %v2165_v46, %v15333_v45  ;;  %v15336_v62 = vld [vmem:[#allocation35_spill] sm:$0xff]  ;;  %v15337_v29 = vld [vmem:[#allocation26_spill] sm:$0xff] }
 0x23b   :  { %15319 = vst [vmem:[#allocation20_spill] sm:$0xff] %v9642_v7  ;;  %15321 = vst [vmem:[#allocation17_spill] sm:$0xff] %v9645_v13  ;;  %v2169_v23 = vmul.f32 %v2165_v46, %v15334_v41  ;;  %v2170_v5 = vmul.f32 %v2165_v46, %v15335_v52  ;;  %v2171_v15 = vmul.f32 %v2165_v46, %v15336_v62  ;;  %v15339_v27 = vld [vmem:[#allocation15_spill] sm:$0xff]  ;;  %v15340_v32 = vld [vmem:[#allocation29_spill] sm:$0xff] }
 0x23c   :  { %15323 = vst [vmem:[#allocation33_spill] sm:$0xff] %v9648_v50  ;;  %15325 = vst [vmem:[#allocation28_spill] sm:$0xff] %v9651_v51  ;;  %v2172_v55 = vmul.f32 %v2165_v46, %v15337_v29  ;;  %v2173_v58 = vmul.f32 %v2165_v46, %v15338_v63  ;;  %v2174_v54 = vmul.f32 %v2165_v46, %v15339_v27  ;;  %v15341_v22 = vld [vmem:[#allocation41_spill] sm:$0xff]  ;;  %v15342_v44 = vld [vmem:[#allocation46_spill] sm:$0xff] }
 0x23d   :  { %15327 = vst [vmem:[#allocation9_spill] sm:$0xff] %v9654_v0  ;;  %15328 = vst [vmem:[#allocation27_spill] sm:$0xff] %v9657_v14  ;;  %v2175_v2 = vmul.f32 %v2165_v46, %v15340_v32  ;;  %v2176_v19 = vmul.f32 %v2165_v46, %v15341_v22  ;;  %v2177_v37 = vmul.f32 %v2165_v46, %v15342_v44  ;;  %v15343_v9 = vld [vmem:[#allocation32_spill] sm:$0xff]  ;;  %v15346_v52 = vld [vmem:[#allocation21_spill] sm:$0xff] }
 0x23e   :  { %15329 = vst [vmem:[#allocation13_spill] sm:$0xff] %v9660_v8  ;;  %15330 = vst [vmem:[#allocation42_spill] sm:$0xff] %v9663_v20  ;;  %v2178_v57 = vmul.f32 %v2165_v46, %v15343_v9  ;;  %v15344_v40 = vld [vmem:[#allocation36_spill] sm:$0xff]  ;;  %v15345_v20 = vld [vmem:[#allocation38_spill] sm:$0xff]  ;;  %v2181_v62 = vmul.f32 %v2165_v46, %v15346_v52 }
 0x23f   :  { %v2179_v4 = vmul.f32 %v2165_v46, %v15344_v40  ;;  %v2180_v8 = vmul.f32 %v2165_v46, %v15345_v20  ;;  %v9684_v63 = vld [vmem:[%s13400_s2 + $0x184] sm:$0xff]  ;;  %v9689_v32 = vld [vmem:[%s13400_s2 + $0x18c] sm:$0xff]  ;;  %v15360_v11 = vld [vmem:[#allocation37_spill] sm:$0xff] }
 0x240   :  { %15347 = vst [vmem:[#allocation12_spill] sm:$0xff] %v9684_v63  ;;  %15348 = vst [vmem:[#allocation7_spill] sm:$0xff] %v9689_v32  ;;  %v15349_v22 = vld [vmem:[#allocation30_spill] sm:$0xff]  ;;  %v15350_v27 = vld [vmem:[#allocation8_spill] sm:$0xff] }
 0x241   :  { %v2182_v44 = vmul.f32 %v2165_v46, %v15349_v22  ;;  %v2183_v9 = vmul.f32 %v2165_v46, %v15350_v27  ;;  %v15351_v29 = vld [vmem:[#allocation24_spill] sm:$0xff]  ;;  %v15352_v41 = vld [vmem:[#allocation19_spill] sm:$0xff]  ;;  %v15358_v47 = vld [vmem:[#allocation22_spill] sm:$0xff]  ;;  %v2193_v27 = vmul.f32 %v2165_v46, %v9507_v33 }
 0x242   :  { %v2184_v40 = vmul.f32 %v2165_v46, %v15351_v29  ;;  %v2185_v20 = vmul.f32 %v2165_v46, %v15352_v41  ;;  %v15353_v14 = vld [vmem:[#allocation23_spill] sm:$0xff]  ;;  %v15355_v51 = vld [vmem:[#allocation48_spill] sm:$0xff]  ;;  %v2191_v3 = vmul.f32 %v2165_v46, %v15358_v47  ;;  %v15359_v10 = vld [vmem:[#allocation6_spill] sm:$0xff]  ;;  %v2194_v29 = vmul.f32 %v2165_v46, %v15360_v11 }
 0x243   :  { %v2186_v52 = vmul.f32 %v2165_v46, %v15353_v14  ;;  %v15354_v45 = vld [vmem:[#allocation31_spill] sm:$0xff]  ;;  %v2188_v50 = vmul.f32 %v2165_v46, %v15355_v51  ;;  %v15357_v59 = vld [vmem:[#allocation40_spill] sm:$0xff]  ;;  %v2192_v22 = vmul.f32 %v2165_v46, %v15359_v10  ;;  %v2195_v41 = vmul.f32 %v2165_v46, %v9517_v39 }
 0x244   :  { %v2187_v0 = vmul.f32 %v2165_v46, %v15354_v45  ;;  %v15356_v13 = vld [vmem:[#allocation39_spill] sm:$0xff]  ;;  %v2190_v6 = vmul.f32 %v2165_v46, %v15357_v59  ;;  %v2196_v14 = vmul.f32 %v2165_v46, %v9684_v63  ;;  %v2197_v45 = vmul.f32 %v2165_v46, %v9689_v32 }
 0x245   :  { %v2189_v7 = vmul.f32 %v2165_v46, %v15356_v13  ;;  %v9708_v51 = vadd.f32 %v2166_v36, %v9558_v28  ;;  %v9711_v13 = vadd.f32 %v2167_v61, %v9561_v30  ;;  %v9714_v47 = vadd.f32 %v2168_v31, %v9564_v56 }
 0x246   :  { %v9717_v10 = vadd.f32 %v2169_v23, %v9567_v53  ;;  %v9720_v11 = vadd.f32 %v2170_v5, %v9572_v17  ;;  %v9723_v39 = vadd.f32 %v2171_v15, %v9575_v48  ;;  %v9726_v46 = vadd.f32 %v2172_v55, %v9578_v42 }
 0x247   :  { %v9729_v28 = vadd.f32 %v2173_v58, %v9581_v35  ;;  %v9732_v30 = vadd.f32 %v2174_v54, %v9584_v34  ;;  %v9735_v56 = vadd.f32 %v2175_v2, %v9587_v26  ;;  %v9738_v53 = vadd.f32 %v2176_v19, %v9590_v21  ;;  %v15381_v58 = vld [vmem:[#allocation27_spill] sm:$0xff]  ;;  %v15382_v2 = vld [vmem:[#allocation16_spill] sm:$0xff] }
 0x248   :  { %v9741_v17 = vadd.f32 %v2177_v37, %v9593_v38  ;;  %v9744_v48 = vadd.f32 %v2178_v57, %v9596_v16  ;;  %v9747_v42 = vadd.f32 %v2179_v4, %v9599_v60  ;;  %v9750_v35 = vadd.f32 %v2180_v8, %v9602_v18  ;;  %v15361_v18 = vld [vmem:[#allocation10_spill] sm:$0xff] }
 0x249   :  { %v9753_v34 = vadd.f32 %v2181_v62, %v9605_v49  ;;  %v9756_v26 = vadd.f32 %v2182_v44, %v9608_v25  ;;  %v9759_v21 = vadd.f32 %v2183_v9, %v9611_v12  ;;  %v9762_v38 = vadd.f32 %v2184_v40, %v9614_v1  ;;  %v15362_v49 = vld [vmem:[#allocation49_spill] sm:$0xff]  ;;  %v15363_v25 = vld [vmem:[#allocation43_spill] sm:$0xff]  ;;  %v15364_v12 = vld [vmem:[#allocation34_spill] sm:$0xff] }
 0x24a   :  { %v9765_v16 = vadd.f32 %v2185_v20, %v9617_v43  ;;  %v9768_v60 = vadd.f32 %v2186_v52, %v9620_v24  ;;  %v9771_v8 = vadd.f32 %v2187_v0, %v15361_v18  ;;  %v9774_v36 = vadd.f32 %v2188_v50, %v15362_v49  ;;  %v15366_v1 = vld [vmem:[#allocation14_spill] sm:$0xff]  ;;  %v15368_v43 = vld [vmem:[#allocation11_spill] sm:$0xff]  ;;  %v15370_v24 = vld [vmem:[#allocation20_spill] sm:$0xff] }
 0x24b   :  { %v9777_v61 = vadd.f32 %v2189_v7, %v15363_v25  ;;  %v9780_v31 = vadd.f32 %v2190_v6, %v15364_v12  ;;  %v9783_v23 = vadd.f32 %v2191_v3, %v15366_v1  ;;  %v9786_v20 = vadd.f32 %v2192_v22, %v15368_v43  ;;  %v15372_v0 = vld [vmem:[#allocation17_spill] sm:$0xff]  ;;  %v15376_v7 = vld [vmem:[#allocation28_spill] sm:$0xff]  ;;  %v15390_v25 = vld [vmem:[#allocation46_spill] sm:$0xff] }
 0x24c   :  { %v9789_v52 = vadd.f32 %v2193_v27, %v15370_v24  ;;  %v9792_v5 = vadd.f32 %v2194_v29, %v15372_v0  ;;  %v15374_v50 = vld [vmem:[#allocation33_spill] sm:$0xff]  ;;  %v9798_v15 = vadd.f32 %v2196_v14, %v15376_v7  ;;  %v15380_v3 = vld [vmem:[#allocation44_spill] sm:$0xff]  ;;  %v2233_v22 = vmul.f32 %v15381_v58, %v15382_v2  ;;  %v15384_v29 = vld [vmem:[#allocation35_spill] sm:$0xff] }
 0x24d   :  { %15365 = vst [vmem:[#allocation10_spill] sm:$0xff] %v9780_v31  ;;  %15367 = vst [vmem:[#allocation49_spill] sm:$0xff] %v9783_v23  ;;  %v9795_v62 = vadd.f32 %v2195_v41, %v15374_v50  ;;  %v15378_v6 = vld [vmem:[#allocation9_spill] sm:$0xff]  ;;  %v2232_v54 = vmul.f32 %v15381_v58, %v15380_v3  ;;  %v2235_v44 = vmul.f32 %v15381_v58, %v15384_v29  ;;  %v15385_v41 = vld [vmem:[#allocation26_spill] sm:$0xff] }
 0x24e   :  { %15369 = vst [vmem:[#allocation43_spill] sm:$0xff] %v9786_v20  ;;  %15371 = vst [vmem:[#allocation34_spill] sm:$0xff] %v9789_v52  ;;  %v9801_v55 = vadd.f32 %v2197_v45, %v15378_v6  ;;  %v15383_v27 = vld [vmem:[#allocation25_spill] sm:$0xff]  ;;  %v2236_v37 = vmul.f32 %v15381_v58, %v15385_v41  ;;  %v15386_v14 = vld [vmem:[#allocation47_spill] sm:$0xff]  ;;  %v2241_v12 = vmul.f32 %v15381_v58, %v15390_v25 }
 0x24f   :  { %15373 = vst [vmem:[#allocation14_spill] sm:$0xff] %v9792_v5  ;;  %15375 = vst [vmem:[#allocation11_spill] sm:$0xff] %v9795_v62  ;;  %v2234_v19 = vmul.f32 %v15381_v58, %v15383_v27  ;;  %v2237_v9 = vmul.f32 %v15381_v58, %v15386_v14  ;;  %v15387_v45 = vld [vmem:[#allocation15_spill] sm:$0xff]  ;;  %v15388_v40 = vld [vmem:[#allocation29_spill] sm:$0xff]  ;;  %v2254_v5 = vmul.f32 %v15381_v58, %v15357_v59 }
 0x250   :  { %15377 = vst [vmem:[#allocation20_spill] sm:$0xff] %v9798_v15  ;;  %15379 = vst [vmem:[#allocation17_spill] sm:$0xff] %v9801_v55  ;;  %v2238_v57 = vmul.f32 %v15381_v58, %v15387_v45  ;;  %v2239_v4 = vmul.f32 %v15381_v58, %v15388_v40  ;;  %v15389_v18 = vld [vmem:[#allocation41_spill] sm:$0xff]  ;;  %v15391_v1 = vld [vmem:[#allocation32_spill] sm:$0xff]  ;;  %v2261_v59 = vmul.f32 %v15381_v58, %v9689_v32 }
 0x251   :  { %v2240_v49 = vmul.f32 %v15381_v58, %v15389_v18  ;;  %v2242_v43 = vmul.f32 %v15381_v58, %v15391_v1  ;;  %v15392_v24 = vld [vmem:[#allocation36_spill] sm:$0xff]  ;;  %v15393_v50 = vld [vmem:[#allocation38_spill] sm:$0xff]  ;;  %v15394_v6 = vld [vmem:[#allocation21_spill] sm:$0xff]  ;;  %v9890_v32 = vadd.f32 %v2236_v37, %v9720_v11 }
 0x252   :  { %v2243_v0 = vmul.f32 %v15381_v58, %v15392_v24  ;;  %v2244_v7 = vmul.f32 %v15381_v58, %v15393_v50  ;;  %v2245_v3 = vmul.f32 %v15381_v58, %v15394_v6  ;;  %v15395_v2 = vld [vmem:[#allocation30_spill] sm:$0xff]  ;;  %v15396_v45 = vld [vmem:[#allocation8_spill] sm:$0xff]  ;;  %v15400_v6 = vld [vmem:[#allocation19_spill] sm:$0xff] }
 0x253   :  { %v2246_v40 = vmul.f32 %v15381_v58, %v15395_v2  ;;  %v2247_v18 = vmul.f32 %v15381_v58, %v15396_v45  ;;  %v9838_v25 = vld [vmem:[%s13400_s2 + $0x19c] sm:$0xff]  ;;  %v9843_v24 = vld [vmem:[%s13400_s2 + $0x1a4] sm:$0xff]  ;;  %v15399_v50 = vld [vmem:[#allocation24_spill] sm:$0xff]  ;;  %v2249_v14 = vmul.f32 %v15381_v58, %v15400_v6 }
 0x254   :  { %15397 = vst [vmem:[#allocation33_spill] sm:$0xff] %v9838_v25  ;;  %15398 = vst [vmem:[#allocation28_spill] sm:$0xff] %v9843_v24  ;;  %v2248_v1 = vmul.f32 %v15381_v58, %v15399_v50  ;;  %v15401_v2 = vld [vmem:[#allocation23_spill] sm:$0xff]  ;;  %v15403_v27 = vld [vmem:[#allocation48_spill] sm:$0xff]  ;;  %v9911_v11 = vadd.f32 %v2243_v0, %v9741_v17 }
 0x255   :  { %v2250_v41 = vmul.f32 %v15381_v58, %v15401_v2  ;;  %v15402_v45 = vld [vmem:[#allocation31_spill] sm:$0xff]  ;;  %v2252_v55 = vmul.f32 %v15381_v58, %v15403_v27  ;;  %v15405_v52 = vld [vmem:[#allocation22_spill] sm:$0xff]  ;;  %v2257_v2 = vmul.f32 %v15381_v58, %v9507_v33  ;;  %v15407_v23 = vld [vmem:[#allocation37_spill] sm:$0xff]  ;;  %v9878_v33 = vadd.f32 %v2232_v54, %v9708_v51 }
 0x256   :  { %v2251_v29 = vmul.f32 %v15381_v58, %v15402_v45  ;;  %v15404_v15 = vld [vmem:[#allocation39_spill] sm:$0xff]  ;;  %v2255_v50 = vmul.f32 %v15381_v58, %v15405_v52  ;;  %v15406_v20 = vld [vmem:[#allocation6_spill] sm:$0xff]  ;;  %v2258_v45 = vmul.f32 %v15381_v58, %v15407_v23  ;;  %v2262_v52 = vmul.f32 %v15381_v58, %v9838_v25  ;;  %v15425_v37 = vld [vmem:[#allocation25_spill] sm:$0xff] }
 0x257   :  { %v2253_v62 = vmul.f32 %v15381_v58, %v15404_v15  ;;  %v2256_v6 = vmul.f32 %v15381_v58, %v15406_v20  ;;  %v15408_v31 = vld [vmem:[#allocation18_spill] sm:$0xff]  ;;  %v2260_v15 = vmul.f32 %v15381_v58, %v9684_v63  ;;  %v2263_v20 = vmul.f32 %v15381_v58, %v9843_v24  ;;  %v15434_v0 = vld [vmem:[#allocation32_spill] sm:$0xff] }
 0x258   :  { %v2259_v27 = vmul.f32 %v15381_v58, %v15408_v31  ;;  %v9881_v23 = vadd.f32 %v2233_v22, %v9711_v13  ;;  %v9884_v31 = vadd.f32 %v2234_v19, %v9714_v47  ;;  %v9887_v63 = vadd.f32 %v2235_v44, %v9717_v10  ;;  %v15423_v44 = vld [vmem:[#allocation17_spill] sm:$0xff] }
 0x259   :  { %v9893_v25 = vadd.f32 %v2237_v9, %v9723_v39  ;;  %v9896_v58 = vadd.f32 %v2238_v57, %v9726_v46  ;;  %v9899_v51 = vadd.f32 %v2239_v4, %v9729_v28  ;;  %v9902_v13 = vadd.f32 %v2240_v49, %v9732_v30 }
 0x25a   :  { %v9905_v47 = vadd.f32 %v2241_v12, %v9735_v56  ;;  %v9908_v10 = vadd.f32 %v2242_v43, %v9738_v53  ;;  %v9914_v39 = vadd.f32 %v2244_v7, %v9744_v48  ;;  %v9917_v46 = vadd.f32 %v2245_v3, %v9747_v42  ;;  %v15435_v7 = vld [vmem:[#allocation36_spill] sm:$0xff]  ;;  %v15436_v3 = vld [vmem:[#allocation38_spill] sm:$0xff] }
 0x25b   :  { %v9920_v28 = vadd.f32 %v2246_v40, %v9750_v35  ;;  %v9923_v30 = vadd.f32 %v2247_v18, %v9753_v34  ;;  %v9926_v56 = vadd.f32 %v2248_v1, %v9756_v26  ;;  %v9929_v53 = vadd.f32 %v2249_v14, %v9759_v21  ;;  %v15409_v21 = vld [vmem:[#allocation10_spill] sm:$0xff]  ;;  %v15426_v14 = vld [vmem:[#allocation13_spill] sm:$0xff] }
 0x25c   :  { %v9932_v17 = vadd.f32 %v2250_v41, %v9762_v38  ;;  %v9935_v48 = vadd.f32 %v2251_v29, %v9765_v16  ;;  %v9938_v42 = vadd.f32 %v2252_v55, %v9768_v60  ;;  %v9941_v35 = vadd.f32 %v2253_v62, %v9771_v8  ;;  %v15411_v38 = vld [vmem:[#allocation49_spill] sm:$0xff]  ;;  %v15413_v16 = vld [vmem:[#allocation43_spill] sm:$0xff]  ;;  %v15415_v60 = vld [vmem:[#allocation34_spill] sm:$0xff] }
 0x25d   :  { %v9944_v34 = vadd.f32 %v2254_v5, %v9774_v36  ;;  %v9947_v26 = vadd.f32 %v2255_v50, %v9777_v61  ;;  %v9950_v54 = vadd.f32 %v2256_v6, %v15409_v21  ;;  %v9953_v22 = vadd.f32 %v2257_v2, %v15411_v38  ;;  %v15417_v8 = vld [vmem:[#allocation14_spill] sm:$0xff]  ;;  %v15419_v36 = vld [vmem:[#allocation11_spill] sm:$0xff]  ;;  %v15421_v61 = vld [vmem:[#allocation20_spill] sm:$0xff] }
 0x25e   :  { %v9956_v19 = vadd.f32 %v2258_v45, %v15413_v16  ;;  %v9959_v55 = vadd.f32 %v2259_v27, %v15415_v60  ;;  %v9962_v62 = vadd.f32 %v2260_v15, %v15417_v8  ;;  %v9965_v5 = vadd.f32 %v2261_v59, %v15419_v36  ;;  %v15427_v45 = vld [vmem:[#allocation35_spill] sm:$0xff]  ;;  %v15428_v27 = vld [vmem:[#allocation26_spill] sm:$0xff]  ;;  %v15437_v21 = vld [vmem:[#allocation21_spill] sm:$0xff] }
 0x25f   :  { %15410 = vst [vmem:[#allocation9_spill] sm:$0xff] %v9950_v54  ;;  %15412 = vst [vmem:[#allocation44_spill] sm:$0xff] %v9953_v22  ;;  %v9968_v29 = vadd.f32 %v2262_v52, %v15421_v61  ;;  %v9971_v41 = vadd.f32 %v2263_v20, %v15423_v44  ;;  %v2298_v9 = vmul.f32 %v15426_v14, %v15425_v37  ;;  %v15429_v15 = vld [vmem:[#allocation47_spill] sm:$0xff]  ;;  %v15431_v52 = vld [vmem:[#allocation29_spill] sm:$0xff] }
 0x260   :  { %15414 = vst [vmem:[#allocation27_spill] sm:$0xff] %v9956_v19  ;;  %15416 = vst [vmem:[#allocation16_spill] sm:$0xff] %v9959_v55  ;;  %v2299_v57 = vmul.f32 %v15426_v14, %v15427_v45  ;;  %v2300_v40 = vmul.f32 %v15426_v14, %v15428_v27  ;;  %v2301_v4 = vmul.f32 %v15426_v14, %v15429_v15  ;;  %v15430_v59 = vld [vmem:[#allocation15_spill] sm:$0xff]  ;;  %v15432_v20 = vld [vmem:[#allocation41_spill] sm:$0xff] }
 0x261   :  { %15418 = vst [vmem:[#allocation10_spill] sm:$0xff] %v9962_v62  ;;  %15420 = vst [vmem:[#allocation49_spill] sm:$0xff] %v9965_v5  ;;  %v2302_v18 = vmul.f32 %v15426_v14, %v15430_v59  ;;  %v2303_v49 = vmul.f32 %v15426_v14, %v15431_v52  ;;  %v2304_v12 = vmul.f32 %v15426_v14, %v15432_v20  ;;  %v15433_v1 = vld [vmem:[#allocation46_spill] sm:$0xff]  ;;  %v15439_v8 = vld [vmem:[#allocation8_spill] sm:$0xff] }
 0x262   :  { %15422 = vst [vmem:[#allocation43_spill] sm:$0xff] %v9968_v29  ;;  %15424 = vst [vmem:[#allocation34_spill] sm:$0xff] %v9971_v41  ;;  %v2305_v43 = vmul.f32 %v15426_v14, %v15433_v1  ;;  %v2306_v50 = vmul.f32 %v15426_v14, %v15434_v0  ;;  %v2307_v6 = vmul.f32 %v15426_v14, %v15435_v7  ;;  %v15438_v16 = vld [vmem:[#allocation30_spill] sm:$0xff]  ;;  %v15440_v61 = vld [vmem:[#allocation24_spill] sm:$0xff] }
 0x263   :  { %v2308_v2 = vmul.f32 %v15426_v14, %v15436_v3  ;;  %v2309_v38 = vmul.f32 %v15426_v14, %v15437_v21  ;;  %v2310_v60 = vmul.f32 %v15426_v14, %v15438_v16  ;;  %v2311_v36 = vmul.f32 %v15426_v14, %v15439_v8  ;;  %v15441_v37 = vld [vmem:[#allocation19_spill] sm:$0xff]  ;;  %v10008_v7 = vld [vmem:[%s13400_s2 + $0x1b4] sm:$0xff]  ;;  %v10013_v21 = vld [vmem:[%s13400_s2 + $0x1bc] sm:$0xff] }
 0x264   :  { %v2312_v44 = vmul.f32 %v15426_v14, %v15440_v61  ;;  %v2313_v45 = vmul.f32 %v15426_v14, %v15441_v37  ;;  %15442 = vst [vmem:[#allocation14_spill] sm:$0xff] %v10008_v7  ;;  %v15443_v16 = vld [vmem:[#allocation23_spill] sm:$0xff]  ;;  %v15445_v61 = vld [vmem:[#allocation48_spill] sm:$0xff]  ;;  %v15448_v15 = vld [vmem:[#allocation22_spill] sm:$0xff] }
 0x265   :  { %v2314_v3 = vmul.f32 %v15426_v14, %v15443_v16  ;;  %v15444_v8 = vld [vmem:[#allocation31_spill] sm:$0xff]  ;;  %v2316_v1 = vmul.f32 %v15426_v14, %v15445_v61  ;;  %v15447_v52 = vld [vmem:[#allocation40_spill] sm:$0xff]  ;;  %v2319_v27 = vmul.f32 %v15426_v14, %v15448_v15  ;;  %v15449_v41 = vld [vmem:[#allocation6_spill] sm:$0xff] }
 0x266   :  { %v2315_v0 = vmul.f32 %v15426_v14, %v15444_v8  ;;  %v15446_v37 = vld [vmem:[#allocation39_spill] sm:$0xff]  ;;  %v2318_v59 = vmul.f32 %v15426_v14, %v15447_v52  ;;  %v2320_v29 = vmul.f32 %v15426_v14, %v15449_v41  ;;  %v15450_v5 = vld [vmem:[#allocation45_spill] sm:$0xff]  ;;  %v15452_v55 = vld [vmem:[#allocation18_spill] sm:$0xff]  ;;  %v2327_v41 = vmul.f32 %v15426_v14, %v9843_v24 }
 0x267   :  { %v2317_v20 = vmul.f32 %v15426_v14, %v15446_v37  ;;  %v2321_v16 = vmul.f32 %v15426_v14, %v15450_v5  ;;  %v15451_v62 = vld [vmem:[#allocation37_spill] sm:$0xff]  ;;  %v2323_v61 = vmul.f32 %v15426_v14, %v15452_v55  ;;  %v15453_v19 = vld [vmem:[#allocation12_spill] sm:$0xff]  ;;  %v15454_v22 = vld [vmem:[#allocation7_spill] sm:$0xff]  ;;  %v2328_v5 = vmul.f32 %v15426_v14, %v10008_v7 }
 0x268   :  { %v2322_v8 = vmul.f32 %v15426_v14, %v15451_v62  ;;  %v2324_v37 = vmul.f32 %v15426_v14, %v15453_v19  ;;  %v2325_v52 = vmul.f32 %v15426_v14, %v15454_v22  ;;  %v15455_v54 = vld [vmem:[#allocation33_spill] sm:$0xff]  ;;  %v2329_v62 = vmul.f32 %v15426_v14, %v10013_v21 }
 0x269   :  { %v2326_v15 = vmul.f32 %v15426_v14, %v15455_v54  ;;  %v10048_v55 = vadd.f32 %v2298_v9, %v9878_v33  ;;  %v10051_v19 = vadd.f32 %v2299_v57, %v9881_v23  ;;  %v10054_v22 = vadd.f32 %v2300_v40, %v9884_v31 }
 0x26a   :  { %v10057_v54 = vadd.f32 %v2301_v4, %v9887_v63  ;;  %v10060_v24 = vadd.f32 %v2302_v18, %v9890_v32  ;;  %v10063_v7 = vadd.f32 %v2303_v49, %v9893_v25  ;;  %v10066_v14 = vadd.f32 %v2304_v12, %v9896_v58  ;;  %v15470_v18 = vld [vmem:[#allocation34_spill] sm:$0xff] }
 0x26b   :  { %v10069_v33 = vadd.f32 %v2305_v43, %v9899_v51  ;;  %v10072_v23 = vadd.f32 %v2306_v50, %v9902_v13  ;;  %v10075_v31 = vadd.f32 %v2307_v6, %v9905_v47  ;;  %v10078_v63 = vadd.f32 %v2308_v2, %v9908_v10  ;;  %v15473_v12 = vld [vmem:[#allocation42_spill] sm:$0xff]  ;;  %v15474_v43 = vld [vmem:[#allocation47_spill] sm:$0xff] }
 0x26c   :  { %v10081_v32 = vadd.f32 %v2309_v38, %v9911_v11  ;;  %v10084_v25 = vadd.f32 %v2310_v60, %v9914_v39  ;;  %v10087_v58 = vadd.f32 %v2311_v36, %v9917_v46  ;;  %v10090_v51 = vadd.f32 %v2312_v44, %v9920_v28 }
 0x26d   :  { %v10093_v13 = vadd.f32 %v2313_v45, %v9923_v30  ;;  %v10096_v47 = vadd.f32 %v2314_v3, %v9926_v56  ;;  %v10099_v10 = vadd.f32 %v2315_v0, %v9929_v53  ;;  %v10102_v11 = vadd.f32 %v2316_v1, %v9932_v17  ;;  %v15456_v53 = vld [vmem:[#allocation9_spill] sm:$0xff]  ;;  %v15458_v17 = vld [vmem:[#allocation44_spill] sm:$0xff] }
 0x26e   :  { %v10105_v39 = vadd.f32 %v2317_v20, %v9935_v48  ;;  %v10108_v46 = vadd.f32 %v2318_v59, %v9938_v42  ;;  %v10111_v28 = vadd.f32 %v2319_v27, %v9941_v35  ;;  %v10114_v30 = vadd.f32 %v2320_v29, %v9944_v34  ;;  %v15460_v48 = vld [vmem:[#allocation27_spill] sm:$0xff]  ;;  %v15462_v42 = vld [vmem:[#allocation16_spill] sm:$0xff]  ;;  %v15464_v35 = vld [vmem:[#allocation10_spill] sm:$0xff] }
 0x26f   :  { %v10117_v56 = vadd.f32 %v2321_v16, %v9947_v26  ;;  %v10120_v9 = vadd.f32 %v2322_v8, %v15456_v53  ;;  %v10123_v57 = vadd.f32 %v2323_v61, %v15458_v17  ;;  %v10126_v40 = vadd.f32 %v2324_v37, %v15460_v48  ;;  %v15466_v34 = vld [vmem:[#allocation49_spill] sm:$0xff]  ;;  %v15468_v26 = vld [vmem:[#allocation43_spill] sm:$0xff]  ;;  %v15472_v20 = vld [vmem:[#allocation26_spill] sm:$0xff] }
 0x270   :  { %v10129_v4 = vadd.f32 %v2325_v52, %v15462_v42  ;;  %v10132_v27 = vadd.f32 %v2326_v15, %v15464_v35  ;;  %v10135_v29 = vadd.f32 %v2327_v41, %v15466_v34  ;;  %v10138_v59 = vadd.f32 %v2328_v5, %v15468_v26  ;;  %v15475_v52 = vld [vmem:[#allocation15_spill] sm:$0xff]  ;;  %v15476_v15 = vld [vmem:[#allocation29_spill] sm:$0xff]  ;;  %v15478_v5 = vld [vmem:[#allocation46_spill] sm:$0xff] }
 0x271   :  { %15457 = vst [vmem:[#allocation11_spill] sm:$0xff] %v10120_v9  ;;  %15459 = vst [vmem:[#allocation20_spill] sm:$0xff] %v10123_v57  ;;  %v10141_v49 = vadd.f32 %v2329_v62, %v15470_v18  ;;  %v2364_v1 = vmul.f32 %v15473_v12, %v15472_v20  ;;  %v2365_v0 = vmul.f32 %v15473_v12, %v15474_v43  ;;  %v15477_v41 = vld [vmem:[#allocation41_spill] sm:$0xff]  ;;  %v15479_v62 = vld [vmem:[#allocation32_spill] sm:$0xff] }
 0x272   :  { %15461 = vst [vmem:[#allocation17_spill] sm:$0xff] %v10126_v40  ;;  %15463 = vst [vmem:[#allocation25_spill] sm:$0xff] %v10129_v4  ;;  %v2366_v50 = vmul.f32 %v15473_v12, %v15475_v52  ;;  %v2367_v6 = vmul.f32 %v15473_v12, %v15476_v15  ;;  %v2368_v3 = vmul.f32 %v15473_v12, %v15477_v41  ;;  %v15480_v16 = vld [vmem:[#allocation36_spill] sm:$0xff]  ;;  %v15481_v8 = vld [vmem:[#allocation38_spill] sm:$0xff] }
 0x273   :  { %15465 = vst [vmem:[#allocation13_spill] sm:$0xff] %v10132_v27  ;;  %15467 = vst [vmem:[#allocation35_spill] sm:$0xff] %v10135_v29  ;;  %v2369_v2 = vmul.f32 %v15473_v12, %v15478_v5  ;;  %v2370_v38 = vmul.f32 %v15473_v12, %v15479_v62  ;;  %v2371_v60 = vmul.f32 %v15473_v12, %v15480_v16  ;;  %v15482_v61 = vld [vmem:[#allocation21_spill] sm:$0xff]  ;;  %v15483_v37 = vld [vmem:[#allocation30_spill] sm:$0xff] }
 0x274   :  { %15469 = vst [vmem:[#allocation9_spill] sm:$0xff] %v10138_v59  ;;  %15471 = vst [vmem:[#allocation44_spill] sm:$0xff] %v10141_v49  ;;  %v2372_v36 = vmul.f32 %v15473_v12, %v15481_v8  ;;  %v2373_v44 = vmul.f32 %v15473_v12, %v15482_v61  ;;  %v2374_v45 = vmul.f32 %v15473_v12, %v15483_v37  ;;  %v15484_v53 = vld [vmem:[#allocation8_spill] sm:$0xff]  ;;  %v15486_v35 = vld [vmem:[#allocation19_spill] sm:$0xff] }
 0x275   :  { %v2375_v17 = vmul.f32 %v15473_v12, %v15484_v53  ;;  %v15485_v48 = vld [vmem:[#allocation24_spill] sm:$0xff]  ;;  %v2377_v34 = vmul.f32 %v15473_v12, %v15486_v35  ;;  %v15487_v26 = vld [vmem:[#allocation23_spill] sm:$0xff]  ;;  %v15495_v5 = vld [vmem:[#allocation6_spill] sm:$0xff]  ;;  %v10230_v9 = vadd.f32 %v2366_v50, %v10054_v22 }
 0x276   :  { %v2376_v42 = vmul.f32 %v15473_v12, %v15485_v48  ;;  %v2378_v18 = vmul.f32 %v15473_v12, %v15487_v26  ;;  %v15488_v20 = vld [vmem:[#allocation31_spill] sm:$0xff]  ;;  %v10183_v53 = vld [vmem:[%s13400_s2 + $0x1d4] sm:$0xff]  ;;  %v2384_v41 = vmul.f32 %v15473_v12, %v15495_v5  ;;  %v15498_v29 = vld [vmem:[#allocation18_spill] sm:$0xff]  ;;  %v10250_v22 = vadd.f32 %v2372_v36, %v10072_v23 }
 0x277   :  { %v2379_v43 = vmul.f32 %v15473_v12, %v15488_v20  ;;  %v10178_v61 = vld [vmem:[%s13400_s2 + $0x1cc] sm:$0xff]  ;;  %15490 = vst [vmem:[#allocation16_spill] sm:$0xff] %v10183_v53  ;;  %v15494_v20 = vld [vmem:[#allocation22_spill] sm:$0xff]  ;;  %v15496_v15 = vld [vmem:[#allocation45_spill] sm:$0xff] }
 0x278   :  { %15489 = vst [vmem:[#allocation27_spill] sm:$0xff] %v10178_v61  ;;  %v15491_v48 = vld [vmem:[#allocation48_spill] sm:$0xff]  ;;  %v15492_v35 = vld [vmem:[#allocation39_spill] sm:$0xff]  ;;  %v2383_v62 = vmul.f32 %v15473_v12, %v15494_v20  ;;  %v2385_v52 = vmul.f32 %v15473_v12, %v15496_v15  ;;  %v15497_v49 = vld [vmem:[#allocation37_spill] sm:$0xff] }
 0x279   :  { %v2380_v37 = vmul.f32 %v15473_v12, %v15491_v48  ;;  %v2381_v8 = vmul.f32 %v15473_v12, %v15492_v35  ;;  %v15493_v26 = vld [vmem:[#allocation40_spill] sm:$0xff]  ;;  %v2386_v59 = vmul.f32 %v15473_v12, %v15497_v49  ;;  %v2387_v48 = vmul.f32 %v15473_v12, %v15498_v29  ;;  %v15500_v27 = vld [vmem:[#allocation7_spill] sm:$0xff]  ;;  %v15501_v4 = vld [vmem:[#allocation33_spill] sm:$0xff] }
 0x27a   :  { %v2382_v16 = vmul.f32 %v15473_v12, %v15493_v26  ;;  %v15499_v35 = vld [vmem:[#allocation12_spill] sm:$0xff]  ;;  %v2389_v20 = vmul.f32 %v15473_v12, %v15500_v27  ;;  %v2390_v5 = vmul.f32 %v15473_v12, %v15501_v4  ;;  %v15503_v49 = vld [vmem:[#allocation14_spill] sm:$0xff]  ;;  %v2393_v29 = vmul.f32 %v15473_v12, %v10013_v21  ;;  %v15527_v36 = vld [vmem:[#allocation29_spill] sm:$0xff] }
 0x27b   :  { %v2388_v26 = vmul.f32 %v15473_v12, %v15499_v35  ;;  %v15502_v40 = vld [vmem:[#allocation28_spill] sm:$0xff]  ;;  %v2392_v57 = vmul.f32 %v15473_v12, %v15503_v49  ;;  %v2394_v35 = vmul.f32 %v15473_v12, %v10178_v61  ;;  %v2395_v27 = vmul.f32 %v15473_v12, %v10183_v53 }
 0x27c   :  { %v2391_v15 = vmul.f32 %v15473_v12, %v15502_v40  ;;  %v10224_v4 = vadd.f32 %v2364_v1, %v10048_v55  ;;  %v10227_v40 = vadd.f32 %v2365_v0, %v10051_v19  ;;  %v10233_v49 = vadd.f32 %v2367_v6, %v10057_v54  ;;  %v15509_v0 = vld [vmem:[#allocation20_spill] sm:$0xff] }
 0x27d   :  { %v10238_v61 = vadd.f32 %v2368_v3, %v10060_v24  ;;  %v10241_v12 = vadd.f32 %v2369_v2, %v10063_v7  ;;  %v10244_v55 = vadd.f32 %v2370_v38, %v10066_v14  ;;  %v10247_v19 = vadd.f32 %v2371_v60, %v10069_v33 }
 0x27e   :  { %v10253_v54 = vadd.f32 %v2373_v44, %v10075_v31  ;;  %v10256_v1 = vadd.f32 %v2374_v45, %v10078_v63  ;;  %v10259_v24 = vadd.f32 %v2375_v17, %v10081_v32  ;;  %v10262_v7 = vadd.f32 %v2376_v42, %v10084_v25  ;;  %v15528_v44 = vld [vmem:[#allocation41_spill] sm:$0xff]  ;;  %v15530_v17 = vld [vmem:[#allocation32_spill] sm:$0xff] }
 0x27f   :  { %v10265_v14 = vadd.f32 %v2377_v34, %v10087_v58  ;;  %v10268_v33 = vadd.f32 %v2378_v18, %v10090_v51  ;;  %v10271_v23 = vadd.f32 %v2379_v43, %v10093_v13  ;;  %v10274_v31 = vadd.f32 %v2380_v37, %v10096_v47  ;;  %v15531_v42 = vld [vmem:[#allocation36_spill] sm:$0xff] }
 0x280   :  { %v10277_v63 = vadd.f32 %v2381_v8, %v10099_v10  ;;  %v10280_v32 = vadd.f32 %v2382_v16, %v10102_v11  ;;  %v10283_v25 = vadd.f32 %v2383_v62, %v10105_v39  ;;  %v10286_v58 = vadd.f32 %v2384_v41, %v10108_v46  ;;  %v15507_v10 = vld [vmem:[#allocation11_spill] sm:$0xff]  ;;  %v15511_v39 = vld [vmem:[#allocation17_spill] sm:$0xff]  ;;  %v15521_v62 = vld [vmem:[#allocation44_spill] sm:$0xff] }
 0x281   :  { %v10289_v51 = vadd.f32 %v2385_v52, %v10111_v28  ;;  %v10292_v13 = vadd.f32 %v2386_v59, %v10114_v30  ;;  %v10295_v47 = vadd.f32 %v2387_v48, %v10117_v56  ;;  %v10298_v11 = vadd.f32 %v2388_v26, %v15507_v10  ;;  %v15513_v41 = vld [vmem:[#allocation25_spill] sm:$0xff]  ;;  %v15517_v30 = vld [vmem:[#allocation35_spill] sm:$0xff]  ;;  %v15535_v10 = vld [vmem:[#allocation8_spill] sm:$0xff] }
 0x282   :  { %v10301_v50 = vadd.f32 %v2389_v20, %v15509_v0  ;;  %v10304_v6 = vadd.f32 %v2390_v5, %v15511_v39  ;;  %v2429_v46 = vstv %s10201_s23  ;;  %v10308_v3 = vadd.f32 %v2391_v15, %v15513_v41  ;;  %v15515_v28 = vld [vmem:[#allocation13_spill] sm:$0xff]  ;;  %v15526_v15 = vld [vmem:[#allocation15_spill] sm:$0xff]  ;;  %v15534_v20 = vld [vmem:[#allocation30_spill] sm:$0xff] }
 0x283   :  { %15504 = vst [vmem:[#allocation10_spill] sm:$0xff] %v10289_v51  ;;  %15505 = vst [vmem:[#allocation49_spill] sm:$0xff] %v10292_v13  ;;  %v10311_v52 = vadd.f32 %v2392_v57, %v15515_v28  ;;  %v10314_v59 = vadd.f32 %v2393_v29, %v15517_v30  ;;  %v15519_v56 = vld [vmem:[#allocation9_spill] sm:$0xff]  ;;  %v10320_v38 = vadd.f32 %v2395_v27, %v15521_v62  ;;  %v10323_v16 = vstv %s10211_s24  ;;  %v15529_v29 = vld [vmem:[#allocation46_spill] sm:$0xff] }
 0x284   :  { %15506 = vst [vmem:[#allocation43_spill] sm:$0xff] %v10295_v47  ;;  %15508 = vst [vmem:[#allocation34_spill] sm:$0xff] %v10298_v11  ;;  %v10317_v2 = vadd.f32 %v2394_v35, %v15519_v56  ;;  %v10326_v5 = vstv %s10221_s25  ;;  %v10329_v60 = vstv %s10235_s26  ;;  %v2430_v8 = vmul.f32 %v2429_v46, %v15526_v15  ;;  %v15532_v27 = vld [vmem:[#allocation38_spill] sm:$0xff]  ;;  %v15533_v26 = vld [vmem:[#allocation21_spill] sm:$0xff] }
 0x285   :  { %15510 = vst [vmem:[#allocation26_spill] sm:$0xff] %v10301_v50  ;;  %15512 = vst [vmem:[#allocation42_spill] sm:$0xff] %v10304_v6  ;;  %v2431_v57 = vmul.f32 %v2429_v46, %v15527_v36  ;;  %v2432_v37 = vmul.f32 %v2429_v46, %v15528_v44  ;;  %v2433_v45 = vmul.f32 %v2429_v46, %v15529_v29  ;;  %v15536_v39 = vld [vmem:[#allocation24_spill] sm:$0xff]  ;;  %v15537_v28 = vld [vmem:[#allocation19_spill] sm:$0xff] }
 0x286   :  { %15514 = vst [vmem:[#allocation47_spill] sm:$0xff] %v10308_v3  ;;  %15516 = vst [vmem:[#allocation11_spill] sm:$0xff] %v10311_v52  ;;  %v2434_v48 = vmul.f32 %v2429_v46, %v15530_v17  ;;  %v2435_v35 = vmul.f32 %v2429_v46, %v15531_v42  ;;  %v2436_v34 = vmul.f32 %v2429_v46, %v15532_v27  ;;  %v15538_v56 = vld [vmem:[#allocation23_spill] sm:$0xff]  ;;  %v15544_v27 = vld [vmem:[#allocation6_spill] sm:$0xff] }
 0x287   :  { %15518 = vst [vmem:[#allocation20_spill] sm:$0xff] %v10314_v59  ;;  %15520 = vst [vmem:[#allocation17_spill] sm:$0xff] %v10317_v2  ;;  %v2437_v18 = vmul.f32 %v2429_v46, %v15533_v26  ;;  %v2438_v43 = vmul.f32 %v2429_v46, %v15534_v20  ;;  %v2439_v0 = vmul.f32 %v2429_v46, %v15535_v10  ;;  %v15539_v15 = vld [vmem:[#allocation31_spill] sm:$0xff]  ;;  %v15543_v20 = vld [vmem:[#allocation22_spill] sm:$0xff] }
 0x288   :  { %15522 = vst [vmem:[#allocation25_spill] sm:$0xff] %v10320_v38  ;;  %15523 = vst [vmem:[#allocation13_spill] sm:$0xff] %v10323_v16  ;;  %v2440_v41 = vmul.f32 %v2429_v46, %v15536_v39  ;;  %v2441_v30 = vmul.f32 %v2429_v46, %v15537_v28  ;;  %v2442_v62 = vmul.f32 %v2429_v46, %v15538_v56  ;;  %v15541_v17 = vld [vmem:[#allocation39_spill] sm:$0xff]  ;;  %v15542_v39 = vld [vmem:[#allocation40_spill] sm:$0xff] }
 0x289   :  { %15524 = vst [vmem:[#allocation35_spill] sm:$0xff] %v10326_v5  ;;  %15525 = vst [vmem:[#allocation9_spill] sm:$0xff] %v10329_v60  ;;  %v2443_v36 = vmul.f32 %v2429_v46, %v15539_v15  ;;  %v15540_v60 = vld [vmem:[#allocation48_spill] sm:$0xff]  ;;  %v2445_v42 = vmul.f32 %v2429_v46, %v15541_v17  ;;  %v10350_v26 = vld [vmem:[%s13400_s2 + $0x1e4] sm:$0xff]  ;;  %v2446_v28 = vmul.f32 %v2429_v46, %v15542_v39 }
 0x28a   :  { %v2444_v5 = vmul.f32 %v2429_v46, %v15540_v60  ;;  %v10355_v10 = vld [vmem:[%s13400_s2 + $0x1ec] sm:$0xff]  ;;  %v2447_v56 = vmul.f32 %v2429_v46, %v15543_v20  ;;  %v2448_v15 = vmul.f32 %v2429_v46, %v15544_v27  ;;  %v15545_v29 = vld [vmem:[#allocation45_spill] sm:$0xff]  ;;  %v15547_v44 = vld [vmem:[#allocation18_spill] sm:$0xff]  ;;  %v2457_v20 = vmul.f32 %v2429_v46, %v10013_v21 }
 0x28b   :  { %v2449_v60 = vmul.f32 %v2429_v46, %v15545_v29  ;;  %v15546_v16 = vld [vmem:[#allocation37_spill] sm:$0xff]  ;;  %v2451_v38 = vmul.f32 %v2429_v46, %v15547_v44  ;;  %v15548_v2 = vld [vmem:[#allocation12_spill] sm:$0xff]  ;;  %v15549_v52 = vld [vmem:[#allocation7_spill] sm:$0xff]  ;;  %v2459_v29 = vmul.f32 %v2429_v46, %v10183_v53  ;;  %v2461_v44 = vmul.f32 %v2429_v46, %v10355_v10 }
 0x28c   :  { %v2450_v17 = vmul.f32 %v2429_v46, %v15546_v16  ;;  %v2452_v59 = vmul.f32 %v2429_v46, %v15548_v2  ;;  %v2453_v3 = vmul.f32 %v2429_v46, %v15549_v52  ;;  %v15550_v6 = vld [vmem:[#allocation33_spill] sm:$0xff]  ;;  %v15551_v11 = vld [vmem:[#allocation28_spill] sm:$0xff]  ;;  %v15552_v13 = vld [vmem:[#allocation14_spill] sm:$0xff]  ;;  %v2460_v16 = vmul.f32 %v2429_v46, %v10350_v26 }
 0x28d   :  { %v2454_v50 = vmul.f32 %v2429_v46, %v15550_v6  ;;  %v2455_v47 = vmul.f32 %v2429_v46, %v15551_v11  ;;  %v2456_v39 = vmul.f32 %v2429_v46, %v15552_v13  ;;  %v15553_v51 = vld [vmem:[#allocation27_spill] sm:$0xff]  ;;  %v10374_v2 = vadd.f32 %v2430_v8, %v10224_v4 }
 0x28e   :  { %v2458_v27 = vmul.f32 %v2429_v46, %v15553_v51  ;;  %v10377_v52 = vadd.f32 %v2431_v57, %v10227_v40  ;;  %v10380_v11 = vadd.f32 %v2432_v37, %v10230_v9  ;;  %v10383_v13 = vadd.f32 %v2433_v45, %v10233_v49 }
 0x28f   :  { %v10386_v51 = vadd.f32 %v2434_v48, %v10238_v61  ;;  %v10389_v53 = vadd.f32 %v2435_v35, %v10241_v12  ;;  %v10392_v46 = vadd.f32 %v2436_v34, %v10244_v55  ;;  %v10395_v4 = vadd.f32 %v2437_v18, %v10247_v19  ;;  %v15575_v18 = vld [vmem:[#allocation13_spill] sm:$0xff] }
 0x290   :  { %v10398_v40 = vadd.f32 %v2438_v43, %v10250_v22  ;;  %v10401_v9 = vadd.f32 %v2439_v0, %v10253_v54  ;;  %v10404_v49 = vadd.f32 %v2440_v41, %v10256_v1  ;;  %v10407_v61 = vadd.f32 %v2441_v30, %v10259_v24  ;;  %v15576_v0 = vld [vmem:[#allocation46_spill] sm:$0xff] }
 0x291   :  { %v10410_v12 = vadd.f32 %v2442_v62, %v10262_v7  ;;  %v10413_v55 = vadd.f32 %v2443_v36, %v10265_v14  ;;  %v10416_v19 = vadd.f32 %v2444_v5, %v10268_v33  ;;  %v10419_v22 = vadd.f32 %v2445_v42, %v10271_v23  ;;  %v15554_v33 = vld [vmem:[#allocation10_spill] sm:$0xff]  ;;  %v15555_v23 = vld [vmem:[#allocation49_spill] sm:$0xff] }
 0x292   :  { %v10422_v54 = vadd.f32 %v2446_v28, %v10274_v31  ;;  %v10425_v1 = vadd.f32 %v2447_v56, %v10277_v63  ;;  %v10428_v24 = vadd.f32 %v2448_v15, %v10280_v32  ;;  %v10431_v7 = vadd.f32 %v2449_v60, %v10283_v25  ;;  %v15556_v31 = vld [vmem:[#allocation43_spill] sm:$0xff]  ;;  %v15558_v63 = vld [vmem:[#allocation34_spill] sm:$0xff]  ;;  %v15582_v15 = vld [vmem:[#allocation8_spill] sm:$0xff] }
 0x293   :  { %v10434_v14 = vadd.f32 %v2450_v17, %v10286_v58  ;;  %v10437_v5 = vadd.f32 %v2451_v38, %v15554_v33  ;;  %v10440_v8 = vadd.f32 %v2452_v59, %v15555_v23  ;;  %v10443_v57 = vadd.f32 %v2453_v3, %v15556_v31  ;;  %v15560_v32 = vld [vmem:[#allocation26_spill] sm:$0xff]  ;;  %v15564_v58 = vld [vmem:[#allocation47_spill] sm:$0xff]  ;;  %v15568_v59 = vld [vmem:[#allocation20_spill] sm:$0xff] }
 0x294   :  { %v10446_v37 = vadd.f32 %v2454_v50, %v15558_v63  ;;  %v10449_v45 = vadd.f32 %v2455_v47, %v15560_v32  ;;  %v15562_v25 = vld [vmem:[#allocation42_spill] sm:$0xff]  ;;  %v10455_v17 = vadd.f32 %v2457_v20, %v15564_v58  ;;  %v15566_v38 = vld [vmem:[#allocation11_spill] sm:$0xff]  ;;  %v10461_v42 = vadd.f32 %v2459_v29, %v15568_v59  ;;  %v15570_v3 = vld [vmem:[#allocation17_spill] sm:$0xff] }
 0x295   :  { %15557 = vst [vmem:[#allocation44_spill] sm:$0xff] %v10443_v57  ;;  %v10452_v60 = vadd.f32 %v2456_v39, %v15562_v25  ;;  %v10458_v48 = vadd.f32 %v2458_v27, %v15566_v38  ;;  %v10464_v35 = vadd.f32 %v2460_v16, %v15570_v3  ;;  %v15572_v50 = vld [vmem:[#allocation25_spill] sm:$0xff]  ;;  %v2497_v39 = vmul.f32 %v15575_v18, %v15576_v0  ;;  %v15577_v20 = vld [vmem:[#allocation32_spill] sm:$0xff]  ;;  %v15579_v29 = vld [vmem:[#allocation38_spill] sm:$0xff] }
 0x296   :  { %15559 = vst [vmem:[#allocation15_spill] sm:$0xff] %v10446_v37  ;;  %15561 = vst [vmem:[#allocation29_spill] sm:$0xff] %v10449_v45  ;;  %v10467_v34 = vadd.f32 %v2461_v44, %v15572_v50  ;;  %v15574_v47 = vld [vmem:[#allocation41_spill] sm:$0xff]  ;;  %v2498_v41 = vmul.f32 %v15575_v18, %v15577_v20  ;;  %v15578_v27 = vld [vmem:[#allocation36_spill] sm:$0xff]  ;;  %v2500_v30 = vmul.f32 %v15575_v18, %v15579_v29 }
 0x297   :  { %15563 = vst [vmem:[#allocation33_spill] sm:$0xff] %v10452_v60  ;;  %15565 = vst [vmem:[#allocation10_spill] sm:$0xff] %v10455_v17  ;;  %v2496_v43 = vmul.f32 %v15575_v18, %v15574_v47  ;;  %v2499_v28 = vmul.f32 %v15575_v18, %v15578_v27  ;;  %v15580_v16 = vld [vmem:[#allocation21_spill] sm:$0xff]  ;;  %v15581_v44 = vld [vmem:[#allocation30_spill] sm:$0xff]  ;;  %v2503_v36 = vmul.f32 %v15575_v18, %v15582_v15 }
 0x298   :  { %15567 = vst [vmem:[#allocation49_spill] sm:$0xff] %v10458_v48  ;;  %15569 = vst [vmem:[#allocation43_spill] sm:$0xff] %v10461_v42  ;;  %v2501_v56 = vmul.f32 %v15575_v18, %v15580_v16  ;;  %v2502_v62 = vmul.f32 %v15575_v18, %v15581_v44  ;;  %v15583_v33 = vld [vmem:[#allocation24_spill] sm:$0xff]  ;;  %v15584_v31 = vld [vmem:[#allocation19_spill] sm:$0xff]  ;;  %v2518_v48 = vmul.f32 %v15575_v18, %v15550_v6 }
 0x299   :  { %15571 = vst [vmem:[#allocation34_spill] sm:$0xff] %v10464_v35  ;;  %15573 = vst [vmem:[#allocation26_spill] sm:$0xff] %v10467_v34  ;;  %v2504_v23 = vmul.f32 %v15575_v18, %v15583_v33  ;;  %v2505_v63 = vmul.f32 %v15575_v18, %v15584_v31  ;;  %v15585_v32 = vld [vmem:[#allocation23_spill] sm:$0xff]  ;;  %v15587_v59 = vld [vmem:[#allocation48_spill] sm:$0xff]  ;;  %v2525_v6 = vmul.f32 %v15575_v18, %v10355_v10 }
 0x29a   :  { %v2506_v25 = vmul.f32 %v15575_v18, %v15585_v32  ;;  %v15586_v58 = vld [vmem:[#allocation31_spill] sm:$0xff]  ;;  %v2508_v3 = vmul.f32 %v15575_v18, %v15587_v59  ;;  %v15589_v0 = vld [vmem:[#allocation40_spill] sm:$0xff]  ;;  %v15590_v27 = vld [vmem:[#allocation22_spill] sm:$0xff]  ;;  %v10553_v10 = vadd.f32 %v2501_v56, %v10389_v53 }
 0x29b   :  { %v2507_v38 = vmul.f32 %v15575_v18, %v15586_v58  ;;  %v15588_v50 = vld [vmem:[#allocation39_spill] sm:$0xff]  ;;  %v2510_v20 = vmul.f32 %v15575_v18, %v15589_v0  ;;  %v2511_v29 = vmul.f32 %v15575_v18, %v15590_v27  ;;  %v2096_v16 = vld [vmem:[%s13400_s2 + $0x1fc] sm:$0xff]  ;;  %v15595_v27 = vld [vmem:[#allocation12_spill] sm:$0xff] }
 0x29c   :  { %v2509_v47 = vmul.f32 %v15575_v18, %v15588_v50  ;;  %v2097_v44 = vld [vmem:[%s13400_s2 + $0x204] sm:$0xff]  ;;  %v15592_v31 = vld [vmem:[#allocation45_spill] sm:$0xff]  ;;  %v2516_v34 = vmul.f32 %v15575_v18, %v15595_v27  ;;  %v15597_v17 = vld [vmem:[#allocation28_spill] sm:$0xff]  ;;  %v10574_v53 = vadd.f32 %v2508_v3, %v10410_v12 }
 0x29d   :  { %v15591_v15 = vld [vmem:[#allocation6_spill] sm:$0xff]  ;;  %v2513_v32 = vmul.f32 %v15575_v18, %v15592_v31  ;;  %v15593_v58 = vld [vmem:[#allocation37_spill] sm:$0xff]  ;;  %v15596_v35 = vld [vmem:[#allocation7_spill] sm:$0xff]  ;;  %v2527_v57 = vmul.f32 %v15575_v18, %v2097_v44 }
 0x29e   :  { %v2512_v33 = vmul.f32 %v15575_v18, %v15591_v15  ;;  %v2514_v59 = vmul.f32 %v15575_v18, %v15593_v58  ;;  %v15594_v50 = vld [vmem:[#allocation18_spill] sm:$0xff]  ;;  %v2517_v42 = vmul.f32 %v15575_v18, %v15596_v35  ;;  %v2519_v15 = vmul.f32 %v15575_v18, %v15597_v17  ;;  %v15599_v45 = vld [vmem:[#allocation27_spill] sm:$0xff]  ;;  %v15600_v37 = vld [vmem:[#allocation16_spill] sm:$0xff] }
 0x29f   :  { %v2515_v0 = vmul.f32 %v15575_v18, %v15594_v50  ;;  %v15598_v60 = vld [vmem:[#allocation14_spill] sm:$0xff]  ;;  %v2521_v58 = vmul.f32 %v15575_v18, %v10013_v21  ;;  %v2522_v50 = vmul.f32 %v15575_v18, %v15599_v45  ;;  %v2523_v27 = vmul.f32 %v15575_v18, %v15600_v37  ;;  %v10680_v3 = vld [vmem:[%s13400_s2 + $0x95] sm:$0xff] }
 0x2a0   :  { %v2520_v31 = vmul.f32 %v15575_v18, %v15598_v60  ;;  %v2524_v35 = vmul.f32 %v15575_v18, %v10350_v26  ;;  %v2526_v17 = vmul.f32 %v15575_v18, %v2096_v16  ;;  %v10538_v60 = vadd.f32 %v2496_v43, %v10374_v2  ;;  %v10599_v12 = vld [vmem:[%s13400_s2 + $0x25] sm:$0xff]  ;;  %15620 = vst [vmem:[#allocation8_spill] sm:$0xff] %v10680_v3 }
 0x2a1   :  { %v10541_v21 = vadd.f32 %v2497_v39, %v10377_v52  ;;  %v10544_v45 = vadd.f32 %v2498_v41, %v10380_v11  ;;  %v10547_v37 = vadd.f32 %v2499_v28, %v10383_v13  ;;  %v10550_v26 = vadd.f32 %v2500_v30, %v10386_v51  ;;  %15602 = vst [vmem:[#allocation47_spill] sm:$0xff] %v10599_v12  ;;  %v10616_v39 = vld [vmem:[%s13400_s2 + $0x35] sm:$0xff]  ;;  %v10621_v41 = vld [vmem:[%s13400_s2 + $0x3d] sm:$0xff]  ;;  %v15624_v16 = vld [vmem:[#allocation43_spill] sm:$0xff] }
 0x2a2   :  { %v10556_v18 = vadd.f32 %v2502_v62, %v10392_v46  ;;  %v10559_v2 = vadd.f32 %v2503_v36, %v10395_v4  ;;  %v10562_v52 = vadd.f32 %v2504_v23, %v10398_v40  ;;  %v10565_v11 = vadd.f32 %v2505_v63, %v10401_v9  ;;  %v2560_v9 = vld [vmem:[%s13400_s2 + $0x5] sm:$0xff]  ;;  %15603 = vst [vmem:[#allocation11_spill] sm:$0xff] %v10616_v39  ;;  %v15607_v30 = vld [vmem:[#allocation44_spill] sm:$0xff] }
 0x2a3   :  { %v10568_v13 = vadd.f32 %v2506_v25, %v10404_v49  ;;  %v10571_v51 = vadd.f32 %v2507_v38, %v10407_v61  ;;  %v10577_v46 = vadd.f32 %v2509_v47, %v10413_v55  ;;  %v10580_v4 = vadd.f32 %v2510_v20, %v10416_v19  ;;  %v2561_v49 = vld [vmem:[%s13400_s2 + $0xd] sm:$0xff]  ;;  %v10594_v61 = vld [vmem:[%s13400_s2 + $0x1d] sm:$0xff]  ;;  %15604 = vst [vmem:[#allocation20_spill] sm:$0xff] %v10621_v41  ;;  %v10648_v62 = vld [vmem:[%s13400_s2 + $0x65] sm:$0xff] }
 0x2a4   :  { %v10583_v40 = vadd.f32 %v2511_v29, %v10419_v22  ;;  %15601 = vst [vmem:[#allocation42_spill] sm:$0xff] %v10594_v61  ;;  %v10602_v55 = vadd.f32 %v2512_v33, %v10422_v54  ;;  %v10605_v19 = vadd.f32 %v2513_v32, %v10425_v1  ;;  %v10608_v22 = vadd.f32 %v2514_v59, %v10428_v24  ;;  %v10626_v54 = vld [vmem:[%s13400_s2 + $0x4d] sm:$0xff]  ;;  %v10631_v1 = vld [vmem:[%s13400_s2 + $0x55] sm:$0xff]  ;;  %v15617_v63 = vld [vmem:[#allocation10_spill] sm:$0xff] }
 0x2a5   :  { %v10611_v43 = vadd.f32 %v2515_v0, %v10431_v7  ;;  %15605 = vst [vmem:[#allocation17_spill] sm:$0xff] %v10626_v54  ;;  %15606 = vst [vmem:[#allocation25_spill] sm:$0xff] %v10631_v1  ;;  %v10634_v24 = vadd.f32 %v2516_v34, %v10434_v14  ;;  %v10637_v7 = vadd.f32 %v2517_v42, %v10437_v5  ;;  %v10653_v36 = vld [vmem:[%s13400_s2 + $0x6d] sm:$0xff]  ;;  %v10658_v14 = vld [vmem:[%s13400_s2 + $0x7d] sm:$0xff] }
 0x2a6   :  { %v10640_v28 = vadd.f32 %v2518_v48, %v10440_v8  ;;  %v10643_v56 = vadd.f32 %v2519_v15, %v15607_v30  ;;  %15608 = vst [vmem:[#allocation41_spill] sm:$0xff] %v10648_v62  ;;  %15609 = vst [vmem:[#allocation13_spill] sm:$0xff] %v10653_v36  ;;  %v15611_v5 = vld [vmem:[#allocation15_spill] sm:$0xff]  ;;  %v15613_v48 = vld [vmem:[#allocation29_spill] sm:$0xff]  ;;  %v10670_v25 = vadd.f32 %v2523_v27, %v15617_v63 }
 0x2a7   :  { %15610 = vst [vmem:[#allocation46_spill] sm:$0xff] %v10658_v14  ;;  %v10661_v8 = vadd.f32 %v2520_v31, %v15611_v5  ;;  %v10664_v42 = vadd.f32 %v2521_v58, %v15613_v48  ;;  %v15615_v34 = vld [vmem:[#allocation33_spill] sm:$0xff]  ;;  %v10675_v38 = vld [vmem:[%s13400_s2 + $0x85] sm:$0xff]  ;;  %v10691_v44 = vadd.f32 %v2525_v6, %v15624_v16  ;;  %v10702_v15 = vld [vmem:[%s13400_s2 + $0xad] sm:$0xff] }
 0x2a8   :  { %v10667_v23 = vadd.f32 %v2522_v50, %v15615_v34  ;;  %15618 = vst [vmem:[#allocation21_spill] sm:$0xff] %v10670_v25  ;;  %15619 = vst [vmem:[#allocation30_spill] sm:$0xff] %v10675_v38  ;;  %v10685_v47 = vld [vmem:[%s13400_s2 + $0x9d] sm:$0xff]  ;;  %v10707_v31 = vld [vmem:[%s13400_s2 + $0xb5] sm:$0xff] }
 0x2a9   :  { %15612 = vst [vmem:[#allocation32_spill] sm:$0xff] %v10661_v8  ;;  %15614 = vst [vmem:[#allocation36_spill] sm:$0xff] %v10664_v42  ;;  %v15622_v20 = vld [vmem:[#allocation49_spill] sm:$0xff]  ;;  %v15626_v33 = vld [vmem:[#allocation34_spill] sm:$0xff] }
 0x2aa   :  { %15616 = vst [vmem:[#allocation38_spill] sm:$0xff] %v10667_v23  ;;  %15621 = vst [vmem:[#allocation24_spill] sm:$0xff] %v10685_v47  ;;  %v10688_v29 = vadd.f32 %v2524_v35, %v15622_v20  ;;  %v10694_v32 = vadd.f32 %v2526_v17, %v15626_v33  ;;  %v15628_v59 = vld [vmem:[#allocation26_spill] sm:$0xff]  ;;  %v15636_v35 = vld [vmem:[#allocation35_spill] sm:$0xff] }
 0x2ab   :  { %15625 = vst [vmem:[#allocation23_spill] sm:$0xff] %v10691_v44  ;;  %v10697_v0 = vadd.f32 %v2527_v57, %v15628_v59  ;;  %15630 = vst [vmem:[#allocation39_spill] sm:$0xff] %v10702_v15  ;;  %v10712_v58 = vld [vmem:[%s13400_s2 + $0xc5] sm:$0xff]  ;;  %v10717_v57 = vld [vmem:[%s13400_s2 + $0xcd] sm:$0xff]  ;;  %v2606_v6 = vmul.f32 %v15636_v35, %v2560_v9  ;;  %v2607_v17 = vmul.f32 %v15636_v35, %v2561_v49 }
 0x2ac   :  { %15623 = vst [vmem:[#allocation19_spill] sm:$0xff] %v10688_v29  ;;  %15627 = vst [vmem:[#allocation31_spill] sm:$0xff] %v10694_v32  ;;  %v10722_v50 = vld [vmem:[%s13400_s2 + $0xdd] sm:$0xff]  ;;  %v10727_v27 = vld [vmem:[%s13400_s2 + $0xe5] sm:$0xff]  ;;  %v2608_v30 = vmul.f32 %v15636_v35, %v10594_v61  ;;  %v2609_v5 = vmul.f32 %v15636_v35, %v10599_v12  ;;  %v2610_v49 = vmul.f32 %v15636_v35, %v10616_v39 }
 0x2ad   :  { %15629 = vst [vmem:[#allocation48_spill] sm:$0xff] %v10697_v0  ;;  %15631 = vst [vmem:[#allocation40_spill] sm:$0xff] %v10707_v31  ;;  %v10738_v48 = vld [vmem:[%s13400_s2 + $0xf5] sm:$0xff]  ;;  %v10743_v34 = vld [vmem:[%s13400_s2 + $0xfd] sm:$0xff]  ;;  %v2611_v63 = vmul.f32 %v15636_v35, %v10621_v41  ;;  %v2612_v20 = vmul.f32 %v15636_v35, %v10626_v54  ;;  %v2613_v16 = vmul.f32 %v15636_v35, %v10631_v1 }
 0x2ae   :  { %15632 = vst [vmem:[#allocation22_spill] sm:$0xff] %v10712_v58  ;;  %15633 = vst [vmem:[#allocation6_spill] sm:$0xff] %v10717_v57  ;;  %v10748_v9 = vld [vmem:[%s13400_s2 + $0x10d] sm:$0xff]  ;;  %v10761_v33 = vld [vmem:[%s13400_s2 + $0x115] sm:$0xff]  ;;  %v2614_v54 = vmul.f32 %v15636_v35, %v10648_v62  ;;  %v2615_v1 = vmul.f32 %v15636_v35, %v10653_v36  ;;  %v2616_v39 = vmul.f32 %v15636_v35, %v10658_v14 }
 0x2af   :  { %15634 = vst [vmem:[#allocation45_spill] sm:$0xff] %v10722_v50  ;;  %15635 = vst [vmem:[#allocation37_spill] sm:$0xff] %v10727_v27  ;;  %v10766_v59 = vld [vmem:[%s13400_s2 + $0x125] sm:$0xff]  ;;  %v10771_v41 = vld [vmem:[%s13400_s2 + $0x12d] sm:$0xff]  ;;  %v2617_v12 = vmul.f32 %v15636_v35, %v10675_v38  ;;  %v2618_v14 = vmul.f32 %v15636_v35, %v10680_v3  ;;  %v2619_v38 = vmul.f32 %v15636_v35, %v10685_v47 }
 0x2b0   :  { %15637 = vst [vmem:[#allocation18_spill] sm:$0xff] %v10738_v48  ;;  %15638 = vst [vmem:[#allocation12_spill] sm:$0xff] %v10743_v34  ;;  %v10784_v61 = vld [vmem:[%s13400_s2 + $0x13d] sm:$0xff]  ;;  %v10789_v0 = vld [vmem:[%s13400_s2 + $0x145] sm:$0xff]  ;;  %v2620_v62 = vmul.f32 %v15636_v35, %v10702_v15  ;;  %v2621_v32 = vmul.f32 %v15636_v35, %v10707_v31  ;;  %v2622_v15 = vmul.f32 %v15636_v35, %v10712_v58 }
 0x2b1   :  { %15639 = vst [vmem:[#allocation7_spill] sm:$0xff] %v10748_v9  ;;  %15640 = vst [vmem:[#allocation28_spill] sm:$0xff] %v10761_v33  ;;  %v10794_v36 = vld [vmem:[%s13400_s2 + $0x155] sm:$0xff]  ;;  %v10807_v44 = vld [vmem:[%s13400_s2 + $0x15d] sm:$0xff]  ;;  %v2623_v31 = vmul.f32 %v15636_v35, %v10717_v57  ;;  %v2624_v3 = vmul.f32 %v15636_v35, %v10722_v50  ;;  %v2625_v25 = vmul.f32 %v15636_v35, %v10727_v27 }
 0x2b2   :  { %15641 = vst [vmem:[#allocation14_spill] sm:$0xff] %v10766_v59  ;;  %15642 = vst [vmem:[#allocation27_spill] sm:$0xff] %v10771_v41  ;;  %v10812_v29 = vld [vmem:[%s13400_s2 + $0x16d] sm:$0xff]  ;;  %v10817_v47 = vld [vmem:[%s13400_s2 + $0x175] sm:$0xff]  ;;  %v2626_v23 = vmul.f32 %v15636_v35, %v10738_v48  ;;  %v2627_v42 = vmul.f32 %v15636_v35, %v10743_v34  ;;  %v2628_v8 = vmul.f32 %v15636_v35, %v10748_v9 }
 0x2b3   :  { %15643 = vst [vmem:[#allocation16_spill] sm:$0xff] %v10784_v61  ;;  %15644 = vst [vmem:[#allocation44_spill] sm:$0xff] %v10789_v0  ;;  %v2629_v58 = vmul.f32 %v15636_v35, %v10761_v33  ;;  %v2630_v57 = vmul.f32 %v15636_v35, %v10766_v59  ;;  %v2631_v50 = vmul.f32 %v15636_v35, %v10771_v41 }
 0x2b4   :  { %15645 = vst [vmem:[#allocation15_spill] sm:$0xff] %v10794_v36  ;;  %15646 = vst [vmem:[#allocation29_spill] sm:$0xff] %v10807_v44  ;;  %v2632_v27 = vmul.f32 %v15636_v35, %v10784_v61  ;;  %v2633_v48 = vmul.f32 %v15636_v35, %v10789_v0  ;;  %v2634_v34 = vmul.f32 %v15636_v35, %v10794_v36 }
 0x2b5   :  { %15647 = vst [vmem:[#allocation33_spill] sm:$0xff] %v10812_v29  ;;  %15648 = vst [vmem:[#allocation10_spill] sm:$0xff] %v10817_v47  ;;  %v2635_v9 = vmul.f32 %v15636_v35, %v10807_v44  ;;  %v2636_v33 = vmul.f32 %v15636_v35, %v10812_v29  ;;  %v2637_v59 = vmul.f32 %v15636_v35, %v10817_v47 }
 0x2b6   :  { %v10852_v41 = vadd.f32 %v2606_v6, %v10538_v60  ;;  %v10855_v61 = vadd.f32 %v2607_v17, %v10541_v21  ;;  %v10858_v0 = vadd.f32 %v2608_v30, %v10544_v45  ;;  %v10861_v36 = vadd.f32 %v2609_v5, %v10547_v37  ;;  %v15671_v17 = vld [vmem:[#allocation25_spill] sm:$0xff] }
 0x2b7   :  { %v10864_v44 = vadd.f32 %v2610_v49, %v10550_v26  ;;  %v10867_v29 = vadd.f32 %v2611_v63, %v10553_v10  ;;  %v10870_v35 = vadd.f32 %v2612_v20, %v10556_v18  ;;  %v10873_v60 = vadd.f32 %v2613_v16, %v10559_v2  ;;  %v15672_v5 = vld [vmem:[#allocation41_spill] sm:$0xff]  ;;  %v15674_v49 = vld [vmem:[#allocation46_spill] sm:$0xff] }
 0x2b8   :  { %v10876_v21 = vadd.f32 %v2614_v54, %v10562_v52  ;;  %v10879_v45 = vadd.f32 %v2615_v1, %v10565_v11  ;;  %v10882_v37 = vadd.f32 %v2616_v39, %v10568_v13  ;;  %v10885_v26 = vadd.f32 %v2617_v12, %v10571_v51  ;;  %v15655_v1 = vld [vmem:[#allocation21_spill] sm:$0xff]  ;;  %v15675_v20 = vld [vmem:[#allocation30_spill] sm:$0xff] }
 0x2b9   :  { %v10888_v10 = vadd.f32 %v2618_v14, %v10574_v53  ;;  %v10891_v18 = vadd.f32 %v2619_v38, %v10577_v46  ;;  %v10894_v2 = vadd.f32 %v2620_v62, %v10580_v4  ;;  %v10897_v52 = vadd.f32 %v2621_v32, %v10583_v40  ;;  %v15666_v38 = vld [vmem:[#allocation9_spill] sm:$0xff]  ;;  %v15667_v32 = vld [vmem:[#allocation47_spill] sm:$0xff] }
 0x2ba   :  { %v10900_v11 = vadd.f32 %v2622_v15, %v10602_v55  ;;  %v10903_v13 = vadd.f32 %v2623_v31, %v10605_v19  ;;  %v10906_v51 = vadd.f32 %v2624_v3, %v10608_v22  ;;  %v10909_v53 = vadd.f32 %v2625_v25, %v10611_v43  ;;  %v15649_v55 = vld [vmem:[#allocation32_spill] sm:$0xff]  ;;  %v15653_v43 = vld [vmem:[#allocation38_spill] sm:$0xff]  ;;  %v15668_v31 = vld [vmem:[#allocation11_spill] sm:$0xff] }
 0x2bb   :  { %v10912_v46 = vadd.f32 %v2626_v23, %v10634_v24  ;;  %v10915_v4 = vadd.f32 %v2627_v42, %v10637_v7  ;;  %v10918_v40 = vadd.f32 %v2628_v8, %v10640_v28  ;;  %v10921_v12 = vadd.f32 %v2629_v58, %v10643_v56  ;;  %v15651_v22 = vld [vmem:[#allocation36_spill] sm:$0xff]  ;;  %v15657_v7 = vld [vmem:[#allocation19_spill] sm:$0xff]  ;;  %v15665_v25 = vld [vmem:[#allocation42_spill] sm:$0xff] }
 0x2bc   :  { %v10924_v19 = vadd.f32 %v2630_v57, %v15649_v55  ;;  %v10927_v39 = vadd.f32 %v2631_v50, %v15651_v22  ;;  %v10930_v54 = vadd.f32 %v2632_v27, %v15653_v43  ;;  %v10933_v24 = vadd.f32 %v2633_v48, %v15655_v1  ;;  %v15659_v28 = vld [vmem:[#allocation23_spill] sm:$0xff]  ;;  %v15663_v42 = vld [vmem:[#allocation48_spill] sm:$0xff]  ;;  %v15670_v27 = vld [vmem:[#allocation17_spill] sm:$0xff] }
 0x2bd   :  { %v10936_v62 = vadd.f32 %v2634_v34, %v15657_v7  ;;  %v10939_v14 = vadd.f32 %v2635_v9, %v15659_v28  ;;  %v15661_v56 = vld [vmem:[#allocation31_spill] sm:$0xff]  ;;  %v10945_v23 = vadd.f32 %v2637_v59, %v15663_v42  ;;  %v2672_v3 = vmul.f32 %v15666_v38, %v15665_v25  ;;  %v15669_v57 = vld [vmem:[#allocation20_spill] sm:$0xff]  ;;  %v15673_v34 = vld [vmem:[#allocation13_spill] sm:$0xff] }
 0x2be   :  { %15650 = vst [vmem:[#allocation49_spill] sm:$0xff] %v10924_v19  ;;  %15652 = vst [vmem:[#allocation43_spill] sm:$0xff] %v10927_v39  ;;  %v10942_v8 = vadd.f32 %v2636_v33, %v15661_v56  ;;  %v2673_v15 = vmul.f32 %v15666_v38, %v15667_v32  ;;  %v2674_v58 = vmul.f32 %v15666_v38, %v15668_v31  ;;  %v15676_v33 = vld [vmem:[#allocation8_spill] sm:$0xff]  ;;  %v15678_v43 = vld [vmem:[#allocation39_spill] sm:$0xff] }
 0x2bf   :  { %15654 = vst [vmem:[#allocation34_spill] sm:$0xff] %v10930_v54  ;;  %15656 = vst [vmem:[#allocation26_spill] sm:$0xff] %v10933_v24  ;;  %v2675_v50 = vmul.f32 %v15666_v38, %v15669_v57  ;;  %v2676_v6 = vmul.f32 %v15666_v38, %v15670_v27  ;;  %v2677_v30 = vmul.f32 %v15666_v38, %v15671_v17  ;;  %v15677_v55 = vld [vmem:[#allocation24_spill] sm:$0xff]  ;;  %v15680_v56 = vld [vmem:[#allocation22_spill] sm:$0xff] }
 0x2c0   :  { %15658 = vst [vmem:[#allocation35_spill] sm:$0xff] %v10936_v62  ;;  %15660 = vst [vmem:[#allocation32_spill] sm:$0xff] %v10939_v14  ;;  %v2678_v48 = vmul.f32 %v15666_v38, %v15672_v5  ;;  %v2679_v9 = vmul.f32 %v15666_v38, %v15673_v34  ;;  %v2680_v63 = vmul.f32 %v15666_v38, %v15674_v49  ;;  %v15679_v7 = vld [vmem:[#allocation40_spill] sm:$0xff]  ;;  %v15681_v25 = vld [vmem:[#allocation6_spill] sm:$0xff] }
 0x2c1   :  { %15662 = vst [vmem:[#allocation36_spill] sm:$0xff] %v10942_v8  ;;  %15664 = vst [vmem:[#allocation38_spill] sm:$0xff] %v10945_v23  ;;  %v2681_v16 = vmul.f32 %v15666_v38, %v15675_v20  ;;  %v2682_v59 = vmul.f32 %v15666_v38, %v15676_v33  ;;  %v2683_v22 = vmul.f32 %v15666_v38, %v15677_v55  ;;  %v10982_v20 = vld [vmem:[%s13400_s2 + $0x185] sm:$0xff]  ;;  %v10987_v55 = vld [vmem:[%s13400_s2 + $0x18d] sm:$0xff] }
 0x2c2   :  { %v2684_v1 = vmul.f32 %v15666_v38, %v15678_v43  ;;  %v2685_v28 = vmul.f32 %v15666_v38, %v15679_v7  ;;  %v2686_v42 = vmul.f32 %v15666_v38, %v15680_v56  ;;  %v2687_v32 = vmul.f32 %v15666_v38, %v15681_v25  ;;  %15682 = vst [vmem:[#allocation21_spill] sm:$0xff] %v10982_v20  ;;  %v15684_v43 = vld [vmem:[#allocation45_spill] sm:$0xff]  ;;  %v15686_v56 = vld [vmem:[#allocation18_spill] sm:$0xff]  ;;  %v15687_v25 = vld [vmem:[#allocation12_spill] sm:$0xff] }
 0x2c3   :  { %15683 = vst [vmem:[#allocation19_spill] sm:$0xff] %v10987_v55  ;;  %v2688_v33 = vmul.f32 %v15666_v38, %v15684_v43  ;;  %v15685_v7 = vld [vmem:[#allocation37_spill] sm:$0xff]  ;;  %v2690_v34 = vmul.f32 %v15666_v38, %v15686_v56  ;;  %v2691_v5 = vmul.f32 %v15666_v38, %v15687_v25  ;;  %v15688_v17 = vld [vmem:[#allocation7_spill] sm:$0xff]  ;;  %v15689_v57 = vld [vmem:[#allocation28_spill] sm:$0xff]  ;;  %v11034_v19 = vadd.f32 %v2674_v58, %v10858_v0 }
 0x2c4   :  { %v2689_v49 = vmul.f32 %v15666_v38, %v15685_v7  ;;  %v2692_v27 = vmul.f32 %v15666_v38, %v15688_v17  ;;  %v2693_v31 = vmul.f32 %v15666_v38, %v15689_v57  ;;  %v15690_v23 = vld [vmem:[#allocation14_spill] sm:$0xff]  ;;  %v15691_v14 = vld [vmem:[#allocation27_spill] sm:$0xff]  ;;  %v15692_v7 = vld [vmem:[#allocation16_spill] sm:$0xff]  ;;  %v11054_v0 = vadd.f32 %v2680_v63, %v10876_v21 }
 0x2c5   :  { %v2694_v8 = vmul.f32 %v15666_v38, %v15690_v23  ;;  %v2695_v43 = vmul.f32 %v15666_v38, %v15691_v14  ;;  %v2696_v56 = vmul.f32 %v15666_v38, %v15692_v7  ;;  %v15693_v62 = vld [vmem:[#allocation44_spill] sm:$0xff]  ;;  %v15694_v24 = vld [vmem:[#allocation15_spill] sm:$0xff]  ;;  %v15695_v54 = vld [vmem:[#allocation29_spill] sm:$0xff]  ;;  %v2701_v14 = vmul.f32 %v15666_v38, %v10817_v47 }
 0x2c6   :  { %v2697_v25 = vmul.f32 %v15666_v38, %v15693_v62  ;;  %v2698_v17 = vmul.f32 %v15666_v38, %v15694_v24  ;;  %v2699_v57 = vmul.f32 %v15666_v38, %v15695_v54  ;;  %v15696_v23 = vld [vmem:[#allocation33_spill] sm:$0xff]  ;;  %v2702_v7 = vmul.f32 %v15666_v38, %v10982_v20  ;;  %v15720_v63 = vld [vmem:[#allocation20_spill] sm:$0xff] }
 0x2c7   :  { %v2700_v39 = vmul.f32 %v15666_v38, %v15696_v23  ;;  %v2703_v62 = vmul.f32 %v15666_v38, %v10987_v55  ;;  %v11028_v24 = vadd.f32 %v2672_v3, %v10852_v41  ;;  %v11031_v54 = vadd.f32 %v2673_v15, %v10855_v61  ;;  %v15702_v15 = vld [vmem:[#allocation43_spill] sm:$0xff] }
 0x2c8   :  { %v11037_v23 = vadd.f32 %v2675_v50, %v10861_v36  ;;  %v11042_v20 = vadd.f32 %v2676_v6, %v10864_v44  ;;  %v11045_v38 = vadd.f32 %v2677_v30, %v10867_v29  ;;  %v11048_v41 = vadd.f32 %v2678_v48, %v10870_v35 }
 0x2c9   :  { %v11051_v61 = vadd.f32 %v2679_v9, %v10873_v60  ;;  %v11057_v36 = vadd.f32 %v2681_v16, %v10879_v45  ;;  %v11060_v3 = vadd.f32 %v2682_v59, %v10882_v37  ;;  %v11063_v44 = vadd.f32 %v2683_v22, %v10885_v26  ;;  %v15721_v16 = vld [vmem:[#allocation17_spill] sm:$0xff] }
 0x2ca   :  { %v11066_v29 = vadd.f32 %v2684_v1, %v10888_v10  ;;  %v11069_v35 = vadd.f32 %v2685_v28, %v10891_v18  ;;  %v11072_v60 = vadd.f32 %v2686_v42, %v10894_v2  ;;  %v11075_v21 = vadd.f32 %v2687_v32, %v10897_v52  ;;  %v15723_v22 = vld [vmem:[#allocation41_spill] sm:$0xff] }
 0x2cb   :  { %v11078_v45 = vadd.f32 %v2688_v33, %v10900_v11  ;;  %v11081_v37 = vadd.f32 %v2689_v49, %v10903_v13  ;;  %v11084_v26 = vadd.f32 %v2690_v34, %v10906_v51  ;;  %v11087_v10 = vadd.f32 %v2691_v5, %v10909_v53  ;;  %v15700_v13 = vld [vmem:[#allocation49_spill] sm:$0xff]  ;;  %v15704_v53 = vld [vmem:[#allocation34_spill] sm:$0xff] }
 0x2cc   :  { %v11090_v18 = vadd.f32 %v2692_v27, %v10912_v46  ;;  %v11093_v2 = vadd.f32 %v2693_v31, %v10915_v4  ;;  %v11096_v52 = vadd.f32 %v2694_v8, %v10918_v40  ;;  %v11099_v11 = vadd.f32 %v2695_v43, %v10921_v12  ;;  %v15706_v27 = vld [vmem:[#allocation26_spill] sm:$0xff]  ;;  %v15708_v4 = vld [vmem:[#allocation35_spill] sm:$0xff]  ;;  %v15710_v40 = vld [vmem:[#allocation32_spill] sm:$0xff] }
 0x2cd   :  { %v11102_v51 = vadd.f32 %v2696_v56, %v15700_v13  ;;  %v11105_v58 = vadd.f32 %v2697_v25, %v15702_v15  ;;  %v11108_v50 = vadd.f32 %v2698_v17, %v15704_v53  ;;  %v2737_v46 = vstv %s11005_s14  ;;  %v15712_v12 = vld [vmem:[#allocation36_spill] sm:$0xff]  ;;  %v15714_v5 = vld [vmem:[#allocation38_spill] sm:$0xff]  ;;  %v15724_v1 = vld [vmem:[#allocation13_spill] sm:$0xff] }
 0x2ce   :  { %15697 = vst [vmem:[#allocation23_spill] sm:$0xff] %v11093_v2  ;;  %15698 = vst [vmem:[#allocation31_spill] sm:$0xff] %v11096_v52  ;;  %v11112_v6 = vadd.f32 %v2699_v57, %v15706_v27  ;;  %v11115_v31 = vadd.f32 %v2700_v39, %v15708_v4  ;;  %v11118_v8 = vadd.f32 %v2701_v14, %v15710_v40  ;;  %v11127_v34 = vstv %s11015_s20  ;;  %v15719_v57 = vld [vmem:[#allocation11_spill] sm:$0xff]  ;;  %v15722_v14 = vld [vmem:[#allocation25_spill] sm:$0xff] }
 0x2cf   :  { %15699 = vst [vmem:[#allocation48_spill] sm:$0xff] %v11099_v11  ;;  %15701 = vst [vmem:[#allocation42_spill] sm:$0xff] %v11102_v51  ;;  %v11121_v30 = vadd.f32 %v2702_v7, %v15712_v12  ;;  %v11124_v48 = vadd.f32 %v2703_v62, %v15714_v5  ;;  %v11130_v17 = vstv %s11025_s17  ;;  %v11133_v9 = vstv %s11039_s0  ;;  %v15725_v62 = vld [vmem:[#allocation46_spill] sm:$0xff]  ;;  %v15727_v25 = vld [vmem:[#allocation8_spill] sm:$0xff] }
 0x2d0   :  { %15703 = vst [vmem:[#allocation9_spill] sm:$0xff] %v11105_v58  ;;  %15705 = vst [vmem:[#allocation47_spill] sm:$0xff] %v11108_v50  ;;  %v2738_v49 = vmul.f32 %v2737_v46, %v15719_v57  ;;  %v2739_v39 = vmul.f32 %v2737_v46, %v15720_v63  ;;  %v2740_v33 = vmul.f32 %v2737_v46, %v15721_v16  ;;  %v15726_v56 = vld [vmem:[#allocation30_spill] sm:$0xff]  ;;  %v15728_v13 = vld [vmem:[#allocation24_spill] sm:$0xff] }
 0x2d1   :  { %15707 = vst [vmem:[#allocation49_spill] sm:$0xff] %v11112_v6  ;;  %15709 = vst [vmem:[#allocation43_spill] sm:$0xff] %v11115_v31  ;;  %v2741_v59 = vmul.f32 %v2737_v46, %v15722_v14  ;;  %v2742_v43 = vmul.f32 %v2737_v46, %v15723_v22  ;;  %v2743_v7 = vmul.f32 %v2737_v46, %v15724_v1  ;;  %v15729_v53 = vld [vmem:[#allocation39_spill] sm:$0xff]  ;;  %v15730_v4 = vld [vmem:[#allocation40_spill] sm:$0xff] }
 0x2d2   :  { %15711 = vst [vmem:[#allocation34_spill] sm:$0xff] %v11118_v8  ;;  %15713 = vst [vmem:[#allocation26_spill] sm:$0xff] %v11121_v30  ;;  %v2744_v28 = vmul.f32 %v2737_v46, %v15725_v62  ;;  %v2745_v42 = vmul.f32 %v2737_v46, %v15726_v56  ;;  %v2746_v32 = vmul.f32 %v2737_v46, %v15727_v25  ;;  %v15731_v12 = vld [vmem:[#allocation22_spill] sm:$0xff]  ;;  %v15734_v22 = vld [vmem:[#allocation37_spill] sm:$0xff] }
 0x2d3   :  { %15715 = vst [vmem:[#allocation35_spill] sm:$0xff] %v11124_v48  ;;  %15716 = vst [vmem:[#allocation32_spill] sm:$0xff] %v11127_v34  ;;  %v2747_v15 = vmul.f32 %v2737_v46, %v15728_v13  ;;  %v2748_v27 = vmul.f32 %v2737_v46, %v15729_v53  ;;  %v2749_v40 = vmul.f32 %v2737_v46, %v15730_v4  ;;  %v15732_v57 = vld [vmem:[#allocation6_spill] sm:$0xff]  ;;  %v15738_v25 = vld [vmem:[#allocation12_spill] sm:$0xff] }
 0x2d4   :  { %15717 = vst [vmem:[#allocation36_spill] sm:$0xff] %v11130_v17  ;;  %15718 = vst [vmem:[#allocation38_spill] sm:$0xff] %v11133_v9  ;;  %v2750_v5 = vmul.f32 %v2737_v46, %v15731_v12  ;;  %v2751_v63 = vmul.f32 %v2737_v46, %v15732_v57  ;;  %v15733_v9 = vld [vmem:[#allocation45_spill] sm:$0xff]  ;;  %v2753_v1 = vmul.f32 %v2737_v46, %v15734_v22  ;;  %v11159_v13 = vld [vmem:[%s13400_s2 + $0x1a5] sm:$0xff] }
 0x2d5   :  { %v2752_v17 = vmul.f32 %v2737_v46, %v15733_v9  ;;  %v11154_v56 = vld [vmem:[%s13400_s2 + $0x19d] sm:$0xff]  ;;  %15736 = vst [vmem:[#allocation20_spill] sm:$0xff] %v11159_v13  ;;  %v2755_v12 = vmul.f32 %v2737_v46, %v15738_v25  ;;  %v15739_v62 = vld [vmem:[#allocation7_spill] sm:$0xff]  ;;  %v15740_v14 = vld [vmem:[#allocation28_spill] sm:$0xff]  ;;  %v2765_v25 = vmul.f32 %v2737_v46, %v10817_v47 }
 0x2d6   :  { %15735 = vst [vmem:[#allocation11_spill] sm:$0xff] %v11154_v56  ;;  %v15737_v53 = vld [vmem:[#allocation18_spill] sm:$0xff]  ;;  %v2756_v57 = vmul.f32 %v2737_v46, %v15739_v62  ;;  %v2757_v9 = vmul.f32 %v2737_v46, %v15740_v14  ;;  %v15742_v16 = vld [vmem:[#allocation27_spill] sm:$0xff]  ;;  %v15743_v30 = vld [vmem:[#allocation16_spill] sm:$0xff]  ;;  %v2767_v14 = vmul.f32 %v2737_v46, %v10987_v55  ;;  %v11193_v55 = vadd.f32 %v2743_v7, %v11045_v38 }
 0x2d7   :  { %v2754_v4 = vmul.f32 %v2737_v46, %v15737_v53  ;;  %v15741_v34 = vld [vmem:[#allocation14_spill] sm:$0xff]  ;;  %v2759_v48 = vmul.f32 %v2737_v46, %v15742_v16  ;;  %v2760_v8 = vmul.f32 %v2737_v46, %v15743_v30  ;;  %v15744_v31 = vld [vmem:[#allocation44_spill] sm:$0xff]  ;;  %v15745_v50 = vld [vmem:[#allocation15_spill] sm:$0xff]  ;;  %v2769_v16 = vmul.f32 %v2737_v46, %v11159_v13 }
 0x2d8   :  { %v2758_v22 = vmul.f32 %v2737_v46, %v15741_v34  ;;  %v2761_v6 = vmul.f32 %v2737_v46, %v15744_v31  ;;  %v2762_v58 = vmul.f32 %v2737_v46, %v15745_v50  ;;  %v15746_v51 = vld [vmem:[#allocation29_spill] sm:$0xff]  ;;  %v2768_v34 = vmul.f32 %v2737_v46, %v11154_v56 }
 0x2d9   :  { %v2763_v11 = vmul.f32 %v2737_v46, %v15746_v51  ;;  %v15747_v52 = vld [vmem:[#allocation33_spill] sm:$0xff]  ;;  %v11178_v30 = vadd.f32 %v2738_v49, %v11028_v24  ;;  %v11181_v31 = vadd.f32 %v2739_v39, %v11031_v54  ;;  %v11184_v51 = vadd.f32 %v2740_v33, %v11034_v19 }
 0x2da   :  { %v2764_v53 = vmul.f32 %v2737_v46, %v15747_v52  ;;  %v15748_v2 = vld [vmem:[#allocation21_spill] sm:$0xff]  ;;  %v11187_v52 = vadd.f32 %v2741_v59, %v11037_v23  ;;  %v11199_v24 = vadd.f32 %v2745_v42, %v11051_v61  ;;  %v11202_v54 = vadd.f32 %v2746_v32, %v11054_v0  ;;  %v15769_v42 = vld [vmem:[#allocation32_spill] sm:$0xff] }
 0x2db   :  { %v2766_v62 = vmul.f32 %v2737_v46, %v15748_v2  ;;  %v11190_v2 = vadd.f32 %v2742_v43, %v11042_v20  ;;  %v11196_v46 = vadd.f32 %v2744_v28, %v11048_v41  ;;  %v11205_v19 = vadd.f32 %v2747_v15, %v11057_v36  ;;  %v15770_v15 = vld [vmem:[#allocation25_spill] sm:$0xff] }
 0x2dc   :  { %v11208_v23 = vadd.f32 %v2748_v27, %v11060_v3  ;;  %v11211_v20 = vadd.f32 %v2749_v40, %v11063_v44  ;;  %v11214_v38 = vadd.f32 %v2750_v5, %v11066_v29  ;;  %v11217_v41 = vadd.f32 %v2751_v63, %v11069_v35 }
 0x2dd   :  { %v11220_v61 = vadd.f32 %v2752_v17, %v11072_v60  ;;  %v11223_v0 = vadd.f32 %v2753_v1, %v11075_v21  ;;  %v11226_v36 = vadd.f32 %v2754_v4, %v11078_v45  ;;  %v11229_v3 = vadd.f32 %v2755_v12, %v11081_v37  ;;  %v15749_v60 = vld [vmem:[#allocation23_spill] sm:$0xff]  ;;  %v15751_v45 = vld [vmem:[#allocation48_spill] sm:$0xff]  ;;  %v15752_v37 = vld [vmem:[#allocation42_spill] sm:$0xff] }
 0x2de   :  { %v11232_v44 = vadd.f32 %v2756_v57, %v11084_v26  ;;  %v11235_v29 = vadd.f32 %v2757_v9, %v11087_v10  ;;  %v11238_v35 = vadd.f32 %v2758_v22, %v11090_v18  ;;  %v11241_v17 = vadd.f32 %v2759_v48, %v15749_v60  ;;  %v15750_v21 = vld [vmem:[#allocation31_spill] sm:$0xff]  ;;  %v15754_v26 = vld [vmem:[#allocation9_spill] sm:$0xff]  ;;  %v15776_v57 = vld [vmem:[#allocation24_spill] sm:$0xff] }
 0x2df   :  { %v11244_v49 = vadd.f32 %v2760_v8, %v15750_v21  ;;  %v11247_v39 = vadd.f32 %v2761_v6, %v15751_v45  ;;  %v11250_v33 = vadd.f32 %v2762_v58, %v15752_v37  ;;  %v11253_v59 = vadd.f32 %v2763_v11, %v15754_v26  ;;  %v15756_v10 = vld [vmem:[#allocation47_spill] sm:$0xff]  ;;  %v15758_v18 = vld [vmem:[#allocation49_spill] sm:$0xff]  ;;  %v15762_v8 = vld [vmem:[#allocation34_spill] sm:$0xff] }
 0x2e0   :  { %v11256_v9 = vadd.f32 %v2764_v53, %v15756_v10  ;;  %v11259_v22 = vadd.f32 %v2765_v25, %v15758_v18  ;;  %v15760_v48 = vld [vmem:[#allocation43_spill] sm:$0xff]  ;;  %v11265_v1 = vadd.f32 %v2767_v14, %v15762_v8  ;;  %v15764_v6 = vld [vmem:[#allocation26_spill] sm:$0xff]  ;;  %v15768_v11 = vld [vmem:[#allocation17_spill] sm:$0xff]  ;;  %v2805_v53 = vmul.f32 %v15769_v42, %v15770_v15 }
 0x2e1   :  { %15753 = vst [vmem:[#allocation23_spill] sm:$0xff] %v11250_v33  ;;  %15755 = vst [vmem:[#allocation31_spill] sm:$0xff] %v11253_v59  ;;  %v11262_v43 = vadd.f32 %v2766_v62, %v15760_v48  ;;  %v11268_v7 = vadd.f32 %v2768_v34, %v15764_v6  ;;  %v15766_v58 = vld [vmem:[#allocation35_spill] sm:$0xff]  ;;  %v2804_v32 = vmul.f32 %v15769_v42, %v15768_v11  ;;  %v15771_v25 = vld [vmem:[#allocation41_spill] sm:$0xff] }
 0x2e2   :  { %15757 = vst [vmem:[#allocation48_spill] sm:$0xff] %v11256_v9  ;;  %15759 = vst [vmem:[#allocation42_spill] sm:$0xff] %v11259_v22  ;;  %v11271_v28 = vadd.f32 %v2769_v16, %v15766_v58  ;;  %v2806_v27 = vmul.f32 %v15769_v42, %v15771_v25  ;;  %v15772_v62 = vld [vmem:[#allocation13_spill] sm:$0xff]  ;;  %v15773_v14 = vld [vmem:[#allocation46_spill] sm:$0xff]  ;;  %v2811_v63 = vmul.f32 %v15769_v42, %v15776_v57 }
 0x2e3   :  { %15761 = vst [vmem:[#allocation9_spill] sm:$0xff] %v11262_v43  ;;  %15763 = vst [vmem:[#allocation47_spill] sm:$0xff] %v11265_v1  ;;  %v2807_v4 = vmul.f32 %v15769_v42, %v15772_v62  ;;  %v2808_v40 = vmul.f32 %v15769_v42, %v15773_v14  ;;  %v15774_v34 = vld [vmem:[#allocation30_spill] sm:$0xff]  ;;  %v15775_v16 = vld [vmem:[#allocation8_spill] sm:$0xff]  ;;  %v2826_v43 = vmul.f32 %v15769_v42, %v15745_v50 }
 0x2e4   :  { %15765 = vst [vmem:[#allocation49_spill] sm:$0xff] %v11268_v7  ;;  %15767 = vst [vmem:[#allocation43_spill] sm:$0xff] %v11271_v28  ;;  %v2809_v12 = vmul.f32 %v15769_v42, %v15774_v34  ;;  %v2810_v5 = vmul.f32 %v15769_v42, %v15775_v16  ;;  %v15777_v60 = vld [vmem:[#allocation39_spill] sm:$0xff]  ;;  %v15778_v45 = vld [vmem:[#allocation40_spill] sm:$0xff]  ;;  %v2833_v50 = vmul.f32 %v15769_v42, %v11159_v13 }
 0x2e5   :  { %v2812_v21 = vmul.f32 %v15769_v42, %v15777_v60  ;;  %v2813_v37 = vmul.f32 %v15769_v42, %v15778_v45  ;;  %v15779_v26 = vld [vmem:[#allocation22_spill] sm:$0xff]  ;;  %v15781_v8 = vld [vmem:[#allocation45_spill] sm:$0xff]  ;;  %v15784_v16 = vld [vmem:[#allocation12_spill] sm:$0xff]  ;;  %v11360_v13 = vadd.f32 %v2808_v40, %v11190_v2 }
 0x2e6   :  { %v2814_v10 = vmul.f32 %v15769_v42, %v15779_v26  ;;  %v15780_v18 = vld [vmem:[#allocation6_spill] sm:$0xff]  ;;  %v2816_v6 = vmul.f32 %v15769_v42, %v15781_v8  ;;  %v15782_v58 = vld [vmem:[#allocation37_spill] sm:$0xff]  ;;  %v2819_v60 = vmul.f32 %v15769_v42, %v15784_v16  ;;  %v15787_v8 = vld [vmem:[#allocation7_spill] sm:$0xff] }
 0x2e7   :  { %v2815_v48 = vmul.f32 %v15769_v42, %v15780_v18  ;;  %v2817_v11 = vmul.f32 %v15769_v42, %v15782_v58  ;;  %v15783_v15 = vld [vmem:[#allocation18_spill] sm:$0xff]  ;;  %v11308_v45 = vld [vmem:[%s13400_s2 + $0x1b5] sm:$0xff]  ;;  %v2820_v26 = vmul.f32 %v15769_v42, %v15787_v8  ;;  %v15790_v16 = vld [vmem:[#allocation27_spill] sm:$0xff] }
 0x2e8   :  { %v2818_v57 = vmul.f32 %v15769_v42, %v15783_v15  ;;  %15785 = vst [vmem:[#allocation34_spill] sm:$0xff] %v11308_v45  ;;  %v11313_v18 = vld [vmem:[%s13400_s2 + $0x1bd] sm:$0xff]  ;;  %v15788_v58 = vld [vmem:[#allocation28_spill] sm:$0xff]  ;;  %v2823_v62 = vmul.f32 %v15769_v42, %v15790_v16  ;;  %v15796_v33 = vld [vmem:[#allocation19_spill] sm:$0xff] }
 0x2e9   :  { %15786 = vst [vmem:[#allocation26_spill] sm:$0xff] %v11313_v18  ;;  %v2821_v34 = vmul.f32 %v15769_v42, %v15788_v58  ;;  %v15789_v15 = vld [vmem:[#allocation14_spill] sm:$0xff]  ;;  %v15791_v25 = vld [vmem:[#allocation16_spill] sm:$0xff]  ;;  %v15793_v22 = vld [vmem:[#allocation29_spill] sm:$0xff]  ;;  %v11381_v2 = vadd.f32 %v2815_v48, %v11211_v20 }
 0x2ea   :  { %v2822_v14 = vmul.f32 %v15769_v42, %v15789_v15  ;;  %v2824_v28 = vmul.f32 %v15769_v42, %v15791_v25  ;;  %v15792_v7 = vld [vmem:[#allocation44_spill] sm:$0xff]  ;;  %v2827_v8 = vmul.f32 %v15769_v42, %v15793_v22  ;;  %v15794_v9 = vld [vmem:[#allocation33_spill] sm:$0xff]  ;;  %v2829_v15 = vmul.f32 %v15769_v42, %v10817_v47  ;;  %v15822_v48 = vld [vmem:[#allocation22_spill] sm:$0xff] }
 0x2eb   :  { %v2825_v1 = vmul.f32 %v15769_v42, %v15792_v7  ;;  %v2828_v58 = vmul.f32 %v15769_v42, %v15794_v9  ;;  %v15795_v59 = vld [vmem:[#allocation21_spill] sm:$0xff]  ;;  %v2831_v25 = vmul.f32 %v15769_v42, %v15796_v33  ;;  %v2832_v7 = vmul.f32 %v15769_v42, %v11154_v56 }
 0x2ec   :  { %v2830_v16 = vmul.f32 %v15769_v42, %v15795_v59  ;;  %v2834_v22 = vmul.f32 %v15769_v42, %v11308_v45  ;;  %v2835_v9 = vmul.f32 %v15769_v42, %v11313_v18  ;;  %v11348_v47 = vadd.f32 %v2804_v32, %v11178_v30  ;;  %v15813_v40 = vld [vmem:[#allocation41_spill] sm:$0xff] }
 0x2ed   :  { %v11351_v59 = vadd.f32 %v2805_v53, %v11181_v31  ;;  %v11354_v33 = vadd.f32 %v2806_v27, %v11184_v51  ;;  %v11357_v56 = vadd.f32 %v2807_v4, %v11187_v52  ;;  %v11363_v45 = vadd.f32 %v2809_v12, %v11193_v55  ;;  %v15811_v4 = vld [vmem:[#allocation43_spill] sm:$0xff] }
 0x2ee   :  { %v11366_v42 = vadd.f32 %v2810_v5, %v11196_v46  ;;  %v11369_v30 = vadd.f32 %v2811_v63, %v11199_v24  ;;  %v11372_v31 = vadd.f32 %v2812_v21, %v11202_v54  ;;  %v11375_v51 = vadd.f32 %v2813_v37, %v11205_v19 }
 0x2ef   :  { %v11378_v52 = vadd.f32 %v2814_v10, %v11208_v23  ;;  %v11384_v55 = vadd.f32 %v2816_v6, %v11214_v38  ;;  %v11387_v46 = vadd.f32 %v2817_v11, %v11217_v41  ;;  %v11390_v24 = vadd.f32 %v2818_v57, %v11220_v61  ;;  %v15823_v6 = vld [vmem:[#allocation6_spill] sm:$0xff]  ;;  %v15824_v11 = vld [vmem:[#allocation45_spill] sm:$0xff] }
 0x2f0   :  { %v11393_v54 = vadd.f32 %v2819_v60, %v11223_v0  ;;  %v11396_v19 = vadd.f32 %v2820_v26, %v11226_v36  ;;  %v11399_v23 = vadd.f32 %v2821_v34, %v11229_v3  ;;  %v11402_v20 = vadd.f32 %v2822_v14, %v11232_v44  ;;  %v15797_v3 = vld [vmem:[#allocation23_spill] sm:$0xff]  ;;  %v15814_v34 = vld [vmem:[#allocation36_spill] sm:$0xff] }
 0x2f1   :  { %v11405_v38 = vadd.f32 %v2823_v62, %v11235_v29  ;;  %v11408_v41 = vadd.f32 %v2824_v28, %v11238_v35  ;;  %v11411_v61 = vadd.f32 %v2825_v1, %v11241_v17  ;;  %v11414_v0 = vadd.f32 %v2826_v43, %v11244_v49  ;;  %v15799_v44 = vld [vmem:[#allocation31_spill] sm:$0xff]  ;;  %v15801_v29 = vld [vmem:[#allocation48_spill] sm:$0xff]  ;;  %v15803_v35 = vld [vmem:[#allocation42_spill] sm:$0xff] }
 0x2f2   :  { %v11417_v36 = vadd.f32 %v2827_v8, %v11247_v39  ;;  %v11420_v32 = vadd.f32 %v2828_v58, %v15797_v3  ;;  %v11423_v53 = vadd.f32 %v2829_v15, %v15799_v44  ;;  %v11426_v27 = vadd.f32 %v2830_v16, %v15801_v29  ;;  %v15805_v17 = vld [vmem:[#allocation9_spill] sm:$0xff]  ;;  %v15807_v49 = vld [vmem:[#allocation47_spill] sm:$0xff]  ;;  %v15821_v26 = vld [vmem:[#allocation40_spill] sm:$0xff] }
 0x2f3   :  { %v11429_v28 = vadd.f32 %v2831_v25, %v15803_v35  ;;  %v11432_v1 = vadd.f32 %v2832_v7, %v15805_v17  ;;  %v11435_v43 = vadd.f32 %v2833_v50, %v15807_v49  ;;  %v15809_v39 = vld [vmem:[#allocation49_spill] sm:$0xff]  ;;  %v11441_v14 = vadd.f32 %v2835_v9, %v15811_v4  ;;  %v15816_v25 = vld [vmem:[#allocation46_spill] sm:$0xff]  ;;  %v15818_v50 = vld [vmem:[#allocation8_spill] sm:$0xff] }
 0x2f4   :  { %15798 = vst [vmem:[#allocation35_spill] sm:$0xff] %v11420_v32  ;;  %15800 = vst [vmem:[#allocation17_spill] sm:$0xff] %v11423_v53  ;;  %v11438_v62 = vadd.f32 %v2834_v22, %v15809_v39  ;;  %v2870_v12 = vmul.f32 %v15814_v34, %v15813_v40  ;;  %v15815_v16 = vld [vmem:[#allocation13_spill] sm:$0xff]  ;;  %v2872_v57 = vmul.f32 %v15814_v34, %v15816_v25  ;;  %v15817_v7 = vld [vmem:[#allocation30_spill] sm:$0xff] }
 0x2f5   :  { %15802 = vst [vmem:[#allocation32_spill] sm:$0xff] %v11426_v27  ;;  %15804 = vst [vmem:[#allocation25_spill] sm:$0xff] %v11429_v28  ;;  %v2871_v5 = vmul.f32 %v15814_v34, %v15815_v16  ;;  %v2873_v63 = vmul.f32 %v15814_v34, %v15817_v7  ;;  %v2874_v60 = vmul.f32 %v15814_v34, %v15818_v50  ;;  %v15819_v22 = vld [vmem:[#allocation24_spill] sm:$0xff]  ;;  %v15820_v9 = vld [vmem:[#allocation39_spill] sm:$0xff] }
 0x2f6   :  { %15806 = vst [vmem:[#allocation23_spill] sm:$0xff] %v11432_v1  ;;  %15808 = vst [vmem:[#allocation31_spill] sm:$0xff] %v11435_v43  ;;  %v2875_v21 = vmul.f32 %v15814_v34, %v15819_v22  ;;  %v2876_v37 = vmul.f32 %v15814_v34, %v15820_v9  ;;  %v2877_v10 = vmul.f32 %v15814_v34, %v15821_v26  ;;  %v15825_v3 = vld [vmem:[#allocation37_spill] sm:$0xff]  ;;  %v15826_v29 = vld [vmem:[#allocation18_spill] sm:$0xff] }
 0x2f7   :  { %15810 = vst [vmem:[#allocation48_spill] sm:$0xff] %v11438_v62  ;;  %15812 = vst [vmem:[#allocation42_spill] sm:$0xff] %v11441_v14  ;;  %v2878_v8 = vmul.f32 %v15814_v34, %v15822_v48  ;;  %v2879_v58 = vmul.f32 %v15814_v34, %v15823_v6  ;;  %v2880_v15 = vmul.f32 %v15814_v34, %v15824_v11  ;;  %v15827_v17 = vld [vmem:[#allocation12_spill] sm:$0xff]  ;;  %v15828_v39 = vld [vmem:[#allocation7_spill] sm:$0xff] }
 0x2f8   :  { %v2881_v44 = vmul.f32 %v15814_v34, %v15825_v3  ;;  %v2882_v35 = vmul.f32 %v15814_v34, %v15826_v29  ;;  %v2883_v49 = vmul.f32 %v15814_v34, %v15827_v17  ;;  %v2884_v4 = vmul.f32 %v15814_v34, %v15828_v39  ;;  %v15829_v40 = vld [vmem:[#allocation28_spill] sm:$0xff]  ;;  %v15831_v29 = vld [vmem:[#allocation14_spill] sm:$0xff]  ;;  %v15832_v17 = vld [vmem:[#allocation27_spill] sm:$0xff] }
 0x2f9   :  { %v2885_v16 = vmul.f32 %v15814_v34, %v15829_v40  ;;  %v11478_v6 = vld [vmem:[%s13400_s2 + $0x1cd] sm:$0xff]  ;;  %v11483_v3 = vld [vmem:[%s13400_s2 + $0x1d5] sm:$0xff]  ;;  %v2886_v11 = vmul.f32 %v15814_v34, %v15831_v29  ;;  %v2887_v48 = vmul.f32 %v15814_v34, %v15832_v17  ;;  %v15838_v43 = vld [vmem:[#allocation10_spill] sm:$0xff] }
 0x2fa   :  { %15830 = vst [vmem:[#allocation9_spill] sm:$0xff] %v11478_v6  ;;  %v15833_v39 = vld [vmem:[#allocation16_spill] sm:$0xff]  ;;  %v15835_v22 = vld [vmem:[#allocation15_spill] sm:$0xff]  ;;  %v15836_v7 = vld [vmem:[#allocation29_spill] sm:$0xff]  ;;  %v2893_v29 = vmul.f32 %v15814_v34, %v15838_v43  ;;  %v2900_v43 = vmul.f32 %v15814_v34, %v11478_v6  ;;  %v11533_v6 = vadd.f32 %v2875_v21, %v11363_v45  ;;  %v11554_v45 = vadd.f32 %v2882_v35, %v11384_v55 }
 0x2fb   :  { %v2888_v26 = vmul.f32 %v15814_v34, %v15833_v39  ;;  %v15834_v40 = vld [vmem:[#allocation44_spill] sm:$0xff]  ;;  %v2890_v50 = vmul.f32 %v15814_v34, %v15835_v22  ;;  %v2891_v25 = vmul.f32 %v15814_v34, %v15836_v7  ;;  %v15837_v14 = vld [vmem:[#allocation33_spill] sm:$0xff]  ;;  %v15840_v28 = vld [vmem:[#allocation19_spill] sm:$0xff] }
 0x2fc   :  { %v2889_v9 = vmul.f32 %v15814_v34, %v15834_v40  ;;  %v2892_v62 = vmul.f32 %v15814_v34, %v15837_v14  ;;  %v15839_v1 = vld [vmem:[#allocation21_spill] sm:$0xff]  ;;  %v2895_v39 = vmul.f32 %v15814_v34, %v15840_v28  ;;  %v15841_v27 = vld [vmem:[#allocation11_spill] sm:$0xff]  ;;  %v15842_v53 = vld [vmem:[#allocation20_spill] sm:$0xff]  ;;  %v2899_v14 = vmul.f32 %v15814_v34, %v11313_v18 }
 0x2fd   :  { %v2894_v17 = vmul.f32 %v15814_v34, %v15839_v1  ;;  %v2896_v40 = vmul.f32 %v15814_v34, %v15841_v27  ;;  %v2897_v22 = vmul.f32 %v15814_v34, %v15842_v53  ;;  %v15843_v32 = vld [vmem:[#allocation34_spill] sm:$0xff]  ;;  %v2901_v1 = vmul.f32 %v15814_v34, %v11483_v3 }
 0x2fe   :  { %v2898_v7 = vmul.f32 %v15814_v34, %v15843_v32  ;;  %v11518_v28 = vadd.f32 %v2870_v12, %v11348_v47  ;;  %v11521_v27 = vadd.f32 %v2871_v5, %v11351_v59  ;;  %v11524_v53 = vadd.f32 %v2872_v57, %v11354_v33 }
 0x2ff   :  { %v11527_v32 = vadd.f32 %v2873_v63, %v11357_v56  ;;  %v11530_v18 = vadd.f32 %v2874_v60, %v11360_v13  ;;  %v11536_v34 = vadd.f32 %v2876_v37, %v11366_v42  ;;  %v11539_v47 = vadd.f32 %v2877_v10, %v11369_v30  ;;  %v15858_v60 = vld [vmem:[#allocation42_spill] sm:$0xff] }
 0x300   :  { %v11542_v59 = vadd.f32 %v2878_v8, %v11372_v31  ;;  %v11545_v33 = vadd.f32 %v2879_v58, %v11375_v51  ;;  %v11548_v56 = vadd.f32 %v2880_v15, %v11378_v52  ;;  %v11551_v13 = vadd.f32 %v2881_v44, %v11381_v2  ;;  %v15861_v37 = vld [vmem:[#allocation38_spill] sm:$0xff] }
 0x301   :  { %v11557_v42 = vadd.f32 %v2883_v49, %v11387_v46  ;;  %v11560_v30 = vadd.f32 %v2884_v4, %v11390_v24  ;;  %v11563_v31 = vadd.f32 %v2885_v16, %v11393_v54  ;;  %v11566_v51 = vadd.f32 %v2886_v11, %v11396_v19  ;;  %v15862_v10 = vld [vmem:[#allocation30_spill] sm:$0xff] }
 0x302   :  { %v11569_v52 = vadd.f32 %v2887_v48, %v11399_v23  ;;  %v11572_v2 = vadd.f32 %v2888_v26, %v11402_v20  ;;  %v11575_v55 = vadd.f32 %v2889_v9, %v11405_v38  ;;  %v11578_v46 = vadd.f32 %v2890_v50, %v11408_v41  ;;  %v15844_v23 = vld [vmem:[#allocation35_spill] sm:$0xff]  ;;  %v15846_v20 = vld [vmem:[#allocation17_spill] sm:$0xff]  ;;  %v15848_v38 = vld [vmem:[#allocation32_spill] sm:$0xff] }
 0x303   :  { %v11581_v24 = vadd.f32 %v2891_v25, %v11411_v61  ;;  %v11584_v54 = vadd.f32 %v2892_v62, %v11414_v0  ;;  %v11587_v19 = vadd.f32 %v2893_v29, %v11417_v36  ;;  %v11590_v12 = vadd.f32 %v2894_v17, %v15844_v23  ;;  %v15850_v41 = vld [vmem:[#allocation25_spill] sm:$0xff]  ;;  %v15852_v61 = vld [vmem:[#allocation23_spill] sm:$0xff]  ;;  %v15856_v36 = vld [vmem:[#allocation48_spill] sm:$0xff] }
 0x304   :  { %v11593_v5 = vadd.f32 %v2895_v39, %v15846_v20  ;;  %v11596_v57 = vadd.f32 %v2896_v40, %v15848_v38  ;;  %v11599_v63 = vadd.f32 %v2897_v22, %v15850_v41  ;;  %v11602_v25 = vadd.f32 %v2898_v7, %v15852_v61  ;;  %v15854_v0 = vld [vmem:[#allocation31_spill] sm:$0xff]  ;;  %v15860_v9 = vld [vmem:[#allocation46_spill] sm:$0xff]  ;;  %v15863_v22 = vld [vmem:[#allocation8_spill] sm:$0xff] }
 0x305   :  { %15845 = vst [vmem:[#allocation47_spill] sm:$0xff] %v11590_v12  ;;  %v11605_v62 = vadd.f32 %v2899_v14, %v15854_v0  ;;  %v11608_v50 = vadd.f32 %v2900_v43, %v15856_v36  ;;  %v11611_v21 = vadd.f32 %v2901_v1, %v15858_v60  ;;  %v2936_v26 = vmul.f32 %v15861_v37, %v15860_v9  ;;  %v15864_v7 = vld [vmem:[#allocation24_spill] sm:$0xff]  ;;  %v15865_v14 = vld [vmem:[#allocation39_spill] sm:$0xff]  ;;  %v15867_v1 = vld [vmem:[#allocation22_spill] sm:$0xff] }
 0x306   :  { %15847 = vst [vmem:[#allocation49_spill] sm:$0xff] %v11593_v5  ;;  %15849 = vst [vmem:[#allocation43_spill] sm:$0xff] %v11596_v57  ;;  %v2937_v48 = vmul.f32 %v15861_v37, %v15862_v10  ;;  %v2938_v8 = vmul.f32 %v15861_v37, %v15863_v22  ;;  %v2939_v58 = vmul.f32 %v15861_v37, %v15864_v7  ;;  %v15866_v43 = vld [vmem:[#allocation40_spill] sm:$0xff]  ;;  %v15868_v29 = vld [vmem:[#allocation6_spill] sm:$0xff] }
 0x307   :  { %15851 = vst [vmem:[#allocation41_spill] sm:$0xff] %v11599_v63  ;;  %15853 = vst [vmem:[#allocation36_spill] sm:$0xff] %v11602_v25  ;;  %v2940_v11 = vmul.f32 %v15861_v37, %v15865_v14  ;;  %v2941_v15 = vmul.f32 %v15861_v37, %v15866_v43  ;;  %v2942_v44 = vmul.f32 %v15861_v37, %v15867_v1  ;;  %v15869_v17 = vld [vmem:[#allocation45_spill] sm:$0xff]  ;;  %v15871_v40 = vld [vmem:[#allocation18_spill] sm:$0xff] }
 0x308   :  { %15855 = vst [vmem:[#allocation13_spill] sm:$0xff] %v11605_v62  ;;  %15857 = vst [vmem:[#allocation35_spill] sm:$0xff] %v11608_v50  ;;  %v2943_v35 = vmul.f32 %v15861_v37, %v15868_v29  ;;  %v2944_v49 = vmul.f32 %v15861_v37, %v15869_v17  ;;  %v15870_v39 = vld [vmem:[#allocation37_spill] sm:$0xff]  ;;  %v2946_v16 = vmul.f32 %v15861_v37, %v15871_v40  ;;  %v15872_v23 = vld [vmem:[#allocation12_spill] sm:$0xff] }
 0x309   :  { %15859 = vst [vmem:[#allocation17_spill] sm:$0xff] %v11611_v21  ;;  %v2945_v4 = vmul.f32 %v15861_v37, %v15870_v39  ;;  %v2947_v20 = vmul.f32 %v15861_v37, %v15872_v23  ;;  %v15873_v38 = vld [vmem:[#allocation7_spill] sm:$0xff]  ;;  %v15874_v61 = vld [vmem:[#allocation28_spill] sm:$0xff]  ;;  %v15875_v36 = vld [vmem:[#allocation14_spill] sm:$0xff]  ;;  %v11700_v12 = vadd.f32 %v2938_v8, %v11524_v53 }
 0x30a   :  { %v2948_v41 = vmul.f32 %v15861_v37, %v15873_v38  ;;  %v2949_v0 = vmul.f32 %v15861_v37, %v15874_v61  ;;  %v2950_v60 = vmul.f32 %v15861_v37, %v15875_v36  ;;  %v15876_v9 = vld [vmem:[#allocation27_spill] sm:$0xff]  ;;  %v15878_v38 = vld [vmem:[#allocation16_spill] sm:$0xff]  ;;  %v15882_v43 = vld [vmem:[#allocation33_spill] sm:$0xff]  ;;  %v11720_v53 = vadd.f32 %v2944_v49, %v11542_v59 }
 0x30b   :  { %v2951_v10 = vmul.f32 %v15861_v37, %v15876_v9  ;;  %v11648_v39 = vld [vmem:[%s13400_s2 + $0x1e5] sm:$0xff]  ;;  %v11653_v23 = vld [vmem:[%s13400_s2 + $0x1ed] sm:$0xff]  ;;  %v2952_v40 = vmul.f32 %v15861_v37, %v15878_v38  ;;  %v15881_v9 = vld [vmem:[#allocation29_spill] sm:$0xff]  ;;  %v2956_v14 = vmul.f32 %v15861_v37, %v15882_v43 }
 0x30c   :  { %15877 = vst [vmem:[#allocation32_spill] sm:$0xff] %v11648_v39  ;;  %v15879_v61 = vld [vmem:[#allocation44_spill] sm:$0xff]  ;;  %v15880_v36 = vld [vmem:[#allocation15_spill] sm:$0xff]  ;;  %v2955_v1 = vmul.f32 %v15861_v37, %v15881_v9  ;;  %v15883_v7 = vld [vmem:[#allocation10_spill] sm:$0xff] }
 0x30d   :  { %v2953_v17 = vmul.f32 %v15861_v37, %v15879_v61  ;;  %v2954_v29 = vmul.f32 %v15861_v37, %v15880_v36  ;;  %v2957_v22 = vmul.f32 %v15861_v37, %v15883_v7  ;;  %v15884_v21 = vld [vmem:[#allocation21_spill] sm:$0xff]  ;;  %v15885_v62 = vld [vmem:[#allocation19_spill] sm:$0xff]  ;;  %v15887_v25 = vld [vmem:[#allocation20_spill] sm:$0xff]  ;;  %v11741_v59 = vadd.f32 %v2951_v10, %v11563_v31 }
 0x30e   :  { %v2958_v50 = vmul.f32 %v15861_v37, %v15884_v21  ;;  %v2959_v38 = vmul.f32 %v15861_v37, %v15885_v62  ;;  %v15886_v61 = vld [vmem:[#allocation11_spill] sm:$0xff]  ;;  %v2961_v9 = vmul.f32 %v15861_v37, %v15887_v25  ;;  %v15888_v63 = vld [vmem:[#allocation34_spill] sm:$0xff]  ;;  %v15890_v21 = vld [vmem:[#allocation9_spill] sm:$0xff]  ;;  %v2965_v62 = vmul.f32 %v15861_v37, %v11483_v3 }
 0x30f   :  { %v2960_v36 = vmul.f32 %v15861_v37, %v15886_v61  ;;  %v2962_v43 = vmul.f32 %v15861_v37, %v15888_v63  ;;  %v15889_v57 = vld [vmem:[#allocation26_spill] sm:$0xff]  ;;  %v2964_v5 = vmul.f32 %v15861_v37, %v15890_v21  ;;  %v2966_v61 = vmul.f32 %v15861_v37, %v11648_v39  ;;  %v15915_v49 = vld [vmem:[#allocation24_spill] sm:$0xff] }
 0x310   :  { %v2963_v7 = vmul.f32 %v15861_v37, %v15889_v57  ;;  %v2967_v25 = vmul.f32 %v15861_v37, %v11653_v23  ;;  %v11694_v63 = vadd.f32 %v2936_v26, %v11518_v28  ;;  %v11697_v57 = vadd.f32 %v2937_v48, %v11521_v27  ;;  %v15897_v48 = vld [vmem:[#allocation49_spill] sm:$0xff] }
 0x311   :  { %v11703_v21 = vadd.f32 %v2939_v58, %v11527_v32  ;;  %v11708_v39 = vadd.f32 %v2940_v11, %v11530_v18  ;;  %v11711_v37 = vadd.f32 %v2941_v15, %v11533_v6  ;;  %v11714_v28 = vadd.f32 %v2942_v44, %v11536_v34 }
 0x312   :  { %v11717_v27 = vadd.f32 %v2943_v35, %v11539_v47  ;;  %v11723_v32 = vadd.f32 %v2945_v4, %v11545_v33  ;;  %v11726_v26 = vadd.f32 %v2946_v16, %v11548_v56  ;;  %v11729_v18 = vadd.f32 %v2947_v20, %v11551_v13  ;;  %v15916_v4 = vld [vmem:[#allocation39_spill] sm:$0xff]  ;;  %v15918_v20 = vld [vmem:[#allocation22_spill] sm:$0xff] }
 0x313   :  { %v11732_v6 = vadd.f32 %v2948_v41, %v11554_v45  ;;  %v11735_v34 = vadd.f32 %v2949_v0, %v11557_v42  ;;  %v11738_v47 = vadd.f32 %v2950_v60, %v11560_v30  ;;  %v11744_v33 = vadd.f32 %v2952_v40, %v11566_v51  ;;  %v15919_v41 = vld [vmem:[#allocation6_spill] sm:$0xff] }
 0x314   :  { %v11747_v56 = vadd.f32 %v2953_v17, %v11569_v52  ;;  %v11750_v13 = vadd.f32 %v2954_v29, %v11572_v2  ;;  %v11753_v45 = vadd.f32 %v2955_v1, %v11575_v55  ;;  %v11756_v42 = vadd.f32 %v2956_v14, %v11578_v46  ;;  %v15895_v52 = vld [vmem:[#allocation47_spill] sm:$0xff]  ;;  %v15901_v14 = vld [vmem:[#allocation41_spill] sm:$0xff] }
 0x315   :  { %v11759_v30 = vadd.f32 %v2957_v22, %v11581_v24  ;;  %v11762_v31 = vadd.f32 %v2958_v50, %v11584_v54  ;;  %v11765_v51 = vadd.f32 %v2959_v38, %v11587_v19  ;;  %v11768_v2 = vadd.f32 %v2960_v36, %v15895_v52  ;;  %v15899_v55 = vld [vmem:[#allocation43_spill] sm:$0xff]  ;;  %v15903_v24 = vld [vmem:[#allocation36_spill] sm:$0xff]  ;;  %v15905_v54 = vld [vmem:[#allocation13_spill] sm:$0xff] }
 0x316   :  { %15891 = vst [vmem:[#allocation25_spill] sm:$0xff] %v11756_v42  ;;  %v11771_v8 = vadd.f32 %v2961_v9, %v15897_v48  ;;  %v11774_v58 = vadd.f32 %v2962_v43, %v15899_v55  ;;  %v3001_v46 = vstv %s11671_s5  ;;  %v11778_v11 = vadd.f32 %v2963_v7, %v15901_v14  ;;  %v15907_v19 = vld [vmem:[#allocation35_spill] sm:$0xff]  ;;  %v15909_v1 = vld [vmem:[#allocation17_spill] sm:$0xff]  ;;  %v15914_v7 = vld [vmem:[#allocation8_spill] sm:$0xff] }
 0x317   :  { %15892 = vst [vmem:[#allocation23_spill] sm:$0xff] %v11759_v30  ;;  %15893 = vst [vmem:[#allocation31_spill] sm:$0xff] %v11762_v31  ;;  %v11781_v22 = vadd.f32 %v2964_v5, %v15903_v24  ;;  %v11784_v50 = vadd.f32 %v2965_v62, %v15905_v54  ;;  %v11787_v15 = vadd.f32 %v2966_v61, %v15907_v19  ;;  %v11793_v29 = vstv %s11681_s6  ;;  %v15917_v62 = vld [vmem:[#allocation40_spill] sm:$0xff]  ;;  %v15921_v36 = vld [vmem:[#allocation37_spill] sm:$0xff] }
 0x318   :  { %15894 = vst [vmem:[#allocation48_spill] sm:$0xff] %v11765_v51  ;;  %15896 = vst [vmem:[#allocation42_spill] sm:$0xff] %v11768_v2  ;;  %v11790_v44 = vadd.f32 %v2967_v25, %v15909_v1  ;;  %v11796_v43 = vstv %s11691_s7  ;;  %v11799_v35 = vstv %s11705_s8  ;;  %v3002_v17 = vmul.f32 %v3001_v46, %v15914_v7  ;;  %v15920_v25 = vld [vmem:[#allocation45_spill] sm:$0xff]  ;;  %v15922_v9 = vld [vmem:[#allocation18_spill] sm:$0xff] }
 0x319   :  { %15898 = vst [vmem:[#allocation46_spill] sm:$0xff] %v11771_v8  ;;  %15900 = vst [vmem:[#allocation38_spill] sm:$0xff] %v11774_v58  ;;  %v3003_v5 = vmul.f32 %v3001_v46, %v15915_v49  ;;  %v3004_v40 = vmul.f32 %v3001_v46, %v15916_v4  ;;  %v3005_v16 = vmul.f32 %v3001_v46, %v15917_v62  ;;  %v15923_v52 = vld [vmem:[#allocation12_spill] sm:$0xff]  ;;  %v15924_v55 = vld [vmem:[#allocation7_spill] sm:$0xff] }
 0x31a   :  { %15902 = vst [vmem:[#allocation30_spill] sm:$0xff] %v11778_v11  ;;  %15904 = vst [vmem:[#allocation47_spill] sm:$0xff] %v11781_v22  ;;  %v3006_v38 = vmul.f32 %v3001_v46, %v15918_v20  ;;  %v3007_v61 = vmul.f32 %v3001_v46, %v15919_v41  ;;  %v3008_v0 = vmul.f32 %v3001_v46, %v15920_v25  ;;  %v15925_v24 = vld [vmem:[#allocation28_spill] sm:$0xff]  ;;  %v15926_v19 = vld [vmem:[#allocation14_spill] sm:$0xff] }
 0x31b   :  { %15906 = vst [vmem:[#allocation49_spill] sm:$0xff] %v11784_v50  ;;  %15908 = vst [vmem:[#allocation43_spill] sm:$0xff] %v11787_v15  ;;  %v3009_v60 = vmul.f32 %v3001_v46, %v15921_v36  ;;  %v3010_v10 = vmul.f32 %v3001_v46, %v15922_v9  ;;  %v3011_v48 = vmul.f32 %v3001_v46, %v15923_v52  ;;  %v15927_v7 = vld [vmem:[#allocation27_spill] sm:$0xff]  ;;  %v15928_v4 = vld [vmem:[#allocation16_spill] sm:$0xff] }
 0x31c   :  { %15910 = vst [vmem:[#allocation41_spill] sm:$0xff] %v11790_v44  ;;  %15911 = vst [vmem:[#allocation36_spill] sm:$0xff] %v11793_v29  ;;  %v3012_v14 = vmul.f32 %v3001_v46, %v15924_v55  ;;  %v3013_v54 = vmul.f32 %v3001_v46, %v15925_v24  ;;  %v3014_v1 = vmul.f32 %v3001_v46, %v15926_v19  ;;  %v15929_v20 = vld [vmem:[#allocation44_spill] sm:$0xff]  ;;  %v2602_v25 = vld [vmem:[%s13400_s2 + $0x1fd] sm:$0xff] }
 0x31d   :  { %15912 = vst [vmem:[#allocation13_spill] sm:$0xff] %v11796_v43  ;;  %15913 = vst [vmem:[#allocation35_spill] sm:$0xff] %v11799_v35  ;;  %v3015_v49 = vmul.f32 %v3001_v46, %v15927_v7  ;;  %v3016_v62 = vmul.f32 %v3001_v46, %v15928_v4  ;;  %v3017_v41 = vmul.f32 %v3001_v46, %v15929_v20  ;;  %v2603_v36 = vld [vmem:[%s13400_s2 + $0x205] sm:$0xff]  ;;  %v15931_v55 = vld [vmem:[#allocation29_spill] sm:$0xff] }
 0x31e   :  { %v15930_v9 = vld [vmem:[#allocation15_spill] sm:$0xff]  ;;  %v3019_v24 = vmul.f32 %v3001_v46, %v15931_v55  ;;  %v15932_v35 = vld [vmem:[#allocation33_spill] sm:$0xff]  ;;  %v15933_v43 = vld [vmem:[#allocation10_spill] sm:$0xff]  ;;  %v3029_v55 = vmul.f32 %v3001_v46, %v11483_v3  ;;  %v3032_v42 = vmul.f32 %v3001_v46, %v2602_v25  ;;  %v11850_v3 = vadd.f32 %v3006_v38, %v11708_v39 }
 0x31f   :  { %v3018_v52 = vmul.f32 %v3001_v46, %v15930_v9  ;;  %v3020_v19 = vmul.f32 %v3001_v46, %v15932_v35  ;;  %v3021_v7 = vmul.f32 %v3001_v46, %v15933_v43  ;;  %v15934_v29 = vld [vmem:[#allocation21_spill] sm:$0xff]  ;;  %v15935_v44 = vld [vmem:[#allocation19_spill] sm:$0xff]  ;;  %v15937_v22 = vld [vmem:[#allocation20_spill] sm:$0xff]  ;;  %v3031_v43 = vmul.f32 %v3001_v46, %v11653_v23 }
 0x320   :  { %v3022_v4 = vmul.f32 %v3001_v46, %v15934_v29  ;;  %v3023_v20 = vmul.f32 %v3001_v46, %v15935_v44  ;;  %v15936_v15 = vld [vmem:[#allocation11_spill] sm:$0xff]  ;;  %v3025_v11 = vmul.f32 %v3001_v46, %v15937_v22  ;;  %v15938_v58 = vld [vmem:[#allocation34_spill] sm:$0xff]  ;;  %v15940_v31 = vld [vmem:[#allocation9_spill] sm:$0xff]  ;;  %v3033_v29 = vmul.f32 %v3001_v46, %v2603_v36 }
 0x321   :  { %v3024_v50 = vmul.f32 %v3001_v46, %v15936_v15  ;;  %v3026_v8 = vmul.f32 %v3001_v46, %v15938_v58  ;;  %v15939_v2 = vld [vmem:[#allocation26_spill] sm:$0xff]  ;;  %v3028_v9 = vmul.f32 %v3001_v46, %v15940_v31  ;;  %v15941_v30 = vld [vmem:[#allocation32_spill] sm:$0xff]  ;;  %v11838_v44 = vadd.f32 %v3002_v17, %v11694_v63  ;;  %v15949_v17 = vld [vmem:[#allocation23_spill] sm:$0xff] }
 0x322   :  { %v3027_v51 = vmul.f32 %v3001_v46, %v15939_v2  ;;  %v3030_v35 = vmul.f32 %v3001_v46, %v15941_v30  ;;  %v11841_v15 = vadd.f32 %v3003_v5, %v11697_v57  ;;  %v11844_v58 = vadd.f32 %v3004_v40, %v11700_v12  ;;  %v11916_v46 = vld [vmem:[%s13400_s2 + $0x36] sm:$0xff]  ;;  %v11921_v22 = vld [vmem:[%s13400_s2 + $0x3e] sm:$0xff]  ;;  %v15950_v40 = vld [vmem:[#allocation31_spill] sm:$0xff] }
 0x323   :  { %v11847_v2 = vadd.f32 %v3005_v16, %v11703_v21  ;;  %v11853_v30 = vadd.f32 %v3007_v61, %v11711_v37  ;;  %v11856_v23 = vadd.f32 %v3008_v0, %v11714_v28  ;;  %v11859_v63 = vadd.f32 %v3009_v60, %v11717_v27  ;;  %15944 = vst [vmem:[#allocation24_spill] sm:$0xff] %v11916_v46  ;;  %v15951_v38 = vld [vmem:[#allocation48_spill] sm:$0xff]  ;;  %v11948_v0 = vld [vmem:[%s13400_s2 + $0x66] sm:$0xff] }
 0x324   :  { %v11862_v57 = vadd.f32 %v3010_v10, %v11720_v53  ;;  %v11865_v12 = vadd.f32 %v3011_v48, %v11723_v32  ;;  %v11868_v21 = vadd.f32 %v3012_v14, %v11726_v26  ;;  %v11871_v39 = vadd.f32 %v3013_v54, %v11729_v18  ;;  %v3066_v32 = vld [vmem:[%s13400_s2 + $0x6] sm:$0xff]  ;;  %v3067_v26 = vld [vmem:[%s13400_s2 + $0xe] sm:$0xff]  ;;  %v11894_v18 = vld [vmem:[%s13400_s2 + $0x1e] sm:$0xff]  ;;  %15945 = vst [vmem:[#allocation39_spill] sm:$0xff] %v11921_v22 }
 0x325   :  { %v11874_v37 = vadd.f32 %v3014_v1, %v11732_v6  ;;  %v11877_v28 = vadd.f32 %v3015_v49, %v11735_v34  ;;  %v11880_v27 = vadd.f32 %v3016_v62, %v11738_v47  ;;  %v11883_v53 = vadd.f32 %v3017_v41, %v11741_v59  ;;  %15942 = vst [vmem:[#allocation17_spill] sm:$0xff] %v11894_v18  ;;  %v11899_v6 = vld [vmem:[%s13400_s2 + $0x26] sm:$0xff]  ;;  %v11953_v60 = vld [vmem:[%s13400_s2 + $0x6e] sm:$0xff]  ;;  %v11958_v10 = vld [vmem:[%s13400_s2 + $0x7e] sm:$0xff] }
 0x326   :  { %15943 = vst [vmem:[#allocation8_spill] sm:$0xff] %v11899_v6  ;;  %v11902_v34 = vadd.f32 %v3018_v52, %v11744_v33  ;;  %v11905_v47 = vadd.f32 %v3019_v24, %v11747_v56  ;;  %v11908_v59 = vadd.f32 %v3020_v19, %v11750_v13  ;;  %v11911_v31 = vadd.f32 %v3021_v7, %v11753_v45  ;;  %v11926_v33 = vld [vmem:[%s13400_s2 + $0x4e] sm:$0xff]  ;;  %v11931_v56 = vld [vmem:[%s13400_s2 + $0x56] sm:$0xff]  ;;  %v15959_v54 = vld [vmem:[#allocation38_spill] sm:$0xff] }
 0x327   :  { %15946 = vst [vmem:[#allocation40_spill] sm:$0xff] %v11926_v33  ;;  %15947 = vst [vmem:[#allocation22_spill] sm:$0xff] %v11931_v56  ;;  %v15948_v13 = vld [vmem:[#allocation25_spill] sm:$0xff]  ;;  %v11937_v5 = vadd.f32 %v3023_v20, %v15949_v17  ;;  %v11940_v16 = vadd.f32 %v3024_v50, %v15950_v40  ;;  %v11943_v61 = vadd.f32 %v3025_v11, %v15951_v38  ;;  %v15955_v50 = vld [vmem:[#allocation42_spill] sm:$0xff] }
 0x328   :  { %v11934_v45 = vadd.f32 %v3022_v4, %v15948_v13  ;;  %15952 = vst [vmem:[#allocation6_spill] sm:$0xff] %v11948_v0  ;;  %15953 = vst [vmem:[#allocation45_spill] sm:$0xff] %v11953_v60  ;;  %v11961_v48 = vadd.f32 %v3026_v8, %v15955_v50  ;;  %v15957_v11 = vld [vmem:[#allocation46_spill] sm:$0xff]  ;;  %v11967_v1 = vadd.f32 %v3028_v9, %v15959_v54  ;;  %v11980_v25 = vld [vmem:[%s13400_s2 + $0x96] sm:$0xff] }
 0x329   :  { %15954 = vst [vmem:[#allocation37_spill] sm:$0xff] %v11958_v10  ;;  %v11964_v14 = vadd.f32 %v3027_v51, %v15957_v11  ;;  %v15961_v49 = vld [vmem:[#allocation30_spill] sm:$0xff]  ;;  %15964 = vst [vmem:[#allocation27_spill] sm:$0xff] %v11980_v25  ;;  %v15966_v8 = vld [vmem:[#allocation47_spill] sm:$0xff] }
 0x32a   :  { %15956 = vst [vmem:[#allocation18_spill] sm:$0xff] %v11961_v48  ;;  %15960 = vst [vmem:[#allocation7_spill] sm:$0xff] %v11967_v1  ;;  %v11970_v62 = vadd.f32 %v3029_v55, %v15961_v49  ;;  %v11975_v41 = vld [vmem:[%s13400_s2 + $0x86] sm:$0xff]  ;;  %v11985_v51 = vld [vmem:[%s13400_s2 + $0x9e] sm:$0xff]  ;;  %v11988_v36 = vadd.f32 %v3030_v35, %v15966_v8 }
 0x32b   :  { %15958 = vst [vmem:[#allocation12_spill] sm:$0xff] %v11964_v14  ;;  %15963 = vst [vmem:[#allocation14_spill] sm:$0xff] %v11975_v41  ;;  %v15968_v52 = vld [vmem:[#allocation49_spill] sm:$0xff]  ;;  %v15970_v19 = vld [vmem:[#allocation43_spill] sm:$0xff] }
 0x32c   :  { %15962 = vst [vmem:[#allocation28_spill] sm:$0xff] %v11970_v62  ;;  %15965 = vst [vmem:[#allocation16_spill] sm:$0xff] %v11985_v51  ;;  %v11991_v24 = vadd.f32 %v3031_v43, %v15968_v52  ;;  %v11994_v7 = vadd.f32 %v3032_v42, %v15970_v19  ;;  %v15972_v4 = vld [vmem:[#allocation41_spill] sm:$0xff]  ;;  %v12002_v9 = vld [vmem:[%s13400_s2 + $0xae] sm:$0xff] }
 0x32d   :  { %15967 = vst [vmem:[#allocation44_spill] sm:$0xff] %v11988_v36  ;;  %v11997_v20 = vadd.f32 %v3033_v29, %v15972_v4  ;;  %15974 = vst [vmem:[#allocation10_spill] sm:$0xff] %v12002_v9  ;;  %v12007_v55 = vld [vmem:[%s13400_s2 + $0xb6] sm:$0xff]  ;;  %v12012_v35 = vld [vmem:[%s13400_s2 + $0xc6] sm:$0xff] }
 0x32e   :  { %15969 = vst [vmem:[#allocation15_spill] sm:$0xff] %v11991_v24  ;;  %15971 = vst [vmem:[#allocation29_spill] sm:$0xff] %v11994_v7  ;;  %v12017_v42 = vld [vmem:[%s13400_s2 + $0xce] sm:$0xff]  ;;  %v12022_v43 = vld [vmem:[%s13400_s2 + $0xde] sm:$0xff] }
 0x32f   :  { %15973 = vst [vmem:[#allocation33_spill] sm:$0xff] %v11997_v20  ;;  %15975 = vst [vmem:[#allocation21_spill] sm:$0xff] %v12007_v55  ;;  %v12027_v29 = vld [vmem:[%s13400_s2 + $0xe6] sm:$0xff]  ;;  %v15980_v13 = vld [vmem:[#allocation36_spill] sm:$0xff] }
 0x330   :  { %15976 = vst [vmem:[#allocation19_spill] sm:$0xff] %v12012_v35  ;;  %15977 = vst [vmem:[#allocation11_spill] sm:$0xff] %v12017_v42  ;;  %v3112_v17 = vmul.f32 %v15980_v13, %v3066_v32  ;;  %v3113_v40 = vmul.f32 %v15980_v13, %v3067_v26  ;;  %v3114_v38 = vmul.f32 %v15980_v13, %v11894_v18  ;;  %v12038_v11 = vld [vmem:[%s13400_s2 + $0xf6] sm:$0xff]  ;;  %v12043_v54 = vld [vmem:[%s13400_s2 + $0xfe] sm:$0xff] }
 0x331   :  { %15978 = vst [vmem:[#allocation20_spill] sm:$0xff] %v12022_v43  ;;  %15979 = vst [vmem:[#allocation34_spill] sm:$0xff] %v12027_v29  ;;  %v3115_v50 = vmul.f32 %v15980_v13, %v11899_v6  ;;  %v12048_v32 = vld [vmem:[%s13400_s2 + $0x10e] sm:$0xff]  ;;  %v3116_v26 = vmul.f32 %v15980_v13, %v11916_v46  ;;  %v3117_v49 = vmul.f32 %v15980_v13, %v11921_v22  ;;  %v12061_v19 = vld [vmem:[%s13400_s2 + $0x116] sm:$0xff] }
 0x332   :  { %15981 = vst [vmem:[#allocation26_spill] sm:$0xff] %v12038_v11  ;;  %15982 = vst [vmem:[#allocation9_spill] sm:$0xff] %v12043_v54  ;;  %v3118_v8 = vmul.f32 %v15980_v13, %v11926_v33  ;;  %v3119_v52 = vmul.f32 %v15980_v13, %v11931_v56  ;;  %v12066_v4 = vld [vmem:[%s13400_s2 + $0x126] sm:$0xff]  ;;  %v12071_v22 = vld [vmem:[%s13400_s2 + $0x12e] sm:$0xff]  ;;  %v3120_v33 = vmul.f32 %v15980_v13, %v11948_v0 }
 0x333   :  { %15983 = vst [vmem:[#allocation32_spill] sm:$0xff] %v12048_v32  ;;  %15984 = vst [vmem:[#allocation25_spill] sm:$0xff] %v12061_v19  ;;  %v3121_v56 = vmul.f32 %v15980_v13, %v11953_v60  ;;  %v3122_v46 = vmul.f32 %v15980_v13, %v11958_v10  ;;  %v3123_v6 = vmul.f32 %v15980_v13, %v11975_v41  ;;  %v12084_v18 = vld [vmem:[%s13400_s2 + $0x13e] sm:$0xff]  ;;  %v12089_v20 = vld [vmem:[%s13400_s2 + $0x146] sm:$0xff] }
 0x334   :  { %15985 = vst [vmem:[#allocation23_spill] sm:$0xff] %v12066_v4  ;;  %15986 = vst [vmem:[#allocation31_spill] sm:$0xff] %v12071_v22  ;;  %v12094_v60 = vld [vmem:[%s13400_s2 + $0x156] sm:$0xff]  ;;  %v3124_v10 = vmul.f32 %v15980_v13, %v11980_v25  ;;  %v3125_v41 = vmul.f32 %v15980_v13, %v11985_v51  ;;  %v3126_v0 = vmul.f32 %v15980_v13, %v12002_v9  ;;  %v12107_v24 = vld [vmem:[%s13400_s2 + $0x15e] sm:$0xff] }
 0x335   :  { %15987 = vst [vmem:[#allocation48_spill] sm:$0xff] %v12084_v18  ;;  %15988 = vst [vmem:[#allocation42_spill] sm:$0xff] %v12089_v20  ;;  %v3127_v7 = vmul.f32 %v15980_v13, %v12007_v55  ;;  %v12112_v36 = vld [vmem:[%s13400_s2 + $0x16e] sm:$0xff]  ;;  %v12117_v51 = vld [vmem:[%s13400_s2 + $0x176] sm:$0xff]  ;;  %v3128_v9 = vmul.f32 %v15980_v13, %v12012_v35  ;;  %v3129_v55 = vmul.f32 %v15980_v13, %v12017_v42 }
 0x336   :  { %15989 = vst [vmem:[#allocation46_spill] sm:$0xff] %v12094_v60  ;;  %15990 = vst [vmem:[#allocation38_spill] sm:$0xff] %v12107_v24  ;;  %v3130_v25 = vmul.f32 %v15980_v13, %v12022_v43  ;;  %v3131_v62 = vmul.f32 %v15980_v13, %v12027_v29  ;;  %v3132_v1 = vmul.f32 %v15980_v13, %v12038_v11 }
 0x337   :  { %15991 = vst [vmem:[#allocation30_spill] sm:$0xff] %v12112_v36  ;;  %15992 = vst [vmem:[#allocation47_spill] sm:$0xff] %v12117_v51  ;;  %v3133_v14 = vmul.f32 %v15980_v13, %v12043_v54  ;;  %v3134_v48 = vmul.f32 %v15980_v13, %v12048_v32  ;;  %v3135_v35 = vmul.f32 %v15980_v13, %v12061_v19 }
 0x338   :  { %v3136_v42 = vmul.f32 %v15980_v13, %v12066_v4  ;;  %v3137_v43 = vmul.f32 %v15980_v13, %v12071_v22  ;;  %v3138_v29 = vmul.f32 %v15980_v13, %v12084_v18  ;;  %v3139_v11 = vmul.f32 %v15980_v13, %v12089_v20 }
 0x339   :  { %v3140_v54 = vmul.f32 %v15980_v13, %v12094_v60  ;;  %v3141_v32 = vmul.f32 %v15980_v13, %v12107_v24  ;;  %v3142_v19 = vmul.f32 %v15980_v13, %v12112_v36  ;;  %v3143_v4 = vmul.f32 %v15980_v13, %v12117_v51 }
 0x33a   :  { %v12152_v22 = vadd.f32 %v3112_v17, %v11838_v44  ;;  %v12155_v18 = vadd.f32 %v3113_v40, %v11841_v15  ;;  %v12158_v20 = vadd.f32 %v3114_v38, %v11844_v58  ;;  %v12161_v60 = vadd.f32 %v3115_v50, %v11847_v2  ;;  %v16015_v40 = vld [vmem:[#allocation22_spill] sm:$0xff] }
 0x33b   :  { %v12164_v24 = vadd.f32 %v3116_v26, %v11850_v3  ;;  %v12167_v36 = vadd.f32 %v3117_v49, %v11853_v30  ;;  %v12170_v13 = vadd.f32 %v3118_v8, %v11856_v23  ;;  %v12173_v44 = vadd.f32 %v3119_v52, %v11859_v63  ;;  %v16016_v50 = vld [vmem:[#allocation6_spill] sm:$0xff]  ;;  %v16018_v26 = vld [vmem:[#allocation37_spill] sm:$0xff] }
 0x33c   :  { %v12176_v15 = vadd.f32 %v3120_v33, %v11862_v57  ;;  %v12179_v58 = vadd.f32 %v3121_v56, %v11865_v12  ;;  %v12182_v2 = vadd.f32 %v3122_v46, %v11868_v21  ;;  %v12185_v3 = vadd.f32 %v3123_v6, %v11871_v39  ;;  %v15999_v56 = vld [vmem:[#allocation28_spill] sm:$0xff]  ;;  %v16019_v8 = vld [vmem:[#allocation14_spill] sm:$0xff] }
 0x33d   :  { %v12188_v30 = vadd.f32 %v3124_v10, %v11874_v37  ;;  %v12191_v23 = vadd.f32 %v3125_v41, %v11877_v28  ;;  %v12194_v63 = vadd.f32 %v3126_v0, %v11880_v27  ;;  %v12197_v57 = vadd.f32 %v3127_v7, %v11883_v53  ;;  %v16010_v41 = vld [vmem:[#allocation13_spill] sm:$0xff]  ;;  %v16011_v7 = vld [vmem:[#allocation8_spill] sm:$0xff] }
 0x33e   :  { %v12200_v12 = vadd.f32 %v3128_v9, %v11902_v34  ;;  %v12203_v21 = vadd.f32 %v3129_v55, %v11905_v47  ;;  %v12206_v39 = vadd.f32 %v3130_v25, %v11908_v59  ;;  %v12209_v37 = vadd.f32 %v3131_v62, %v11911_v31  ;;  %v15993_v34 = vld [vmem:[#allocation18_spill] sm:$0xff]  ;;  %v15995_v59 = vld [vmem:[#allocation12_spill] sm:$0xff]  ;;  %v15997_v31 = vld [vmem:[#allocation7_spill] sm:$0xff] }
 0x33f   :  { %v12212_v28 = vadd.f32 %v3132_v1, %v11934_v45  ;;  %v12215_v27 = vadd.f32 %v3133_v14, %v11937_v5  ;;  %v12218_v53 = vadd.f32 %v3134_v48, %v11940_v16  ;;  %v12221_v6 = vadd.f32 %v3135_v35, %v11943_v61  ;;  %v16001_v5 = vld [vmem:[#allocation44_spill] sm:$0xff]  ;;  %v16003_v16 = vld [vmem:[#allocation15_spill] sm:$0xff]  ;;  %v16005_v61 = vld [vmem:[#allocation29_spill] sm:$0xff] }
 0x340   :  { %v12224_v47 = vadd.f32 %v3136_v42, %v15993_v34  ;;  %v12227_v46 = vadd.f32 %v3137_v43, %v15995_v59  ;;  %v12230_v33 = vadd.f32 %v3138_v29, %v15997_v31  ;;  %v12233_v45 = vadd.f32 %v3139_v11, %v15999_v56  ;;  %v16007_v14 = vld [vmem:[#allocation33_spill] sm:$0xff]  ;;  %v16012_v55 = vld [vmem:[#allocation24_spill] sm:$0xff]  ;;  %v16013_v42 = vld [vmem:[#allocation39_spill] sm:$0xff] }
 0x341   :  { %v12236_v0 = vadd.f32 %v3140_v54, %v16001_v5  ;;  %v12239_v10 = vadd.f32 %v3141_v32, %v16003_v16  ;;  %v12242_v48 = vadd.f32 %v3142_v19, %v16005_v61  ;;  %v12245_v1 = vadd.f32 %v3143_v4, %v16007_v14  ;;  %v16009_v62 = vld [vmem:[#allocation17_spill] sm:$0xff]  ;;  %v16014_v29 = vld [vmem:[#allocation40_spill] sm:$0xff]  ;;  %v16020_v19 = vld [vmem:[#allocation27_spill] sm:$0xff] }
 0x342   :  { %15994 = vst [vmem:[#allocation49_spill] sm:$0xff] %v12224_v47  ;;  %15996 = vst [vmem:[#allocation43_spill] sm:$0xff] %v12227_v46  ;;  %v3178_v25 = vmul.f32 %v16010_v41, %v16009_v62  ;;  %v3179_v9 = vmul.f32 %v16010_v41, %v16011_v7  ;;  %v3180_v35 = vmul.f32 %v16010_v41, %v16012_v55  ;;  %v16017_v54 = vld [vmem:[#allocation45_spill] sm:$0xff]  ;;  %v16021_v34 = vld [vmem:[#allocation16_spill] sm:$0xff] }
 0x343   :  { %15998 = vst [vmem:[#allocation41_spill] sm:$0xff] %v12230_v33  ;;  %16000 = vst [vmem:[#allocation36_spill] sm:$0xff] %v12233_v45  ;;  %v3181_v43 = vmul.f32 %v16010_v41, %v16013_v42  ;;  %v3182_v17 = vmul.f32 %v16010_v41, %v16014_v29  ;;  %v3183_v38 = vmul.f32 %v16010_v41, %v16015_v40  ;;  %v16022_v31 = vld [vmem:[#allocation10_spill] sm:$0xff]  ;;  %v16023_v5 = vld [vmem:[#allocation21_spill] sm:$0xff] }
 0x344   :  { %16002 = vst [vmem:[#allocation18_spill] sm:$0xff] %v12236_v0  ;;  %16004 = vst [vmem:[#allocation12_spill] sm:$0xff] %v12239_v10  ;;  %v3184_v11 = vmul.f32 %v16010_v41, %v16016_v50  ;;  %v3185_v32 = vmul.f32 %v16010_v41, %v16017_v54  ;;  %v3186_v49 = vmul.f32 %v16010_v41, %v16018_v26  ;;  %v16024_v61 = vld [vmem:[#allocation19_spill] sm:$0xff]  ;;  %v16032_v40 = vld [vmem:[#allocation32_spill] sm:$0xff] }
 0x345   :  { %16006 = vst [vmem:[#allocation7_spill] sm:$0xff] %v12242_v48  ;;  %16008 = vst [vmem:[#allocation28_spill] sm:$0xff] %v12245_v1  ;;  %v3187_v52 = vmul.f32 %v16010_v41, %v16019_v8  ;;  %v3188_v4 = vmul.f32 %v16010_v41, %v16020_v19  ;;  %v3189_v59 = vmul.f32 %v16010_v41, %v16021_v34  ;;  %v16025_v62 = vld [vmem:[#allocation11_spill] sm:$0xff]  ;;  %v16033_v42 = vld [vmem:[#allocation25_spill] sm:$0xff] }
 0x346   :  { %v3190_v56 = vmul.f32 %v16010_v41, %v16022_v31  ;;  %v3191_v16 = vmul.f32 %v16010_v41, %v16023_v5  ;;  %v3192_v14 = vmul.f32 %v16010_v41, %v16024_v61  ;;  %v3193_v7 = vmul.f32 %v16010_v41, %v16025_v62  ;;  %v12282_v8 = vld [vmem:[%s13400_s2 + $0x186] sm:$0xff]  ;;  %v12287_v34 = vld [vmem:[%s13400_s2 + $0x18e] sm:$0xff]  ;;  %v16031_v62 = vld [vmem:[#allocation9_spill] sm:$0xff] }
 0x347   :  { %16026 = vst [vmem:[#allocation44_spill] sm:$0xff] %v12282_v8  ;;  %16027 = vst [vmem:[#allocation15_spill] sm:$0xff] %v12287_v34  ;;  %v16028_v31 = vld [vmem:[#allocation20_spill] sm:$0xff]  ;;  %v16029_v5 = vld [vmem:[#allocation34_spill] sm:$0xff]  ;;  %v3197_v50 = vmul.f32 %v16010_v41, %v16031_v62  ;;  %v3198_v29 = vmul.f32 %v16010_v41, %v16032_v40  ;;  %v3199_v55 = vmul.f32 %v16010_v41, %v16033_v42 }
 0x348   :  { %v3194_v19 = vmul.f32 %v16010_v41, %v16028_v31  ;;  %v3195_v26 = vmul.f32 %v16010_v41, %v16029_v5  ;;  %v16030_v61 = vld [vmem:[#allocation26_spill] sm:$0xff]  ;;  %v16034_v1 = vld [vmem:[#allocation23_spill] sm:$0xff]  ;;  %v16036_v0 = vld [vmem:[#allocation48_spill] sm:$0xff] }
 0x349   :  { %v3196_v54 = vmul.f32 %v16010_v41, %v16030_v61  ;;  %v3200_v48 = vmul.f32 %v16010_v41, %v16034_v1  ;;  %v16035_v10 = vld [vmem:[#allocation31_spill] sm:$0xff]  ;;  %v3202_v5 = vmul.f32 %v16010_v41, %v16036_v0  ;;  %v16037_v45 = vld [vmem:[#allocation42_spill] sm:$0xff]  ;;  %v3207_v1 = vmul.f32 %v16010_v41, %v12117_v51 }
 0x34a   :  { %v3201_v31 = vmul.f32 %v16010_v41, %v16035_v10  ;;  %v3203_v61 = vmul.f32 %v16010_v41, %v16037_v45  ;;  %v16038_v33 = vld [vmem:[#allocation46_spill] sm:$0xff]  ;;  %v3208_v10 = vmul.f32 %v16010_v41, %v12282_v8  ;;  %v3209_v0 = vmul.f32 %v16010_v41, %v12287_v34 }
 0x34b   :  { %v3204_v62 = vmul.f32 %v16010_v41, %v16038_v33  ;;  %v16039_v46 = vld [vmem:[#allocation38_spill] sm:$0xff]  ;;  %v12322_v45 = vadd.f32 %v3178_v25, %v12152_v22  ;;  %v12325_v33 = vadd.f32 %v3179_v9, %v12155_v18  ;;  %v12334_v51 = vadd.f32 %v3182_v17, %v12164_v24 }
 0x34c   :  { %v3205_v40 = vmul.f32 %v16010_v41, %v16039_v46  ;;  %v16040_v47 = vld [vmem:[#allocation30_spill] sm:$0xff]  ;;  %v12328_v46 = vadd.f32 %v3180_v35, %v12158_v20  ;;  %v12337_v8 = vadd.f32 %v3183_v38, %v12167_v36  ;;  %v12343_v22 = vadd.f32 %v3185_v32, %v12173_v44  ;;  %v16055_v17 = vld [vmem:[#allocation28_spill] sm:$0xff]  ;;  %v16059_v32 = vld [vmem:[#allocation39_spill] sm:$0xff] }
 0x34d   :  { %v3206_v42 = vmul.f32 %v16010_v41, %v16040_v47  ;;  %v12331_v47 = vadd.f32 %v3181_v43, %v12161_v60  ;;  %v12340_v41 = vadd.f32 %v3184_v11, %v12170_v13  ;;  %v12346_v18 = vadd.f32 %v3186_v49, %v12176_v15  ;;  %v16058_v11 = vld [vmem:[#allocation35_spill] sm:$0xff] }
 0x34e   :  { %v12349_v20 = vadd.f32 %v3187_v52, %v12179_v58  ;;  %v12352_v60 = vadd.f32 %v3188_v4, %v12182_v2  ;;  %v12355_v24 = vadd.f32 %v3189_v59, %v12185_v3  ;;  %v12358_v36 = vadd.f32 %v3190_v56, %v12188_v30 }
 0x34f   :  { %v12361_v13 = vadd.f32 %v3191_v16, %v12191_v23  ;;  %v12364_v44 = vadd.f32 %v3192_v14, %v12194_v63  ;;  %v12367_v15 = vadd.f32 %v3193_v7, %v12197_v57  ;;  %v12370_v58 = vadd.f32 %v3194_v19, %v12200_v12 }
 0x350   :  { %v12373_v2 = vadd.f32 %v3195_v26, %v12203_v21  ;;  %v12376_v3 = vadd.f32 %v3196_v54, %v12206_v39  ;;  %v12379_v30 = vadd.f32 %v3197_v50, %v12209_v37  ;;  %v12382_v23 = vadd.f32 %v3198_v29, %v12212_v28  ;;  %v16041_v21 = vld [vmem:[#allocation49_spill] sm:$0xff]  ;;  %v16043_v39 = vld [vmem:[#allocation43_spill] sm:$0xff]  ;;  %v16047_v28 = vld [vmem:[#allocation36_spill] sm:$0xff] }
 0x351   :  { %v12385_v63 = vadd.f32 %v3199_v55, %v12215_v27  ;;  %v12388_v57 = vadd.f32 %v3200_v48, %v12218_v53  ;;  %v12391_v12 = vadd.f32 %v3201_v31, %v12221_v6  ;;  %v12394_v25 = vadd.f32 %v3202_v5, %v16041_v21  ;;  %v16045_v37 = vld [vmem:[#allocation41_spill] sm:$0xff]  ;;  %v16049_v27 = vld [vmem:[#allocation18_spill] sm:$0xff]  ;;  %v16051_v53 = vld [vmem:[#allocation12_spill] sm:$0xff] }
 0x352   :  { %v12397_v9 = vadd.f32 %v3203_v61, %v16043_v39  ;;  %v12400_v35 = vadd.f32 %v3204_v62, %v16045_v37  ;;  %v12403_v43 = vadd.f32 %v3205_v40, %v16047_v28  ;;  %v12406_v55 = vadd.f32 %v3206_v42, %v16049_v27  ;;  %v16053_v6 = vld [vmem:[#allocation7_spill] sm:$0xff]  ;;  %v16057_v50 = vld [vmem:[#allocation24_spill] sm:$0xff]  ;;  %v16061_v42 = vld [vmem:[#allocation22_spill] sm:$0xff] }
 0x353   :  { %16042 = vst [vmem:[#allocation29_spill] sm:$0xff] %v12394_v25  ;;  %v12409_v48 = vadd.f32 %v3207_v1, %v16051_v53  ;;  %v12412_v29 = vadd.f32 %v3208_v10, %v16053_v6  ;;  %v12415_v38 = vadd.f32 %v3209_v0, %v16055_v17  ;;  %v3244_v54 = vmul.f32 %v16058_v11, %v16057_v50  ;;  %v16060_v40 = vld [vmem:[#allocation40_spill] sm:$0xff]  ;;  %v16062_v1 = vld [vmem:[#allocation6_spill] sm:$0xff]  ;;  %v16063_v10 = vld [vmem:[#allocation45_spill] sm:$0xff] }
 0x354   :  { %16044 = vst [vmem:[#allocation33_spill] sm:$0xff] %v12397_v9  ;;  %16046 = vst [vmem:[#allocation17_spill] sm:$0xff] %v12400_v35  ;;  %v3245_v26 = vmul.f32 %v16058_v11, %v16059_v32  ;;  %v3246_v49 = vmul.f32 %v16058_v11, %v16060_v40  ;;  %v3247_v52 = vmul.f32 %v16058_v11, %v16061_v42  ;;  %v16064_v0 = vld [vmem:[#allocation37_spill] sm:$0xff]  ;;  %v16065_v31 = vld [vmem:[#allocation14_spill] sm:$0xff] }
 0x355   :  { %16048 = vst [vmem:[#allocation13_spill] sm:$0xff] %v12403_v43  ;;  %16050 = vst [vmem:[#allocation8_spill] sm:$0xff] %v12406_v55  ;;  %v3248_v19 = vmul.f32 %v16058_v11, %v16062_v1  ;;  %v3249_v4 = vmul.f32 %v16058_v11, %v16063_v10  ;;  %v3250_v59 = vmul.f32 %v16058_v11, %v16064_v0  ;;  %v16066_v5 = vld [vmem:[#allocation27_spill] sm:$0xff]  ;;  %v16067_v61 = vld [vmem:[#allocation16_spill] sm:$0xff] }
 0x356   :  { %16052 = vst [vmem:[#allocation49_spill] sm:$0xff] %v12409_v48  ;;  %16054 = vst [vmem:[#allocation43_spill] sm:$0xff] %v12412_v29  ;;  %v3251_v56 = vmul.f32 %v16058_v11, %v16065_v31  ;;  %v3252_v16 = vmul.f32 %v16058_v11, %v16066_v5  ;;  %v3253_v14 = vmul.f32 %v16058_v11, %v16067_v61  ;;  %v16068_v62 = vld [vmem:[#allocation10_spill] sm:$0xff]  ;;  %v16069_v21 = vld [vmem:[#allocation21_spill] sm:$0xff] }
 0x357   :  { %16056 = vst [vmem:[#allocation41_spill] sm:$0xff] %v12415_v38  ;;  %v3254_v7 = vmul.f32 %v16058_v11, %v16068_v62  ;;  %v3255_v39 = vmul.f32 %v16058_v11, %v16069_v21  ;;  %v16070_v37 = vld [vmem:[#allocation19_spill] sm:$0xff]  ;;  %v16072_v6 = vld [vmem:[#allocation20_spill] sm:$0xff]  ;;  %v16073_v50 = vld [vmem:[#allocation34_spill] sm:$0xff]  ;;  %v12504_v25 = vadd.f32 %v3246_v49, %v12328_v46 }
 0x358   :  { %v3256_v28 = vmul.f32 %v16058_v11, %v16070_v37  ;;  %v16071_v27 = vld [vmem:[#allocation11_spill] sm:$0xff]  ;;  %v3258_v17 = vmul.f32 %v16058_v11, %v16072_v6  ;;  %v3259_v32 = vmul.f32 %v16058_v11, %v16073_v50  ;;  %v12452_v61 = vld [vmem:[%s13400_s2 + $0x19e] sm:$0xff]  ;;  %v16078_v6 = vld [vmem:[#allocation32_spill] sm:$0xff]  ;;  %v12524_v46 = vadd.f32 %v3252_v16, %v12346_v18 }
 0x359   :  { %v3257_v53 = vmul.f32 %v16058_v11, %v16071_v27  ;;  %16074 = vst [vmem:[#allocation36_spill] sm:$0xff] %v12452_v61  ;;  %v12457_v21 = vld [vmem:[%s13400_s2 + $0x1a6] sm:$0xff]  ;;  %v16077_v27 = vld [vmem:[#allocation9_spill] sm:$0xff]  ;;  %v3262_v31 = vmul.f32 %v16058_v11, %v16078_v6  ;;  %v16082_v38 = vld [vmem:[#allocation48_spill] sm:$0xff] }
 0x35a   :  { %16075 = vst [vmem:[#allocation18_spill] sm:$0xff] %v12457_v21  ;;  %v16076_v37 = vld [vmem:[#allocation26_spill] sm:$0xff]  ;;  %v3261_v5 = vmul.f32 %v16058_v11, %v16077_v27  ;;  %v16079_v50 = vld [vmem:[#allocation25_spill] sm:$0xff]  ;;  %v16080_v10 = vld [vmem:[#allocation23_spill] sm:$0xff]  ;;  %v3266_v29 = vmul.f32 %v16058_v11, %v16082_v38  ;;  %v12545_v18 = vadd.f32 %v3259_v32, %v12367_v15 }
 0x35b   :  { %v3260_v62 = vmul.f32 %v16058_v11, %v16076_v37  ;;  %v3263_v0 = vmul.f32 %v16058_v11, %v16079_v50  ;;  %v3264_v1 = vmul.f32 %v16058_v11, %v16080_v10  ;;  %v16081_v42 = vld [vmem:[#allocation31_spill] sm:$0xff]  ;;  %v16083_v48 = vld [vmem:[#allocation42_spill] sm:$0xff]  ;;  %v16088_v38 = vld [vmem:[#allocation44_spill] sm:$0xff] }
 0x35c   :  { %v3265_v40 = vmul.f32 %v16058_v11, %v16081_v42  ;;  %v3267_v37 = vmul.f32 %v16058_v11, %v16083_v48  ;;  %v16084_v27 = vld [vmem:[#allocation46_spill] sm:$0xff]  ;;  %v16087_v35 = vld [vmem:[#allocation47_spill] sm:$0xff]  ;;  %v3272_v9 = vmul.f32 %v16058_v11, %v16088_v38  ;;  %v3273_v48 = vmul.f32 %v16058_v11, %v12287_v34 }
 0x35d   :  { %v3268_v6 = vmul.f32 %v16058_v11, %v16084_v27  ;;  %v16085_v55 = vld [vmem:[#allocation38_spill] sm:$0xff]  ;;  %v3271_v42 = vmul.f32 %v16058_v11, %v16087_v35  ;;  %v3274_v27 = vmul.f32 %v16058_v11, %v12452_v61  ;;  %v12501_v35 = vadd.f32 %v3245_v26, %v12325_v33  ;;  %v16094_v26 = vld [vmem:[#allocation33_spill] sm:$0xff] }
 0x35e   :  { %v3269_v50 = vmul.f32 %v16058_v11, %v16085_v55  ;;  %v16086_v43 = vld [vmem:[#allocation30_spill] sm:$0xff]  ;;  %v3275_v55 = vmul.f32 %v16058_v11, %v12457_v21  ;;  %v12507_v38 = vadd.f32 %v3247_v52, %v12331_v47  ;;  %v12512_v61 = vadd.f32 %v3248_v19, %v12334_v51 }
 0x35f   :  { %v3270_v10 = vmul.f32 %v16058_v11, %v16086_v43  ;;  %v12498_v43 = vadd.f32 %v3244_v54, %v12322_v45  ;;  %v12515_v11 = vadd.f32 %v3249_v4, %v12337_v8  ;;  %v12518_v45 = vadd.f32 %v3250_v59, %v12340_v41  ;;  %v16112_v16 = vld [vmem:[#allocation22_spill] sm:$0xff] }
 0x360   :  { %v12521_v33 = vadd.f32 %v3251_v56, %v12343_v22  ;;  %v12527_v47 = vadd.f32 %v3253_v14, %v12349_v20  ;;  %v12530_v54 = vadd.f32 %v3254_v7, %v12352_v60  ;;  %v12533_v51 = vadd.f32 %v3255_v39, %v12355_v24  ;;  %v16113_v14 = vld [vmem:[#allocation6_spill] sm:$0xff]  ;;  %v16115_v39 = vld [vmem:[#allocation37_spill] sm:$0xff] }
 0x361   :  { %v12536_v8 = vadd.f32 %v3256_v28, %v12358_v36  ;;  %v12539_v41 = vadd.f32 %v3257_v53, %v12361_v13  ;;  %v12542_v22 = vadd.f32 %v3258_v17, %v12364_v44  ;;  %v12548_v20 = vadd.f32 %v3260_v62, %v12370_v58  ;;  %v16116_v28 = vld [vmem:[#allocation14_spill] sm:$0xff] }
 0x362   :  { %v12551_v60 = vadd.f32 %v3261_v5, %v12373_v2  ;;  %v12554_v24 = vadd.f32 %v3262_v31, %v12376_v3  ;;  %v12557_v36 = vadd.f32 %v3263_v0, %v12379_v30  ;;  %v12560_v13 = vadd.f32 %v3264_v1, %v12382_v23  ;;  %v16092_v2 = vld [vmem:[#allocation29_spill] sm:$0xff] }
 0x363   :  { %v12563_v44 = vadd.f32 %v3265_v40, %v12385_v63  ;;  %v12566_v15 = vadd.f32 %v3266_v29, %v12388_v57  ;;  %v12569_v58 = vadd.f32 %v3267_v37, %v12391_v12  ;;  %v12572_v3 = vadd.f32 %v3268_v6, %v16092_v2  ;;  %v16096_v30 = vld [vmem:[#allocation17_spill] sm:$0xff]  ;;  %v16100_v63 = vld [vmem:[#allocation8_spill] sm:$0xff]  ;;  %v16104_v12 = vld [vmem:[#allocation43_spill] sm:$0xff] }
 0x364   :  { %v12575_v49 = vadd.f32 %v3269_v50, %v16094_v26  ;;  %v12578_v52 = vadd.f32 %v3270_v10, %v16096_v30  ;;  %v3309_v23 = vstv %s12475_s28  ;;  %v16098_v1 = vld [vmem:[#allocation13_spill] sm:$0xff]  ;;  %v12585_v40 = vadd.f32 %v3272_v9, %v16100_v63  ;;  %v16118_v6 = vld [vmem:[#allocation16_spill] sm:$0xff]  ;;  %v16119_v50 = vld [vmem:[#allocation10_spill] sm:$0xff] }
 0x365   :  { %16089 = vst [vmem:[#allocation12_spill] sm:$0xff] %v12563_v44  ;;  %16090 = vst [vmem:[#allocation7_spill] sm:$0xff] %v12566_v15  ;;  %v12582_v19 = vadd.f32 %v3271_v42, %v16098_v1  ;;  %v16102_v57 = vld [vmem:[#allocation49_spill] sm:$0xff]  ;;  %v12591_v4 = vadd.f32 %v3274_v27, %v16104_v12  ;;  %v12597_v31 = vstv %s12485_s29  ;;  %v12600_v10 = vstv %s12495_s30  ;;  %v16111_v42 = vld [vmem:[#allocation40_spill] sm:$0xff] }
 0x366   :  { %16091 = vst [vmem:[#allocation28_spill] sm:$0xff] %v12569_v58  ;;  %16093 = vst [vmem:[#allocation24_spill] sm:$0xff] %v12572_v3  ;;  %v12588_v29 = vadd.f32 %v3273_v48, %v16102_v57  ;;  %v16106_v0 = vld [vmem:[#allocation41_spill] sm:$0xff]  ;;  %v12603_v56 = vstv %s12509_s16  ;;  %v3310_v5 = vmul.f32 %v3309_v23, %v16111_v42  ;;  %v3311_v9 = vmul.f32 %v3309_v23, %v16112_v16  ;;  %v16121_v30 = vld [vmem:[#allocation19_spill] sm:$0xff] }
 0x367   :  { %16095 = vst [vmem:[#allocation35_spill] sm:$0xff] %v12575_v49  ;;  %16097 = vst [vmem:[#allocation39_spill] sm:$0xff] %v12578_v52  ;;  %v12594_v59 = vadd.f32 %v3275_v55, %v16106_v0  ;;  %v3312_v62 = vmul.f32 %v3309_v23, %v16113_v14  ;;  %v16114_v48 = vld [vmem:[#allocation45_spill] sm:$0xff]  ;;  %v3314_v37 = vmul.f32 %v3309_v23, %v16115_v39  ;;  %v16117_v55 = vld [vmem:[#allocation27_spill] sm:$0xff] }
 0x368   :  { %16099 = vst [vmem:[#allocation29_spill] sm:$0xff] %v12582_v19  ;;  %16101 = vst [vmem:[#allocation33_spill] sm:$0xff] %v12585_v40  ;;  %v3313_v7 = vmul.f32 %v3309_v23, %v16114_v48  ;;  %v3315_v27 = vmul.f32 %v3309_v23, %v16116_v28  ;;  %v3316_v53 = vmul.f32 %v3309_v23, %v16117_v55  ;;  %v16120_v2 = vld [vmem:[#allocation21_spill] sm:$0xff]  ;;  %v16122_v63 = vld [vmem:[#allocation11_spill] sm:$0xff] }
 0x369   :  { %16103 = vst [vmem:[#allocation17_spill] sm:$0xff] %v12588_v29  ;;  %16105 = vst [vmem:[#allocation13_spill] sm:$0xff] %v12591_v4  ;;  %v3317_v17 = vmul.f32 %v3309_v23, %v16118_v6  ;;  %v3318_v32 = vmul.f32 %v3309_v23, %v16119_v50  ;;  %v3319_v26 = vmul.f32 %v3309_v23, %v16120_v2  ;;  %v16123_v12 = vld [vmem:[#allocation20_spill] sm:$0xff]  ;;  %v16124_v42 = vld [vmem:[#allocation34_spill] sm:$0xff] }
 0x36a   :  { %16107 = vst [vmem:[#allocation8_spill] sm:$0xff] %v12594_v59  ;;  %16108 = vst [vmem:[#allocation49_spill] sm:$0xff] %v12597_v31  ;;  %v3320_v1 = vmul.f32 %v3309_v23, %v16121_v30  ;;  %v3321_v57 = vmul.f32 %v3309_v23, %v16122_v63  ;;  %v3322_v0 = vmul.f32 %v3309_v23, %v16123_v12  ;;  %v16126_v39 = vld [vmem:[#allocation9_spill] sm:$0xff]  ;;  %v16129_v30 = vld [vmem:[#allocation32_spill] sm:$0xff] }
 0x36b   :  { %16109 = vst [vmem:[#allocation43_spill] sm:$0xff] %v12600_v10  ;;  %16110 = vst [vmem:[#allocation41_spill] sm:$0xff] %v12603_v56  ;;  %v3323_v16 = vmul.f32 %v3309_v23, %v16124_v42  ;;  %v16125_v56 = vld [vmem:[#allocation26_spill] sm:$0xff]  ;;  %v3325_v28 = vmul.f32 %v3309_v23, %v16126_v39  ;;  %v12624_v6 = vld [vmem:[%s13400_s2 + $0x1b6] sm:$0xff]  ;;  %v3326_v63 = vmul.f32 %v3309_v23, %v16129_v30 }
 0x36c   :  { %v3324_v10 = vmul.f32 %v3309_v23, %v16125_v56  ;;  %16127 = vst [vmem:[#allocation40_spill] sm:$0xff] %v12624_v6  ;;  %v12629_v2 = vld [vmem:[%s13400_s2 + $0x1be] sm:$0xff]  ;;  %v16131_v55 = vld [vmem:[#allocation23_spill] sm:$0xff]  ;;  %v16133_v31 = vld [vmem:[#allocation48_spill] sm:$0xff] }
 0x36d   :  { %16128 = vst [vmem:[#allocation22_spill] sm:$0xff] %v12629_v2  ;;  %v16130_v50 = vld [vmem:[#allocation25_spill] sm:$0xff]  ;;  %v3328_v42 = vmul.f32 %v3309_v23, %v16131_v55  ;;  %v16132_v48 = vld [vmem:[#allocation31_spill] sm:$0xff]  ;;  %v3330_v39 = vmul.f32 %v3309_v23, %v16133_v31  ;;  %v16134_v14 = vld [vmem:[#allocation42_spill] sm:$0xff]  ;;  %v3340_v31 = vmul.f32 %v3309_v23, %v12624_v6 }
 0x36e   :  { %v3327_v12 = vmul.f32 %v3309_v23, %v16130_v50  ;;  %v3329_v56 = vmul.f32 %v3309_v23, %v16132_v48  ;;  %v3331_v59 = vmul.f32 %v3309_v23, %v16134_v14  ;;  %v16135_v4 = vld [vmem:[#allocation46_spill] sm:$0xff]  ;;  %v16138_v3 = vld [vmem:[#allocation47_spill] sm:$0xff]  ;;  %v16139_v15 = vld [vmem:[#allocation44_spill] sm:$0xff]  ;;  %v3337_v50 = vmul.f32 %v3309_v23, %v12287_v34 }
 0x36f   :  { %v3332_v29 = vmul.f32 %v3309_v23, %v16135_v4  ;;  %v16136_v40 = vld [vmem:[#allocation38_spill] sm:$0xff]  ;;  %v3335_v58 = vmul.f32 %v3309_v23, %v16138_v3  ;;  %v3336_v30 = vmul.f32 %v3309_v23, %v16139_v15  ;;  %v16140_v44 = vld [vmem:[#allocation36_spill] sm:$0xff]  ;;  %v3339_v48 = vmul.f32 %v3309_v23, %v12457_v21 }
 0x370   :  { %v3333_v19 = vmul.f32 %v3309_v23, %v16136_v40  ;;  %v16137_v52 = vld [vmem:[#allocation30_spill] sm:$0xff]  ;;  %v3338_v55 = vmul.f32 %v3309_v23, %v16140_v44  ;;  %v3341_v14 = vmul.f32 %v3309_v23, %v12629_v2  ;;  %v12648_v4 = vadd.f32 %v3310_v5, %v12498_v43 }
 0x371   :  { %v3334_v49 = vmul.f32 %v3309_v23, %v16137_v52  ;;  %v12651_v40 = vadd.f32 %v3311_v9, %v12501_v35  ;;  %v12654_v3 = vadd.f32 %v3312_v62, %v12504_v25  ;;  %v12657_v15 = vadd.f32 %v3313_v7, %v12507_v38 }
 0x372   :  { %v12660_v44 = vadd.f32 %v3314_v37, %v12512_v61  ;;  %v12663_v21 = vadd.f32 %v3315_v27, %v12515_v11  ;;  %v12666_v23 = vadd.f32 %v3316_v53, %v12518_v45  ;;  %v12669_v43 = vadd.f32 %v3317_v17, %v12521_v33  ;;  %v16161_v17 = vld [vmem:[#allocation49_spill] sm:$0xff] }
 0x373   :  { %v12672_v35 = vadd.f32 %v3318_v32, %v12524_v46  ;;  %v12675_v25 = vadd.f32 %v3319_v26, %v12527_v47  ;;  %v12678_v38 = vadd.f32 %v3320_v1, %v12530_v54  ;;  %v12681_v61 = vadd.f32 %v3321_v57, %v12533_v51  ;;  %v16162_v26 = vld [vmem:[#allocation45_spill] sm:$0xff] }
 0x374   :  { %v12684_v11 = vadd.f32 %v3322_v0, %v12536_v8  ;;  %v12687_v45 = vadd.f32 %v3323_v16, %v12539_v41  ;;  %v12690_v33 = vadd.f32 %v3324_v10, %v12542_v22  ;;  %v12693_v46 = vadd.f32 %v3325_v28, %v12545_v18  ;;  %v16141_v22 = vld [vmem:[#allocation12_spill] sm:$0xff]  ;;  %v16142_v18 = vld [vmem:[#allocation7_spill] sm:$0xff] }
 0x375   :  { %v12696_v47 = vadd.f32 %v3326_v63, %v12548_v20  ;;  %v12699_v54 = vadd.f32 %v3327_v12, %v12551_v60  ;;  %v12702_v51 = vadd.f32 %v3328_v42, %v12554_v24  ;;  %v12705_v8 = vadd.f32 %v3329_v56, %v12557_v36  ;;  %v16143_v20 = vld [vmem:[#allocation28_spill] sm:$0xff]  ;;  %v16146_v24 = vld [vmem:[#allocation35_spill] sm:$0xff]  ;;  %v16168_v42 = vld [vmem:[#allocation21_spill] sm:$0xff] }
 0x376   :  { %v12708_v41 = vadd.f32 %v3330_v39, %v12560_v13  ;;  %v12711_v10 = vadd.f32 %v3331_v59, %v16141_v22  ;;  %v12714_v5 = vadd.f32 %v3332_v29, %v16142_v18  ;;  %v12717_v9 = vadd.f32 %v3333_v19, %v16143_v20  ;;  %v16144_v60 = vld [vmem:[#allocation24_spill] sm:$0xff]  ;;  %v16148_v36 = vld [vmem:[#allocation39_spill] sm:$0xff]  ;;  %v16150_v13 = vld [vmem:[#allocation29_spill] sm:$0xff] }
 0x377   :  { %v12720_v62 = vadd.f32 %v3334_v49, %v16144_v60  ;;  %v12723_v7 = vadd.f32 %v3335_v58, %v16146_v24  ;;  %v12726_v56 = vadd.f32 %v3336_v30, %v16148_v36  ;;  %v12729_v39 = vadd.f32 %v3337_v50, %v16150_v13  ;;  %v16152_v59 = vld [vmem:[#allocation33_spill] sm:$0xff]  ;;  %v16158_v49 = vld [vmem:[#allocation8_spill] sm:$0xff]  ;;  %v16160_v58 = vld [vmem:[#allocation6_spill] sm:$0xff] }
 0x378   :  { %v12732_v37 = vadd.f32 %v3338_v55, %v16152_v59  ;;  %v16154_v29 = vld [vmem:[#allocation17_spill] sm:$0xff]  ;;  %v12741_v53 = vadd.f32 %v3341_v14, %v16158_v49  ;;  %v3376_v32 = vmul.f32 %v16161_v17, %v16160_v58  ;;  %v3377_v30 = vmul.f32 %v16161_v17, %v16162_v26  ;;  %v16164_v55 = vld [vmem:[#allocation14_spill] sm:$0xff]  ;;  %v16169_v22 = vld [vmem:[#allocation19_spill] sm:$0xff] }
 0x379   :  { %16145 = vst [vmem:[#allocation12_spill] sm:$0xff] %v12720_v62  ;;  %16147 = vst [vmem:[#allocation7_spill] sm:$0xff] %v12723_v7  ;;  %v12735_v28 = vadd.f32 %v3339_v48, %v16154_v29  ;;  %v16156_v19 = vld [vmem:[#allocation13_spill] sm:$0xff]  ;;  %v3379_v63 = vmul.f32 %v16161_v17, %v16164_v55  ;;  %v16165_v48 = vld [vmem:[#allocation27_spill] sm:$0xff]  ;;  %v3383_v16 = vmul.f32 %v16161_v17, %v16168_v42 }
 0x37a   :  { %16149 = vst [vmem:[#allocation28_spill] sm:$0xff] %v12726_v56  ;;  %16151 = vst [vmem:[#allocation24_spill] sm:$0xff] %v12729_v39  ;;  %v12738_v27 = vadd.f32 %v3340_v31, %v16156_v19  ;;  %v16163_v50 = vld [vmem:[#allocation37_spill] sm:$0xff]  ;;  %v3380_v57 = vmul.f32 %v16161_v17, %v16165_v48  ;;  %v16166_v31 = vld [vmem:[#allocation16_spill] sm:$0xff]  ;;  %v3384_v18 = vmul.f32 %v16161_v17, %v16169_v22 }
 0x37b   :  { %16153 = vst [vmem:[#allocation35_spill] sm:$0xff] %v12732_v37  ;;  %16155 = vst [vmem:[#allocation39_spill] sm:$0xff] %v12735_v28  ;;  %v3378_v1 = vmul.f32 %v16161_v17, %v16163_v50  ;;  %v3381_v12 = vmul.f32 %v16161_v17, %v16166_v31  ;;  %v16167_v14 = vld [vmem:[#allocation10_spill] sm:$0xff]  ;;  %v16170_v20 = vld [vmem:[#allocation11_spill] sm:$0xff]  ;;  %v3398_v37 = vmul.f32 %v16161_v17, %v16137_v52 }
 0x37c   :  { %16157 = vst [vmem:[#allocation29_spill] sm:$0xff] %v12738_v27  ;;  %16159 = vst [vmem:[#allocation33_spill] sm:$0xff] %v12741_v53  ;;  %v3382_v0 = vmul.f32 %v16161_v17, %v16167_v14  ;;  %v3385_v60 = vmul.f32 %v16161_v17, %v16170_v20  ;;  %v16171_v24 = vld [vmem:[#allocation20_spill] sm:$0xff]  ;;  %v16172_v13 = vld [vmem:[#allocation34_spill] sm:$0xff]  ;;  %v3405_v52 = vmul.f32 %v16161_v17, %v12629_v2 }
 0x37d   :  { %v3386_v36 = vmul.f32 %v16161_v17, %v16171_v24  ;;  %v3387_v59 = vmul.f32 %v16161_v17, %v16172_v13  ;;  %v16173_v29 = vld [vmem:[#allocation26_spill] sm:$0xff]  ;;  %v16174_v49 = vld [vmem:[#allocation9_spill] sm:$0xff]  ;;  %v16175_v26 = vld [vmem:[#allocation32_spill] sm:$0xff]  ;;  %v12830_v2 = vadd.f32 %v3380_v57, %v12660_v44 }
 0x37e   :  { %v3388_v19 = vmul.f32 %v16161_v17, %v16173_v29  ;;  %v3389_v58 = vmul.f32 %v16161_v17, %v16174_v49  ;;  %v3390_v42 = vmul.f32 %v16161_v17, %v16175_v26  ;;  %v16176_v14 = vld [vmem:[#allocation25_spill] sm:$0xff]  ;;  %v12778_v20 = vld [vmem:[%s13400_s2 + $0x1ce] sm:$0xff]  ;;  %v16183_v50 = vld [vmem:[#allocation46_spill] sm:$0xff] }
 0x37f   :  { %v3391_v22 = vmul.f32 %v16161_v17, %v16176_v14  ;;  %16177 = vst [vmem:[#allocation17_spill] sm:$0xff] %v12778_v20  ;;  %v12783_v13 = vld [vmem:[%s13400_s2 + $0x1d6] sm:$0xff]  ;;  %v16179_v29 = vld [vmem:[#allocation23_spill] sm:$0xff]  ;;  %v16182_v14 = vld [vmem:[#allocation42_spill] sm:$0xff]  ;;  %v3396_v53 = vmul.f32 %v16161_v17, %v16183_v50  ;;  %v12851_v44 = vadd.f32 %v3387_v59, %v12681_v61 }
 0x380   :  { %16178 = vst [vmem:[#allocation13_spill] sm:$0xff] %v12783_v13  ;;  %v3392_v24 = vmul.f32 %v16161_v17, %v16179_v29  ;;  %v16180_v49 = vld [vmem:[#allocation31_spill] sm:$0xff]  ;;  %v16181_v26 = vld [vmem:[#allocation48_spill] sm:$0xff]  ;;  %v3395_v55 = vmul.f32 %v16161_v17, %v16182_v14  ;;  %v16184_v27 = vld [vmem:[#allocation38_spill] sm:$0xff] }
 0x381   :  { %v3393_v31 = vmul.f32 %v16161_v17, %v16180_v49  ;;  %v3394_v48 = vmul.f32 %v16161_v17, %v16181_v26  ;;  %v3397_v28 = vmul.f32 %v16161_v17, %v16184_v27  ;;  %v16185_v39 = vld [vmem:[#allocation47_spill] sm:$0xff]  ;;  %v16186_v56 = vld [vmem:[#allocation44_spill] sm:$0xff]  ;;  %v3401_v26 = vmul.f32 %v16161_v17, %v12287_v34  ;;  %v16188_v62 = vld [vmem:[#allocation18_spill] sm:$0xff] }
 0x382   :  { %v3399_v29 = vmul.f32 %v16161_v17, %v16185_v39  ;;  %v3400_v49 = vmul.f32 %v16161_v17, %v16186_v56  ;;  %v16187_v7 = vld [vmem:[#allocation36_spill] sm:$0xff]  ;;  %v3403_v50 = vmul.f32 %v16161_v17, %v16188_v62  ;;  %v3404_v27 = vmul.f32 %v16161_v17, %v12624_v6  ;;  %v16211_v57 = vld [vmem:[#allocation37_spill] sm:$0xff] }
 0x383   :  { %v3402_v14 = vmul.f32 %v16161_v17, %v16187_v7  ;;  %v3406_v39 = vmul.f32 %v16161_v17, %v12778_v20  ;;  %v3407_v56 = vmul.f32 %v16161_v17, %v12783_v13  ;;  %v12818_v34 = vadd.f32 %v3376_v32, %v12648_v4  ;;  %v16220_v59 = vld [vmem:[#allocation20_spill] sm:$0xff] }
 0x384   :  { %v12821_v7 = vadd.f32 %v3377_v30, %v12651_v40  ;;  %v12824_v62 = vadd.f32 %v3378_v1, %v12654_v3  ;;  %v12827_v6 = vadd.f32 %v3379_v63, %v12657_v15  ;;  %v12833_v20 = vadd.f32 %v3381_v12, %v12663_v21  ;;  %v16209_v63 = vld [vmem:[#allocation33_spill] sm:$0xff] }
 0x385   :  { %v12836_v17 = vadd.f32 %v3382_v0, %v12666_v23  ;;  %v12839_v4 = vadd.f32 %v3383_v16, %v12669_v43  ;;  %v12842_v40 = vadd.f32 %v3384_v18, %v12672_v35  ;;  %v12845_v3 = vadd.f32 %v3385_v60, %v12675_v25 }
 0x386   :  { %v12848_v15 = vadd.f32 %v3386_v36, %v12678_v38  ;;  %v12854_v21 = vadd.f32 %v3388_v19, %v12684_v11  ;;  %v12857_v23 = vadd.f32 %v3389_v58, %v12687_v45  ;;  %v12860_v43 = vadd.f32 %v3390_v42, %v12690_v33  ;;  %v16221_v19 = vld [vmem:[#allocation34_spill] sm:$0xff] }
 0x387   :  { %v12863_v35 = vadd.f32 %v3391_v22, %v12693_v46  ;;  %v12866_v25 = vadd.f32 %v3392_v24, %v12696_v47  ;;  %v12869_v38 = vadd.f32 %v3393_v31, %v12699_v54  ;;  %v12872_v61 = vadd.f32 %v3394_v48, %v12702_v51  ;;  %v16195_v54 = vld [vmem:[#allocation12_spill] sm:$0xff]  ;;  %v16197_v51 = vld [vmem:[#allocation7_spill] sm:$0xff]  ;;  %v16222_v58 = vld [vmem:[#allocation26_spill] sm:$0xff] }
 0x388   :  { %v12875_v11 = vadd.f32 %v3395_v55, %v12705_v8  ;;  %v12878_v45 = vadd.f32 %v3396_v53, %v12708_v41  ;;  %v12881_v33 = vadd.f32 %v3397_v28, %v12711_v10  ;;  %v12884_v46 = vadd.f32 %v3398_v37, %v12714_v5  ;;  %v16199_v8 = vld [vmem:[#allocation28_spill] sm:$0xff]  ;;  %v16203_v10 = vld [vmem:[#allocation35_spill] sm:$0xff] }
 0x389   :  { %16189 = vst [vmem:[#allocation8_spill] sm:$0xff] %v12872_v61  ;;  %v12887_v47 = vadd.f32 %v3399_v29, %v12717_v9  ;;  %v12890_v32 = vadd.f32 %v3400_v49, %v16195_v54  ;;  %v12893_v30 = vadd.f32 %v3401_v26, %v16197_v51  ;;  %v12896_v1 = vadd.f32 %v3402_v14, %v16199_v8  ;;  %v16201_v41 = vld [vmem:[#allocation24_spill] sm:$0xff]  ;;  %v16205_v5 = vld [vmem:[#allocation39_spill] sm:$0xff]  ;;  %v16207_v9 = vld [vmem:[#allocation29_spill] sm:$0xff] }
 0x38a   :  { %16190 = vst [vmem:[#allocation6_spill] sm:$0xff] %v12875_v11  ;;  %16191 = vst [vmem:[#allocation49_spill] sm:$0xff] %v12878_v45  ;;  %v12899_v53 = vadd.f32 %v3403_v50, %v16201_v41  ;;  %v12902_v28 = vadd.f32 %v3404_v27, %v16203_v10  ;;  %v12905_v37 = vadd.f32 %v3405_v52, %v16205_v5  ;;  %v16212_v31 = vld [vmem:[#allocation43_spill] sm:$0xff]  ;;  %v16213_v14 = vld [vmem:[#allocation14_spill] sm:$0xff] }
 0x38b   :  { %16192 = vst [vmem:[#allocation45_spill] sm:$0xff] %v12881_v33  ;;  %16193 = vst [vmem:[#allocation50_spill] sm:$0xff] %v12884_v46  ;;  %v12908_v55 = vadd.f32 %v3406_v39, %v16207_v9  ;;  %v12911_v48 = vadd.f32 %v3407_v56, %v16209_v63  ;;  %v3442_v12 = vmul.f32 %v16212_v31, %v16211_v57  ;;  %v16214_v50 = vld [vmem:[#allocation27_spill] sm:$0xff]  ;;  %v16215_v27 = vld [vmem:[#allocation16_spill] sm:$0xff] }
 0x38c   :  { %16194 = vst [vmem:[#allocation51_spill] sm:$0xff] %v12887_v47  ;;  %16196 = vst [vmem:[#allocation12_spill] sm:$0xff] %v12890_v32  ;;  %v3443_v0 = vmul.f32 %v16212_v31, %v16213_v14  ;;  %v3444_v42 = vmul.f32 %v16212_v31, %v16214_v50  ;;  %v3445_v16 = vmul.f32 %v16212_v31, %v16215_v27  ;;  %v16216_v52 = vld [vmem:[#allocation10_spill] sm:$0xff]  ;;  %v16217_v39 = vld [vmem:[#allocation21_spill] sm:$0xff] }
 0x38d   :  { %16198 = vst [vmem:[#allocation7_spill] sm:$0xff] %v12893_v30  ;;  %16200 = vst [vmem:[#allocation28_spill] sm:$0xff] %v12896_v1  ;;  %v3446_v22 = vmul.f32 %v16212_v31, %v16216_v52  ;;  %v3447_v18 = vmul.f32 %v16212_v31, %v16217_v39  ;;  %v16218_v56 = vld [vmem:[#allocation19_spill] sm:$0xff]  ;;  %v3450_v29 = vmul.f32 %v16212_v31, %v16220_v59  ;;  %v16223_v54 = vld [vmem:[#allocation9_spill] sm:$0xff] }
 0x38e   :  { %16202 = vst [vmem:[#allocation24_spill] sm:$0xff] %v12899_v53  ;;  %16204 = vst [vmem:[#allocation35_spill] sm:$0xff] %v12902_v28  ;;  %v3448_v60 = vmul.f32 %v16212_v31, %v16218_v56  ;;  %v16219_v24 = vld [vmem:[#allocation11_spill] sm:$0xff]  ;;  %v3451_v49 = vmul.f32 %v16212_v31, %v16221_v19  ;;  %v3452_v26 = vmul.f32 %v16212_v31, %v16222_v58  ;;  %v16224_v8 = vld [vmem:[#allocation32_spill] sm:$0xff] }
 0x38f   :  { %16206 = vst [vmem:[#allocation39_spill] sm:$0xff] %v12905_v37  ;;  %16208 = vst [vmem:[#allocation29_spill] sm:$0xff] %v12908_v55  ;;  %v3449_v36 = vmul.f32 %v16212_v31, %v16219_v24  ;;  %v3453_v51 = vmul.f32 %v16212_v31, %v16223_v54  ;;  %v3454_v41 = vmul.f32 %v16212_v31, %v16224_v8  ;;  %v16225_v10 = vld [vmem:[#allocation25_spill] sm:$0xff]  ;;  %v16226_v9 = vld [vmem:[#allocation23_spill] sm:$0xff] }
 0x390   :  { %16210 = vst [vmem:[#allocation33_spill] sm:$0xff] %v12911_v48  ;;  %v3455_v5 = vmul.f32 %v16212_v31, %v16225_v10  ;;  %v3456_v63 = vmul.f32 %v16212_v31, %v16226_v9  ;;  %v16227_v57 = vld [vmem:[#allocation31_spill] sm:$0xff]  ;;  %v16229_v8 = vld [vmem:[#allocation48_spill] sm:$0xff]  ;;  %v16230_v10 = vld [vmem:[#allocation42_spill] sm:$0xff]  ;;  %v3475_v39 = vadd.f32 %v3443_v0, %v12821_v7  ;;  %v3478_v11 = vadd.f32 %v3446_v22, %v12830_v2 }
 0x391   :  { %v3457_v14 = vmul.f32 %v16212_v31, %v16227_v57  ;;  %v12948_v48 = vld [vmem:[%s13400_s2 + $0x1e6] sm:$0xff]  ;;  %v12953_v54 = vld [vmem:[%s13400_s2 + $0x1ee] sm:$0xff]  ;;  %v3458_v55 = vmul.f32 %v16212_v31, %v16229_v8  ;;  %v3459_v58 = vmul.f32 %v16212_v31, %v16230_v10  ;;  %v16241_v45 = vld [vmem:[#allocation17_spill] sm:$0xff]  ;;  %v3481_v61 = vadd.f32 %v3449_v36, %v12839_v4 }
 0x392   :  { %16228 = vst [vmem:[#allocation37_spill] sm:$0xff] %v12948_v48  ;;  %v16231_v9 = vld [vmem:[#allocation46_spill] sm:$0xff]  ;;  %v16234_v1 = vld [vmem:[#allocation47_spill] sm:$0xff]  ;;  %v16235_v24 = vld [vmem:[#allocation44_spill] sm:$0xff]  ;;  %v3485_v7 = vadd.f32 %v3453_v51, %v12851_v44  ;;  %v13004_v2 = vadd.f32 %v3456_v63, %v12860_v43 }
 0x393   :  { %v3460_v37 = vmul.f32 %v16212_v31, %v16231_v9  ;;  %v16232_v57 = vld [vmem:[#allocation38_spill] sm:$0xff]  ;;  %v3463_v59 = vmul.f32 %v16212_v31, %v16234_v1  ;;  %v3464_v30 = vmul.f32 %v16212_v31, %v16235_v24  ;;  %v16236_v32 = vld [vmem:[#allocation15_spill] sm:$0xff]  ;;  %v16237_v47 = vld [vmem:[#allocation36_spill] sm:$0xff]  ;;  %v3470_v1 = vmul.f32 %v16212_v31, %v16241_v45 }
 0x394   :  { %v3461_v28 = vmul.f32 %v16212_v31, %v16232_v57  ;;  %v16233_v19 = vld [vmem:[#allocation30_spill] sm:$0xff]  ;;  %v3465_v8 = vmul.f32 %v16212_v31, %v16236_v32  ;;  %v3466_v10 = vmul.f32 %v16212_v31, %v16237_v47  ;;  %v16239_v46 = vld [vmem:[#allocation40_spill] sm:$0xff]  ;;  %v3471_v24 = vmul.f32 %v16212_v31, %v12783_v13  ;;  %v16242_v4 = vld [vmem:[#allocation41_spill] sm:$0xff] }
 0x395   :  { %v3462_v53 = vmul.f32 %v16212_v31, %v16233_v19  ;;  %v16238_v56 = vld [vmem:[#allocation18_spill] sm:$0xff]  ;;  %v3468_v57 = vmul.f32 %v16212_v31, %v16239_v46  ;;  %v3472_v32 = vmul.f32 %v16212_v31, %v12948_v48  ;;  %v3473_v47 = vmul.f32 %v16212_v31, %v12953_v54  ;;  %v16255_v51 = vld [vmem:[#allocation28_spill] sm:$0xff] }
 0x396   :  { %v3467_v9 = vmul.f32 %v16212_v31, %v16238_v56  ;;  %v16240_v33 = vld [vmem:[#allocation22_spill] sm:$0xff]  ;;  %v3474_v56 = vadd.f32 %v3442_v12, %v12818_v34  ;;  %v3476_v46 = vadd.f32 %v3444_v42, %v12824_v62  ;;  %v3479_v45 = vadd.f32 %v3447_v18, %v12833_v20  ;;  %v16246_v12 = vld [vmem:[#allocation49_spill] sm:$0xff] }
 0x397   :  { %v3469_v19 = vmul.f32 %v16212_v31, %v16240_v33  ;;  %v3477_v33 = vadd.f32 %v3445_v16, %v12827_v6  ;;  %v3480_v13 = vadd.f32 %v3448_v60, %v12836_v17  ;;  %v3482_v48 = vadd.f32 %v3450_v29, %v12842_v40  ;;  %v16244_v43 = vld [vmem:[#allocation6_spill] sm:$0xff]  ;;  %v16252_v60 = vld [vmem:[#allocation7_spill] sm:$0xff] }
 0x398   :  { %v3483_v31 = vadd.f32 %v3451_v49, %v12845_v3  ;;  %v3484_v34 = vadd.f32 %v3452_v26, %v12848_v15  ;;  %v3486_v62 = vadd.f32 %v3454_v41, %v12854_v21  ;;  %v13001_v6 = vadd.f32 %v3455_v5, %v12857_v23  ;;  %v16243_v21 = vld [vmem:[#allocation8_spill] sm:$0xff] }
 0x399   :  { %v13007_v20 = vadd.f32 %v3457_v14, %v12863_v35  ;;  %v13010_v17 = vadd.f32 %v3458_v55, %v12866_v25  ;;  %v3508_v40 = vmul.f32 %v16242_v4, %v16214_v50  ;;  %v3509_v3 = vmul.f32 %v16242_v4, %v16215_v27  ;;  %v16245_v25 = vld [vmem:[#allocation21_spill] sm:$0xff]  ;;  %v16248_v27 = vld [vmem:[#allocation50_spill] sm:$0xff]  ;;  %v16258_v14 = vld [vmem:[#allocation35_spill] sm:$0xff] }
 0x39a   :  { %v3510_v15 = vmul.f32 %v16242_v4, %v16216_v52  ;;  %v13019_v44 = vadd.f32 %v3459_v58, %v12869_v38  ;;  %v13022_v23 = vadd.f32 %v3460_v37, %v16243_v21  ;;  %v13025_v35 = vadd.f32 %v3461_v28, %v16244_v43  ;;  %v16247_v50 = vld [vmem:[#allocation45_spill] sm:$0xff]  ;;  %v16249_v38 = vld [vmem:[#allocation19_spill] sm:$0xff]  ;;  %v16251_v28 = vld [vmem:[#allocation12_spill] sm:$0xff] }
 0x39b   :  { %v3511_v55 = vmul.f32 %v16242_v4, %v16245_v25  ;;  %v13030_v0 = vadd.f32 %v3462_v53, %v16246_v12  ;;  %v13033_v42 = vadd.f32 %v3463_v59, %v16247_v50  ;;  %v13036_v16 = vadd.f32 %v3464_v30, %v16248_v27  ;;  %v16250_v37 = vld [vmem:[#allocation51_spill] sm:$0xff]  ;;  %v16254_v59 = vld [vmem:[#allocation20_spill] sm:$0xff]  ;;  %v16260_v12 = vld [vmem:[#allocation26_spill] sm:$0xff] }
 0x39c   :  { %v3512_v52 = vmul.f32 %v16242_v4, %v16249_v38  ;;  %v13041_v22 = vadd.f32 %v3465_v8, %v16250_v37  ;;  %v13044_v18 = vadd.f32 %v3466_v10, %v16251_v28  ;;  %v13047_v36 = vadd.f32 %v3467_v9, %v16252_v60  ;;  %v16253_v53 = vld [vmem:[#allocation11_spill] sm:$0xff]  ;;  %v16256_v8 = vld [vmem:[#allocation24_spill] sm:$0xff]  ;;  %v16257_v10 = vld [vmem:[#allocation34_spill] sm:$0xff] }
 0x39d   :  { %v3513_v29 = vmul.f32 %v16242_v4, %v16253_v53  ;;  %v3514_v49 = vmul.f32 %v16242_v4, %v16254_v59  ;;  %v3540_v30 = vadd.f32 %v3508_v40, %v3474_v56  ;;  %v3541_v58 = vadd.f32 %v3509_v3, %v3475_v39  ;;  %v16259_v43 = vld [vmem:[#allocation39_spill] sm:$0xff]  ;;  %v16261_v56 = vld [vmem:[#allocation29_spill] sm:$0xff]  ;;  %v16263_v3 = vld [vmem:[#allocation32_spill] sm:$0xff] }
 0x39e   :  { %v3542_v26 = vadd.f32 %v3510_v15, %v3476_v46  ;;  %v13054_v41 = vadd.f32 %v3468_v57, %v16255_v51  ;;  %v13057_v5 = vadd.f32 %v3469_v19, %v16256_v8  ;;  %v3515_v63 = vmul.f32 %v16242_v4, %v16257_v10  ;;  %v16262_v40 = vld [vmem:[#allocation9_spill] sm:$0xff]  ;;  %v16266_v28 = vld [vmem:[#allocation23_spill] sm:$0xff]  ;;  %v16270_v10 = vld [vmem:[#allocation46_spill] sm:$0xff] }
 0x39f   :  { %v3543_v9 = vadd.f32 %v3511_v55, %v3477_v33  ;;  %v13062_v21 = vadd.f32 %v3470_v1, %v16258_v14  ;;  %v13065_v25 = vadd.f32 %v3471_v24, %v16259_v43  ;;  %v3516_v39 = vmul.f32 %v16242_v4, %v16260_v12  ;;  %v16264_v24 = vld [vmem:[#allocation33_spill] sm:$0xff]  ;;  %v16267_v51 = vld [vmem:[#allocation31_spill] sm:$0xff]  ;;  %v16271_v14 = vld [vmem:[#allocation38_spill] sm:$0xff] }
 0x3a0   :  { %v3544_v46 = vadd.f32 %v3512_v52, %v3478_v11  ;;  %v13070_v57 = vadd.f32 %v3472_v32, %v16261_v56  ;;  %v3517_v19 = vmul.f32 %v16242_v4, %v16262_v40  ;;  %v3518_v15 = vmul.f32 %v16242_v4, %v16263_v3  ;;  %v16265_v37 = vld [vmem:[#allocation25_spill] sm:$0xff]  ;;  %v16273_v40 = vld [vmem:[#allocation47_spill] sm:$0xff] }
 0x3a1   :  { %v3545_v33 = vadd.f32 %v3513_v29, %v3479_v45  ;;  %v3546_v55 = vadd.f32 %v3514_v49, %v3480_v13  ;;  %v3915_v1 = vmul.f32 -1.442695, %v3540_v30  ;;  %v3916_v50 = vmul.f32 -1.442695, %v3541_v58  ;;  %v16268_v49 = vld [vmem:[#allocation48_spill] sm:$0xff] }
 0x3a2   :  { %v3917_v27 = vmul.f32 -1.442695, %v3542_v26  ;;  %v13077_v38 = vadd.f32 %v3473_v47, %v16264_v24  ;;  %v3519_v11 = vmul.f32 %v16242_v4, %v16265_v37  ;;  %v3547_v52 = vadd.f32 %v3515_v63, %v3481_v61  ;;  %v16269_v61 = vld [vmem:[#allocation42_spill] sm:$0xff]  ;;  %v16276_v24 = vld [vmem:[#allocation36_spill] sm:$0xff] }
 0x3a3   :  { %v3918_v32 = vmul.f32 -1.442695, %v3543_v9  ;;  %v3520_v60 = vmul.f32 %v16242_v4, %v16266_v28  ;;  %v3548_v53 = vadd.f32 %v3516_v39, %v3482_v48  ;;  %3980 = vpow2.f32 %v3915_v1  ;;  %v16272_v39 = vld [vmem:[#allocation30_spill] sm:$0xff]  ;;  %v16275_v1 = vld [vmem:[#allocation15_spill] sm:$0xff] }
 0x3a4   :  { %v3919_v59 = vmul.f32 -1.442695, %v3544_v46  ;;  %v3521_v13 = vmul.f32 %v16242_v4, %v16267_v51  ;;  %v3549_v45 = vadd.f32 %v3517_v19, %v3483_v31  ;;  %3982 = vpow2.f32 %v3916_v50 }
 0x3a5   :  { %v3920_v29 = vmul.f32 -1.442695, %v3545_v33  ;;  %v3522_v47 = vmul.f32 %v16242_v4, %v16268_v49  ;;  %v3550_v30 = vadd.f32 %v3518_v15, %v3484_v34  ;;  %3984 = vpow2.f32 %v3917_v27  ;;  %v16274_v15 = vld [vmem:[#allocation44_spill] sm:$0xff] }
 0x3a6   :  { %v3921_v58 = vmul.f32 -1.442695, %v3546_v55  ;;  %v3523_v26 = vmul.f32 %v16242_v4, %v16269_v61  ;;  %v3551_v8 = vadd.f32 %v3519_v11, %v3485_v7  ;;  %3986 = vpow2.f32 %v3918_v32  ;;  %v3108_v61 = vld [vmem:[%s13400_s2 + $0x1fe] sm:$0xff] }
 0x3a7   :  { %v3922_v48 = vmul.f32 -1.442695, %v3547_v52  ;;  %v3524_v63 = vmul.f32 %v16242_v4, %v16270_v10  ;;  %v3552_v9 = vadd.f32 %v3520_v60, %v3486_v62  ;;  %3988 = vpow2.f32 %v3919_v59  ;;  %v16277_v52 = vld [vmem:[#allocation18_spill] sm:$0xff]  ;;  %v16278_v60 = vld [vmem:[#allocation40_spill] sm:$0xff] }
 0x3a8   :  { %v3923_v31 = vmul.f32 -1.442695, %v3548_v53  ;;  %v3525_v43 = vmul.f32 %v16242_v4, %v16271_v14  ;;  %v3553_v12 = vadd.f32 %v3521_v13, %v13001_v6  ;;  %3990 = vpow2.f32 %v3920_v29  ;;  %v16279_v13 = vld [vmem:[#allocation22_spill] sm:$0xff] }
 0x3a9   :  { %v3924_v34 = vmul.f32 -1.442695, %v3549_v45  ;;  %v3526_v46 = vmul.f32 %v16242_v4, %v16272_v39  ;;  %v3554_v7 = vadd.f32 %v3522_v47, %v13004_v2  ;;  %3992 = vpow2.f32 %v3921_v58 }
 0x3aa   :  { %v3925_v56 = vmul.f32 -1.442695, %v3550_v30  ;;  %v3527_v19 = vmul.f32 %v16242_v4, %v16273_v40  ;;  %v3555_v62 = vadd.f32 %v3523_v26, %v13007_v20  ;;  %3994 = vpow2.f32 %v3922_v48  ;;  %v16281_v26 = vld [vmem:[#allocation13_spill] sm:$0xff] }
 0x3ab   :  { %v3926_v3 = vmul.f32 -1.442695, %v3551_v8  ;;  %v3528_v33 = vmul.f32 %v16242_v4, %v16274_v15  ;;  %v3556_v6 = vadd.f32 %v3524_v63, %v13010_v17  ;;  %3996 = vpow2.f32 %v3923_v31  ;;  %v3109_v63 = vld [vmem:[%s13400_s2 + $0x206] sm:$0xff] }
 0x3ac   :  { %v3927_v55 = vmul.f32 -1.442695, %v3552_v9  ;;  %v3529_v50 = vmul.f32 %v16242_v4, %v16275_v1  ;;  %v3557_v2 = vadd.f32 %v3525_v43, %v13019_v44  ;;  %3998 = vpow2.f32 %v3924_v34 }
 0x3ad   :  { %v3928_v27 = vmul.f32 -1.442695, %v3553_v12  ;;  %v3530_v37 = vmul.f32 %v16242_v4, %v16276_v24  ;;  %v3558_v20 = vadd.f32 %v3526_v46, %v13022_v23  ;;  %4000 = vpow2.f32 %v3925_v56 }
 0x3ae   :  { %v3929_v11 = vmul.f32 -1.442695, %v3554_v7  ;;  %v3531_v32 = vmul.f32 %v16242_v4, %v16277_v52  ;;  %v3559_v17 = vadd.f32 %v3527_v19, %v13025_v35  ;;  %4002 = vpow2.f32 %v3926_v3  ;;  %v16280_v35 = vld [vmem:[#allocation17_spill] sm:$0xff] }
 0x3af   :  { %v3930_v28 = vmul.f32 -1.442695, %v3555_v62  ;;  %v3532_v53 = vmul.f32 %v16242_v4, %v16278_v60  ;;  %v3560_v44 = vadd.f32 %v3528_v33, %v13030_v0  ;;  %4004 = vpow2.f32 %v3927_v55 }
 0x3b0   :  { %v3931_v59 = vmul.f32 -1.442695, %v3556_v6  ;;  %v13115_v51 = vpop.eup %3980  ;;  %v3533_v23 = vmul.f32 %v16242_v4, %v16279_v13  ;;  %v3561_v45 = vadd.f32 %v3529_v50, %v13033_v42  ;;  %4006 = vpow2.f32 %v3928_v27 }
 0x3b1   :  { %v3932_v29 = vmul.f32 -1.442695, %v3557_v2  ;;  %v13120_v49 = vpop.eup %3982  ;;  %v3534_v47 = vmul.f32 %v16242_v4, %v16280_v35  ;;  %v3562_v30 = vadd.f32 %v3530_v37, %v13036_v16  ;;  %4008 = vpow2.f32 %v3929_v11  ;;  %v16282_v16 = vld [vmem:[#allocation37_spill] sm:$0xff] }
 0x3b2   :  { %v3933_v0 = vmul.f32 -1.442695, %v3558_v20  ;;  %v3985_v58 = vpop.eup %3984  ;;  %v3535_v8 = vmul.f32 %v16242_v4, %v16281_v26  ;;  %v3563_v42 = vadd.f32 %v3531_v32, %v13041_v22  ;;  %4010 = vpow2.f32 %v3930_v28 }
 0x3b3   :  { %v3934_v48 = vmul.f32 -1.442695, %v3559_v17  ;;  %v3987_v10 = vpop.eup %3986  ;;  %v3536_v9 = vmul.f32 %v16242_v4, %v16282_v16  ;;  %v3564_v31 = vadd.f32 %v3532_v53, %v13044_v18  ;;  %4012 = vpow2.f32 %v3931_v59 }
 0x3b4   :  { %v3935_v14 = vmul.f32 -1.442695, %v3560_v44  ;;  %v3989_v43 = vpop.eup %3988  ;;  %v3537_v12 = vmul.f32 %v16242_v4, %v12953_v54  ;;  %v3565_v22 = vadd.f32 %v3533_v23, %v13047_v36  ;;  %4014 = vpow2.f32 %v3932_v29 }
 0x3b5   :  { %v3936_v34 = vmul.f32 -1.442695, %v3561_v45  ;;  %v3991_v39 = vpop.eup %3990  ;;  %v3538_v46 = vmul.f32 %v16242_v4, %v3108_v61  ;;  %v3566_v7 = vadd.f32 %v3534_v47, %v13054_v41  ;;  %4016 = vpow2.f32 %v3933_v0 }
 0x3b6   :  { %v3937_v56 = vmul.f32 -1.442695, %v3562_v30  ;;  %v3993_v40 = vpop.eup %3992  ;;  %v3539_v18 = vmul.f32 %v16242_v4, %v3109_v63  ;;  %v3567_v19 = vadd.f32 %v3535_v8, %v13057_v5  ;;  %4018 = vpow2.f32 %v3934_v48 }
 0x3b7   :  { %v3938_v62 = vmul.f32 -1.442695, %v3563_v42  ;;  %v3995_v3 = vpop.eup %3994  ;;  %v3568_v54 = vadd.f32 %v3536_v9, %v13062_v21  ;;  %4020 = vpow2.f32 %v3935_v14  ;;  %v3939_v36 = vmul.f32 -1.442695, %v3564_v31 }
 0x3b8   :  { %v3997_v15 = vpop.eup %3996  ;;  %v3569_v33 = vadd.f32 %v3537_v12, %v13065_v25  ;;  %4022 = vpow2.f32 %v3936_v34  ;;  %v3940_v6 = vmul.f32 -1.442695, %v3565_v22  ;;  %v3570_v55 = vadd.f32 %v3538_v46, %v13070_v57  ;;  %v3948_v34 = vld [vmem:[%s13400_s2 + $0x53] sm:$0xff] }
 0x3b9   :  { %v3999_v41 = vpop.eup %3998  ;;  %4024 = vpow2.f32 %v3937_v56  ;;  %v3941_v1 = vmul.f32 -1.442695, %v3566_v7  ;;  %v3571_v5 = vadd.f32 %v3539_v18, %v13077_v38  ;;  %v3942_v50 = vmul.f32 -1.442695, %v3567_v19  ;;  %v3949_v7 = vld [vmem:[%s13400_s2 + $0x63] sm:$0xff]  ;;  %v3950_v18 = vld [vmem:[%s13400_s2 + $0x6b] sm:$0xff] }
 0x3ba   :  { %v4001_v4 = vpop.eup %4000  ;;  %4026 = vpow2.f32 %v3938_v62  ;;  %v3943_v21 = vmul.f32 -1.442695, %v3568_v54  ;;  %v3944_v24 = vmul.f32 -1.442695, %v3569_v33  ;;  %v3945_v25 = vmul.f32 -1.442695, %v3570_v55 }
 0x3bb   :  { %v4003_v2 = vpop.eup %4002  ;;  %4028 = vpow2.f32 %v3939_v36  ;;  %v3946_v11 = vmul.f32 -1.442695, %v3571_v5  ;;  %v3668_v52 = vadd.f32 1.0, %v13115_v51  ;;  %v3669_v38 = vadd.f32 1.0, %v13120_v49  ;;  %v3951_v54 = vld [vmem:[%s13400_s2 + $0x7b] sm:$0xff] }
 0x3bc   :  { %v4005_v27 = vpop.eup %4004  ;;  %4030 = vpow2.f32 %v3940_v6  ;;  %v3670_v28 = vadd.f32 1.0, %v3985_v58  ;;  %v3671_v53 = vadd.f32 1.0, %v3987_v10  ;;  %v3672_v59 = vadd.f32 1.0, %v3989_v43  ;;  %v3947_v43 = vld [vmem:[%s13400_s2 + $0x4b] sm:$0xff]  ;;  %v3952_v6 = vld [vmem:[%s13400_s2 + $0x83] sm:$0xff] }
 0x3bd   :  { %v4007_v37 = vpop.eup %4006  ;;  %4032 = vpow2.f32 %v3941_v1  ;;  %v3673_v23 = vadd.f32 1.0, %v3991_v39  ;;  %v3674_v29 = vadd.f32 1.0, %v3993_v40  ;;  %v3675_v35 = vadd.f32 1.0, %v3995_v3 }
 0x3be   :  { %v4009_v20 = vpop.eup %4008  ;;  %4034 = vpow2.f32 %v3942_v50  ;;  %v3676_v49 = vadd.f32 1.0, %v3997_v15  ;;  %v3677_v0 = vadd.f32 1.0, %v3999_v41  ;;  %v3678_v61 = vadd.f32 1.0, %v4001_v4  ;;  %v3953_v4 = vld [vmem:[%s13400_s2 + $0x93] sm:$0xff] }
 0x3bf   :  { %v4011_v57 = vpop.eup %4010  ;;  %4036 = vpow2.f32 %v3943_v21  ;;  %v3679_v8 = vadd.f32 1.0, %v4003_v2  ;;  %v3680_v48 = vadd.f32 1.0, %v4005_v27  ;;  %v3681_v63 = vadd.f32 1.0, %v4007_v37  ;;  %v3954_v21 = vld [vmem:[%s13400_s2 + $0x9b] sm:$0xff] }
 0x3c0   :  { %v4013_v32 = vpop.eup %4012  ;;  %4038 = vpow2.f32 %v3944_v24  ;;  %v3682_v9 = vadd.f32 1.0, %v4009_v20  ;;  %v3683_v14 = vadd.f32 1.0, %v4011_v57 }
 0x3c1   :  { %v4015_v17 = vpop.eup %4014  ;;  %4040 = vpow2.f32 %v3945_v25  ;;  %v3684_v22 = vadd.f32 1.0, %v4013_v32  ;;  %v3955_v25 = vld [vmem:[%s13400_s2 + $0xab] sm:$0xff] }
 0x3c2   :  { %v4017_v60 = vpop.eup %4016  ;;  %4042 = vpow2.f32 %v3946_v11  ;;  %v3685_v46 = vadd.f32 1.0, %v4015_v17 }
 0x3c3   :  { %v4019_v44 = vpop.eup %4018  ;;  %4044 = vrcp.f32 %v3668_v52  ;;  %v3686_v40 = vadd.f32 1.0, %v4017_v60  ;;  %v3956_v52 = vld [vmem:[%s13400_s2 + $0xb3] sm:$0xff] }
 0x3c4   :  { %v4021_v13 = vpop.eup %4020  ;;  %4046 = vrcp.f32 %v3669_v38  ;;  %v3687_v3 = vadd.f32 1.0, %v4019_v44 }
 0x3c5   :  { %v4023_v45 = vpop.eup %4022  ;;  %4048 = vrcp.f32 %v3670_v28  ;;  %v3688_v33 = vadd.f32 1.0, %v4021_v13  ;;  %v3957_v28 = vld [vmem:[%s13400_s2 + $0xc3] sm:$0xff] }
 0x3c6   :  { %v4025_v51 = vpop.eup %4024  ;;  %4050 = vrcp.f32 %v3671_v53  ;;  %v3689_v1 = vadd.f32 1.0, %v4023_v45 }
 0x3c7   :  { %v4027_v47 = vpop.eup %4026  ;;  %4052 = vrcp.f32 %v3672_v59  ;;  %v3690_v2 = vadd.f32 1.0, %v4025_v51  ;;  %v3958_v59 = vld [vmem:[%s13400_s2 + $0xcb] sm:$0xff] }
 0x3c8   :  { %v13150_v30 = vpop.eup %4028  ;;  %4054 = vrcp.f32 %v3673_v23  ;;  %v3691_v37 = vadd.f32 1.0, %v4027_v47 }
 0x3c9   :  { %v13152_v58 = vpop.eup %4030  ;;  %4056 = vrcp.f32 %v3674_v29  ;;  %v3692_v57 = vadd.f32 1.0, %v13150_v30  ;;  %v3959_v29 = vld [vmem:[%s13400_s2 + $0xdb] sm:$0xff] }
 0x3ca   :  { %v13154_v26 = vpop.eup %4032  ;;  %4058 = vrcp.f32 %v3675_v35  ;;  %v3693_v17 = vadd.f32 1.0, %v13152_v58 }
 0x3cb   :  { %v13156_v42 = vpop.eup %4034  ;;  %4060 = vrcp.f32 %v3676_v49  ;;  %v3694_v44 = vadd.f32 1.0, %v13154_v26  ;;  %v3960_v49 = vld [vmem:[%s13400_s2 + $0xe3] sm:$0xff] }
 0x3cc   :  { %v13158_v10 = vpop.eup %4036  ;;  %4062 = vrcp.f32 %v3677_v0  ;;  %v3695_v45 = vadd.f32 1.0, %v13156_v42 }
 0x3cd   :  { %v13160_v16 = vpop.eup %4038  ;;  %4064 = vrcp.f32 %v3678_v61  ;;  %v3696_v47 = vadd.f32 1.0, %v13158_v10  ;;  %v3961_v61 = vld [vmem:[%s13400_s2 + $0xf3] sm:$0xff] }
 0x3ce   :  { %v13162_v31 = vpop.eup %4040  ;;  %4066 = vrcp.f32 %v3679_v8  ;;  %v3697_v58 = vadd.f32 1.0, %v13160_v16 }
 0x3cf   :  { %v13167_v12 = vpop.eup %4042  ;;  %4068 = vrcp.f32 %v3680_v48  ;;  %v3698_v42 = vadd.f32 1.0, %v13162_v31  ;;  %v3962_v48 = vld [vmem:[%s13400_s2 + $0xfb] sm:$0xff] }
 0x3d0   :  { %v4045_v39 = vpop.eup %4044  ;;  %4070 = vrcp.f32 %v3681_v63  ;;  %v3699_v16 = vadd.f32 1.0, %v13167_v12 }
 0x3d1   :  { %v4047_v56 = vpop.eup %4046  ;;  %4072 = vrcp.f32 %v3682_v9  ;;  %v3797_v19 = vmul.f32 %v4045_v39, %v3947_v43  ;;  %v3963_v9 = vld [vmem:[%s13400_s2 + $0x10b] sm:$0xff]  ;;  %v3964_v43 = vld [vmem:[%s13400_s2 + $0x113] sm:$0xff] }
 0x3d2   :  { %v4049_v62 = vpop.eup %4048  ;;  %4074 = vrcp.f32 %v3683_v14  ;;  %v3798_v36 = vmul.f32 %v4047_v56, %v3948_v34  ;;  %v3965_v34 = vld [vmem:[%s13400_s2 + $0x123] sm:$0xff] }
 0x3d3   :  { %v4051_v15 = vpop.eup %4050  ;;  %4076 = vrcp.f32 %v3684_v22  ;;  %v3799_v41 = vmul.f32 %v4049_v62, %v3949_v7  ;;  %3830 = vst.msk [vmem:[%s13401_s3] sm:$0xff] %vm3829_vm0, %v3797_v19  ;;  %v3966_v7 = vld [vmem:[%s13400_s2 + $0x12b] sm:$0xff] }
 0x3d4   :  { %v4053_v55 = vpop.eup %4052  ;;  %4078 = vrcp.f32 %v3685_v46  ;;  %v3800_v5 = vmul.f32 %v4051_v15, %v3950_v18  ;;  %3831 = vst.msk [vmem:[%s13401_s3 + $0x8] sm:$0xff] %vm3829_vm0, %v3798_v36  ;;  %v3967_v18 = vld [vmem:[%s13400_s2 + $0x13b] sm:$0xff]  ;;  %v3969_v15 = vld [vmem:[%s13400_s2 + $0x153] sm:$0xff] }
 0x3d5   :  { %v4055_v50 = vpop.eup %4054  ;;  %4080 = vrcp.f32 %v3686_v40  ;;  %v3801_v27 = vmul.f32 %v4053_v55, %v3951_v54  ;;  %3832 = vst.msk [vmem:[%s13401_s3 + $0x10] sm:$0xff] %vm3829_vm0, %v3799_v41  ;;  %v3970_v41 = vld [vmem:[%s13400_s2 + $0x15b] sm:$0xff] }
 0x3d6   :  { %v4057_v24 = vpop.eup %4056  ;;  %4082 = vrcp.f32 %v3687_v3  ;;  %v3802_v20 = vmul.f32 %v4055_v50, %v3952_v6  ;;  %3833 = vst.msk [vmem:[%s13401_s3 + $0x18] sm:$0xff] %vm3829_vm0, %v3800_v5  ;;  %v3968_v3 = vld [vmem:[%s13400_s2 + $0x143] sm:$0xff] }
 0x3d7   :  { %v4059_v11 = vpop.eup %4058  ;;  %4084 = vrcp.f32 %v3688_v33  ;;  %v3803_v32 = vmul.f32 %v4057_v24, %v3953_v4  ;;  %3834 = vst.msk [vmem:[%s13401_s3 + $0x20] sm:$0xff] %vm3829_vm0, %v3801_v27  ;;  %v3971_v4 = vld [vmem:[%s13400_s2 + $0x16b] sm:$0xff]  ;;  %v3973_v24 = vld [vmem:[%s13400_s2 + $0x183] sm:$0xff] }
 0x3d8   :  { %v4061_v38 = vpop.eup %4060  ;;  %4086 = vrcp.f32 %v3689_v1  ;;  %v3804_v60 = vmul.f32 %v4059_v11, %v3954_v21  ;;  %3835 = vst.msk [vmem:[%s13401_s3 + $0x28] sm:$0xff] %vm3829_vm0, %v3802_v20  ;;  %v3974_v20 = vld [vmem:[%s13400_s2 + $0x18b] sm:$0xff] }
 0x3d9   :  { %v4063_v53 = vpop.eup %4062  ;;  %4088 = vrcp.f32 %v3690_v2  ;;  %v3805_v13 = vmul.f32 %v4061_v38, %v3955_v25  ;;  %3836 = vst.msk [vmem:[%s13401_s3 + $0x30] sm:$0xff] %vm3829_vm0, %v3803_v32  ;;  %v3972_v2 = vld [vmem:[%s13400_s2 + $0x173] sm:$0xff] }
 0x3da   :  { %v4065_v23 = vpop.eup %4064  ;;  %4090 = vrcp.f32 %v3691_v37  ;;  %v3806_v51 = vmul.f32 %v4063_v53, %v3956_v52  ;;  %3837 = vst.msk [vmem:[%s13401_s3 + $0x38] sm:$0xff] %vm3829_vm0, %v3804_v60  ;;  %v3975_v52 = vld [vmem:[%s13400_s2 + $0x19b] sm:$0xff]  ;;  %v3977_v53 = vld [vmem:[%s13400_s2 + $0x1b3] sm:$0xff] }
 0x3db   :  { %v4067_v35 = vpop.eup %4066  ;;  %4092 = vrcp.f32 %v3692_v57  ;;  %v3807_v30 = vmul.f32 %v4065_v23, %v3957_v28  ;;  %3838 = vst.msk [vmem:[%s13401_s3 + $0x40] sm:$0xff] %vm3829_vm0, %v3805_v13  ;;  %v3978_v13 = vld [vmem:[%s13400_s2 + $0x1bb] sm:$0xff] }
 0x3dc   :  { %v4069_v0 = vpop.eup %4068  ;;  %4094 = vrcp.f32 %v3693_v17  ;;  %v3808_v26 = vmul.f32 %v4067_v35, %v3958_v59  ;;  %3839 = vst.msk [vmem:[%s13401_s3 + $0x48] sm:$0xff] %vm3829_vm0, %v3806_v51  ;;  %v3976_v17 = vld [vmem:[%s13400_s2 + $0x1a3] sm:$0xff] }
 0x3dd   :  { %v4071_v8 = vpop.eup %4070  ;;  %4096 = vrcp.f32 %v3694_v44  ;;  %v3809_v10 = vmul.f32 %v4069_v0, %v3959_v29  ;;  %3840 = vst.msk [vmem:[%s13401_s3 + $0x50] sm:$0xff] %vm3829_vm0, %v3807_v30 }
 0x3de   :  { %v4073_v63 = vpop.eup %4072  ;;  %4098 = vrcp.f32 %v3695_v45  ;;  %v3810_v31 = vmul.f32 %v4071_v8, %v3960_v49  ;;  %3841 = vst.msk [vmem:[%s13401_s3 + $0x58] sm:$0xff] %vm3829_vm0, %v3808_v26 }
 0x3df   :  { %v4075_v14 = vpop.eup %4074  ;;  %4100 = vrcp.f32 %v3696_v47  ;;  %v3811_v22 = vmul.f32 %v4073_v63, %v3961_v61  ;;  %3842 = vst.msk [vmem:[%s13401_s3 + $0x60] sm:$0xff] %vm3829_vm0, %v3809_v10 }
 0x3e0   :  { %v4077_v12 = vpop.eup %4076  ;;  %4102 = vrcp.f32 %v3697_v58  ;;  %v3812_v39 = vmul.f32 %v4075_v14, %v3962_v48  ;;  %3843 = vst.msk [vmem:[%s13401_s3 + $0x68] sm:$0xff] %vm3829_vm0, %v3810_v31 }
 0x3e1   :  { %v4079_v46 = vpop.eup %4078  ;;  %4104 = vrcp.f32 %v3698_v42  ;;  %v3813_v56 = vmul.f32 %v4077_v12, %v3963_v9  ;;  %3844 = vst.msk [vmem:[%s13401_s3 + $0x70] sm:$0xff] %vm3829_vm0, %v3811_v22 }
 0x3e2   :  { %v4081_v40 = vpop.eup %4080  ;;  %4106 = vrcp.f32 %v3699_v16  ;;  %v3814_v19 = vmul.f32 %v4079_v46, %v3964_v43  ;;  %3845 = vst.msk [vmem:[%s13401_s3 + $0x78] sm:$0xff] %vm3829_vm0, %v3812_v39 }
 0x3e3   :  { %v4083_v62 = vpop.eup %4082  ;;  %v3815_v54 = vmul.f32 %v4081_v40, %v3965_v34  ;;  %3846 = vst.msk [vmem:[%s13401_s3 + $0x80] sm:$0xff] %vm3829_vm0, %v3813_v56 }
 0x3e4   :  { %v4085_v36 = vpop.eup %4084  ;;  %v3816_v33 = vmul.f32 %v4083_v62, %v3966_v7  ;;  %3847 = vst.msk [vmem:[%s13401_s3 + $0x88] sm:$0xff] %vm3829_vm0, %v3814_v19 }
 0x3e5   :  { %v4087_v6 = vpop.eup %4086  ;;  %v3817_v55 = vmul.f32 %v4085_v36, %v3967_v18  ;;  %3848 = vst.msk [vmem:[%s13401_s3 + $0x90] sm:$0xff] %vm3829_vm0, %v3815_v54 }
 0x3e6   :  { %v4089_v1 = vpop.eup %4088  ;;  %v3818_v5 = vmul.f32 %v4087_v6, %v3968_v3  ;;  %3849 = vst.msk [vmem:[%s13401_s3 + $0x98] sm:$0xff] %vm3829_vm0, %v3816_v33 }
 0x3e7   :  { %v4091_v50 = vpop.eup %4090  ;;  %v3819_v21 = vmul.f32 %v4089_v1, %v3969_v15  ;;  %3850 = vst.msk [vmem:[%s13401_s3 + $0xa0] sm:$0xff] %vm3829_vm0, %v3817_v55 }
 0x3e8   :  { %v4093_v27 = vpop.eup %4092  ;;  %v3820_v37 = vmul.f32 %v4091_v50, %v3970_v41  ;;  %3851 = vst.msk [vmem:[%s13401_s3 + $0xa8] sm:$0xff] %vm3829_vm0, %v3818_v5 }
 0x3e9   :  { %v4095_v25 = vpop.eup %4094  ;;  %v3821_v11 = vmul.f32 %v4093_v27, %v3971_v4  ;;  %3852 = vst.msk [vmem:[%s13401_s3 + $0xb0] sm:$0xff] %vm3829_vm0, %v3819_v21 }
 0x3ea   :  { %v4097_v57 = vpop.eup %4096  ;;  %v3822_v32 = vmul.f32 %v4095_v25, %v3972_v2  ;;  %3853 = vst.msk [vmem:[%s13401_s3 + $0xb8] sm:$0xff] %vm3829_vm0, %v3820_v37 }
 0x3eb   :  { %v4099_v38 = vpop.eup %4098  ;;  %v3823_v28 = vmul.f32 %v4097_v57, %v3973_v24  ;;  %3854 = vst.msk [vmem:[%s13401_s3 + $0xc0] sm:$0xff] %vm3829_vm0, %v3821_v11 }
 0x3ec   :  { %v4101_v60 = vpop.eup %4100  ;;  %v3824_v44 = vmul.f32 %v4099_v38, %v3974_v20  ;;  %3855 = vst.msk [vmem:[%s13401_s3 + $0xc8] sm:$0xff] %vm3829_vm0, %v3822_v32 }
 0x3ed   :  { %v4103_v59 = vpop.eup %4102  ;;  %v3825_v23 = vmul.f32 %v4101_v60, %v3975_v52  ;;  %3856 = vst.msk [vmem:[%s13401_s3 + $0xd0] sm:$0xff] %vm3829_vm0, %v3823_v28 }
 0x3ee   :  { %v4105_v45 = vpop.eup %4104  ;;  %v3826_v29 = vmul.f32 %v4103_v59, %v3976_v17  ;;  %3857 = vst.msk [vmem:[%s13401_s3 + $0xd8] sm:$0xff] %vm3829_vm0, %v3824_v44 }
 0x3ef   :  { %v4107_v51 = vpop.eup %4106  ;;  %v3827_v35 = vmul.f32 %v4105_v45, %v3977_v53  ;;  %3858 = vst.msk [vmem:[%s13401_s3 + $0xe0] sm:$0xff] %vm3829_vm0, %v3825_v23 }
 0x3f0   :  { %v3828_v47 = vmul.f32 %v4107_v51, %v3978_v13  ;;  %3859 = vst.msk [vmem:[%s13401_s3 + $0xe8] sm:$0xff] %vm3829_vm0, %v3826_v29 }
 0x3f1   :  { %3860 = vst.msk [vmem:[%s13401_s3 + $0xf0] sm:$0xff] %vm3829_vm0, %v3827_v35 }
 0x3f2   :  { %3861 = vst.msk [vmem:[%s13401_s3 + $0xf8] sm:$0xff] %vm3829_vm0, %v3828_v47 }
 0x3f3   :  { %3866 = vsyncpa [#allocation4], 1 }

</bundles_post_ra>
